<compile_context>
chip_gen: v5e
topology: v5e:2x2
jax: 0.10.0
libtpu: 0.0.40
codegen_flags: <defaults>
</compile_context>

<pallas_src>
import functools

import jax
import jax.numpy as jnp
from jax.experimental import pallas as pl
from jax.experimental.pallas import tpu as pltpu

_BN_EPS = 1e-5


def _vmem_limit_bytes():
    """Generation-aware VMEM budget: big on 128 MiB parts, conservative on v7x."""
    cap = 128 * 1024 * 1024
    try:
        cap = int(getattr(pltpu.get_tpu_info(), "vmem_capacity_bytes", cap))
    except Exception:  # pragma: no cover - info query is best-effort
        pass
    if cap >= 128 * 1024 * 1024:
        return 96 * 1024 * 1024          # v5e / v6e
    return 40 * 1024 * 1024              # v7x (64 MiB physical)


def _choose_h_tile(H, W, cin, cout, vmem_limit):
    """Largest divisor of H whose per-step working set fits ~half the budget."""
    budget = vmem_limit // 2
    chosen = 1
    for ht in range(H, 0, -1):
        if H % ht:
            continue
        est = (H * W * cin * 4 * 2            # whole-image input block, dbl-buffered (f32 worst case)
               + (ht + 2) * (W + 2) * cin * 2  # bf16 zero-halo scratch
               + ht * W * 9 * cin * 2          # bf16 im2col slab
               + ht * W * cout * 4 * 2)        # output tile, dbl-buffered
        if est <= budget:
            return ht
        chosen = ht
    # TODO(synk): for images where even the whole-image input block overflows
    # VMEM, switch the input to memory_space=pl.ANY and DMA (H_t+2)-row slabs.
    return chosen


# --------------------------------------------------------------------------
# fused [affine(+ReLU) on input] -> conv3x3(pad=1) -> per-tile BN statistics
# --------------------------------------------------------------------------
def _affine_conv3x3_kernel(x_ref, scale_ref, shift_ref, w_ref,
                           y_ref, stats_ref, pad_ref, col_ref, *,
                           apply_input_relu):
    """One (batch, H-tile) grid point.

    x_ref:     (H, W, Cin)        raw previous conv output (pre-BN) or input
    scale_ref: (1, Cin)           folded BN scale for the input (1.0 for layer 1)
    shift_ref: (1, Cin)           folded BN shift for the input (0.0 for layer 1)
    w_ref:     (9*Cin, Cout)      conv weight, (kh,kw,ci) raveled, bf16
    y_ref:     (H_t, W, Cout)     pre-BN conv output tile
    stats_ref: (2, Cout)          per-tile [sum, sum_of_squares] of conv output
    pad_ref:   (H_t+2, W+2, Cin)  bf16 zero-halo activation scratch
    col_ref:   (H_t, W, 9*Cin)    bf16 im2col slab scratch
    """
    H, W, Cin = x_ref.shape
    Ht, _, Cout = y_ref.shape
    n_ht = pl.num_programs(1)
    h_idx = pl.program_id(1)
    start = h_idx * Ht

    scale = scale_ref[...]
    shift = shift_ref[...]

    def loaded(rows):
        v = rows.astype(jnp.float32) * scale + shift
        if apply_input_relu:
            v = jnp.maximum(v, 0.0)
        return v.astype(jnp.bfloat16)

    # Interior rows of this H tile (previous layer's BN+ReLU folded in).
    pad_ref[1:Ht + 1, 1:W + 1, :] = loaded(x_ref[pl.ds(start, Ht)])

    # Halo rows: clamped (always in-bounds) loads, masked to zero at the
    # image boundary.
    top = loaded(x_ref[pl.ds(jnp.maximum(start - 1, 0), 1)])       # (1, W, Cin)
    bot = loaded(x_ref[pl.ds(jnp.minimum(start + Ht, H - 1), 1)])  # (1, W, Cin)
    zrow = jnp.zeros_like(top)
    pad_ref[0:1, 1:W + 1, :] = jnp.where(h_idx > 0, top, zrow)
    pad_ref[Ht + 1:Ht + 2, 1:W + 1, :] = jnp.where(h_idx + 1 < n_ht, bot, zrow)

    # Left/right halo columns (also cover the four corners). Only the border
    # is zeroed — the interior was just written above.
    side = jnp.zeros((Ht + 2, 1, Cin), jnp.bfloat16)
    pad_ref[:, 0:1, :] = side
    pad_ref[:, W + 1:W + 2, :] = side

    # im2col: pack the 9 shifted windows along the lane (channel) axis so the
    # whole 3x3 conv becomes ONE K = 9*Cin MXU contraction.
    for kh in range(3):
        for kw in range(3):
            t = kh * 3 + kw
            col_ref[:, :, t * Cin:(t + 1) * Cin] = pad_ref[kh:kh + Ht, kw:kw + W, :]

    patches = col_ref[...].reshape(Ht * W, 9 * Cin)
    acc = jnp.dot(patches, w_ref[...], preferred_element_type=jnp.float32)

    # TODO(synk): for small Cout (<128) the output store is a masked vst; a
    # lane-dense (H_t, W*Cout) packing would speed up the write path further.
    y_ref[...] = acc.reshape(Ht, W, Cout).astype(y_ref.dtype)

    # Per-tile partial BN statistics (reduced over (batch, h-tiles) in the
    # wrapper so both grid axes stay "parallel").
    stats_ref[0:1, :] = jnp.sum(acc, axis=0, keepdims=True)
    stats_ref[1:2, :] = jnp.sum(acc * acc, axis=0, keepdims=True)


def _conv_bn_stats(x_nhwc, scale, shift, w2d, *, apply_input_relu, h_tile,
                   out_dtype, vmem_limit):
    N, H, W, Cin = x_nhwc.shape
    K, Cout = w2d.shape
    n_ht = H // h_tile
    kernel = functools.partial(_affine_conv3x3_kernel,
                               apply_input_relu=apply_input_relu)
    return pl.pallas_call(
        kernel,
        grid=(N, n_ht),
        in_specs=[
            pl.BlockSpec((None, H, W, Cin), lambda n, h: (n, 0, 0, 0)),
            pl.BlockSpec((1, Cin), lambda n, h: (0, 0)),
            pl.BlockSpec((1, Cin), lambda n, h: (0, 0)),
            pl.BlockSpec((K, Cout), lambda n, h: (0, 0)),
        ],
        out_specs=(
            pl.BlockSpec((None, h_tile, W, Cout), lambda n, h: (n, h, 0, 0)),
            pl.BlockSpec((None, None, 2, Cout), lambda n, h: (n, h, 0, 0)),
        ),
        out_shape=(
            jax.ShapeDtypeStruct((N, H, W, Cout), out_dtype),
            jax.ShapeDtypeStruct((N, n_ht, 2, Cout), jnp.float32),
        ),
        scratch_shapes=[
            pltpu.VMEM((h_tile + 2, W + 2, Cin), jnp.bfloat16),
            pltpu.VMEM((h_tile, W, 9 * Cin), jnp.bfloat16),
        ],
        compiler_params=pltpu.CompilerParams(
            dimension_semantics=("parallel", "parallel"),
            vmem_limit_bytes=vmem_limit),
    )(x_nhwc, scale, shift, w2d)


# --------------------------------------------------------------------------
# final folded BatchNorm (scale/shift) + ReLU, row-tiled
# --------------------------------------------------------------------------
def _bn_relu_kernel(x_ref, scale_ref, shift_ref, o_ref):
    v = x_ref[...].astype(jnp.float32) * scale_ref[...] + shift_ref[...]
    o_ref[...] = jnp.maximum(v, 0.0).astype(o_ref.dtype)


def _bn_relu(x_nhwc, scale, shift, *, h_tile, vmem_limit):
    # TODO(synk): when chaining double_conv blocks this pass should instead be
    # folded into the next consumer's load path (like BN1+ReLU is into conv2).
    N, H, W, C = x_nhwc.shape
    n_ht = H // h_tile
    return pl.pallas_call(
        _bn_relu_kernel,
        grid=(N, n_ht),
        in_specs=[
            pl.BlockSpec((None, h_tile, W, C), lambda n, h: (n, h, 0, 0)),
            pl.BlockSpec((1, C), lambda n, h: (0, 0)),
            pl.BlockSpec((1, C), lambda n, h: (0, 0)),
        ],
        out_specs=pl.BlockSpec((None, h_tile, W, C), lambda n, h: (n, h, 0, 0)),
        out_shape=jax.ShapeDtypeStruct((N, H, W, C), jnp.float32),
        compiler_params=pltpu.CompilerParams(
            dimension_semantics=("parallel", "parallel"),
            vmem_limit_bytes=vmem_limit),
    )(x_nhwc, scale, shift)


# --------------------------------------------------------------------------
# BatchNorm folding (training-mode batch statistics, biased variance)
# --------------------------------------------------------------------------
def _fold_bn_affine(stats, gamma, beta, count):
    """stats: (N, n_ht, 2, C) partial [sum, sum_sq] -> per-channel scale/shift."""
    total = jnp.sum(stats, axis=(0, 1))                       # (2, C)
    mean = total[0] / count
    # TODO(synk): single-pass E[x^2]-E[x]^2 can cancel for huge N*H*W; use a
    # shifted/two-pass accumulation if bit-tight parity with torch is needed.
    var = jnp.maximum(total[1] / count - mean * mean, 0.0)
    inv = jax.lax.rsqrt(var + _BN_EPS)
    scale = gamma * inv
    shift = beta - mean * scale
    return (scale.reshape(1, -1).astype(jnp.float32),
            shift.reshape(1, -1).astype(jnp.float32))


# --------------------------------------------------------------------------
# double_conv forward
# --------------------------------------------------------------------------
def double_conv_forward(params, x_nchw):
    """(conv3x3 pad1 -> BatchNorm2d (batch stats) -> ReLU) * 2.  NCHW in/out."""
    N, Cin, H, W = x_nchw.shape
    # TODO(synk): when chaining double_conv blocks keep activations NHWC
    # end-to-end and drop these two transposes (each is a full HBM pass).
    x = jnp.transpose(x_nchw, (0, 2, 3, 1))           # NCHW -> NHWC

    Cout = params['w1'].shape[-1]
    w1 = params['w1'].astype(jnp.bfloat16).reshape(9 * Cin, Cout)
    w2 = params['w2'].astype(jnp.bfloat16).reshape(9 * Cout, Cout)

    vmem_limit = _vmem_limit_bytes()
    ht1 = _choose_h_tile(H, W, Cin, Cout, vmem_limit)
    ht2 = _choose_h_tile(H, W, Cout, Cout, vmem_limit)

    one = jnp.ones((1, Cin), jnp.float32)
    zero = jnp.zeros((1, Cin), jnp.float32)
    count = N * H * W

    # Layer 1 conv (conv bias dropped: cancelled by BN mean subtraction).
    # y1 is emitted in bf16: it is cast to bf16 for the layer-2 MXU anyway.
    y1, s1 = _conv_bn_stats(x, one, zero, w1, apply_input_relu=False,
                            h_tile=ht1, out_dtype=jnp.bfloat16,
                            vmem_limit=vmem_limit)
    scale1, shift1 = _fold_bn_affine(s1, params['g1'], params['be1'], count)

    # Layer 2 conv with BN1 + ReLU folded into its load path.
    y2, s2 = _conv_bn_stats(y1, scale1, shift1, w2, apply_input_relu=True,
                            h_tile=ht2, out_dtype=jnp.float32,
                            vmem_limit=vmem_limit)
    scale2, shift2 = _fold_bn_affine(s2, params['g2'], params['be2'], count)

    out = _bn_relu(y2, scale2, shift2, h_tile=ht2, vmem_limit=vmem_limit)
    return jnp.transpose(out, (0, 3, 1, 2))           # NHWC -> NCHW


def init_params(key, in_ch, out_ch):
    # Conv biases are intentionally omitted (exactly cancelled by BatchNorm).
    k1, k2 = jax.random.split(key)
    return dict(
        w1=jax.random.normal(k1, (3, 3, in_ch, out_ch), jnp.float32) * 0.1,
        g1=jnp.ones((out_ch,), jnp.float32),
        be1=jnp.zeros((out_ch,), jnp.float32),
        w2=jax.random.normal(k2, (3, 3, out_ch, out_ch), jnp.float32) * 0.1,
        g2=jnp.ones((out_ch,), jnp.float32),
        be2=jnp.zeros((out_ch,), jnp.float32),
    )


def _reference(params, x_nchw):
    """Pure-JAX f32 reference of the same forward (bf16-rounded weights)."""
    x = jnp.transpose(x_nchw, (0, 2, 3, 1))

    def block(a, w, g, b):
        w = w.astype(jnp.bfloat16).astype(jnp.float32)
        y = jax.lax.conv_general_dilated(
            a, w, window_strides=(1, 1), padding='SAME',
            dimension_numbers=('NHWC', 'HWIO', 'NHWC'))
        mean = jnp.mean(y, axis=(0, 1, 2))
        var = jnp.var(y, axis=(0, 1, 2))
        y = (y - mean) * jax.lax.rsqrt(var + _BN_EPS) * g + b
        return jnp.maximum(y, 0.0)

    y = block(x, params['w1'], params['g1'], params['be1'])
    y = block(y, params['w2'], params['g2'], params['be2'])
    return jnp.transpose(y, (0, 3, 1, 2))


if __name__ == "__main__":
    key = jax.random.PRNGKey(0)
    kx, kp = jax.random.split(key)

    in_ch, out_ch = 4, 8
    x = jax.random.normal(kx, (2, in_ch, 16, 16), jnp.float32)
    params = init_params(kp, in_ch, out_ch)

    fwd = jax.jit(lambda a: double_conv_forward(params, a))
    out = fwd(x)
    jax.block_until_ready(out)

    assert out.shape == (2, out_ch, 16, 16), out.shape
    assert bool(jnp.all(out >= 0.0))            # ReLU output
    assert bool(jnp.all(jnp.isfinite(out)))

    # Loose-tolerance parity with a pure-JAX f32 reference (bf16 MXU drift).
    ref = _reference(params, x)
    max_err = float(jnp.max(jnp.abs(out - ref)))
    assert max_err < 0.2, f"max abs error vs reference: {max_err}"

    print("KERNEL_OK")
</pallas_src>

<mosaic_0001>
module attributes {stable_mosaic.version = 11 : i64} {
  func.func @_affine_conv3x3_kernel(%arg0: i32, %arg1: i32, %arg2: memref<1x16x16x4xf32, #tpu.memory_space<vmem>>, %arg3: memref<1x4xf32, #tpu.memory_space<vmem>>, %arg4: memref<1x4xf32, #tpu.memory_space<vmem>>, %arg5: memref<36x8xbf16, #tpu.memory_space<vmem>>, %arg6: memref<1x16x16x8xbf16, #tpu.memory_space<vmem>>, %arg7: memref<1x1x2x8xf32, #tpu.memory_space<vmem>>, %arg8: memref<18x18x4xbf16, #tpu.memory_space<vmem>>, %arg9: memref<16x16x36xbf16, #tpu.memory_space<vmem>>) attributes {dimension_semantics = [#tpu.dimension_semantics<parallel>, #tpu.dimension_semantics<parallel>], iteration_bounds = array<i64: 2, 1>, scalar_prefetch = 0 : i64, scratch_operands = 2 : i64, tpu.core_type = #tpu.core_type<tc>, window_params = [{transform_indices = @transform_0, window_bounds = array<i64: 1, 16, 16, 4>}, {pipeline_mode = #tpu.pipeline_mode<synchronous>, transform_indices = @transform_1, window_bounds = array<i64: 1, 4>}, {pipeline_mode = #tpu.pipeline_mode<synchronous>, transform_indices = @transform_2, window_bounds = array<i64: 1, 4>}, {pipeline_mode = #tpu.pipeline_mode<synchronous>, transform_indices = @transform_3, window_bounds = array<i64: 36, 8>}, {transform_indices = @transform_4, window_bounds = array<i64: 1, 16, 16, 8>}, {transform_indices = @transform_5, window_bounds = array<i64: 1, 1, 2, 8>}]} {
    %c16_i32 = arith.constant 16 : i32
    %0 = arith.muli %arg1, %c16_i32 : i32
    %c0 = arith.constant 0 : index
    %c0_0 = arith.constant 0 : index
    %1 = vector.load %arg3[%c0, %c0_0] : memref<1x4xf32, #tpu.memory_space<vmem>>, vector<1x4xf32>
    %c0_1 = arith.constant 0 : index
    %c0_2 = arith.constant 0 : index
    %2 = vector.load %arg4[%c0_1, %c0_2] : memref<1x4xf32, #tpu.memory_space<vmem>>, vector<1x4xf32>
    %c0_3 = arith.constant 0 : index
    %3 = arith.index_cast %0 : i32 to index
    %c0_4 = arith.constant 0 : index
    %c0_5 = arith.constant 0 : index
    %4 = vector.load %arg2[%c0_3, %3, %c0_4, %c0_5] : memref<1x16x16x4xf32, #tpu.memory_space<vmem>>, vector<1x16x16x4xf32>
    %5 = vector.shape_cast %4 : vector<1x16x16x4xf32> to vector<16x16x4xf32>
    %6 = vector.shape_cast %1 : vector<1x4xf32> to vector<1x1x4xf32>
    %7 = vector.broadcast %6 : vector<1x1x4xf32> to vector<16x16x4xf32>
    %8 = arith.mulf %5, %7 : vector<16x16x4xf32>
    %9 = vector.shape_cast %2 : vector<1x4xf32> to vector<1x1x4xf32>
    %10 = vector.broadcast %9 : vector<1x1x4xf32> to vector<16x16x4xf32>
    %11 = arith.addf %8, %10 : vector<16x16x4xf32>
    %12 = arith.truncf %11 : vector<16x16x4xf32> to vector<16x16x4xbf16>
    %c1 = arith.constant 1 : index
    %c1_6 = arith.constant 1 : index
    %c0_7 = arith.constant 0 : index
    %13 = vector.load %arg8[%c1, %c1_6, %c0_7] : memref<18x18x4xbf16, #tpu.memory_space<vmem>>, vector<16x16x4xbf16>
    tpu.vector_store %arg8[%c1, %c1_6, %c0_7], %12 {strides = array<i32>} : memref<18x18x4xbf16, #tpu.memory_space<vmem>>, vector<16x16x4xbf16>,
    %c1_i32 = arith.constant 1 : i32
    %14 = arith.subi %0, %c1_i32 : i32
    %c0_i32 = arith.constant 0 : i32
    %15 = arith.maxsi %14, %c0_i32 : i32
    %c0_8 = arith.constant 0 : index
    %16 = arith.index_cast %15 : i32 to index
    %c0_9 = arith.constant 0 : index
    %c0_10 = arith.constant 0 : index
    %17 = vector.load %arg2[%c0_8, %16, %c0_9, %c0_10] : memref<1x16x16x4xf32, #tpu.memory_space<vmem>>, vector<1x1x16x4xf32>
    %18 = vector.shape_cast %17 : vector<1x1x16x4xf32> to vector<1x16x4xf32>
    %19 = vector.shape_cast %1 : vector<1x4xf32> to vector<1x1x4xf32>
    %20 = vector.broadcast %19 : vector<1x1x4xf32> to vector<1x16x4xf32>
    %21 = arith.mulf %18, %20 : vector<1x16x4xf32>
    %22 = vector.shape_cast %2 : vector<1x4xf32> to vector<1x1x4xf32>
    %23 = vector.broadcast %22 : vector<1x1x4xf32> to vector<1x16x4xf32>
    %24 = arith.addf %21, %23 : vector<1x16x4xf32>
    %25 = arith.truncf %24 : vector<1x16x4xf32> to vector<1x16x4xbf16>
    %c16_i32_11 = arith.constant 16 : i32
    %26 = arith.addi %0, %c16_i32_11 : i32
    %c15_i32 = arith.constant 15 : i32
    %27 = arith.minsi %26, %c15_i32 : i32
    %c0_12 = arith.constant 0 : index
    %28 = arith.index_cast %27 : i32 to index
    %c0_13 = arith.constant 0 : index
    %c0_14 = arith.constant 0 : index
    %29 = vector.load %arg2[%c0_12, %28, %c0_13, %c0_14] : memref<1x16x16x4xf32, #tpu.memory_space<vmem>>, vector<1x1x16x4xf32>
    %30 = vector.shape_cast %29 : vector<1x1x16x4xf32> to vector<1x16x4xf32>
    %31 = vector.shape_cast %1 : vector<1x4xf32> to vector<1x1x4xf32>
    %32 = vector.broadcast %31 : vector<1x1x4xf32> to vector<1x16x4xf32>
    %33 = arith.mulf %30, %32 : vector<1x16x4xf32>
    %34 = vector.shape_cast %2 : vector<1x4xf32> to vector<1x1x4xf32>
    %35 = vector.broadcast %34 : vector<1x1x4xf32> to vector<1x16x4xf32>
    %36 = arith.addf %33, %35 : vector<1x16x4xf32>
    %37 = arith.truncf %36 : vector<1x16x4xf32> to vector<1x16x4xbf16>
    %cst = arith.constant 0.000000e+00 : bf16
    %38 = vector.broadcast %cst : bf16 to vector<1x16x4xbf16>
    %c0_i32_15 = arith.constant 0 : i32
    %39 = arith.cmpi sgt, %arg1, %c0_i32_15 : i32
    %40 = arith.select %39, %25, %38 : vector<1x16x4xbf16>
    %c0_16 = arith.constant 0 : index
    %c1_17 = arith.constant 1 : index
    %c0_18 = arith.constant 0 : index
    %41 = vector.load %arg8[%c0_16, %c1_17, %c0_18] : memref<18x18x4xbf16, #tpu.memory_space<vmem>>, vector<1x16x4xbf16>
    tpu.vector_store %arg8[%c0_16, %c1_17, %c0_18], %40 {strides = array<i32>} : memref<18x18x4xbf16, #tpu.memory_space<vmem>>, vector<1x16x4xbf16>,
    %c1_i32_19 = arith.constant 1 : i32
    %42 = arith.addi %arg1, %c1_i32_19 : i32
    %c1_i32_20 = arith.constant 1 : i32
    %43 = arith.cmpi slt, %42, %c1_i32_20 : i32
    %44 = arith.select %43, %37, %38 : vector<1x16x4xbf16>
    %c17 = arith.constant 17 : index
    %c1_21 = arith.constant 1 : index
    %c0_22 = arith.constant 0 : index
    %45 = vector.load %arg8[%c17, %c1_21, %c0_22] : memref<18x18x4xbf16, #tpu.memory_space<vmem>>, vector<1x16x4xbf16>
    tpu.vector_store %arg8[%c17, %c1_21, %c0_22], %44 {strides = array<i32>} : memref<18x18x4xbf16, #tpu.memory_space<vmem>>, vector<1x16x4xbf16>,
    %cst_23 = arith.constant 0.000000e+00 : bf16
    %46 = vector.broadcast %cst_23 : bf16 to vector<18x1x4xbf16>
    %c0_24 = arith.constant 0 : index
    %c0_25 = arith.constant 0 : index
    %c0_26 = arith.constant 0 : index
    %47 = vector.load %arg8[%c0_24, %c0_25, %c0_26] : memref<18x18x4xbf16, #tpu.memory_space<vmem>>, vector<18x1x4xbf16>
    tpu.vector_store %arg8[%c0_24, %c0_25, %c0_26], %46 {strides = array<i32>} : memref<18x18x4xbf16, #tpu.memory_space<vmem>>, vector<18x1x4xbf16>,
    %c0_27 = arith.constant 0 : index
    %c17_28 = arith.constant 17 : index
    %c0_29 = arith.constant 0 : index
    %48 = vector.load %arg8[%c0_27, %c17_28, %c0_29] : memref<18x18x4xbf16, #tpu.memory_space<vmem>>, vector<18x1x4xbf16>
    tpu.vector_store %arg8[%c0_27, %c17_28, %c0_29], %46 {strides = array<i32>} : memref<18x18x4xbf16, #tpu.memory_space<vmem>>, vector<18x1x4xbf16>,
    %c0_30 = arith.constant 0 : index
    %c0_31 = arith.constant 0 : index
    %c0_32 = arith.constant 0 : index
    %49 = vector.load %arg8[%c0_30, %c0_31, %c0_32] : memref<18x18x4xbf16, #tpu.memory_space<vmem>>, vector<16x16x4xbf16>
    %c0_33 = arith.constant 0 : index
    %c0_34 = arith.constant 0 : index
    %c0_35 = arith.constant 0 : index
    %50 = vector.load %arg9[%c0_33, %c0_34, %c0_35] : memref<16x16x36xbf16, #tpu.memory_space<vmem>>, vector<16x16x4xbf16>
    tpu.vector_store %arg9[%c0_33, %c0_34, %c0_35], %49 {strides = array<i32>} : memref<16x16x36xbf16, #tpu.memory_space<vmem>>, vector<16x16x4xbf16>,
    %c0_36 = arith.constant 0 : index
    %c1_37 = arith.constant 1 : index
    %c0_38 = arith.constant 0 : index
    %51 = vector.load %arg8[%c0_36, %c1_37, %c0_38] : memref<18x18x4xbf16, #tpu.memory_space<vmem>>, vector<16x16x4xbf16>
    %c0_39 = arith.constant 0 : index
    %c0_40 = arith.constant 0 : index
    %c4 = arith.constant 4 : index
    %52 = vector.load %arg9[%c0_39, %c0_40, %c4] : memref<16x16x36xbf16, #tpu.memory_space<vmem>>, vector<16x16x4xbf16>
    tpu.vector_store %arg9[%c0_39, %c0_40, %c4], %51 {strides = array<i32>} : memref<16x16x36xbf16, #tpu.memory_space<vmem>>, vector<16x16x4xbf16>,
    %c0_41 = arith.constant 0 : index
    %c2 = arith.constant 2 : index
    %c0_42 = arith.constant 0 : index
    %53 = vector.load %arg8[%c0_41, %c2, %c0_42] : memref<18x18x4xbf16, #tpu.memory_space<vmem>>, vector<16x16x4xbf16>
    %c0_43 = arith.constant 0 : index
    %c0_44 = arith.constant 0 : index
    %c8 = arith.constant 8 : index
    %54 = vector.load %arg9[%c0_43, %c0_44, %c8] : memref<16x16x36xbf16, #tpu.memory_space<vmem>>, vector<16x16x4xbf16>
    tpu.vector_store %arg9[%c0_43, %c0_44, %c8], %53 {strides = array<i32>} : memref<16x16x36xbf16, #tpu.memory_space<vmem>>, vector<16x16x4xbf16>,
    %c1_45 = arith.constant 1 : index
    %c0_46 = arith.constant 0 : index
    %c0_47 = arith.constant 0 : index
    %55 = vector.load %arg8[%c1_45, %c0_46, %c0_47] : memref<18x18x4xbf16, #tpu.memory_space<vmem>>, vector<16x16x4xbf16>
    %c0_48 = arith.constant 0 : index
    %c0_49 = arith.constant 0 : index
    %c12 = arith.constant 12 : index
    %56 = vector.load %arg9[%c0_48, %c0_49, %c12] : memref<16x16x36xbf16, #tpu.memory_space<vmem>>, vector<16x16x4xbf16>
    tpu.vector_store %arg9[%c0_48, %c0_49, %c12], %55 {strides = array<i32>} : memref<16x16x36xbf16, #tpu.memory_space<vmem>>, vector<16x16x4xbf16>,
    %c1_50 = arith.constant 1 : index
    %c1_51 = arith.constant 1 : index
    %c0_52 = arith.constant 0 : index
    %57 = vector.load %arg8[%c1_50, %c1_51, %c0_52] : memref<18x18x4xbf16, #tpu.memory_space<vmem>>, vector<16x16x4xbf16>
    %c0_53 = arith.constant 0 : index
    %c0_54 = arith.constant 0 : index
    %c16 = arith.constant 16 : index
    %58 = vector.load %arg9[%c0_53, %c0_54, %c16] : memref<16x16x36xbf16, #tpu.memory_space<vmem>>, vector<16x16x4xbf16>
    tpu.vector_store %arg9[%c0_53, %c0_54, %c16], %57 {strides = array<i32>} : memref<16x16x36xbf16, #tpu.memory_space<vmem>>, vector<16x16x4xbf16>,
    %c1_55 = arith.constant 1 : index
    %c2_56 = arith.constant 2 : index
    %c0_57 = arith.constant 0 : index
    %59 = vector.load %arg8[%c1_55, %c2_56, %c0_57] : memref<18x18x4xbf16, #tpu.memory_space<vmem>>, vector<16x16x4xbf16>
    %c0_58 = arith.constant 0 : index
    %c0_59 = arith.constant 0 : index
    %c20 = arith.constant 20 : index
    %60 = vector.load %arg9[%c0_58, %c0_59, %c20] : memref<16x16x36xbf16, #tpu.memory_space<vmem>>, vector<16x16x4xbf16>
    tpu.vector_store %arg9[%c0_58, %c0_59, %c20], %59 {strides = array<i32>} : memref<16x16x36xbf16, #tpu.memory_space<vmem>>, vector<16x16x4xbf16>,
    %c2_60 = arith.constant 2 : index
    %c0_61 = arith.constant 0 : index
    %c0_62 = arith.constant 0 : index
    %61 = vector.load %arg8[%c2_60, %c0_61, %c0_62] : memref<18x18x4xbf16, #tpu.memory_space<vmem>>, vector<16x16x4xbf16>
    %c0_63 = arith.constant 0 : index
    %c0_64 = arith.constant 0 : index
    %c24 = arith.constant 24 : index
    %62 = vector.load %arg9[%c0_63, %c0_64, %c24] : memref<16x16x36xbf16, #tpu.memory_space<vmem>>, vector<16x16x4xbf16>
    tpu.vector_store %arg9[%c0_63, %c0_64, %c24], %61 {strides = array<i32>} : memref<16x16x36xbf16, #tpu.memory_space<vmem>>, vector<16x16x4xbf16>,
    %c2_65 = arith.constant 2 : index
    %c1_66 = arith.constant 1 : index
    %c0_67 = arith.constant 0 : index
    %63 = vector.load %arg8[%c2_65, %c1_66, %c0_67] : memref<18x18x4xbf16, #tpu.memory_space<vmem>>, vector<16x16x4xbf16>
    %c0_68 = arith.constant 0 : index
    %c0_69 = arith.constant 0 : index
    %c28 = arith.constant 28 : index
    %64 = vector.load %arg9[%c0_68, %c0_69, %c28] : memref<16x16x36xbf16, #tpu.memory_space<vmem>>, vector<16x16x4xbf16>
    tpu.vector_store %arg9[%c0_68, %c0_69, %c28], %63 {strides = array<i32>} : memref<16x16x36xbf16, #tpu.memory_space<vmem>>, vector<16x16x4xbf16>,
    %c2_70 = arith.constant 2 : index
    %c2_71 = arith.constant 2 : index
    %c0_72 = arith.constant 0 : index
    %65 = vector.load %arg8[%c2_70, %c2_71, %c0_72] : memref<18x18x4xbf16, #tpu.memory_space<vmem>>, vector<16x16x4xbf16>
    %c0_73 = arith.constant 0 : index
    %c0_74 = arith.constant 0 : index
    %c32 = arith.constant 32 : index
    %66 = vector.load %arg9[%c0_73, %c0_74, %c32] : memref<16x16x36xbf16, #tpu.memory_space<vmem>>, vector<16x16x4xbf16>
    tpu.vector_store %arg9[%c0_73, %c0_74, %c32], %65 {strides = array<i32>} : memref<16x16x36xbf16, #tpu.memory_space<vmem>>, vector<16x16x4xbf16>,
    %c0_75 = arith.constant 0 : index
    %c0_76 = arith.constant 0 : index
    %c0_77 = arith.constant 0 : index
    %67 = vector.load %arg9[%c0_75, %c0_76, %c0_77] : memref<16x16x36xbf16, #tpu.memory_space<vmem>>, vector<16x16x36xbf16>
    %68 = vector.shape_cast %67 : vector<16x16x36xbf16> to vector<256x36xbf16>
    %c0_78 = arith.constant 0 : index
    %c0_79 = arith.constant 0 : index
    %69 = vector.load %arg5[%c0_78, %c0_79] : memref<36x8xbf16, #tpu.memory_space<vmem>>, vector<36x8xbf16>
    %cst_80 = arith.constant dense<0.000000e+00> : vector<256x8xf32>
    %70 = tpu.matmul %68, %69, %cst_80 {dimension_numbers = #tpu.dot_dimension_numbers<[1], [0], [0], [1], [0, 0, 1, 1], [], []>} : vector<256x36xbf16>, vector<36x8xbf16>, vector<256x8xf32> -> vector<256x8xf32>
    %71 = vector.shape_cast %70 : vector<256x8xf32> to vector<16x16x8xf32>
    %72 = arith.truncf %71 : vector<16x16x8xf32> to vector<16x16x8xbf16>
    %c0_81 = arith.constant 0 : index
    %c0_82 = arith.constant 0 : index
    %c0_83 = arith.constant 0 : index
    %c0_84 = arith.constant 0 : index
    %73 = vector.load %arg6[%c0_81, %c0_82, %c0_83, %c0_84] : memref<1x16x16x8xbf16, #tpu.memory_space<vmem>>, vector<1x16x16x8xbf16>
    %74 = vector.shape_cast %73 : vector<1x16x16x8xbf16> to vector<16x16x8xbf16>
    %75 = vector.shape_cast %72 : vector<16x16x8xbf16> to vector<1x16x16x8xbf16>
    tpu.vector_store %arg6[%c0_81, %c0_82, %c0_83, %c0_84], %75 {strides = array<i32>} : memref<1x16x16x8xbf16, #tpu.memory_space<vmem>>, vector<1x16x16x8xbf16>,
    %cst_85 = arith.constant dense<0.000000e+00> : vector<8xf32>
    %76 = vector.multi_reduction <add>, %70, %cst_85 [0] : vector<256x8xf32> to vector<8xf32>
    %77 = vector.shape_cast %76 : vector<8xf32> to vector<1x8xf32>
    %c0_86 = arith.constant 0 : index
    %c0_87 = arith.constant 0 : index
    %c0_88 = arith.constant 0 : index
    %c0_89 = arith.constant 0 : index
    %78 = vector.load %arg7[%c0_86, %c0_87, %c0_88, %c0_89] : memref<1x1x2x8xf32, #tpu.memory_space<vmem>>, vector<1x1x1x8xf32>
    %79 = vector.shape_cast %78 : vector<1x1x1x8xf32> to vector<1x8xf32>
    %80 = vector.shape_cast %77 : vector<1x8xf32> to vector<1x1x1x8xf32>
    tpu.vector_store %arg7[%c0_86, %c0_87, %c0_88, %c0_89], %80 {strides = array<i32>} : memref<1x1x2x8xf32, #tpu.memory_space<vmem>>, vector<1x1x1x8xf32>,
    %81 = arith.mulf %70, %70 : vector<256x8xf32>
    %cst_90 = arith.constant dense<0.000000e+00> : vector<8xf32>
    %82 = vector.multi_reduction <add>, %81, %cst_90 [0] : vector<256x8xf32> to vector<8xf32>
    %83 = vector.shape_cast %82 : vector<8xf32> to vector<1x8xf32>
    %c0_91 = arith.constant 0 : index
    %c0_92 = arith.constant 0 : index
    %c1_93 = arith.constant 1 : index
    %c0_94 = arith.constant 0 : index
    %84 = vector.load %arg7[%c0_91, %c0_92, %c1_93, %c0_94] : memref<1x1x2x8xf32, #tpu.memory_space<vmem>>, vector<1x1x1x8xf32>
    %85 = vector.shape_cast %84 : vector<1x1x1x8xf32> to vector<1x8xf32>
    %86 = vector.shape_cast %83 : vector<1x8xf32> to vector<1x1x1x8xf32>
    tpu.vector_store %arg7[%c0_91, %c0_92, %c1_93, %c0_94], %86 {strides = array<i32>} : memref<1x1x2x8xf32, #tpu.memory_space<vmem>>, vector<1x1x1x8xf32>,
    return
  }
  func.func @transform_0(%arg0: i32, %arg1: i32) -> (i32, i32, i32, i32) {
    %c0_i32 = arith.constant 0 : i32
    %c0_i32_0 = arith.constant 0 : i32
    %c0_i32_1 = arith.constant 0 : i32
    %c0_i32_2 = arith.constant 0 : i32
    return %arg0, %c0_i32, %c0_i32_0, %c0_i32_1 : i32, i32, i32, i32
  }
  func.func @transform_1(%arg0: i32, %arg1: i32) -> (i32, i32) {
    %c0_i32 = arith.constant 0 : i32
    %c0_i32_0 = arith.constant 0 : i32
    %c0_i32_1 = arith.constant 0 : i32
    return %c0_i32, %c0_i32_0 : i32, i32
  }
  func.func @transform_2(%arg0: i32, %arg1: i32) -> (i32, i32) {
    %c0_i32 = arith.constant 0 : i32
    %c0_i32_0 = arith.constant 0 : i32
    %c0_i32_1 = arith.constant 0 : i32
    return %c0_i32, %c0_i32_0 : i32, i32
  }
  func.func @transform_3(%arg0: i32, %arg1: i32) -> (i32, i32) {
    %c0_i32 = arith.constant 0 : i32
    %c0_i32_0 = arith.constant 0 : i32
    %c0_i32_1 = arith.constant 0 : i32
    return %c0_i32, %c0_i32_0 : i32, i32
  }
  func.func @transform_4(%arg0: i32, %arg1: i32) -> (i32, i32, i32, i32) {
    %c0_i32 = arith.constant 0 : i32
    %c0_i32_0 = arith.constant 0 : i32
    %c0_i32_1 = arith.constant 0 : i32
    return %arg0, %arg1, %c0_i32, %c0_i32_0 : i32, i32, i32, i32
  }
  func.func @transform_5(%arg0: i32, %arg1: i32) -> (i32, i32, i32, i32) {
    %c0_i32 = arith.constant 0 : i32
    %c0_i32_0 = arith.constant 0 : i32
    %c0_i32_1 = arith.constant 0 : i32
    return %arg0, %arg1, %c0_i32, %c0_i32_0 : i32, i32, i32, i32
  }
}

module attributes {stable_mosaic.version = 11 : i64} {
  func.func @_bn_relu_kernel(%arg0: i32, %arg1: i32, %arg2: memref<1x16x16x8xf32, #tpu.memory_space<vmem>>, %arg3: memref<1x8xf32, #tpu.memory_space<vmem>>, %arg4: memref<1x8xf32, #tpu.memory_space<vmem>>, %arg5: memref<1x16x16x8xf32, #tpu.memory_space<vmem>>) attributes {dimension_semantics = [#tpu.dimension_semantics<parallel>, #tpu.dimension_semantics<parallel>], iteration_bounds = array<i64: 2, 1>, scalar_prefetch = 0 : i64, scratch_operands = 0 : i64, tpu.core_type = #tpu.core_type<tc>, window_params = [{transform_indices = @transform_0, window_bounds = array<i64: 1, 16, 16, 8>}, {pipeline_mode = #tpu.pipeline_mode<synchronous>, transform_indices = @transform_1, window_bounds = array<i64: 1, 8>}, {pipeline_mode = #tpu.pipeline_mode<synchronous>, transform_indices = @transform_2, window_bounds = array<i64: 1, 8>}, {transform_indices = @transform_3, window_bounds = array<i64: 1, 16, 16, 8>}]} {
    %c0 = arith.constant 0 : index
    %c0_0 = arith.constant 0 : index
    %c0_1 = arith.constant 0 : index
    %c0_2 = arith.constant 0 : index
    %0 = vector.load %arg2[%c0, %c0_0, %c0_1, %c0_2] : memref<1x16x16x8xf32, #tpu.memory_space<vmem>>, vector<1x16x16x8xf32>
    %1 = vector.shape_cast %0 : vector<1x16x16x8xf32> to vector<16x16x8xf32>
    %c0_3 = arith.constant 0 : index
    %c0_4 = arith.constant 0 : index
    %2 = vector.load %arg3[%c0_3, %c0_4] : memref<1x8xf32, #tpu.memory_space<vmem>>, vector<1x8xf32>
    %3 = vector.shape_cast %2 : vector<1x8xf32> to vector<1x1x8xf32>
    %4 = vector.broadcast %3 : vector<1x1x8xf32> to vector<16x16x8xf32>
    %5 = arith.mulf %1, %4 : vector<16x16x8xf32>
    %c0_5 = arith.constant 0 : index
    %c0_6 = arith.constant 0 : index
    %6 = vector.load %arg4[%c0_5, %c0_6] : memref<1x8xf32, #tpu.memory_space<vmem>>, vector<1x8xf32>
    %7 = vector.shape_cast %6 : vector<1x8xf32> to vector<1x1x8xf32>
    %8 = vector.broadcast %7 : vector<1x1x8xf32> to vector<16x16x8xf32>
    %9 = arith.addf %5, %8 : vector<16x16x8xf32>
    %cst = arith.constant 0.000000e+00 : f32
    %10 = vector.broadcast %cst : f32 to vector<16x16x8xf32>
    %11 = arith.maximumf %9, %10 : vector<16x16x8xf32>
    %c0_7 = arith.constant 0 : index
    %c0_8 = arith.constant 0 : index
    %c0_9 = arith.constant 0 : index
    %c0_10 = arith.constant 0 : index
    %12 = vector.load %arg5[%c0_7, %c0_8, %c0_9, %c0_10] : memref<1x16x16x8xf32, #tpu.memory_space<vmem>>, vector<1x16x16x8xf32>
    %13 = vector.shape_cast %12 : vector<1x16x16x8xf32> to vector<16x16x8xf32>
    %14 = vector.shape_cast %11 : vector<16x16x8xf32> to vector<1x16x16x8xf32>
    tpu.vector_store %arg5[%c0_7, %c0_8, %c0_9, %c0_10], %14 {strides = array<i32>} : memref<1x16x16x8xf32, #tpu.memory_space<vmem>>, vector<1x16x16x8xf32>,
    return
  }
  func.func @transform_0(%arg0: i32, %arg1: i32) -> (i32, i32, i32, i32) {
    %c0_i32 = arith.constant 0 : i32
    %c0_i32_0 = arith.constant 0 : i32
    %c0_i32_1 = arith.constant 0 : i32
    return %arg0, %arg1, %c0_i32, %c0_i32_0 : i32, i32, i32, i32
  }
  func.func @transform_1(%arg0: i32, %arg1: i32) -> (i32, i32) {
    %c0_i32 = arith.constant 0 : i32
    %c0_i32_0 = arith.constant 0 : i32
    %c0_i32_1 = arith.constant 0 : i32
    return %c0_i32, %c0_i32_0 : i32, i32
  }
  func.func @transform_2(%arg0: i32, %arg1: i32) -> (i32, i32) {
    %c0_i32 = arith.constant 0 : i32
    %c0_i32_0 = arith.constant 0 : i32
    %c0_i32_1 = arith.constant 0 : i32
    return %c0_i32, %c0_i32_0 : i32, i32
  }
  func.func @transform_3(%arg0: i32, %arg1: i32) -> (i32, i32, i32, i32) {
    %c0_i32 = arith.constant 0 : i32
    %c0_i32_0 = arith.constant 0 : i32
    %c0_i32_1 = arith.constant 0 : i32
    return %arg0, %arg1, %c0_i32, %c0_i32_0 : i32, i32, i32, i32
  }
}

module attributes {stable_mosaic.version = 11 : i64} {
  func.func @_affine_conv3x3_kernel(%arg0: i32, %arg1: i32, %arg2: memref<1x16x16x8xbf16, #tpu.memory_space<vmem>>, %arg3: memref<1x8xf32, #tpu.memory_space<vmem>>, %arg4: memref<1x8xf32, #tpu.memory_space<vmem>>, %arg5: memref<72x8xbf16, #tpu.memory_space<vmem>>, %arg6: memref<1x16x16x8xf32, #tpu.memory_space<vmem>>, %arg7: memref<1x1x2x8xf32, #tpu.memory_space<vmem>>, %arg8: memref<18x18x8xbf16, #tpu.memory_space<vmem>>, %arg9: memref<16x16x72xbf16, #tpu.memory_space<vmem>>) attributes {dimension_semantics = [#tpu.dimension_semantics<parallel>, #tpu.dimension_semantics<parallel>], iteration_bounds = array<i64: 2, 1>, scalar_prefetch = 0 : i64, scratch_operands = 2 : i64, tpu.core_type = #tpu.core_type<tc>, window_params = [{transform_indices = @transform_0, window_bounds = array<i64: 1, 16, 16, 8>}, {pipeline_mode = #tpu.pipeline_mode<synchronous>, transform_indices = @transform_1, window_bounds = array<i64: 1, 8>}, {pipeline_mode = #tpu.pipeline_mode<synchronous>, transform_indices = @transform_2, window_bounds = array<i64: 1, 8>}, {pipeline_mode = #tpu.pipeline_mode<synchronous>, transform_indices = @transform_3, window_bounds = array<i64: 72, 8>}, {transform_indices = @transform_4, window_bounds = array<i64: 1, 16, 16, 8>}, {transform_indices = @transform_5, window_bounds = array<i64: 1, 1, 2, 8>}]} {
    %c16_i32 = arith.constant 16 : i32
    %0 = arith.muli %arg1, %c16_i32 : i32
    %c0 = arith.constant 0 : index
    %c0_0 = arith.constant 0 : index
    %1 = vector.load %arg3[%c0, %c0_0] : memref<1x8xf32, #tpu.memory_space<vmem>>, vector<1x8xf32>
    %c0_1 = arith.constant 0 : index
    %c0_2 = arith.constant 0 : index
    %2 = vector.load %arg4[%c0_1, %c0_2] : memref<1x8xf32, #tpu.memory_space<vmem>>, vector<1x8xf32>
    %c0_3 = arith.constant 0 : index
    %3 = arith.index_cast %0 : i32 to index
    %c0_4 = arith.constant 0 : index
    %c0_5 = arith.constant 0 : index
    %4 = vector.load %arg2[%c0_3, %3, %c0_4, %c0_5] : memref<1x16x16x8xbf16, #tpu.memory_space<vmem>>, vector<1x16x16x8xbf16>
    %5 = vector.shape_cast %4 : vector<1x16x16x8xbf16> to vector<16x16x8xbf16>
    %6 = arith.extf %5 : vector<16x16x8xbf16> to vector<16x16x8xf32>
    %7 = vector.shape_cast %1 : vector<1x8xf32> to vector<1x1x8xf32>
    %8 = vector.broadcast %7 : vector<1x1x8xf32> to vector<16x16x8xf32>
    %9 = arith.mulf %6, %8 : vector<16x16x8xf32>
    %10 = vector.shape_cast %2 : vector<1x8xf32> to vector<1x1x8xf32>
    %11 = vector.broadcast %10 : vector<1x1x8xf32> to vector<16x16x8xf32>
    %12 = arith.addf %9, %11 : vector<16x16x8xf32>
    %cst = arith.constant 0.000000e+00 : f32
    %13 = vector.broadcast %cst : f32 to vector<16x16x8xf32>
    %14 = arith.maximumf %12, %13 : vector<16x16x8xf32>
    %15 = arith.truncf %14 : vector<16x16x8xf32> to vector<16x16x8xbf16>
    %c1 = arith.constant 1 : index
    %c1_6 = arith.constant 1 : index
    %c0_7 = arith.constant 0 : index
    %16 = vector.load %arg8[%c1, %c1_6, %c0_7] : memref<18x18x8xbf16, #tpu.memory_space<vmem>>, vector<16x16x8xbf16>
    tpu.vector_store %arg8[%c1, %c1_6, %c0_7], %15 {strides = array<i32>} : memref<18x18x8xbf16, #tpu.memory_space<vmem>>, vector<16x16x8xbf16>,
    %c1_i32 = arith.constant 1 : i32
    %17 = arith.subi %0, %c1_i32 : i32
    %c0_i32 = arith.constant 0 : i32
    %18 = arith.maxsi %17, %c0_i32 : i32
    %c0_8 = arith.constant 0 : index
    %19 = arith.index_cast %18 : i32 to index
    %c0_9 = arith.constant 0 : index
    %c0_10 = arith.constant 0 : index
    %20 = vector.load %arg2[%c0_8, %19, %c0_9, %c0_10] : memref<1x16x16x8xbf16, #tpu.memory_space<vmem>>, vector<1x1x16x8xbf16>
    %21 = vector.shape_cast %20 : vector<1x1x16x8xbf16> to vector<1x16x8xbf16>
    %22 = arith.extf %21 : vector<1x16x8xbf16> to vector<1x16x8xf32>
    %23 = vector.shape_cast %1 : vector<1x8xf32> to vector<1x1x8xf32>
    %24 = vector.broadcast %23 : vector<1x1x8xf32> to vector<1x16x8xf32>
    %25 = arith.mulf %22, %24 : vector<1x16x8xf32>
    %26 = vector.shape_cast %2 : vector<1x8xf32> to vector<1x1x8xf32>
    %27 = vector.broadcast %26 : vector<1x1x8xf32> to vector<1x16x8xf32>
    %28 = arith.addf %25, %27 : vector<1x16x8xf32>
    %cst_11 = arith.constant 0.000000e+00 : f32
    %29 = vector.broadcast %cst_11 : f32 to vector<1x16x8xf32>
    %30 = arith.maximumf %28, %29 : vector<1x16x8xf32>
    %31 = arith.truncf %30 : vector<1x16x8xf32> to vector<1x16x8xbf16>
    %c16_i32_12 = arith.constant 16 : i32
    %32 = arith.addi %0, %c16_i32_12 : i32
    %c15_i32 = arith.constant 15 : i32
    %33 = arith.minsi %32, %c15_i32 : i32
    %c0_13 = arith.constant 0 : index
    %34 = arith.index_cast %33 : i32 to index
    %c0_14 = arith.constant 0 : index
    %c0_15 = arith.constant 0 : index
    %35 = vector.load %arg2[%c0_13, %34, %c0_14, %c0_15] : memref<1x16x16x8xbf16, #tpu.memory_space<vmem>>, vector<1x1x16x8xbf16>
    %36 = vector.shape_cast %35 : vector<1x1x16x8xbf16> to vector<1x16x8xbf16>
    %37 = arith.extf %36 : vector<1x16x8xbf16> to vector<1x16x8xf32>
    %38 = vector.shape_cast %1 : vector<1x8xf32> to vector<1x1x8xf32>
    %39 = vector.broadcast %38 : vector<1x1x8xf32> to vector<1x16x8xf32>
    %40 = arith.mulf %37, %39 : vector<1x16x8xf32>
    %41 = vector.shape_cast %2 : vector<1x8xf32> to vector<1x1x8xf32>
    %42 = vector.broadcast %41 : vector<1x1x8xf32> to vector<1x16x8xf32>
    %43 = arith.addf %40, %42 : vector<1x16x8xf32>
    %cst_16 = arith.constant 0.000000e+00 : f32
    %44 = vector.broadcast %cst_16 : f32 to vector<1x16x8xf32>
    %45 = arith.maximumf %43, %44 : vector<1x16x8xf32>
    %46 = arith.truncf %45 : vector<1x16x8xf32> to vector<1x16x8xbf16>
    %cst_17 = arith.constant 0.000000e+00 : bf16
    %47 = vector.broadcast %cst_17 : bf16 to vector<1x16x8xbf16>
    %c0_i32_18 = arith.constant 0 : i32
    %48 = arith.cmpi sgt, %arg1, %c0_i32_18 : i32
    %49 = arith.select %48, %31, %47 : vector<1x16x8xbf16>
    %c0_19 = arith.constant 0 : index
    %c1_20 = arith.constant 1 : index
    %c0_21 = arith.constant 0 : index
    %50 = vector.load %arg8[%c0_19, %c1_20, %c0_21] : memref<18x18x8xbf16, #tpu.memory_space<vmem>>, vector<1x16x8xbf16>
    tpu.vector_store %arg8[%c0_19, %c1_20, %c0_21], %49 {strides = array<i32>} : memref<18x18x8xbf16, #tpu.memory_space<vmem>>, vector<1x16x8xbf16>,
    %c1_i32_22 = arith.constant 1 : i32
    %51 = arith.addi %arg1, %c1_i32_22 : i32
    %c1_i32_23 = arith.constant 1 : i32
    %52 = arith.cmpi slt, %51, %c1_i32_23 : i32
    %53 = arith.select %52, %46, %47 : vector<1x16x8xbf16>
    %c17 = arith.constant 17 : index
    %c1_24 = arith.constant 1 : index
    %c0_25 = arith.constant 0 : index
    %54 = vector.load %arg8[%c17, %c1_24, %c0_25] : memref<18x18x8xbf16, #tpu.memory_space<vmem>>, vector<1x16x8xbf16>
    tpu.vector_store %arg8[%c17, %c1_24, %c0_25], %53 {strides = array<i32>} : memref<18x18x8xbf16, #tpu.memory_space<vmem>>, vector<1x16x8xbf16>,
    %cst_26 = arith.constant 0.000000e+00 : bf16
    %55 = vector.broadcast %cst_26 : bf16 to vector<18x1x8xbf16>
    %c0_27 = arith.constant 0 : index
    %c0_28 = arith.constant 0 : index
    %c0_29 = arith.constant 0 : index
    %56 = vector.load %arg8[%c0_27, %c0_28, %c0_29] : memref<18x18x8xbf16, #tpu.memory_space<vmem>>, vector<18x1x8xbf16>
    tpu.vector_store %arg8[%c0_27, %c0_28, %c0_29], %55 {strides = array<i32>} : memref<18x18x8xbf16, #tpu.memory_space<vmem>>, vector<18x1x8xbf16>,
    %c0_30 = arith.constant 0 : index
    %c17_31 = arith.constant 17 : index
    %c0_32 = arith.constant 0 : index
    %57 = vector.load %arg8[%c0_30, %c17_31, %c0_32] : memref<18x18x8xbf16, #tpu.memory_space<vmem>>, vector<18x1x8xbf16>
    tpu.vector_store %arg8[%c0_30, %c17_31, %c0_32], %55 {strides = array<i32>} : memref<18x18x8xbf16, #tpu.memory_space<vmem>>, vector<18x1x8xbf16>,
    %c0_33 = arith.constant 0 : index
    %c0_34 = arith.constant 0 : index
    %c0_35 = arith.constant 0 : index
    %58 = vector.load %arg8[%c0_33, %c0_34, %c0_35] : memref<18x18x8xbf16, #tpu.memory_space<vmem>>, vector<16x16x8xbf16>
    %c0_36 = arith.constant 0 : index
    %c0_37 = arith.constant 0 : index
    %c0_38 = arith.constant 0 : index
    %59 = vector.load %arg9[%c0_36, %c0_37, %c0_38] : memref<16x16x72xbf16, #tpu.memory_space<vmem>>, vector<16x16x8xbf16>
    tpu.vector_store %arg9[%c0_36, %c0_37, %c0_38], %58 {strides = array<i32>} : memref<16x16x72xbf16, #tpu.memory_space<vmem>>, vector<16x16x8xbf16>,
    %c0_39 = arith.constant 0 : index
    %c1_40 = arith.constant 1 : index
    %c0_41 = arith.constant 0 : index
    %60 = vector.load %arg8[%c0_39, %c1_40, %c0_41] : memref<18x18x8xbf16, #tpu.memory_space<vmem>>, vector<16x16x8xbf16>
    %c0_42 = arith.constant 0 : index
    %c0_43 = arith.constant 0 : index
    %c8 = arith.constant 8 : index
    %61 = vector.load %arg9[%c0_42, %c0_43, %c8] : memref<16x16x72xbf16, #tpu.memory_space<vmem>>, vector<16x16x8xbf16>
    tpu.vector_store %arg9[%c0_42, %c0_43, %c8], %60 {strides = array<i32>} : memref<16x16x72xbf16, #tpu.memory_space<vmem>>, vector<16x16x8xbf16>,
    %c0_44 = arith.constant 0 : index
    %c2 = arith.constant 2 : index
    %c0_45 = arith.constant 0 : index
    %62 = vector.load %arg8[%c0_44, %c2, %c0_45] : memref<18x18x8xbf16, #tpu.memory_space<vmem>>, vector<16x16x8xbf16>
    %c0_46 = arith.constant 0 : index
    %c0_47 = arith.constant 0 : index
    %c16 = arith.constant 16 : index
    %63 = vector.load %arg9[%c0_46, %c0_47, %c16] : memref<16x16x72xbf16, #tpu.memory_space<vmem>>, vector<16x16x8xbf16>
    tpu.vector_store %arg9[%c0_46, %c0_47, %c16], %62 {strides = array<i32>} : memref<16x16x72xbf16, #tpu.memory_space<vmem>>, vector<16x16x8xbf16>,
    %c1_48 = arith.constant 1 : index
    %c0_49 = arith.constant 0 : index
    %c0_50 = arith.constant 0 : index
    %64 = vector.load %arg8[%c1_48, %c0_49, %c0_50] : memref<18x18x8xbf16, #tpu.memory_space<vmem>>, vector<16x16x8xbf16>
    %c0_51 = arith.constant 0 : index
    %c0_52 = arith.constant 0 : index
    %c24 = arith.constant 24 : index
    %65 = vector.load %arg9[%c0_51, %c0_52, %c24] : memref<16x16x72xbf16, #tpu.memory_space<vmem>>, vector<16x16x8xbf16>
    tpu.vector_store %arg9[%c0_51, %c0_52, %c24], %64 {strides = array<i32>} : memref<16x16x72xbf16, #tpu.memory_space<vmem>>, vector<16x16x8xbf16>,
    %c1_53 = arith.constant 1 : index
    %c1_54 = arith.constant 1 : index
    %c0_55 = arith.constant 0 : index
    %66 = vector.load %arg8[%c1_53, %c1_54, %c0_55] : memref<18x18x8xbf16, #tpu.memory_space<vmem>>, vector<16x16x8xbf16>
    %c0_56 = arith.constant 0 : index
    %c0_57 = arith.constant 0 : index
    %c32 = arith.constant 32 : index
    %67 = vector.load %arg9[%c0_56, %c0_57, %c32] : memref<16x16x72xbf16, #tpu.memory_space<vmem>>, vector<16x16x8xbf16>
    tpu.vector_store %arg9[%c0_56, %c0_57, %c32], %66 {strides = array<i32>} : memref<16x16x72xbf16, #tpu.memory_space<vmem>>, vector<16x16x8xbf16>,
    %c1_58 = arith.constant 1 : index
    %c2_59 = arith.constant 2 : index
    %c0_60 = arith.constant 0 : index
    %68 = vector.load %arg8[%c1_58, %c2_59, %c0_60] : memref<18x18x8xbf16, #tpu.memory_space<vmem>>, vector<16x16x8xbf16>
    %c0_61 = arith.constant 0 : index
    %c0_62 = arith.constant 0 : index
    %c40 = arith.constant 40 : index
    %69 = vector.load %arg9[%c0_61, %c0_62, %c40] : memref<16x16x72xbf16, #tpu.memory_space<vmem>>, vector<16x16x8xbf16>
    tpu.vector_store %arg9[%c0_61, %c0_62, %c40], %68 {strides = array<i32>} : memref<16x16x72xbf16, #tpu.memory_space<vmem>>, vector<16x16x8xbf16>,
    %c2_63 = arith.constant 2 : index
    %c0_64 = arith.constant 0 : index
    %c0_65 = arith.constant 0 : index
    %70 = vector.load %arg8[%c2_63, %c0_64, %c0_65] : memref<18x18x8xbf16, #tpu.memory_space<vmem>>, vector<16x16x8xbf16>
    %c0_66 = arith.constant 0 : index
    %c0_67 = arith.constant 0 : index
    %c48 = arith.constant 48 : index
    %71 = vector.load %arg9[%c0_66, %c0_67, %c48] : memref<16x16x72xbf16, #tpu.memory_space<vmem>>, vector<16x16x8xbf16>
    tpu.vector_store %arg9[%c0_66, %c0_67, %c48], %70 {strides = array<i32>} : memref<16x16x72xbf16, #tpu.memory_space<vmem>>, vector<16x16x8xbf16>,
    %c2_68 = arith.constant 2 : index
    %c1_69 = arith.constant 1 : index
    %c0_70 = arith.constant 0 : index
    %72 = vector.load %arg8[%c2_68, %c1_69, %c0_70] : memref<18x18x8xbf16, #tpu.memory_space<vmem>>, vector<16x16x8xbf16>
    %c0_71 = arith.constant 0 : index
    %c0_72 = arith.constant 0 : index
    %c56 = arith.constant 56 : index
    %73 = vector.load %arg9[%c0_71, %c0_72, %c56] : memref<16x16x72xbf16, #tpu.memory_space<vmem>>, vector<16x16x8xbf16>
    tpu.vector_store %arg9[%c0_71, %c0_72, %c56], %72 {strides = array<i32>} : memref<16x16x72xbf16, #tpu.memory_space<vmem>>, vector<16x16x8xbf16>,
    %c2_73 = arith.constant 2 : index
    %c2_74 = arith.constant 2 : index
    %c0_75 = arith.constant 0 : index
    %74 = vector.load %arg8[%c2_73, %c2_74, %c0_75] : memref<18x18x8xbf16, #tpu.memory_space<vmem>>, vector<16x16x8xbf16>
    %c0_76 = arith.constant 0 : index
    %c0_77 = arith.constant 0 : index
    %c64 = arith.constant 64 : index
    %75 = vector.load %arg9[%c0_76, %c0_77, %c64] : memref<16x16x72xbf16, #tpu.memory_space<vmem>>, vector<16x16x8xbf16>
    tpu.vector_store %arg9[%c0_76, %c0_77, %c64], %74 {strides = array<i32>} : memref<16x16x72xbf16, #tpu.memory_space<vmem>>, vector<16x16x8xbf16>,
    %c0_78 = arith.constant 0 : index
    %c0_79 = arith.constant 0 : index
    %c0_80 = arith.constant 0 : index
    %76 = vector.load %arg9[%c0_78, %c0_79, %c0_80] : memref<16x16x72xbf16, #tpu.memory_space<vmem>>, vector<16x16x72xbf16>
    %77 = vector.shape_cast %76 : vector<16x16x72xbf16> to vector<256x72xbf16>
    %c0_81 = arith.constant 0 : index
    %c0_82 = arith.constant 0 : index
    %78 = vector.load %arg5[%c0_81, %c0_82] : memref<72x8xbf16, #tpu.memory_space<vmem>>, vector<72x8xbf16>
    %cst_83 = arith.constant dense<0.000000e+00> : vector<256x8xf32>
    %79 = tpu.matmul %77, %78, %cst_83 {dimension_numbers = #tpu.dot_dimension_numbers<[1], [0], [0], [1], [0, 0, 1, 1], [], []>} : vector<256x72xbf16>, vector<72x8xbf16>, vector<256x8xf32> -> vector<256x8xf32>
    %80 = vector.shape_cast %79 : vector<256x8xf32> to vector<16x16x8xf32>
    %c0_84 = arith.constant 0 : index
    %c0_85 = arith.constant 0 : index
    %c0_86 = arith.constant 0 : index
    %c0_87 = arith.constant 0 : index
    %81 = vector.load %arg6[%c0_84, %c0_85, %c0_86, %c0_87] : memref<1x16x16x8xf32, #tpu.memory_space<vmem>>, vector<1x16x16x8xf32>
    %82 = vector.shape_cast %81 : vector<1x16x16x8xf32> to vector<16x16x8xf32>
    %83 = vector.shape_cast %80 : vector<16x16x8xf32> to vector<1x16x16x8xf32>
    tpu.vector_store %arg6[%c0_84, %c0_85, %c0_86, %c0_87], %83 {strides = array<i32>} : memref<1x16x16x8xf32, #tpu.memory_space<vmem>>, vector<1x16x16x8xf32>,
    %cst_88 = arith.constant dense<0.000000e+00> : vector<8xf32>
    %84 = vector.multi_reduction <add>, %79, %cst_88 [0] : vector<256x8xf32> to vector<8xf32>
    %85 = vector.shape_cast %84 : vector<8xf32> to vector<1x8xf32>
    %c0_89 = arith.constant 0 : index
    %c0_90 = arith.constant 0 : index
    %c0_91 = arith.constant 0 : index
    %c0_92 = arith.constant 0 : index
    %86 = vector.load %arg7[%c0_89, %c0_90, %c0_91, %c0_92] : memref<1x1x2x8xf32, #tpu.memory_space<vmem>>, vector<1x1x1x8xf32>
    %87 = vector.shape_cast %86 : vector<1x1x1x8xf32> to vector<1x8xf32>
    %88 = vector.shape_cast %85 : vector<1x8xf32> to vector<1x1x1x8xf32>
    tpu.vector_store %arg7[%c0_89, %c0_90, %c0_91, %c0_92], %88 {strides = array<i32>} : memref<1x1x2x8xf32, #tpu.memory_space<vmem>>, vector<1x1x1x8xf32>,
    %89 = arith.mulf %79, %79 : vector<256x8xf32>
    %cst_93 = arith.constant dense<0.000000e+00> : vector<8xf32>
    %90 = vector.multi_reduction <add>, %89, %cst_93 [0] : vector<256x8xf32> to vector<8xf32>
    %91 = vector.shape_cast %90 : vector<8xf32> to vector<1x8xf32>
    %c0_94 = arith.constant 0 : index
    %c0_95 = arith.constant 0 : index
    %c1_96 = arith.constant 1 : index
    %c0_97 = arith.constant 0 : index
    %92 = vector.load %arg7[%c0_94, %c0_95, %c1_96, %c0_97] : memref<1x1x2x8xf32, #tpu.memory_space<vmem>>, vector<1x1x1x8xf32>
    %93 = vector.shape_cast %92 : vector<1x1x1x8xf32> to vector<1x8xf32>
    %94 = vector.shape_cast %91 : vector<1x8xf32> to vector<1x1x1x8xf32>
    tpu.vector_store %arg7[%c0_94, %c0_95, %c1_96, %c0_97], %94 {strides = array<i32>} : memref<1x1x2x8xf32, #tpu.memory_space<vmem>>, vector<1x1x1x8xf32>,
    return
  }
  func.func @transform_0(%arg0: i32, %arg1: i32) -> (i32, i32, i32, i32) {
    %c0_i32 = arith.constant 0 : i32
    %c0_i32_0 = arith.constant 0 : i32
    %c0_i32_1 = arith.constant 0 : i32
    %c0_i32_2 = arith.constant 0 : i32
    return %arg0, %c0_i32, %c0_i32_0, %c0_i32_1 : i32, i32, i32, i32
  }
  func.func @transform_1(%arg0: i32, %arg1: i32) -> (i32, i32) {
    %c0_i32 = arith.constant 0 : i32
    %c0_i32_0 = arith.constant 0 : i32
    %c0_i32_1 = arith.constant 0 : i32
    return %c0_i32, %c0_i32_0 : i32, i32
  }
  func.func @transform_2(%arg0: i32, %arg1: i32) -> (i32, i32) {
    %c0_i32 = arith.constant 0 : i32
    %c0_i32_0 = arith.constant 0 : i32
    %c0_i32_1 = arith.constant 0 : i32
    return %c0_i32, %c0_i32_0 : i32, i32
  }
  func.func @transform_3(%arg0: i32, %arg1: i32) -> (i32, i32) {
    %c0_i32 = arith.constant 0 : i32
    %c0_i32_0 = arith.constant 0 : i32
    %c0_i32_1 = arith.constant 0 : i32
    return %c0_i32, %c0_i32_0 : i32, i32
  }
  func.func @transform_4(%arg0: i32, %arg1: i32) -> (i32, i32, i32, i32) {
    %c0_i32 = arith.constant 0 : i32
    %c0_i32_0 = arith.constant 0 : i32
    %c0_i32_1 = arith.constant 0 : i32
    return %arg0, %arg1, %c0_i32, %c0_i32_0 : i32, i32, i32, i32
  }
  func.func @transform_5(%arg0: i32, %arg1: i32) -> (i32, i32, i32, i32) {
    %c0_i32 = arith.constant 0 : i32
    %c0_i32_0 = arith.constant 0 : i32
    %c0_i32_1 = arith.constant 0 : i32
    return %arg0, %arg1, %c0_i32, %c0_i32_0 : i32, i32, i32, i32
  }
}

</mosaic_0001>

<bundles_post_ra>
// kernel: _lambda_.5
= control target key start
LH: loop header
LB: loop body
LE: loop exit
PB: predicated region body
PF: predicated region fallthrough
CT: control target
= control target key end

     0   :  { %s563_s12 = smov 0   ;;  %s565_s13 = smov 0   ;;  %s770_s0 = inlined_call_operand.vmem [shape: f32[2,16,16,8], index: 0, kind: input, shape index: {}]   ;;  %s771_s1 = inlined_call_operand.vmem [shape: f32[1,8], index: 1, kind: input, shape index: {}]   ;;  %s772_s2 = inlined_call_operand.vmem [shape: f32[1,8], index: 2, kind: input, shape index: {}]   ;;  %s773_s3 = inlined_call_operand.vmem [shape: f32[2,16,16,8], index: 3, kind: output, shape index: {}]  }
   0x1   :  { %s567_s14 = smov 0  }
   0x2 LB: > { %s25_s15 = sadd.s32 1, %s537_s13  ;;  %p484_p0 = scmp.ge.s32.totalorder %s541_s14, 1  ;;  %s541_s14 = sphi %s567_s14, %s13_s14   ;;  %s537_s13 = sphi %s565_s13, %s775_s13   ;;  %s533_s12 = sphi %s563_s12, %s774_s12  }
   0x3   : > { %p27_p1 = scmp.ge.s32.totalorder %s25_s15, 2  ;;  %p159_p2 = scmp.lt.s32.totalorder %s541_s14, 3 }
   0x5   : > { %s777_s15 = smov (%p27_p1, %s25_s15), 0  ;;  %p160_p3 = pnand %p484_p0, %p159_p2 }
   0x6   : > { %p194_p4 = scmp.lt.s32.totalorder (!%p160_p3), %s533_s12, 1 }
   0x7   : > { %163 = sbr.rel (%p160_p3) target bundleno = 54 (0x36), region = 32 }
   0xc   : > { %s779_s12 = smov (!%p194_p4, %s533_s12), 1  ;;  %v584_v0 = vld [vmem:[%s771_s1] ss:$0 sm:$0xff]  ;;  %vm351_vm0 = vcmask 64512  }
   0xd   : > { %s491_s18 = sshll.u32 %s779_s12, 8  ;;  %v594_v1 = vld [vmem:[%s772_s2] ss:$0 sm:$0xff] }
   0xe   : > { %s589_s21 = scalar_lea.vmem %s770_s0, %s491_s18  ;;  %s617_s26 = scalar_lea.vmem %s773_s3, %s491_s18 }
   0xf   : > { %v215_v2 = vld [vmem:[%s589_s21] sm:$0xff]  ;;  %v216_v3 = vld [vmem:[%s589_s21 + $0x8] sm:$0xff]  ;;  %v217_v4 = vld [vmem:[%s589_s21 + $0x10] sm:$0xff] }
  0x10   : > { %v251_v5 = vmul.f32 %v584_v0, %v215_v2  ;;  %v252_v6 = vmul.f32 %v584_v0, %v216_v3  ;;  %v253_v7 = vmul.f32 %v584_v0, %v217_v4  ;;  %v218_v8 = vld [vmem:[%s589_s21 + $0x18] sm:$0xff]  ;;  %v219_v9 = vld [vmem:[%s589_s21 + $0x20] sm:$0xff]  ;;  %v220_v10 = vld [vmem:[%s589_s21 + $0x28] sm:$0xff] }
  0x11   : > { %v254_v11 = vmul.f32 %v584_v0, %v218_v8  ;;  %v255_v12 = vmul.f32 %v584_v0, %v219_v9  ;;  %v256_v13 = vmul.f32 %v584_v0, %v220_v10  ;;  %v221_v14 = vld [vmem:[%s589_s21 + $0x30] sm:$0xff]  ;;  %v222_v15 = vld [vmem:[%s589_s21 + $0x38] sm:$0xff]  ;;  %v223_v24 = vld [vmem:[%s589_s21 + $0x40] sm:$0xff] }
  0x12   : > { %v287_v16 = vadd.f32 %v594_v1, %v251_v5  ;;  %v288_v17 = vadd.f32 %v594_v1, %v252_v6  ;;  %v289_v18 = vadd.f32 %v594_v1, %v253_v7  ;;  %v257_v19 = vmul.f32 %v584_v0, %v221_v14  ;;  %v224_v25 = vld [vmem:[%s589_s21 + $0x48] sm:$0xff]  ;;  %v225_v26 = vld [vmem:[%s589_s21 + $0x50] sm:$0xff]  ;;  %v226_v31 = vld [vmem:[%s589_s21 + $0x58] sm:$0xff] }
  0x13   : > { %v290_v20 = vadd.f32 %v594_v1, %v254_v11  ;;  %v291_v21 = vadd.f32 %v594_v1, %v255_v12  ;;  %v292_v22 = vadd.f32 %v594_v1, %v256_v13  ;;  %v258_v23 = vmul.f32 %v584_v0, %v222_v15  ;;  %v227_v32 = vld [vmem:[%s589_s21 + $0x60] sm:$0xff]  ;;  %v228_v33 = vld [vmem:[%s589_s21 + $0x68] sm:$0xff]  ;;  %v229_v37 = vld [vmem:[%s589_s21 + $0x70] sm:$0xff] }
  0x14   : > { %v319_v27 = vmax.f32 %v287_v16, 0.0  ;;  %v320_v28 = vmax.f32 %v288_v17, 0.0  ;;  %v321_v29 = vmax.f32 %v289_v18, 0.0  ;;  %v293_v30 = vadd.f32 %v594_v1, %v257_v19  ;;  %v230_v42 = vld [vmem:[%s589_s21 + $0x78] sm:$0xff]  ;;  %v231_v54 = vld [vmem:[%s589_s21 + $0x80] sm:$0xff]  ;;  %v232_v55 = vld [vmem:[%s589_s21 + $0x88] sm:$0xff] }
  0x15   : > { %v322_v34 = vmax.f32 %v290_v20, 0.0  ;;  %v323_v35 = vmax.f32 %v291_v21, 0.0  ;;  %v294_v36 = vadd.f32 %v594_v1, %v258_v23  ;;  %v324_v38 = vmax.f32 %v292_v22, 0.0  ;;  %v233_v56 = vld [vmem:[%s589_s21 + $0x90] sm:$0xff]  ;;  %v234_v59 = vld [vmem:[%s589_s21 + $0x98] sm:$0xff]  ;;  %v235_v63 = vld [vmem:[%s589_s21 + $0xa0] sm:$0xff] }
  0x16   : > { %352 = vst.msk [vmem:[%s617_s26] sm:$0xff] %vm351_vm0, %v319_v27  ;;  %v259_v39 = vmul.f32 %v584_v0, %v223_v24  ;;  %v260_v40 = vmul.f32 %v584_v0, %v224_v25  ;;  %v261_v41 = vmul.f32 %v584_v0, %v225_v26  ;;  %v325_v43 = vmax.f32 %v293_v30, 0.0  ;;  %v236_v6 = vld [vmem:[%s589_s21 + $0xa8] sm:$0xff]  ;;  %v237_v10 = vld [vmem:[%s589_s21 + $0xb0] sm:$0xff]  ;;  %v238_v14 = vld [vmem:[%s589_s21 + $0xb8] sm:$0xff] }
  0x17   : > { %353 = vst.msk [vmem:[%s617_s26 + $0x8] sm:$0xff] %vm351_vm0, %v320_v28  ;;  %v262_v44 = vmul.f32 %v584_v0, %v226_v31  ;;  %v263_v45 = vmul.f32 %v584_v0, %v227_v32  ;;  %v264_v46 = vmul.f32 %v584_v0, %v228_v33  ;;  %v265_v50 = vmul.f32 %v584_v0, %v229_v37  ;;  %v239_v18 = vld [vmem:[%s589_s21 + $0xc0] sm:$0xff]  ;;  %v240_v22 = vld [vmem:[%s589_s21 + $0xc8] sm:$0xff]  ;;  %v241_v26 = vld [vmem:[%s589_s21 + $0xd0] sm:$0xff] }
  0x18   : > { %354 = vst.msk [vmem:[%s617_s26 + $0x10] sm:$0xff] %vm351_vm0, %v321_v29  ;;  %v295_v47 = vadd.f32 %v594_v1, %v259_v39  ;;  %v296_v48 = vadd.f32 %v594_v1, %v260_v40  ;;  %v297_v49 = vadd.f32 %v594_v1, %v261_v41  ;;  %v326_v51 = vmax.f32 %v294_v36, 0.0  ;;  %v242_v30 = vld [vmem:[%s589_s21 + $0xd8] sm:$0xff] }
  0x19   : > { %355 = vst.msk [vmem:[%s617_s26 + $0x18] sm:$0xff] %vm351_vm0, %v322_v34  ;;  %v298_v52 = vadd.f32 %v594_v1, %v262_v44  ;;  %v266_v53 = vmul.f32 %v584_v0, %v230_v42  ;;  %v299_v58 = vadd.f32 %v594_v1, %v263_v45  ;;  %v300_v62 = vadd.f32 %v594_v1, %v264_v46  ;;  %v243_v34 = vld [vmem:[%s589_s21 + $0xe0] sm:$0xff]  ;;  %v245_v42 = vld [vmem:[%s589_s21 + $0xf0] sm:$0xff]  ;;  %v246_v46 = vld [vmem:[%s589_s21 + $0xf8] sm:$0xff] }
  0x1a   : > { %356 = vst.msk [vmem:[%s617_s26 + $0x20] sm:$0xff] %vm351_vm0, %v323_v35  ;;  %v327_v57 = vmax.f32 %v295_v47, 0.0  ;;  %v328_v60 = vmax.f32 %v296_v48, 0.0  ;;  %v329_v61 = vmax.f32 %v297_v49, 0.0  ;;  %v301_v2 = vadd.f32 %v594_v1, %v265_v50 }
  0x1b   : > { %357 = vst.msk [vmem:[%s617_s26 + $0x28] sm:$0xff] %vm351_vm0, %v324_v38  ;;  %v267_v3 = vmul.f32 %v584_v0, %v231_v54  ;;  %v268_v4 = vmul.f32 %v584_v0, %v232_v55  ;;  %v269_v5 = vmul.f32 %v584_v0, %v233_v56  ;;  %v330_v7 = vmax.f32 %v298_v52, 0.0  ;;  %v244_v38 = vld [vmem:[%s589_s21 + $0xe8] sm:$0xff] }
  0x1c   : > { %358 = vst.msk [vmem:[%s617_s26 + $0x30] sm:$0xff] %vm351_vm0, %v325_v43  ;;  %v302_v8 = vadd.f32 %v594_v1, %v266_v53  ;;  %v270_v9 = vmul.f32 %v584_v0, %v234_v59  ;;  %v331_v11 = vmax.f32 %v299_v58, 0.0  ;;  %v271_v13 = vmul.f32 %v584_v0, %v235_v63 }
  0x1d   : > { %359 = vst.msk [vmem:[%s617_s26 + $0x38] sm:$0xff] %vm351_vm0, %v326_v51  ;;  %v303_v12 = vadd.f32 %v594_v1, %v267_v3  ;;  %v332_v15 = vmax.f32 %v300_v62, 0.0  ;;  %v304_v16 = vadd.f32 %v594_v1, %v268_v4  ;;  %v272_v17 = vmul.f32 %v584_v0, %v236_v6 }
  0x1e   : > { %360 = vst.msk [vmem:[%s617_s26 + $0x40] sm:$0xff] %vm351_vm0, %v327_v57  ;;  %v333_v19 = vmax.f32 %v301_v2, 0.0  ;;  %v305_v20 = vadd.f32 %v594_v1, %v269_v5  ;;  %v273_v21 = vmul.f32 %v584_v0, %v237_v10  ;;  %v334_v23 = vmax.f32 %v302_v8, 0.0 }
  0x1f   : > { %361 = vst.msk [vmem:[%s617_s26 + $0x48] sm:$0xff] %vm351_vm0, %v328_v60  ;;  %v306_v24 = vadd.f32 %v594_v1, %v270_v9  ;;  %v274_v25 = vmul.f32 %v584_v0, %v238_v14  ;;  %v335_v27 = vmax.f32 %v303_v12, 0.0  ;;  %v307_v28 = vadd.f32 %v594_v1, %v271_v13 }
  0x20   : > { %362 = vst.msk [vmem:[%s617_s26 + $0x50] sm:$0xff] %vm351_vm0, %v329_v61  ;;  %v275_v29 = vmul.f32 %v584_v0, %v239_v18  ;;  %v336_v31 = vmax.f32 %v304_v16, 0.0  ;;  %v308_v32 = vadd.f32 %v594_v1, %v272_v17  ;;  %v276_v33 = vmul.f32 %v584_v0, %v240_v22 }
  0x21   : > { %363 = vst.msk [vmem:[%s617_s26 + $0x58] sm:$0xff] %vm351_vm0, %v330_v7  ;;  %v337_v35 = vmax.f32 %v305_v20, 0.0  ;;  %v309_v36 = vadd.f32 %v594_v1, %v273_v21  ;;  %v277_v37 = vmul.f32 %v584_v0, %v241_v26  ;;  %v338_v39 = vmax.f32 %v306_v24, 0.0 }
  0x22   : > { %364 = vst.msk [vmem:[%s617_s26 + $0x60] sm:$0xff] %vm351_vm0, %v331_v11  ;;  %v310_v40 = vadd.f32 %v594_v1, %v274_v25  ;;  %v278_v41 = vmul.f32 %v584_v0, %v242_v30  ;;  %v339_v43 = vmax.f32 %v307_v28, 0.0  ;;  %v311_v44 = vadd.f32 %v594_v1, %v275_v29 }
  0x23   : > { %365 = vst.msk [vmem:[%s617_s26 + $0x68] sm:$0xff] %vm351_vm0, %v332_v15  ;;  %v279_v45 = vmul.f32 %v584_v0, %v243_v34  ;;  %v340_v47 = vmax.f32 %v308_v32, 0.0  ;;  %v312_v48 = vadd.f32 %v594_v1, %v276_v33  ;;  %v280_v49 = vmul.f32 %v584_v0, %v244_v38 }
  0x24   : > { %366 = vst.msk [vmem:[%s617_s26 + $0x70] sm:$0xff] %vm351_vm0, %v333_v19  ;;  %v341_v50 = vmax.f32 %v309_v36, 0.0  ;;  %v313_v51 = vadd.f32 %v594_v1, %v277_v37  ;;  %v281_v52 = vmul.f32 %v584_v0, %v245_v42  ;;  %v342_v53 = vmax.f32 %v310_v40, 0.0 }
  0x25   : > { %367 = vst.msk [vmem:[%s617_s26 + $0x78] sm:$0xff] %vm351_vm0, %v334_v23  ;;  %v314_v54 = vadd.f32 %v594_v1, %v278_v41  ;;  %v282_v55 = vmul.f32 %v584_v0, %v246_v46  ;;  %v343_v56 = vmax.f32 %v311_v44, 0.0  ;;  %v315_v57 = vadd.f32 %v594_v1, %v279_v45 }
  0x26   : > { %368 = vst.msk [vmem:[%s617_s26 + $0x80] sm:$0xff] %vm351_vm0, %v335_v27  ;;  %v344_v58 = vmax.f32 %v312_v48, 0.0  ;;  %v316_v59 = vadd.f32 %v594_v1, %v280_v49  ;;  %v345_v60 = vmax.f32 %v313_v51, 0.0  ;;  %v317_v0 = vadd.f32 %v594_v1, %v281_v52 }
  0x27   : > { %369 = vst.msk [vmem:[%s617_s26 + $0x88] sm:$0xff] %vm351_vm0, %v336_v31  ;;  %v346_v61 = vmax.f32 %v314_v54, 0.0  ;;  %v318_v62 = vadd.f32 %v594_v1, %v282_v55  ;;  %v347_v63 = vmax.f32 %v315_v57, 0.0 }
  0x28   : > { %370 = vst.msk [vmem:[%s617_s26 + $0x90] sm:$0xff] %vm351_vm0, %v337_v35  ;;  %v348_v2 = vmax.f32 %v316_v59, 0.0  ;;  %v349_v3 = vmax.f32 %v317_v0, 0.0 }
  0x29   : > { %371 = vst.msk [vmem:[%s617_s26 + $0x98] sm:$0xff] %vm351_vm0, %v338_v39  ;;  %v350_v4 = vmax.f32 %v318_v62, 0.0 }
  0x2a   : > { %372 = vst.msk [vmem:[%s617_s26 + $0xa0] sm:$0xff] %vm351_vm0, %v339_v43 }
  0x2b   : > { %373 = vst.msk [vmem:[%s617_s26 + $0xa8] sm:$0xff] %vm351_vm0, %v340_v47 }
  0x2c   : > { %374 = vst.msk [vmem:[%s617_s26 + $0xb0] sm:$0xff] %vm351_vm0, %v341_v50 }
  0x2d   : > { %375 = vst.msk [vmem:[%s617_s26 + $0xb8] sm:$0xff] %vm351_vm0, %v342_v53 }
  0x2e   : > { %376 = vst.msk [vmem:[%s617_s26 + $0xc0] sm:$0xff] %vm351_vm0, %v343_v56 }
  0x2f   : > { %377 = vst.msk [vmem:[%s617_s26 + $0xc8] sm:$0xff] %vm351_vm0, %v344_v58 }
  0x30   : > { %378 = vst.msk [vmem:[%s617_s26 + $0xd0] sm:$0xff] %vm351_vm0, %v345_v60 }
  0x31   : > { %379 = vst.msk [vmem:[%s617_s26 + $0xd8] sm:$0xff] %vm351_vm0, %v346_v61 }
  0x32   : > { %380 = vst.msk [vmem:[%s617_s26 + $0xe0] sm:$0xff] %vm351_vm0, %v347_v63 }
  0x33   : > { %381 = vst.msk [vmem:[%s617_s26 + $0xe8] sm:$0xff] %vm351_vm0, %v348_v2 }
  0x34   : > { %382 = vst.msk [vmem:[%s617_s26 + $0xf0] sm:$0xff] %vm351_vm0, %v349_v3 }
  0x35   : > { %383 = vst.msk [vmem:[%s617_s26 + $0xf8] sm:$0xff] %vm351_vm0, %v350_v4 }
  0x36 PF: > { %s13_s14 = sadd.s32 1, %s541_s14   ;;  %s774_s12 = smov %s537_s13 }
  0x37   : > { %p10_p5 = scmp.ge.s32.totalorder %s13_s14, 4   ;;  %s775_s13 = smov %s777_s15 }
  0x39   :  { %12 = sbr.rel (!%p10_p5) target bundleno = 2 (0x2), region = 62 }

// kernel: _lambda_.3
= control target key start
LH: loop header
LB: loop body
LE: loop exit
PB: predicated region body
PF: predicated region fallthrough
CT: control target
= control target key end

     0   :  { %s5133_s18 = smov 0   ;;  %s5135_s19 = smov 0   ;;  %s7137_s0 = inlined_call_operand.vmem [shape: f32[2,16,16,4], index: 0, kind: input, shape index: {}]   ;;  %s7138_s1 = inlined_call_operand.vmem [shape: f32[1,4], index: 1, kind: input, shape index: {}]   ;;  %s7139_s2 = inlined_call_operand.vmem [shape: f32[1,4], index: 2, kind: input, shape index: {}]   ;;  %s7140_s3 = inlined_call_operand.vmem [shape: bf16[36,8], index: 3, kind: input, shape index: {}]   ;;  %s7141_s4 = inlined_call_operand.vmem [shape: bf16[2,16,16,8], index: 4, kind: output, shape index: {0}]   ;;  %s7142_s5 = inlined_call_operand.vmem [shape: f32[2,1,2,8], index: 5, kind: output, shape index: {1}]  }
   0x1   :  { %s5137_s20 = smov 0  }
   0x2 LB: > { %s28_s21 = sadd.s32 1, %s5088_s19  ;;  %p4856_p0 = scmp.ge.s32.totalorder %s5092_s20, 1  ;;  %s5092_s20 = sphi %s5137_s20, %s16_s20   ;;  %s5088_s19 = sphi %s5135_s19, %s7156_s19   ;;  %s5084_s18 = sphi %s5133_s18, %s7155_s18  }
   0x3   : > { %p30_p1 = scmp.ge.s32.totalorder %s28_s21, 2  ;;  %p206_p2 = scmp.lt.s32.totalorder %s5092_s20, 3 }
   0x5   : > { %s7158_s21 = smov (%p30_p1, %s28_s21), 0  ;;  %p207_p3 = pnand %p4856_p0, %p206_p2 }
   0x6   : > { %p246_p4 = scmp.lt.s32.totalorder (!%p207_p3), %s5084_s18, 1  ;;  %s5095_s30 = smov (!%p207_p3), 4  }
   0x7   : > { %210 = sbr.rel (%p207_p3) target bundleno = 1054 (0x41e), region = 36  ;;  %s5096_s10 = smov (!%p207_p3), 8  }
   0x8   : > { %s5097_s11 = smov (!%p207_p3), 12   ;;  %s5098_s16 = smov (!%p207_p3), 16  }
   0x9   : > { %s5099_s17 = smov (!%p207_p3), 20   ;;  %s5100_s22 = smov (!%p207_p3), 28  }
   0xa   : > { %s5101_s23 = smov (!%p207_p3), 32  }
   0xc   : > { %vm409_vm0 = vsmask.f32 256  ;;  %vm410_vm1 = vsmask.f32 4368  ;;  %vm741_vm2 = vcmask 24576   ;;  %vm733_vm4 = vcmask 27648  }
   0xd   : > { %vm5151_vm3 = vmor %vm409_vm0, %vm410_vm1  ;;  %vm734_vm5 = vsmask.f32 7938  ;;  %v5094_v1 = vmov 0   ;;  %v907_v4 = vld [vmem:[#allocation2 + $0x8] sm:$0x1]  ;;  %s7160_s18 = smov (!%p246_p4, %s5084_s18), 1 }
   0xe   : > { %v5155_v2 = vrot.slane %v5094_v1, 7  ;;  %vm5158_vm6 = vmand %vm741_vm2, %vm409_vm0  ;;  %v903_v6 = vld [vmem:[#allocation2] sm:$0xf]  ;;  %s5002_s24 = sshll.u32 %s7160_s18, 8  ;;  %vm1166_vm9 = vsmask.f32 3328 }
   0xf   : > { %vm5169_vm7 = vmand %vm733_vm4, %vm734_vm5  ;;  %v5176_v8 = vld [vmem:[%s7138_s1] ss:$0 sm:$0xff]  ;;  %s5193_s27 = scalar_lea.vmem %s7137_s0, %s5002_s24  ;;  %vm1167_vm10 = vsmask.f32 7440  ;;  %v743_v62 = vld [vmem:[#allocation2 + $0x14] sm:$0x1] }
  0x10   : > { %v5163_v5 = vrot.slane %v5155_v2, 4  ;;  %v904_v11 = vsel %vm5169_vm7, %v5155_v2, %v903_v6  ;;  %v5198_v12 = vld [vmem:[%s7139_s2] ss:$0 sm:$0xff]  ;;  %v276_v14 = vld [vmem:[%s5193_s27 + $0x8] sm:$0xff]  ;;  %v281_v15 = vld [vmem:[%s5193_s27 + $0x30] sm:$0xff]  ;;  %vm1778_vm12 = vcmask 1042432  }
  0x11   : > { %v275_v13 = vld [vmem:[%s5193_s27] sm:$0xff]  ;;  %v311_v17 = vmul.f32 %v5176_v8, %v276_v14  ;;  %v282_v18 = vld [vmem:[%s5193_s27 + $0x38] sm:$0xff]  ;;  %v316_v19 = vmul.f32 %v5176_v8, %v281_v15  ;;  %v280_v21 = vld [vmem:[%s5193_s27 + $0x28] sm:$0xff]  ;;  %905 = vst [vmem:[#allocation2] sm:$0xf] %v904_v11  ;;  %vm1779_vm13 = vcmask 1046532  }
  0x12   : > { %v898_v9 = vsel %vm5151_vm3, %v5163_v5, %v5155_v2  ;;  %v908_v10 = vsel %vm5158_vm6, %v5163_v5, %v907_v4  ;;  %v310_v16 = vmul.f32 %v5176_v8, %v275_v13  ;;  %v279_v20 = vld [vmem:[%s5193_s27 + $0x20] sm:$0xff]  ;;  %v317_v22 = vmul.f32 %v5176_v8, %v282_v18  ;;  %v288_v26 = vld [vmem:[%s5193_s27 + $0x68] sm:$0xff]  ;;  %vm5225_vm8 = vmand %vm741_vm2, %vm734_vm5  ;;  %s5102_s24 = smov 24   ;;  %s5003_s6 = sshll.u32 %s7160_s18, 7 }
  0x13   : > { %906 = vst.msk [vmem:[#allocation2 + $0x4] sm:$0xf] %vm733_vm4, %v898_v9  ;;  %v314_v23 = vmul.f32 %v5176_v8, %v279_v20  ;;  %v315_v24 = vmul.f32 %v5176_v8, %v280_v21  ;;  %v287_v25 = vld [vmem:[%s5193_s27 + $0x60] sm:$0xff]  ;;  %v346_v28 = vadd.f32 %v5198_v12, %v311_v17  ;;  %v351_v29 = vadd.f32 %v5198_v12, %v316_v19  ;;  %v764_v15 = vld [vmem:[#allocation2 + $0x38] sm:$0x1]  ;;  %v285_v20 = vld [vmem:[%s5193_s27 + $0x50] sm:$0xff]  ;;  %s6854_s9 = scalar_lea.vmem %s7141_s4, %s5003_s6 }
  0x14   : > { %909 = vst [vmem:[#allocation2 + $0x8] sm:$0x1] %v908_v10  ;;  %v345_v27 = vadd.f32 %v5198_v12, %v310_v16  ;;  %v322_v30 = vmul.f32 %v5176_v8, %v287_v25  ;;  %v352_v31 = vadd.f32 %v5198_v12, %v317_v22  ;;  %v323_v34 = vmul.f32 %v5176_v8, %v288_v26  ;;  %v286_v21 = vld [vmem:[%s5193_s27 + $0x58] sm:$0xff]  ;;  %vm5282_vm11 = vmor %vm1166_vm9, %vm1167_vm10 }
  0x15   : > { %941 = vst.msk [vmem:[#allocation2 + $0xd0] sm:$0xf] %vm733_vm4, %v898_v9  ;;  %v349_v32 = vadd.f32 %v5198_v12, %v314_v23  ;;  %v350_v33 = vadd.f32 %v5198_v12, %v315_v24  ;;  %v378_v37 = vpack.c.bf16 %v346_v28, %v346_v28  ;;  %v5231_v38 = vpack.c.bf16 %v351_v29, %v351_v29  ;;  %v757_v29 = vld [vmem:[#allocation2 + $0x2c] sm:$0x1]  ;;  %vm5723_vm14 = vmor %vm1778_vm12, %vm1779_vm13 }
  0x16   : > { %v5229_v36 = vpack.c.bf16 %v345_v27, %v345_v27  ;;  %v357_v39 = vadd.f32 %v5198_v12, %v322_v30  ;;  %v384_v41 = vpack.c.bf16 %v352_v31, %v352_v31  ;;  %v358_v44 = vadd.f32 %v5198_v12, %v323_v34 }
  0x17   : > { %v5234_v42 = vpack.c.bf16 %v349_v32, %v349_v32  ;;  %v5236_v43 = vpack.c.bf16 %v350_v33, %v350_v33  ;;  %v421_v49 = vshrl.u32 %v378_v37, 16  ;;  %v424_v51 = vshll.u32 %v378_v37, 16 }
  0x18   : > { %v413_v48 = vshrl.u32 %v5229_v36, 16  ;;  %v464_v52 = vshrl.u32 %v5231_v38, 16  ;;  %v472_v53 = vshrl.u32 %v384_v41, 16  ;;  %v945_v56 = vld [vmem:[#allocation2] sm:$0x1]  ;;  %v5245_v57 = vpack.c.bf16 %v357_v39, %v357_v39 }
  0x19   : > { %v390_v58 = vpack.c.bf16 %v358_v44, %v358_v44  ;;  %v946_v59 = vsel %vm5158_vm6, 0, %v945_v56  ;;  %v423_v61 = vrot.slane %v421_v49, 7  ;;  %v475_v6 = vshll.u32 %v384_v41, 16 }
  0x1a   : > { %v1119_v40 = vld [vmem:[#allocation2 + $0x4] sm:$0xf]  ;;  %v5249_v60 = vrot.slane %v413_v48, 7  ;;  %v5251_v63 = vrot.slane %v464_v52, 7  ;;  %947 = vst [vmem:[#allocation2] sm:$0x1] %v946_v59  ;;  %v320_v34 = vmul.f32 %v5176_v8, %v285_v20  ;;  %v321_v37 = vmul.f32 %v5176_v8, %v286_v21 }
  0x1b   : > { %v1000_v45 = vld [vmem:[#allocation2 + $0x8] sm:$0x1]  ;;  %v1179_v46 = vshll.u32 %v1119_v40, 16  ;;  %v1183_v47 = vshrl.u32 %v1119_v40, 16  ;;  %v474_v4 = vrot.slane %v472_v53, 7  ;;  %v447_v9 = vshrl.u32 %v5234_v42, 16 }
  0x1c   : > { %v1001_v50 = vsel %vm5225_vm8, 0, %v1000_v45  ;;  %v419_v10 = vrot.slane %v5249_v60, 4  ;;  %v426_v11 = vor.u32 %v424_v51, %v423_v61  ;;  %v428_v13 = vrot.slane %v423_v61, 4  ;;  %v753_v21 = vld [vmem:[#allocation2 + $0x24] sm:$0xf] }
  0x1d   : > { %1002 = vst [vmem:[#allocation2 + $0x8] sm:$0x1] %v1001_v50  ;;  %v5243_v54 = vrot.slane %v1179_v46, 5  ;;  %v1185_v55 = vrot.slane %v1183_v47, 4  ;;  %v470_v14 = vrot.slane %v5251_v63, 4  ;;  %v477_v17 = vor.u32 %v475_v6, %v474_v4  ;;  %v277_v6 = vld [vmem:[%s5193_s27 + $0x10] sm:$0xff] }
  0x1e   : > { %v479_v18 = vrot.slane %v474_v4, 4  ;;  %v5257_v19 = vrot.slane %v447_v9, 7  ;;  %v427_v22 = vsel %vm5151_vm3, %v419_v10, %v426_v11  ;;  %v744_v23 = vsel %vm5158_vm6, %v428_v13, %v743_v62 }
  0x1f   : > { %v1186_v1 = vor.u32 %v1185_v55, %v5243_v54  ;;  %v455_v24 = vshrl.u32 %v5236_v43, 16  ;;  %v458_v25 = vshll.u32 %v5236_v43, 16  ;;  %740 = vst.msk [vmem:[#allocation2 + $0x10] sm:$0xf] %vm733_vm4, %v427_v22  ;;  %v478_v26 = vsel %vm5151_vm3, %v470_v14, %v477_v17  ;;  %v278_v22 = vld [vmem:[%s5193_s27 + $0x18] sm:$0xff] }
  0x20   : > { %v765_v27 = vsel %vm5158_vm6, %v479_v18, %v764_v15  ;;  %v453_v28 = vrot.slane %v5257_v19, 4  ;;  %v515_v30 = vshrl.u32 %v5245_v57, 16  ;;  %745 = vst [vmem:[#allocation2 + $0x14] sm:$0x1] %v744_v23  ;;  %v523_v33 = vshrl.u32 %v390_v58, 16 }
  0x21   : > { %v1187_v16 = vrot.slane %v1186_v1, 4  ;;  %v457_v32 = vrot.slane %v455_v24, 7  ;;  %763 = vst.msk [vmem:[#allocation2 + $0x34] sm:$0xf] %vm733_vm4, %v478_v26  ;;  %v526_v41 = vshll.u32 %v390_v58, 16  ;;  %v450_v43 = vshll.u32 %v5234_v42, 16 }
  0x22   : > { %v5277_v40 = vrot.slane %v515_v30, 7  ;;  %v1118_v45 = vld [vmem:[#allocation2] sm:$0xf]  ;;  %766 = vst [vmem:[#allocation2 + $0x38] sm:$0x1] %v765_v27  ;;  %v525_v48 = vrot.slane %v523_v33, 7  ;;  %v355_v49 = vadd.f32 %v5198_v12, %v320_v34  ;;  %v356_v4 = vadd.f32 %v5198_v12, %v321_v37 }
  0x23   : > { %v460_v46 = vor.u32 %v458_v25, %v457_v32  ;;  %v462_v47 = vrot.slane %v457_v32, 4  ;;  %v1170_v51 = vshrl.u32 %v1118_v45, 16  ;;  %v1173_v52 = vshll.u32 %v1118_v45, 16  ;;  %v785_v42 = vld [vmem:[#allocation2 + $0x5c] sm:$0x1] }
  0x24   : > { %v1120_v31 = vld [vmem:[#allocation2 + $0x8] sm:$0x1]  ;;  %v521_v53 = vrot.slane %v5277_v40, 4  ;;  %v528_v58 = vor.u32 %v526_v41, %v525_v48  ;;  %v530_v59 = vrot.slane %v525_v48, 4  ;;  %v5302_v13 = vpack.c.bf16 %v355_v49, %v355_v49 }
  0x25   : > { %v1189_v39 = vshll.u32 %v1120_v31, 16  ;;  %v461_v55 = vsel %vm5151_vm3, %v453_v28, %v460_v46  ;;  %v758_v56 = vsel %vm5158_vm6, %v462_v47, %v757_v29  ;;  %v1172_v62 = vrot.slane %v1170_v51, 4 }
  0x26   : > { %v1175_v1 = vrot.slane %v1173_v52, 5  ;;  %756 = vst.msk [vmem:[#allocation2 + $0x28] sm:$0xf] %vm733_vm4, %v461_v55  ;;  %v1122_v9 = vld [vmem:[#allocation2 + $0x10] sm:$0xf]  ;;  %v529_v10 = vsel %vm5151_vm3, %v521_v53, %v528_v58  ;;  %v786_v11 = vsel %vm5158_vm6, %v530_v59, %v785_v42  ;;  %v416_v14 = vshll.u32 %v5229_v36, 16 }
  0x27   : > { %v1191_v50 = vrot.slane %v1189_v39, 5  ;;  %759 = vst [vmem:[#allocation2 + $0x2c] sm:$0x1] %v758_v56  ;;  %v1203_v17 = vshll.u32 %v1122_v9, 16  ;;  %v1207_v18 = vshrl.u32 %v1122_v9, 16  ;;  %v388_v20 = vpack.c.bf16 %v356_v4, %v356_v4 }
  0x28   : > { %v1176_v15 = vor.u32 %v1175_v1, %v1172_v62  ;;  %784 = vst.msk [vmem:[#allocation2 + $0x58] sm:$0xf] %vm733_vm4, %v529_v10  ;;  %v1131_v24 = vld [vmem:[#allocation2 + $0x34] sm:$0xf]  ;;  %v498_v25 = vshrl.u32 %v5302_v13, 16  ;;  %v452_v26 = vor.u32 %v450_v43, %v5257_v19  ;;  %v312_v36 = vmul.f32 %v5176_v8, %v277_v6 }
  0x29   : > { %v1192_v61 = vsel %vm5282_vm11, %v1187_v16, %v1191_v50  ;;  %v1003_v16 = vld [vmem:[#allocation2 + $0x14] sm:$0x1]  ;;  %787 = vst [vmem:[#allocation2 + $0x5c] sm:$0x1] %v786_v11  ;;  %v5312_v28 = vrot.slane %v1203_v17, 5  ;;  %v1209_v29 = vrot.slane %v1207_v18, 4  ;;  %v313_v49 = vmul.f32 %v5176_v8, %v278_v22 }
  0x2a   : > { %1555 = vrot.lane.b32.xlu0 %v1192_v61, %s5095_s30  ;;  %v1004_v23 = vsel %vm5225_vm8, 0, %v1003_v16  ;;  %v1177_v27 = vrot.slane %v1176_v15, 4  ;;  %v1275_v30 = vshll.u32 %v1131_v24, 16  ;;  %v1012_v31 = vld [vmem:[#allocation2 + $0x38] sm:$0x1]  ;;  %v1279_v32 = vshrl.u32 %v1131_v24, 16 }
  0x2b   : > { %1005 = vst [vmem:[#allocation2 + $0x14] sm:$0x1] %v1004_v23  ;;  %v5314_v33 = vrot.slane %v498_v25, 7  ;;  %v506_v34 = vshrl.u32 %v388_v20, 16  ;;  %v509_v37 = vshll.u32 %v388_v20, 16  ;;  %v1210_v19 = vor.u32 %v1209_v29, %v5312_v28 }
  0x2c   : > { %v1182_v39 = vsel %vm5282_vm11, %v1177_v27, %v5243_v54  ;;  %v1013_v41 = vsel %vm5225_vm8, 0, %v1012_v31  ;;  %v5322_v43 = vrot.slane %v1275_v30, 5  ;;  %v1281_v45 = vrot.slane %v1279_v32, 4  ;;  %v778_v58 = vld [vmem:[#allocation2 + $0x50] sm:$0x1]  ;;  %v284_v32 = vld [vmem:[%s5193_s27 + $0x48] sm:$0xff] }
  0x2d   : > { %1014 = vst [vmem:[#allocation2 + $0x38] sm:$0x1] %v1013_v41  ;;  %v1128_v46 = vld [vmem:[#allocation2 + $0x28] sm:$0xf]  ;;  %v504_v47 = vrot.slane %v5314_v33, 4  ;;  %v754_v48 = vsel %vm5169_vm7, %v452_v26, %v753_v21  ;;  %v1211_v50 = vrot.slane %v1210_v19, 4  ;;  %v347_v59 = vadd.f32 %v5198_v12, %v312_v36 }
  0x2e   : > { %v1009_v51 = vld [vmem:[#allocation2 + $0x2c] sm:$0x1]  ;;  %v1251_v54 = vshll.u32 %v1128_v46, 16  ;;  %v1255_v52 = vshrl.u32 %v1128_v46, 16  ;;  %v508_v53 = vrot.slane %v506_v34, 7  ;;  %v1282_v42 = vor.u32 %v1281_v45, %v5322_v43  ;;  %v283_v26 = vld [vmem:[%s5193_s27 + $0x40] sm:$0xff] }
  0x2f   : > { %v1010_v55 = vsel %vm5225_vm8, 0, %v1009_v51  ;;  %v1140_v56 = vld [vmem:[#allocation2 + $0x58] sm:$0xf]  ;;  %755 = vst [vmem:[#allocation2 + $0x24] sm:$0xf] %v754_v48  ;;  %v348_v61 = vadd.f32 %v5198_v12, %v313_v49  ;;  %v418_v10 = vor.u32 %v416_v14, %v5249_v60  ;;  %v5345_v14 = vpack.c.bf16 %v347_v59, %v347_v59  ;;  %v291_v41 = vld [vmem:[%s5193_s27 + $0x80] sm:$0xff] }
  0x30   : > { %v736_v62 = vld [vmem:[#allocation2 + $0xc] sm:$0xf]  ;;  %1011 = vst [vmem:[#allocation2 + $0x2c] sm:$0x1] %v1010_v55  ;;  %v5334_v1 = vrot.slane %v1251_v54, 5  ;;  %v1257_v4 = vrot.slane %v1255_v52, 4  ;;  %v511_v9 = vor.u32 %v509_v37, %v508_v53  ;;  %v318_v49 = vmul.f32 %v5176_v8, %v283_v26 }
  0x31   : > { %v1021_v6 = vld [vmem:[#allocation2 + $0x5c] sm:$0x1]  ;;  %v1283_v15 = vrot.slane %v1282_v42, 4  ;;  %v1347_v17 = vshll.u32 %v1140_v56, 16  ;;  %v1351_v18 = vshrl.u32 %v1140_v56, 16  ;;  %v513_v23 = vrot.slane %v508_v53, 4 }
  0x32   : > { %1553 = vrot.lane.b32.xlu0 %v1182_v39, %s5095_s30  ;;  %v1123_v11 = vld [vmem:[#allocation2 + $0x14] sm:$0x1]  ;;  %v1022_v16 = vsel %vm5225_vm8, 0, %v1021_v6  ;;  %v1258_v21 = vor.u32 %v1257_v4, %v5334_v1  ;;  %v512_v22 = vsel %vm5151_vm3, %v504_v47, %v511_v9  ;;  %v380_v25 = vpack.c.bf16 %v348_v61, %v348_v61  ;;  %v750_v4 = vld [vmem:[#allocation2 + $0x20] sm:$0x1] }
  0x33   : > { %v1213_v20 = vshll.u32 %v1123_v11, 16  ;;  %1023 = vst [vmem:[#allocation2 + $0x5c] sm:$0x1] %v1022_v16  ;;  %v5342_v24 = vrot.slane %v1347_v17, 5  ;;  %v1353_v60 = vrot.slane %v1351_v18, 4  ;;  %v779_v30 = vsel %vm5158_vm6, %v513_v23, %v778_v58 }
  0x34   : > { %777 = vst.msk [vmem:[#allocation2 + $0x4c] sm:$0xf] %vm733_vm4, %v512_v22  ;;  %v1132_v27 = vld [vmem:[#allocation2 + $0x38] sm:$0x1]  ;;  %v5348_v29 = vrot.slane %v1258_v21, 4  ;;  %v737_v31 = vsel %vm5169_vm7, %v418_v10, %v736_v62  ;;  %v430_v39 = vshrl.u32 %v5345_v14, 16  ;;  %v353_v6 = vadd.f32 %v5198_v12, %v318_v49 }
  0x35   : > { %v1215_v36 = vrot.slane %v1213_v20, 5  ;;  %v1285_v34 = vshll.u32 %v1132_v27, 16  ;;  %v1354_v37 = vor.u32 %v1353_v60, %v5342_v24  ;;  %780 = vst [vmem:[#allocation2 + $0x50] sm:$0x1] %v779_v30  ;;  %v438_v19 = vshrl.u32 %v380_v25, 16  ;;  %v292_v22 = vld [vmem:[%s5193_s27 + $0x88] sm:$0xff] }
  0x36   : > { %v954_v46 = vld [vmem:[#allocation2 + $0x24] sm:$0x1]  ;;  %v441_v47 = vshll.u32 %v380_v25, 16  ;;  %738 = vst [vmem:[#allocation2 + $0xc] sm:$0xf] %v737_v31  ;;  %v501_v48 = vshll.u32 %v5302_v13, 16  ;;  %v319_v13 = vmul.f32 %v5176_v8, %v284_v32  ;;  %v326_v9 = vmul.f32 %v5176_v8, %v291_v41 }
  0x37   : > { %v1216_v45 = vsel %vm5282_vm11, %v1211_v50, %v1215_v36  ;;  %v1287_v51 = vrot.slane %v1285_v34, 5  ;;  %v1129_v54 = vld [vmem:[#allocation2 + $0x2c] sm:$0x1]  ;;  %v1355_v52 = vrot.slane %v1354_v37, 4  ;;  %v955_v53 = vsel %vm5158_vm6, 0, %v954_v46  ;;  %v289_v27 = vld [vmem:[%s5193_s27 + $0x70] sm:$0xff] }
  0x38   : > { %1559 = vrot.lane.b32.xlu1 %v1216_v45, %s5095_s30  ;;  %v5365_v42 = vrot.slane %v430_v39, 7  ;;  %v1261_v55 = vshll.u32 %v1129_v54, 16  ;;  %956 = vst [vmem:[#allocation2 + $0x24] sm:$0x1] %v955_v53  ;;  %v440_v50 = vrot.slane %v438_v19, 7  ;;  %v503_v56 = vor.u32 %v501_v48, %v5314_v33  ;;  %v290_v45 = vld [vmem:[%s5193_s27 + $0x78] sm:$0xff] }
  0x39   : > { %v774_v58 = vld [vmem:[#allocation2 + $0x48] sm:$0xf]  ;;  %v1288_v59 = vsel %vm5282_vm11, %v1283_v15, %v1287_v51  ;;  %v354_v21 = vadd.f32 %v5198_v12, %v319_v13  ;;  %v327_v19 = vmul.f32 %v5176_v8, %v292_v22  ;;  %v361_v41 = vadd.f32 %v5198_v12, %v326_v9 }
  0x3a   : > { %v1141_v61 = vld [vmem:[#allocation2 + $0x5c] sm:$0x1]  ;;  %v436_v62 = vrot.slane %v5365_v42, 4  ;;  %1571 = vrot.lane.b32.xlu0 %v1288_v59, %s5095_s30  ;;  %v1263_v10 = vrot.slane %v1261_v55, 5  ;;  %v443_v16 = vor.u32 %v441_v47, %v440_v50  ;;  %v445_v17 = vrot.slane %v440_v50, 4 }
  0x3b   : > { %v1357_v33 = vshll.u32 %v1141_v61, 16  ;;  %v1137_v11 = vld [vmem:[#allocation2 + $0x4c] sm:$0xf]  ;;  %v775_v15 = vsel %vm5169_vm7, %v503_v56, %v774_v58  ;;  %v386_v39 = vpack.c.bf16 %v354_v21, %v354_v21  ;;  %v324_v51 = vmul.f32 %v5176_v8, %v289_v27 }
  0x3c   : > { %v1323_v18 = vshll.u32 %v1137_v11, 16  ;;  %v1327_v20 = vshrl.u32 %v1137_v11, 16  ;;  %v1264_v23 = vsel %vm5282_vm11, %v5348_v29, %v1263_v10  ;;  %v1018_v25 = vld [vmem:[#allocation2 + $0x50] sm:$0x1]  ;;  %v444_v26 = vsel %vm5151_vm3, %v436_v62, %v443_v16  ;;  %776 = vst [vmem:[#allocation2 + $0x48] sm:$0xf] %v775_v15 }
  0x3d   : > { %v1359_v60 = vrot.slane %v1357_v33, 5  ;;  %v751_v36 = vsel %vm5158_vm6, %v445_v17, %v750_v4  ;;  %v1019_v30 = vsel %vm5225_vm8, 0, %v1018_v25  ;;  %749 = vst.msk [vmem:[#allocation2 + $0x1c] sm:$0xf] %vm733_vm4, %v444_v26  ;;  %v385_v29 = vpack.c.bf16 %v353_v6, %v353_v6  ;;  %v948_v37 = vld [vmem:[#allocation2 + $0xc] sm:$0x1] }
  0x3e   : > { %v5389_v31 = vrot.slane %v1323_v18, 5  ;;  %v1329_v32 = vrot.slane %v1327_v20, 4  ;;  %1020 = vst [vmem:[#allocation2 + $0x50] sm:$0x1] %v1019_v30  ;;  %v949_v48 = vsel %vm5158_vm6, 0, %v948_v37  ;;  %v489_v53 = vshrl.u32 %v386_v39, 16 }
  0x3f   : > { %v1360_v34 = vsel %vm5282_vm11, %v1355_v52, %v1359_v60  ;;  %v1127_v47 = vld [vmem:[#allocation2 + $0x24] sm:$0xf]  ;;  %752 = vst [vmem:[#allocation2 + $0x20] sm:$0x1] %v751_v36  ;;  %v481_v49 = vshrl.u32 %v385_v29, 16  ;;  %v492_v55 = vshll.u32 %v386_v39, 16  ;;  %v362_v13 = vadd.f32 %v5198_v12, %v327_v19 }
  0x40   : > { %1567 = vrot.lane.b32.xlu1 %v1264_v23, %s5095_s30  ;;  %v1330_v46 = vor.u32 %v1329_v32, %v5389_v31  ;;  %v1242_v54 = vshrl.u32 %v1127_v47, 16  ;;  %v1245_v52 = vshll.u32 %v1127_v47, 16  ;;  %950 = vst [vmem:[#allocation2 + $0xc] sm:$0x1] %v949_v48  ;;  %v484_v58 = vshll.u32 %v385_v29, 16 }
  0x41   : > { %v483_v56 = vrot.slane %v481_v49, 7  ;;  %v491_v62 = vrot.slane %v489_v53, 7  ;;  %v767_v4 = vld [vmem:[#allocation2 + $0x3c] sm:$0xf]  ;;  %v393_v6 = vpack.c.bf16 %v361_v41, %v361_v41  ;;  %v771_v33 = vld [vmem:[#allocation2 + $0x44] sm:$0x1]  ;;  %v394_v16 = vpack.c.bf16 %v362_v13, %v362_v13 }
  0x42   : > { %v1331_v50 = vrot.slane %v1330_v46, 4  ;;  %1583 = vrot.lane.b32.xlu0 %v1360_v34, %s5095_s30  ;;  %v1244_v59 = vrot.slane %v1242_v54, 4  ;;  %v1247_v61 = vrot.slane %v1245_v52, 5  ;;  %v325_v17 = vmul.f32 %v5176_v8, %v290_v45 }
  0x43   : > { %v963_v9 = vld [vmem:[#allocation2 + $0x48] sm:$0x1]  ;;  %v487_v10 = vrot.slane %v483_v56, 4  ;;  %v486_v11 = vor.u32 %v484_v58, %v483_v56  ;;  %v494_v21 = vor.u32 %v492_v55, %v491_v62  ;;  %v496_v22 = vrot.slane %v491_v62, 4  ;;  %v293_v56 = vld [vmem:[%s5193_s27 + $0x90] sm:$0xff] }
  0x44   : > { %v1248_v18 = vor.u32 %v1247_v61, %v1244_v59  ;;  %v1125_v20 = vld [vmem:[#allocation2 + $0x1c] sm:$0xf]  ;;  %v964_v15 = vsel %vm5158_vm6, 0, %v963_v9  ;;  %v359_v36 = vadd.f32 %v5198_v12, %v324_v51  ;;  %v549_v45 = vshrl.u32 %v393_v6, 16  ;;  %v795_v51 = vld [vmem:[#allocation2 + $0x6c] sm:$0xf] }
  0x45   : > { %v1138_v23 = vld [vmem:[#allocation2 + $0x50] sm:$0x1]  ;;  %v1227_v60 = vshll.u32 %v1125_v20, 16  ;;  %v1231_v25 = vshrl.u32 %v1125_v20, 16  ;;  %965 = vst [vmem:[#allocation2 + $0x48] sm:$0x1] %v964_v15  ;;  %v768_v26 = vsel %vm5169_vm7, %v486_v11, %v767_v4  ;;  %v495_v29 = vsel %vm5151_vm3, %v487_v10, %v494_v21 }
  0x46   : > { %v1333_v27 = vshll.u32 %v1138_v23, 16  ;;  %v1249_v30 = vrot.slane %v1248_v18, 4  ;;  %v1006_v32 = vld [vmem:[#allocation2 + $0x20] sm:$0x1]  ;;  %v772_v34 = vsel %vm5158_vm6, %v496_v22, %v771_v33  ;;  %769 = vst [vmem:[#allocation2 + $0x3c] sm:$0xf] %v768_v26  ;;  %v360_v33 = vadd.f32 %v5198_v12, %v325_v17 }
  0x47   : > { %v1007_v37 = vsel %vm5225_vm8, 0, %v1006_v32  ;;  %v5416_v39 = vrot.slane %v1227_v60, 5  ;;  %v1233_v19 = vrot.slane %v1231_v25, 4  ;;  %v1121_v41 = vld [vmem:[#allocation2 + $0xc] sm:$0xf]  ;;  %v551_v52 = vrot.slane %v549_v45, 7 }
  0x48   : > { %v1335_v46 = vrot.slane %v1333_v27, 5  ;;  %v1254_v47 = vsel %vm5282_vm11, %v1249_v30, %v5334_v1  ;;  %1008 = vst [vmem:[#allocation2 + $0x20] sm:$0x1] %v1007_v37  ;;  %v1194_v48 = vshrl.u32 %v1121_v41, 16  ;;  %v1197_v49 = vshll.u32 %v1121_v41, 16  ;;  %v294_v18 = vld [vmem:[%s5193_s27 + $0x98] sm:$0xff] }
  0x49   : > { %v1234_v54 = vor.u32 %v1233_v19, %v5416_v39  ;;  %770 = vst.msk [vmem:[#allocation2 + $0x40] sm:$0xf] %vm733_vm4, %v495_v29  ;;  %v552_v53 = vshll.u32 %v393_v6, 16  ;;  %v557_v55 = vshrl.u32 %v394_v16, 16  ;;  %v560_v59 = vshll.u32 %v394_v16, 16 }
  0x4a   : > { %v1336_v58 = vsel %vm5282_vm11, %v1331_v50, %v1335_v46  ;;  %1565 = vrot.lane.b32.xlu0 %v1254_v47, %s5095_s30  ;;  %v1196_v13 = vrot.slane %v1194_v48, 4  ;;  %v1199_v1 = vrot.slane %v1197_v49, 5  ;;  %773 = vst [vmem:[#allocation2 + $0x44] sm:$0x1] %v772_v34  ;;  %v555_v4 = vrot.slane %v551_v52, 4 }
  0x4b   : > { %1579 = vrot.lane.b32.xlu1 %v1336_v58, %s5095_s30  ;;  %v1235_v61 = vrot.slane %v1234_v54, 4  ;;  %v554_v62 = vor.u32 %v552_v53, %v551_v52  ;;  %v5428_v9 = vrot.slane %v557_v55, 7  ;;  %v391_v11 = vpack.c.bf16 %v359_v36, %v359_v36 }
  0x4c   : > { %v1200_v6 = vor.u32 %v1199_v1, %v1196_v13  ;;  %v1136_v10 = vld [vmem:[#allocation2 + $0x48] sm:$0xf]  ;;  %v328_v50 = vmul.f32 %v5176_v8, %v293_v56  ;;  %v392_v25 = vpack.c.bf16 %v360_v33, %v360_v33  ;;  %v329_v32 = vmul.f32 %v5176_v8, %v294_v18 }
  0x4d   : > { %v1314_v20 = vshrl.u32 %v1136_v10, 16  ;;  %v1317_v15 = vshll.u32 %v1136_v10, 16  ;;  %v960_v21 = vld [vmem:[#allocation2 + $0x3c] sm:$0x1]  ;;  %v562_v16 = vor.u32 %v560_v59, %v5428_v9  ;;  %v796_v22 = vsel %vm5169_vm7, %v554_v62, %v795_v51  ;;  %v792_v1 = vld [vmem:[#allocation2 + $0x68] sm:$0x1] }
  0x4e   : > { %v1201_v23 = vrot.slane %v1200_v6, 4  ;;  %v961_v60 = vsel %vm5158_vm6, 0, %v960_v21  ;;  %797 = vst [vmem:[#allocation2 + $0x6c] sm:$0xf] %v796_v22  ;;  %v532_v26 = vshrl.u32 %v391_v11, 16  ;;  %v363_v41 = vadd.f32 %v5198_v12, %v328_v50  ;;  %v297_v22 = vld [vmem:[%s5193_s27 + $0xb0] sm:$0xff] }
  0x4f   : > { %v1126_v17 = vld [vmem:[#allocation2 + $0x20] sm:$0x1]  ;;  %v1316_v36 = vrot.slane %v1314_v20, 4  ;;  %v1319_v27 = vrot.slane %v1317_v15, 5  ;;  %962 = vst [vmem:[#allocation2 + $0x3c] sm:$0x1] %v961_v60  ;;  %v563_v30 = vsel %vm5151_vm3, %v555_v4, %v562_v16  ;;  %v364_v62 = vadd.f32 %v5198_v12, %v329_v32 }
  0x50   : > { %v1237_v29 = vshll.u32 %v1126_v17, 16  ;;  %v1206_v34 = vsel %vm5282_vm11, %v1201_v23, %v5312_v28  ;;  %v1134_v37 = vld [vmem:[#allocation2 + $0x40] sm:$0xf]  ;;  %798 = vst.msk [vmem:[#allocation2 + $0x70] sm:$0xf] %vm733_vm4, %v563_v30  ;;  %v534_v19 = vrot.slane %v532_v26, 7  ;;  %v5454_v4 = vpack.c.bf16 %v363_v41, %v363_v41 }
  0x51   : > { %v1320_v45 = vor.u32 %v1319_v27, %v1316_v36  ;;  %v1015_v46 = vld [vmem:[#allocation2 + $0x44] sm:$0x1]  ;;  %v1299_v47 = vshll.u32 %v1134_v37, 16  ;;  %v1303_v48 = vshrl.u32 %v1134_v37, 16  ;;  %v540_v49 = vshrl.u32 %v392_v25, 16  ;;  %v298_v26 = vld [vmem:[%s5193_s27 + $0xb8] sm:$0xff] }
  0x52   : > { %v1239_v51 = vrot.slane %v1237_v29, 5  ;;  %v1016_v54 = vsel %vm5225_vm8, 0, %v1015_v46  ;;  %v538_v52 = vrot.slane %v534_v19, 4  ;;  %v543_v53 = vshll.u32 %v392_v25, 16  ;;  %v806_v41 = vld [vmem:[#allocation2 + $0x80] sm:$0x1] }
  0x53   : > { %1557 = vrot.lane.b32.xlu1 %v1206_v34, %s5095_s30  ;;  %v1321_v28 = vrot.slane %v1320_v45, 4  ;;  %1017 = vst [vmem:[#allocation2 + $0x44] sm:$0x1] %v1016_v54  ;;  %v5449_v55 = vrot.slane %v1299_v47, 5  ;;  %v1305_v56 = vrot.slane %v1303_v48, 4  ;;  %v542_v58 = vrot.slane %v540_v49, 7 }
  0x54   : > { %v1240_v13 = vsel %vm5282_vm11, %v1235_v61, %v1239_v51  ;;  %v535_v59 = vshll.u32 %v391_v11, 16  ;;  %v788_v61 = vld [vmem:[#allocation2 + $0x60] sm:$0xf]  ;;  %v396_v21 = vpack.c.bf16 %v364_v62, %v364_v62  ;;  %v566_v16 = vshrl.u32 %v5454_v4, 16 }
  0x55   : > { %1563 = vrot.lane.b32.xlu2 %v1240_v13, %s5095_s30  ;;  %v1326_v6 = vsel %vm5282_vm11, %v1321_v28, %v5389_v31  ;;  %v1306_v10 = vor.u32 %v1305_v56, %v5449_v55  ;;  %v972_v33 = vld [vmem:[#allocation2 + $0x6c] sm:$0x1]  ;;  %v545_v18 = vor.u32 %v543_v53, %v542_v58  ;;  %v547_v50 = vrot.slane %v542_v58, 4  ;;  %v799_v28 = vld [vmem:[#allocation2 + $0x74] sm:$0x1] }
  0x56   : > { %1577 = vrot.lane.b32.xlu0 %v1326_v6, %s5095_s30  ;;  %v1133_v11 = vld [vmem:[#allocation2 + $0x3c] sm:$0xf]  ;;  %v973_v20 = vsel %vm5158_vm6, 0, %v972_v33  ;;  %v537_v15 = vor.u32 %v535_v59, %v534_v19  ;;  %v5474_v30 = vrot.slane %v566_v16, 7  ;;  %v574_v32 = vshrl.u32 %v396_v21, 16 }
  0x57   : > { %v1307_v23 = vrot.slane %v1306_v10, 4  ;;  %v1290_v31 = vshrl.u32 %v1133_v11, 16  ;;  %v1293_v60 = vshll.u32 %v1133_v11, 16  ;;  %974 = vst [vmem:[#allocation2 + $0x6c] sm:$0x1] %v973_v20  ;;  %v546_v25 = vsel %vm5151_vm3, %v538_v52, %v545_v18 }
  0x58   : > { %v1146_v17 = vld [vmem:[#allocation2 + $0x70] sm:$0xf]  ;;  %791 = vst.msk [vmem:[#allocation2 + $0x64] sm:$0xf] %vm733_vm4, %v546_v25  ;;  %v793_v36 = vsel %vm5158_vm6, %v547_v50, %v792_v1  ;;  %v789_v27 = vsel %vm5169_vm7, %v537_v15, %v788_v61  ;;  %v572_v46 = vrot.slane %v5474_v30, 4  ;;  %v576_v47 = vrot.slane %v574_v32, 7 }
  0x59   : > { %v1292_v29 = vrot.slane %v1290_v31, 4  ;;  %v1295_v34 = vrot.slane %v1293_v60, 5  ;;  %v1395_v37 = vshll.u32 %v1146_v17, 16  ;;  %v1399_v19 = vshrl.u32 %v1146_v17, 16  ;;  %794 = vst [vmem:[#allocation2 + $0x68] sm:$0x1] %v793_v36 }
  0x5a   : > { %v1135_v45 = vld [vmem:[#allocation2 + $0x44] sm:$0x1]  ;;  %790 = vst [vmem:[#allocation2 + $0x60] sm:$0xf] %v789_v27  ;;  %v332_v48 = vmul.f32 %v5176_v8, %v297_v22  ;;  %v333_v49 = vmul.f32 %v5176_v8, %v298_v26  ;;  %v577_v53 = vshll.u32 %v396_v21, 16  ;;  %v581_v56 = vrot.slane %v576_v47, 4 }
  0x5b   : > { %v1309_v51 = vshll.u32 %v1135_v45, 16  ;;  %v1296_v54 = vor.u32 %v1295_v34, %v1292_v29  ;;  %v5479_v52 = vrot.slane %v1395_v37, 5  ;;  %v433_v58 = vshll.u32 %v5345_v14, 16  ;;  %v746_v10 = vld [vmem:[#allocation2 + $0x18] sm:$0xf]  ;;  %v295_v27 = vld [vmem:[%s5193_s27 + $0xa0] sm:$0xff] }
  0x5c   : > { %v564_v13 = vrot.slane %v5428_v9, 4  ;;  %v367_v1 = vadd.f32 %v5198_v12, %v332_v48  ;;  %v579_v6 = vor.u32 %v577_v53, %v576_v47  ;;  %v368_v33 = vadd.f32 %v5198_v12, %v333_v49  ;;  %v296_v47 = vld [vmem:[%s5193_s27 + $0xa8] sm:$0xff]  ;;  %v2220_v0 = vld [vmem:[#allocation2 + $0x20] sm:$0x1] }
  0x5d   : > { %v1311_v59 = vrot.slane %v1309_v51, 5  ;;  %v1297_v62 = vrot.slane %v1296_v54, 4  ;;  %v807_v50 = vsel %vm5158_vm6, %v581_v56, %v806_v41  ;;  %v435_v61 = vor.u32 %v433_v58, %v5365_v42  ;;  %v760_v54 = vld [vmem:[#allocation2 + $0x30] sm:$0xf] }
  0x5e   : > { %v1145_v18 = vld [vmem:[#allocation2 + $0x6c] sm:$0xf]  ;;  %v800_v11 = vsel %vm5158_vm6, %v564_v13, %v799_v28  ;;  %v1401_v14 = vrot.slane %v1399_v19, 4  ;;  %808 = vst [vmem:[#allocation2 + $0x80] sm:$0x1] %v807_v50  ;;  %v580_v60 = vsel %vm5151_vm3, %v572_v46, %v579_v6  ;;  %v399_v37 = vpack.c.bf16 %v367_v1, %v367_v1 }
  0x5f   : > { %v1312_v9 = vsel %vm5282_vm11, %v1307_v23, %v1311_v59  ;;  %v1302_v20 = vsel %vm5282_vm11, %v1297_v62, %v5449_v55  ;;  %v1386_v15 = vshrl.u32 %v1145_v18, 16  ;;  %v1389_v21 = vshll.u32 %v1145_v18, 16  ;;  %v1143_v16 = vld [vmem:[#allocation2 + $0x64] sm:$0xf]  ;;  %801 = vst [vmem:[#allocation2 + $0x74] sm:$0x1] %v800_v11 }
  0x60   : > { %1575 = vrot.lane.b32.xlu2 %v1312_v9, %s5095_s30  ;;  %1573 = vrot.lane.b32.xlu1 %v1302_v20, %s5095_s30  ;;  %v1024_v42 = vld [vmem:[#allocation2 + $0x68] sm:$0x1]  ;;  %v1371_v22 = vshll.u32 %v1143_v16, 16  ;;  %v1375_v31 = vshrl.u32 %v1143_v16, 16  ;;  %v747_v23 = vsel %vm5169_vm7, %v435_v61, %v746_v10  ;;  %v1402_v36 = vor.u32 %v1401_v14, %v5479_v52  ;;  %805 = vst.msk [vmem:[#allocation2 + $0x7c] sm:$0xf] %vm733_vm4, %v580_v60 }
  0x61   : > { %v1388_v55 = vrot.slane %v1386_v15, 4  ;;  %v1391_v25 = vrot.slane %v1389_v21, 5  ;;  %v1025_v26 = vsel %vm5225_vm8, 0, %v1024_v42  ;;  %v969_v17 = vld [vmem:[#allocation2 + $0x60] sm:$0x1]  ;;  %v400_v45 = vpack.c.bf16 %v368_v33, %v368_v33  ;;  %v300_v33 = vld [vmem:[%s5193_s27 + $0xc8] sm:$0xff] }
  0x62   : > { %1026 = vst [vmem:[#allocation2 + $0x68] sm:$0x1] %v1025_v26  ;;  %v5505_v32 = vrot.slane %v1371_v22, 5  ;;  %v1377_v29 = vrot.slane %v1375_v31, 4  ;;  %v970_v34 = vsel %vm5158_vm6, 0, %v969_v17  ;;  %v5509_v41 = vrot.slane %v1402_v36, 4 }
  0x63   : > { %v1392_v19 = vor.u32 %v1391_v25, %v1388_v55  ;;  %971 = vst [vmem:[#allocation2 + $0x60] sm:$0x1] %v970_v34  ;;  %v467_v46 = vshll.u32 %v5231_v38, 16  ;;  %v600_v49 = vshrl.u32 %v399_v37, 16  ;;  %v603_v51 = vshll.u32 %v399_v37, 16  ;;  %v299_v10 = vld [vmem:[%s5193_s27 + $0xc0] sm:$0xff] }
  0x64   : > { %v1378_v48 = vor.u32 %v1377_v29, %v5505_v32  ;;  %v330_v53 = vmul.f32 %v5176_v8, %v295_v27  ;;  %748 = vst [vmem:[#allocation2 + $0x18] sm:$0xf] %v747_v23  ;;  %v608_v56 = vshrl.u32 %v400_v45, 16  ;;  %v611_v58 = vshll.u32 %v400_v45, 16  ;;  %v5539_v31 = vld [vmem:[%s7138_s1] ss:$0 sm:$0xff] }
  0x65   : > { %v1393_v28 = vrot.slane %v1392_v19, 4  ;;  %v469_v13 = vor.u32 %v467_v46, %v5251_v63  ;;  %v1030_v38 = vld [vmem:[#allocation2 + $0x80] sm:$0x1]  ;;  %v602_v59 = vrot.slane %v600_v49, 7  ;;  %v331_v62 = vmul.f32 %v5176_v8, %v296_v47  ;;  %v816_v63 = vld [vmem:[#allocation2 + $0x90] sm:$0xf] }
  0x66   : > { %v1379_v1 = vrot.slane %v1378_v48, 4  ;;  %v365_v6 = vadd.f32 %v5198_v12, %v330_v53  ;;  %v1031_v50 = vsel %vm5225_vm8, 0, %v1030_v38  ;;  %v1027_v61 = vld [vmem:[#allocation2 + $0x74] sm:$0x1]  ;;  %v5526_v11 = vrot.slane %v608_v56, 7 }
  0x67   : > { %v1398_v18 = vsel %vm5282_vm11, %v1393_v28, %v5479_v52  ;;  %v761_v14 = vsel %vm5169_vm7, %v469_v13, %v760_v54  ;;  %1032 = vst [vmem:[#allocation2 + $0x80] sm:$0x1] %v1031_v50  ;;  %v1028_v9 = vsel %vm5225_vm8, 0, %v1027_v61  ;;  %v605_v20 = vor.u32 %v603_v51, %v602_v59  ;;  %v1149_v27 = vld [vmem:[#allocation2 + $0x7c] sm:$0xf] }
  0x68   : > { %1589 = vrot.lane.b32.xlu0 %v1398_v18, %s5095_s30  ;;  %v606_v15 = vrot.slane %v602_v59, 4  ;;  %v366_v52 = vadd.f32 %v5198_v12, %v331_v62  ;;  %1029 = vst [vmem:[#allocation2 + $0x74] sm:$0x1] %v1028_v9  ;;  %v613_v16 = vor.u32 %v611_v58, %v5526_v11  ;;  %v397_v42 = vpack.c.bf16 %v365_v6, %v365_v6  ;;  %v5550_v29 = vld [vmem:[%s7139_s2] ss:$0 sm:$0xff] }
  0x69   : > { %v1144_v21 = vld [vmem:[#allocation2 + $0x68] sm:$0x1]  ;;  %v334_v22 = vmul.f32 %v5176_v8, %v299_v10  ;;  %v335_v60 = vmul.f32 %v5539_v31, %v300_v33  ;;  %v817_v25 = vsel %vm5169_vm7, %v605_v20, %v816_v63  ;;  %762 = vst [vmem:[#allocation2 + $0x30] sm:$0xf] %v761_v14  ;;  %v518_v26 = vshll.u32 %v5245_v57, 16 }
  0x6a   : > { %v1381_v23 = vshll.u32 %v1144_v21, 16  ;;  %v1142_v55 = vld [vmem:[#allocation2 + $0x60] sm:$0xf]  ;;  %v398_v12 = vpack.c.bf16 %v366_v52, %v366_v52  ;;  %v614_v8 = vsel %vm5151_vm3, %v606_v15, %v613_v16  ;;  %818 = vst [vmem:[#allocation2 + $0x90] sm:$0xf] %v817_v25  ;;  %v1419_v19 = vshll.u32 %v1149_v27, 16 }
  0x6b   : > { %v1362_v17 = vshrl.u32 %v1142_v55, 16  ;;  %v1365_v36 = vshll.u32 %v1142_v55, 16  ;;  %v369_v34 = vadd.f32 %v5550_v29, %v334_v22  ;;  %v1423_v45 = vshrl.u32 %v1149_v27, 16  ;;  %v951_v46 = vld [vmem:[#allocation2 + $0x18] sm:$0x1] }
  0x6c   : > { %v1383_v37 = vrot.slane %v1381_v23, 5  ;;  %v583_v47 = vshrl.u32 %v397_v42, 16  ;;  %v952_v49 = vsel %vm5158_vm6, 0, %v951_v46  ;;  %819 = vst.msk [vmem:[#allocation2 + $0x94] sm:$0xf] %vm733_vm4, %v614_v8  ;;  %v586_v51 = vshll.u32 %v397_v42, 16 }
  0x6d   : > { %v1364_v57 = vrot.slane %v1362_v17, 4  ;;  %v1367_v48 = vrot.slane %v1365_v36, 5  ;;  %v5558_v53 = vrot.slane %v1419_v19, 5  ;;  %v1425_v28 = vrot.slane %v1423_v45, 4  ;;  %953 = vst [vmem:[#allocation2 + $0x18] sm:$0x1] %v952_v49 }
  0x6e   : > { %v1384_v54 = vsel %vm5282_vm11, %v1379_v1, %v1383_v37  ;;  %v585_v56 = vrot.slane %v583_v47, 7  ;;  %v1150_v13 = vld [vmem:[#allocation2 + $0x80] sm:$0x1]  ;;  %v591_v38 = vshrl.u32 %v398_v12, 16  ;;  %v594_v59 = vshll.u32 %v398_v12, 16  ;;  %v304_v49 = vld [vmem:[%s5193_s27 + $0xe8] sm:$0xff] }
  0x6f   : > { %1587 = vrot.lane.b32.xlu2 %v1384_v54, %s5095_s30  ;;  %v1368_v58 = vor.u32 %v1367_v48, %v1364_v57  ;;  %v809_v62 = vld [vmem:[#allocation2 + $0x84] sm:$0xf]  ;;  %v370_v6 = vadd.f32 %v5550_v29, %v335_v60  ;;  %v1426_v10 = vor.u32 %v1425_v28, %v5558_v53  ;;  %v1429_v33 = vshll.u32 %v1150_v13, 16  ;;  %v1147_v18 = vld [vmem:[#allocation2 + $0x74] sm:$0x1] }
  0x70   : > { %v588_v50 = vor.u32 %v586_v51, %v585_v56  ;;  %v589_v1 = vrot.slane %v585_v56, 4  ;;  %v1405_v63 = vshll.u32 %v1147_v18, 16  ;;  %v957_v14 = vld [vmem:[#allocation2 + $0x30] sm:$0x1]  ;;  %v5563_v9 = vrot.slane %v591_v38, 7  ;;  %v303_v8 = vld [vmem:[%s5193_s27 + $0xe0] sm:$0xff] }
  0x71   : > { %v1369_v61 = vrot.slane %v1368_v58, 4  ;;  %v5565_v20 = vpack.c.bf16 %v369_v34, %v369_v34  ;;  %v1427_v15 = vrot.slane %v1426_v10, 4  ;;  %v1431_v52 = vrot.slane %v1429_v33, 5  ;;  %v981_v21 = vld [vmem:[#allocation2 + $0x90] sm:$0x1] }
  0x72   : > { %v958_v16 = vsel %vm5158_vm6, 0, %v957_v14  ;;  %v810_v42 = vsel %vm5169_vm7, %v588_v50, %v809_v62  ;;  %v1407_v60 = vrot.slane %v1405_v63, 5  ;;  %v982_v23 = vsel %vm5158_vm6, 0, %v981_v21  ;;  %v781_v25 = vld [vmem:[#allocation2 + $0x54] sm:$0xf] }
  0x73   : > { %v1374_v22 = vsel %vm5282_vm11, %v1369_v61, %v5505_v32  ;;  %959 = vst [vmem:[#allocation2 + $0x30] sm:$0x1] %v958_v16  ;;  %v596_v55 = vor.u32 %v594_v59, %v5563_v9  ;;  %v1432_v12 = vsel %vm5282_vm11, %v1427_v15, %v1431_v52  ;;  %v402_v17 = vpack.c.bf16 %v370_v6, %v370_v6  ;;  %v820_v32 = vld [vmem:[#allocation2 + $0x98] sm:$0x1]  ;;  %v5584_v37 = vld [vmem:[#allocation2 + $0x94] sm:$0xf] }
  0x74   : > { %1585 = vrot.lane.b32.xlu1 %v1374_v22, %s5095_s30  ;;  %983 = vst [vmem:[#allocation2 + $0x90] sm:$0x1] %v982_v23  ;;  %v617_v36 = vshrl.u32 %v5565_v20, 16  ;;  %v520_v27 = vor.u32 %v518_v26, %v5277_v40  ;;  %1595 = vrot.lane.b32.xlu0 %v1432_v12, %s5095_s30  ;;  %v1124_v34 = vld [vmem:[#allocation2 + $0x18] sm:$0xf]  ;;  %v615_v48 = vrot.slane %v5526_v11, 4  ;;  %v1408_v58 = vsel %vm5282_vm11, %v5509_v41, %v1407_v60 }
  0x75   : > { %v597_v19 = vsel %vm5151_vm3, %v589_v1, %v596_v55  ;;  %811 = vst [vmem:[#allocation2 + $0x84] sm:$0xf] %v810_v42  ;;  %v1218_v45 = vshrl.u32 %v1124_v34, 16  ;;  %v1221_v46 = vshll.u32 %v1124_v34, 16  ;;  %v625_v57 = vshrl.u32 %v402_v17, 16 }
  0x76   : > { %812 = vst.msk [vmem:[#allocation2 + $0x88] sm:$0xf] %vm733_vm4, %v597_v19  ;;  %v5589_v47 = vrot.slane %v617_v36, 7  ;;  %v628_v40 = vshll.u32 %v402_v17, 16  ;;  %v782_v26 = vsel %vm5169_vm7, %v520_v27, %v781_v25  ;;  %v1467_v13 = vshll.u32 %v5584_v37, 16  ;;  %v301_v17 = vld [vmem:[%s5193_s27 + $0xd0] sm:$0xff] }
  0x77   : > { %v1220_v51 = vrot.slane %v1218_v45, 4  ;;  %v1223_v54 = vrot.slane %v1221_v46, 5  ;;  %v627_v56 = vrot.slane %v625_v57, 7  ;;  %783 = vst [vmem:[#allocation2 + $0x54] sm:$0xf] %v782_v26  ;;  %v821_v59 = vsel %vm5158_vm6, %v615_v48, %v820_v32 }
  0x78   : > { %v623_v28 = vrot.slane %v5589_v47, 4  ;;  %v827_v38 = vld [vmem:[#allocation2 + $0xa4] sm:$0x1]  ;;  %v338_v62 = vmul.f32 %v5539_v31, %v303_v8  ;;  %822 = vst [vmem:[#allocation2 + $0x98] sm:$0x1] %v821_v59  ;;  %v339_v18 = vmul.f32 %v5539_v31, %v304_v49  ;;  %v569_v63 = vshll.u32 %v5454_v4, 16 }
  0x79   : > { %v1224_v11 = vor.u32 %v1223_v54, %v1220_v51  ;;  %v630_v10 = vor.u32 %v628_v40, %v627_v56  ;;  %v632_v33 = vrot.slane %v627_v56, 4  ;;  %v5620_v36 = vrot.slane %v1467_v13, 5  ;;  %v802_v57 = vld [vmem:[#allocation2 + $0x78] sm:$0xf] }
  0x7a   : > { %v1130_v6 = vld [vmem:[#allocation2 + $0x30] sm:$0xf]  ;;  %v373_v41 = vadd.f32 %v5550_v29, %v338_v62  ;;  %v1471_v27 = vshrl.u32 %v5584_v37, 16  ;;  %v374_v34 = vadd.f32 %v5550_v29, %v339_v18  ;;  %v571_v48 = vor.u32 %v569_v63, %v5474_v30  ;;  %v302_v49 = vld [vmem:[%s5193_s27 + $0xd8] sm:$0xff] }
  0x7b   : > { %v1154_v50 = vld [vmem:[#allocation2 + $0x90] sm:$0xf]  ;;  %v1266_v1 = vshrl.u32 %v1130_v6, 16  ;;  %v1269_v61 = vshll.u32 %v1130_v6, 16  ;;  %v1225_v14 = vrot.slane %v1224_v11, 4  ;;  %v631_v16 = vsel %vm5151_vm3, %v623_v28, %v630_v10 }
  0x7c   : > { %1591 = vrot.lane.b32.xlu1 %v1408_v58, %s5095_s30  ;;  %v1458_v15 = vshrl.u32 %v1154_v50, 16  ;;  %v1461_v52 = vshll.u32 %v1154_v50, 16  ;;  %v978_v21 = vld [vmem:[#allocation2 + $0x84] sm:$0x1]  ;;  %v828_v4 = vsel %vm5158_vm6, %v632_v33, %v827_v38  ;;  %826 = vst.msk [vmem:[#allocation2 + $0xa0] sm:$0xf] %vm733_vm4, %v631_v16  ;;  %v405_v46 = vpack.c.bf16 %v373_v41, %v373_v41 }
  0x7d   : > { %v1268_v42 = vrot.slane %v1266_v1, 4  ;;  %v1271_v22 = vrot.slane %v1269_v61, 5  ;;  %v979_v60 = vsel %vm5158_vm6, 0, %v978_v21  ;;  %v5611_v23 = vld [vmem:[#allocation2 + $0x88] sm:$0xf]  ;;  %v1230_v55 = vsel %vm5282_vm11, %v1225_v14, %v5416_v39 }
  0x7e   : > { %v1460_v25 = vrot.slane %v1458_v15, 4  ;;  %v1463_v12 = vrot.slane %v1461_v52, 5  ;;  %980 = vst [vmem:[#allocation2 + $0x84] sm:$0x1] %v979_v60  ;;  %1561 = vrot.lane.b32.xlu2 %v1230_v55, %s5095_s30  ;;  %v966_v8 = vld [vmem:[#allocation2 + $0x54] sm:$0x1]  ;;  %v406_v37 = vpack.c.bf16 %v374_v34, %v374_v34  ;;  %v336_v51 = vmul.f32 %v5539_v31, %v301_v17 }
  0x7f   : > { %v1272_v32 = vor.u32 %v1271_v22, %v1268_v42  ;;  %v1443_v39 = vshll.u32 %v5611_v23, 16  ;;  %829 = vst [vmem:[#allocation2 + $0xa4] sm:$0x1] %v828_v4  ;;  %v967_v45 = vsel %vm5158_vm6, 0, %v966_v8  ;;  %v1036_v26 = vld [vmem:[#allocation2 + $0x98] sm:$0x1]  ;;  %v803_v59 = vsel %vm5169_vm7, %v571_v48, %v802_v57 }
  0x80   : > { %v1464_v19 = vor.u32 %v1463_v12, %v1460_v25  ;;  %968 = vst [vmem:[#allocation2 + $0x54] sm:$0x1] %v967_v45  ;;  %v1037_v28 = vsel %vm5225_vm8, 0, %v1036_v26  ;;  %v651_v56 = vshrl.u32 %v405_v46, 16  ;;  %v654_v58 = vshll.u32 %v405_v46, 16 }
  0x81   : > { %v1273_v40 = vrot.slane %v1272_v32, 4  ;;  %1038 = vst [vmem:[#allocation2 + $0x98] sm:$0x1] %v1037_v28  ;;  %v659_v13 = vshrl.u32 %v406_v37, 16  ;;  %v662_v38 = vshll.u32 %v406_v37, 16  ;;  %v337_v10 = vmul.f32 %v5539_v31, %v302_v49 }
  0x82   : > { %v1465_v54 = vrot.slane %v1464_v19, 4  ;;  %v653_v11 = vrot.slane %v651_v56, 7  ;;  %v837_v6 = vld [vmem:[#allocation2 + $0xb4] sm:$0xf]  ;;  %804 = vst [vmem:[#allocation2 + $0x78] sm:$0xf] %v803_v59  ;;  %v371_v61 = vadd.f32 %v5550_v29, %v336_v51 }
  0x83   : > { %v1278_v30 = vsel %vm5282_vm11, %v1273_v40, %v5322_v43  ;;  %v5643_v18 = vrot.slane %v1443_v39, 5  ;;  %v1473_v50 = vrot.slane %v1471_v27, 4  ;;  %v5645_v1 = vrot.slane %v659_v13, 7  ;;  %v1158_v14 = vld [vmem:[#allocation2 + $0xa0] sm:$0xf] }
  0x84   : > { %v1470_v62 = vsel %vm5282_vm11, %v1465_v54, %v5620_v36  ;;  %v656_v15 = vor.u32 %v654_v58, %v653_v11  ;;  %v657_v43 = vrot.slane %v653_v11, 4  ;;  %v1491_v21 = vshll.u32 %v1158_v14, 16  ;;  %v813_v13 = vld [vmem:[#allocation2 + $0x8c] sm:$0x1] }
  0x85   : > { %1601 = vrot.lane.b32.xlu0 %v1470_v62, %s5095_s30  ;;  %v1151_v33 = vld [vmem:[#allocation2 + $0x84] sm:$0xf]  ;;  %v1495_v31 = vshrl.u32 %v1158_v14, 16  ;;  %v664_v16 = vor.u32 %v662_v38, %v5645_v1  ;;  %v372_v42 = vadd.f32 %v5550_v29, %v337_v10  ;;  %v403_v19 = vpack.c.bf16 %v371_v61, %v371_v61 }
  0x86   : > { %v1434_v41 = vshrl.u32 %v1151_v33, 16  ;;  %v1437_v63 = vshll.u32 %v1151_v33, 16  ;;  %1569 = vrot.lane.b32.xlu2 %v1278_v30, %s5095_s30  ;;  %v1039_v52 = vld [vmem:[#allocation2 + $0xa4] sm:$0x1]  ;;  %v838_v25 = vsel %vm5169_vm7, %v656_v15, %v837_v6  ;;  %v5655_v12 = vrot.slane %v1491_v21, 5 }
  0x87   : > { %v1040_v4 = vsel %vm5225_vm8, 0, %v1039_v52  ;;  %v1139_v55 = vld [vmem:[#allocation2 + $0x54] sm:$0xf]  ;;  %v1497_v17 = vrot.slane %v1495_v31, 4  ;;  %v665_v29 = vsel %vm5151_vm3, %v657_v43, %v664_v16  ;;  %839 = vst [vmem:[#allocation2 + $0xb4] sm:$0xf] %v838_v25  ;;  %v404_v39 = vpack.c.bf16 %v372_v42, %v372_v42 }
  0x88   : > { %v1436_v22 = vrot.slane %v1434_v41, 4  ;;  %v1439_v60 = vrot.slane %v1437_v63, 5  ;;  %1041 = vst [vmem:[#allocation2 + $0xa4] sm:$0x1] %v1040_v4  ;;  %v1338_v27 = vshrl.u32 %v1139_v55, 16  ;;  %v1341_v32 = vshll.u32 %v1139_v55, 16 }
  0x89   : > { %v1156_v34 = vld [vmem:[#allocation2 + $0x98] sm:$0x1]  ;;  %v1474_v57 = vor.u32 %v1473_v50, %v5620_v36  ;;  %840 = vst.msk [vmem:[#allocation2 + $0xb8] sm:$0xf] %vm733_vm4, %v665_v29  ;;  %v634_v48 = vshrl.u32 %v403_v19, 16  ;;  %v637_v49 = vshll.u32 %v403_v19, 16  ;;  %v1498_v54 = vor.u32 %v1497_v17, %v5655_v12 }
  0x8a   : > { %v1440_v8 = vor.u32 %v1439_v60, %v1436_v22  ;;  %v1340_v45 = vrot.slane %v1338_v27, 4  ;;  %v1343_v46 = vrot.slane %v1341_v32, 5  ;;  %v1477_v40 = vshll.u32 %v1156_v34, 16  ;;  %v975_v37 = vld [vmem:[#allocation2 + $0x78] sm:$0x1] }
  0x8b   : > { %v642_v51 = vshrl.u32 %v404_v39, 16  ;;  %v976_v56 = vsel %vm5158_vm6, 0, %v975_v37  ;;  %v598_v58 = vrot.slane %v5563_v9, 4  ;;  %v636_v38 = vrot.slane %v634_v48, 7  ;;  %v830_v6 = vld [vmem:[#allocation2 + $0xa8] sm:$0xf] }
  0x8c   : > { %v1441_v26 = vrot.slane %v1440_v8, 4  ;;  %v1344_v28 = vor.u32 %v1343_v46, %v1340_v45  ;;  %977 = vst [vmem:[#allocation2 + $0x78] sm:$0x1] %v976_v56  ;;  %v645_v62 = vshll.u32 %v404_v39, 16  ;;  %v1475_v11 = vrot.slane %v1474_v57, 4 }
  0x8d   : > { %v644_v59 = vrot.slane %v642_v51, 7  ;;  %v620_v10 = vshll.u32 %v5565_v20, 16  ;;  %v1479_v50 = vrot.slane %v1477_v40, 5  ;;  %v639_v61 = vor.u32 %v637_v49, %v636_v38  ;;  %v841_v42 = vld [vmem:[#allocation2 + $0xbc] sm:$0x1] }
  0x8e   : > { %v1446_v36 = vsel %vm5282_vm11, %v1441_v26, %v5643_v18  ;;  %v1345_v30 = vrot.slane %v1344_v28, 4  ;;  %v640_v9 = vrot.slane %v636_v38, 4  ;;  %v1499_v63 = vrot.slane %v1498_v54, 4  ;;  %v990_v43 = vld [vmem:[#allocation2 + $0xb4] sm:$0x1] }
  0x8f   : > { %1597 = vrot.lane.b32.xlu1 %v1446_v36, %s5095_s30  ;;  %v1159_v33 = vld [vmem:[#allocation2 + $0xa4] sm:$0x1]  ;;  %v647_v41 = vor.u32 %v645_v62, %v644_v59  ;;  %v814_v52 = vsel %vm5158_vm6, %v598_v58, %v813_v13  ;;  %v991_v20 = vsel %vm5158_vm6, 0, %v990_v43  ;;  %v831_v31 = vsel %vm5169_vm7, %v639_v61, %v830_v6  ;;  %v823_v4 = vld [vmem:[#allocation2 + $0x9c] sm:$0xf] }
  0x90   : > { %v1501_v14 = vshll.u32 %v1159_v33, 16  ;;  %v1350_v15 = vsel %vm5282_vm11, %v1345_v30, %v5342_v24  ;;  %815 = vst [vmem:[#allocation2 + $0x8c] sm:$0x1] %v814_v52  ;;  %v1480_v24 = vsel %vm5282_vm11, %v1475_v11, %v1479_v50  ;;  %v666_v22 = vrot.slane %v5645_v1, 4  ;;  %v1164_v1 = vld [vmem:[#allocation2 + $0xb8] sm:$0xf] }
  0x91   : > { %1581 = vrot.lane.b32.xlu2 %v1350_v15, %s5095_s30  ;;  %v648_v21 = vsel %vm5151_vm3, %v640_v9, %v647_v41  ;;  %992 = vst [vmem:[#allocation2 + $0xb4] sm:$0x1] %v991_v20  ;;  %v622_v60 = vor.u32 %v620_v10, %v5589_v47  ;;  %v1447_v17 = vshrl.u32 %v5611_v23, 16  ;;  %v649_v34 = vrot.slane %v644_v59, 4  ;;  %v834_v39 = vld [vmem:[#allocation2 + $0xb0] sm:$0x1] }
  0x92   : > { %v1503_v16 = vrot.slane %v1501_v14, 5  ;;  %832 = vst [vmem:[#allocation2 + $0xa8] sm:$0xf] %v831_v31  ;;  %v842_v8 = vsel %vm5158_vm6, %v666_v22, %v841_v42  ;;  %v1539_v46 = vshll.u32 %v1164_v1, 16  ;;  %v5702_v13 = vld [vmem:[#allocation2 + $0x4] sm:$0xf] }
  0x93   : > { %v1148_v25 = vld [vmem:[#allocation2 + $0x78] sm:$0xf]  ;;  %833 = vst.msk [vmem:[#allocation2 + $0xac] sm:$0xf] %vm733_vm4, %v648_v21  ;;  %v824_v47 = vsel %vm5169_vm7, %v622_v60, %v823_v4  ;;  %v1449_v26 = vrot.slane %v1447_v17, 4  ;;  %v835_v51 = vsel %vm5158_vm6, %v649_v34, %v834_v39  ;;  %v1783_v10 = vrot.slane %v5702_v13, 5 }
  0x94   : > { %v1504_v55 = vsel %vm5282_vm11, %v1499_v63, %v1503_v16  ;;  %v1410_v27 = vshrl.u32 %v1148_v25, 16  ;;  %v1413_v32 = vshll.u32 %v1148_v25, 16  ;;  %843 = vst [vmem:[#allocation2 + $0xbc] sm:$0x1] %v842_v8  ;;  %v5707_v62 = vrot.slane %v1539_v46, 5 }
  0x95   : > { %1607 = vrot.lane.b32.xlu0 %v1504_v55, %s5095_s30  ;;  %825 = vst [vmem:[#allocation2 + $0x9c] sm:$0xf] %v824_v47  ;;  %v1450_v30 = vor.u32 %v1449_v26, %v5643_v18  ;;  %v1684_v50 = vld [vmem:[#allocation2 + $0x8] sm:$0x1]  ;;  %v1543_v61 = vshrl.u32 %v1164_v1, 16  ;;  %v1785_v43 = vrot.slane %v1783_v10, 4 }
  0x96   : > { %v1412_v29 = vrot.slane %v1410_v27, 4  ;;  %v1415_v19 = vrot.slane %v1413_v32, 5  ;;  %836 = vst [vmem:[#allocation2 + $0xb0] sm:$0x1] %v835_v51  ;;  %v1786_v52 = vrot.slane %v1684_v50, 5  ;;  %vm1649_vm15 = vcmask 60448  }
  0x97   : > { %1603 = vrot.lane.b32.xlu1 %v1480_v24, %s5095_s30  ;;  %v1033_v23 = vld [vmem:[#allocation2 + $0x8c] sm:$0x1]  ;;  %v1451_v63 = vrot.slane %v1450_v30, 4  ;;  %v1545_v60 = vrot.slane %v1543_v61, 4  ;;  %v1688_v1 = vld [vmem:[#allocation2 + $0x18] sm:$0xe] }
  0x98   : > { %v1163_v45 = vld [vmem:[#allocation2 + $0xb4] sm:$0xf]  ;;  %v1416_v57 = vor.u32 %v1415_v19, %v1412_v29  ;;  %v1034_v40 = vsel %vm5225_vm8, 0, %v1033_v23  ;;  %v1787_v8 = vsel %vm5723_vm14, %v1785_v43, %v1786_v52  ;;  %v1055_v34 = vld [vmem:[#allocation2 + $0x4] sm:$0xf]  ;;  %v4866_v51 = vrot.slane %v1688_v1, 9 }
  0x99   : > { %v1530_v37 = vshrl.u32 %v1163_v45, 16  ;;  %v1533_v48 = vshll.u32 %v1163_v45, 16  ;;  %v987_v49 = vld [vmem:[#allocation2 + $0xa8] sm:$0x1]  ;;  %1035 = vst [vmem:[#allocation2 + $0x8c] sm:$0x1] %v1034_v40  ;;  %v1546_v45 = vor.u32 %v1545_v60, %v5707_v62 }
  0x9a   : > { %v1417_v54 = vrot.slane %v1416_v57, 4  ;;  %v988_v28 = vsel %vm5158_vm6, 0, %v987_v49  ;;  %v1161_v9 = vld [vmem:[#allocation2 + $0xac] sm:$0xf]  ;;  %1087 = vst.msk [vmem:[#allocation3 + $0x4] sm:$0xf] %vm733_vm4, %v1055_v34 }
  0x9b   : > { %v1532_v56 = vrot.slane %v1530_v37, 4  ;;  %v1535_v58 = vrot.slane %v1533_v48, 5  ;;  %989 = vst [vmem:[#allocation2 + $0xa8] sm:$0x1] %v988_v28  ;;  %v1045_v38 = vld [vmem:[#allocation2 + $0xbc] sm:$0x1] }
  0x9c   : > { %v1422_v36 = vsel %vm5282_vm11, %v1417_v54, %v5558_v53  ;;  %v1046_v11 = vsel %vm5225_vm8, 0, %v1045_v38  ;;  %v984_v6 = vld [vmem:[#allocation2 + $0x9c] sm:$0x1]  ;;  %v1515_v31 = vshll.u32 %v1161_v9, 16  ;;  %v1519_v22 = vshrl.u32 %v1161_v9, 16  ;;  %v1556_v55 = vpop.permute.xlu0 %1555 }
  0x9d   : > { %v1536_v59 = vor.u32 %v1535_v58, %v1532_v56  ;;  %1593 = vrot.lane.b32.xlu2 %v1422_v36, %s5095_s30  ;;  %1047 = vst [vmem:[#allocation2 + $0xbc] sm:$0x1] %v1046_v11  ;;  %v985_v33 = vsel %vm5158_vm6, 0, %v984_v6  ;;  %v1042_v24 = vld [vmem:[#allocation2 + $0xb0] sm:$0x1]  ;;  %v1547_v56 = vrot.slane %v1546_v45, 4 }
  0x9e   : > { %986 = vst [vmem:[#allocation2 + $0x9c] sm:$0x1] %v985_v33  ;;  %v1043_v4 = vsel %vm5225_vm8, 0, %v1042_v24  ;;  %v1517_v19 = vrot.slane %v1515_v31, 5  ;;  %v5736_v57 = vld [vmem:[#allocation2 + $0x1c] sm:$0xf] }
  0x9f   : > { %v1537_v53 = vrot.slane %v1536_v59, 4  ;;  %1044 = vst [vmem:[#allocation2 + $0xb0] sm:$0x1] %v1043_v4  ;;  %v1521_v48 = vrot.slane %v1519_v22, 4  ;;  %v1797_v54 = vrot.slane %v5736_v57, 5  ;;  %vm1989_vm0 = vcmask 93248  }
  0xa0   : > { %v1153_v41 = vld [vmem:[#allocation2 + $0x8c] sm:$0x1]  ;;  %1651 = vst.msk [vmem:[#allocation3 + $0x4] sm:$0xf] %vm1649_vm15, %v1556_v55  ;;  %v5744_v36 = vld [vmem:[#allocation2 + $0x28] sm:$0xf] }
  0xa1   : > { %v1542_v18 = vsel %vm5282_vm11, %v1537_v53, %v5707_v62  ;;  %v1453_v14 = vshll.u32 %v1153_v41, 16  ;;  %v1522_v30 = vor.u32 %v1521_v48, %v1517_v19  ;;  %v1054_v6 = vld [vmem:[#allocation2] sm:$0xf]  ;;  %v1059_v33 = vld [vmem:[#allocation2 + $0x1c] sm:$0xf]  ;;  %v1798_v53 = vsel %vm5723_vm14, %v4866_v51, %v1797_v54 }
  0xa2   : > { %1613 = vrot.lane.b32.xlu0 %v1542_v18, %s5095_s30  ;;  %v1160_v15 = vld [vmem:[#allocation2 + $0xa8] sm:$0xf]  ;;  %1086 = vst.msk [vmem:[#allocation3] sm:$0xf] %vm733_vm4, %v1054_v6  ;;  %v1804_v61 = vrot.slane %v5744_v36, 5  ;;  %vm2182_vm1 = vcmask 126048  }
  0xa3   : > { %v1506_v20 = vshrl.u32 %v1160_v15, 16  ;;  %v1509_v21 = vshll.u32 %v1160_v15, 16  ;;  %v1455_v42 = vrot.slane %v1453_v14, 5  ;;  %v1693_v41 = vld [vmem:[#allocation2 + $0x2c] sm:$0x1]  ;;  %vm2743_vm2 = vcmask 158848  }
  0xa4   : > { %v1165_v32 = vld [vmem:[#allocation2 + $0xbc] sm:$0x1]  ;;  %v1554_v59 = vpop.permute.xlu0 %1553  ;;  %1091 = vst.msk [vmem:[#allocation3 + $0x14] sm:$0xf] %vm733_vm4, %v1059_v33  ;;  %v1686_v15 = vld [vmem:[#allocation2 + $0x10] sm:$0xf] }
  0xa5   : > { %v1508_v25 = vrot.slane %v1506_v20, 4  ;;  %v1511_v17 = vrot.slane %v1509_v21, 5  ;;  %v1456_v27 = vsel %vm5282_vm11, %v1451_v63, %v1455_v42  ;;  %v1157_v47 = vld [vmem:[#allocation2 + $0x9c] sm:$0xf]  ;;  %v1549_v46 = vshll.u32 %v1165_v32, 16 }
  0xa6   : > { %1599 = vrot.lane.b32.xlu2 %v1456_v27, %s5095_s30  ;;  %v1482_v39 = vshrl.u32 %v1157_v47, 16  ;;  %v1485_v23 = vshll.u32 %v1157_v47, 16  ;;  %v1162_v38 = vld [vmem:[#allocation2 + $0xb0] sm:$0x1]  ;;  %1650 = vst.msk [vmem:[#allocation3] sm:$0xf] %vm1649_vm15, %v1554_v59 }
  0xa7   : > { %v1512_v29 = vor.u32 %v1511_v17, %v1508_v25  ;;  %v1551_v58 = vrot.slane %v1549_v46, 5  ;;  %v1525_v11 = vshll.u32 %v1162_v38, 16  ;;  %v1523_v63 = vrot.slane %v1522_v30, 4  ;;  %v1057_v21 = vld [vmem:[#allocation2 + $0x10] sm:$0xf] }
  0xa8   : > { %v1484_v26 = vrot.slane %v1482_v39, 4  ;;  %v1487_v37 = vrot.slane %v1485_v23, 5  ;;  %v1806_v43 = vrot.slane %v1804_v61, 4  ;;  %v1807_v52 = vrot.slane %v1693_v41, 5  ;;  %v1063_v42 = vld [vmem:[#allocation2 + $0x34] sm:$0xf] }
  0xa9   : > { %v1513_v40 = vrot.slane %v1512_v29, 4  ;;  %v1552_v18 = vsel %vm5282_vm11, %v1547_v56, %v1551_v58  ;;  %v1527_v14 = vrot.slane %v1525_v11, 5  ;;  %v1790_v22 = vrot.slane %v1686_v15, 5  ;;  %1089 = vst.msk [vmem:[#allocation3 + $0xc] sm:$0xf] %vm733_vm4, %v1057_v21 }
  0xaa   : > { %1895 = vrot.lane.b32.xlu0 %v1787_v8, %s5096_s10  ;;  %v1488_v28 = vor.u32 %v1487_v37, %v1484_v26  ;;  %v1560_v20 = vpop.permute.xlu1 %1559  ;;  %v1682_v4 = vld [vmem:[#allocation2] sm:$0xe]  ;;  %v1808_v25 = vsel %vm5723_vm14, %v1806_v43, %v1807_v52  ;;  %1095 = vst.msk [vmem:[#allocation3 + $0x24] sm:$0xf] %vm733_vm4, %v1063_v42  ;;  %v1697_v17 = vld [vmem:[#allocation2 + $0x3c] sm:$0xe] }
  0xab   : > { %v1518_v49 = vsel %vm5282_vm11, %v1513_v40, %v1517_v19  ;;  %v1528_v60 = vsel %vm5282_vm11, %v1523_v63, %v1527_v14  ;;  %1653 = vst.msk [vmem:[#allocation3 + $0xc] sm:$0xf] %vm1649_vm15, %v1560_v20  ;;  %v1065_v55 = vld [vmem:[#allocation2 + $0x40] sm:$0xf]  ;;  %v4864_v8 = vrot.slane %v1682_v4, 9  ;;  %v4869_v34 = vrot.slane %v1697_v17, 9 }
  0xac   : > { %1609 = vrot.lane.b32.xlu1 %v1518_v49, %s5095_s30  ;;  %v1489_v62 = vrot.slane %v1488_v28, 4  ;;  %v1572_v31 = vpop.permute.xlu0 %1571  ;;  %v5773_v27 = vld [vmem:[#allocation2 + $0x40] sm:$0xf]  ;;  %1097 = vst.msk [vmem:[#allocation3 + $0x2c] sm:$0xf] %vm733_vm4, %v1065_v55  ;;  %v1799_v40 = vrot.slane %v1797_v54, 4 }
  0xad   : > { %1659 = vst.msk [vmem:[#allocation3 + $0x24] sm:$0xf] %vm1649_vm15, %v1572_v31  ;;  %v1690_v47 = vld [vmem:[#allocation2 + $0x20] sm:$0x1]  ;;  %v1818_v29 = vrot.slane %v5773_v27, 5  ;;  %v1784_v37 = vsel %vm5723_vm14, %v4864_v8, %v1783_v10  ;;  %v1792_v10 = vrot.slane %v1790_v22, 4 }
  0xae   : > { %v1494_v50 = vsel %vm5282_vm11, %v1489_v62, %v5655_v12  ;;  %v1685_v12 = vld [vmem:[#allocation2 + $0xc] sm:$0xe]  ;;  %v1061_v39 = vld [vmem:[#allocation2 + $0x28] sm:$0xf]  ;;  %v1069_v45 = vld [vmem:[#allocation2 + $0x58] sm:$0xf] }
  0xaf   : > { %v1564_v9 = vpop.permute.xlu2 %1563  ;;  %1605 = vrot.lane.b32.xlu2 %v1494_v50, %s5095_s30  ;;  %v4865_v24 = vrot.slane %v1685_v12, 9  ;;  %v5783_v19 = vld [vmem:[#allocation2 + $0x4c] sm:$0xf]  ;;  %v1800_v26 = vrot.slane %v1690_v47, 5  ;;  %1093 = vst.msk [vmem:[#allocation3 + $0x1c] sm:$0xf] %vm733_vm4, %v1061_v39  ;;  %v1819_v51 = vsel %vm5723_vm14, %v4869_v34, %v1818_v29 }
  0xb0   : > { %1655 = vst.msk [vmem:[#allocation3 + $0x14] sm:$0xf] %vm1649_vm15, %v1564_v9  ;;  %v1687_v48 = vld [vmem:[#allocation2 + $0x14] sm:$0x1]  ;;  %v1071_v49 = vld [vmem:[#allocation2 + $0x64] sm:$0xf] }
  0xb1   : > { %v1791_v32 = vsel %vm5723_vm14, %v4865_v24, %v1790_v22  ;;  %v1825_v28 = vrot.slane %v5783_v19, 5  ;;  %1101 = vst.msk [vmem:[#allocation3 + $0x3c] sm:$0xf] %vm733_vm4, %v1069_v45  ;;  %v1702_v57 = vld [vmem:[#allocation2 + $0x50] sm:$0x1]  ;;  %v1801_v13 = vsel %vm5723_vm14, %v1799_v40, %v1800_v26  ;;  %v1793_v54 = vrot.slane %v1687_v48, 5 }
  0xb2   : > { %1901 = vrot.lane.b32.xlu0 %v1798_v53, %s5096_s10  ;;  %v1568_v23 = vpop.permute.xlu1 %1567  ;;  %1103 = vst.msk [vmem:[#allocation3 + $0x44] sm:$0xf] %vm733_vm4, %v1071_v49  ;;  %v1694_v56 = vld [vmem:[#allocation2 + $0x30] sm:$0xe]  ;;  %v1695_v58 = vld [vmem:[#allocation2 + $0x34] sm:$0xf] }
  0xb3   : > { %1657 = vst.msk [vmem:[#allocation3 + $0x1c] sm:$0xf] %vm1649_vm15, %v1568_v23  ;;  %v1827_v38 = vrot.slane %v1825_v28, 4  ;;  %v1828_v59 = vrot.slane %v1702_v57, 5  ;;  %v1067_v62 = vld [vmem:[#allocation2 + $0x4c] sm:$0xf]  ;;  %v1794_v50 = vsel %vm5723_vm14, %v1792_v10, %v1793_v54 }
  0xb4   : > { %1615 = vrot.lane.b32.xlu1 %v1552_v18, %s5095_s30  ;;  %v1584_v46 = vpop.permute.xlu0 %1583  ;;  %v1060_v6 = vld [vmem:[#allocation2 + $0x24] sm:$0xf]  ;;  %v4868_v33 = vrot.slane %v1694_v56, 9  ;;  %v1811_v53 = vrot.slane %v1695_v58, 5  ;;  %1099 = vst.msk [vmem:[#allocation3 + $0x34] sm:$0xf] %vm733_vm4, %v1067_v62 }
  0xb5   : > { %1665 = vst.msk [vmem:[#allocation3 + $0x3c] sm:$0xf] %vm1649_vm15, %v1584_v46  ;;  %v1691_v9 = vld [vmem:[#allocation2 + $0x24] sm:$0xe]  ;;  %v1829_v41 = vsel %vm5723_vm14, %v1827_v38, %v1828_v59  ;;  %v1058_v63 = vld [vmem:[#allocation2 + $0x18] sm:$0xf] }
  0xb6   : > { %1092 = vst.msk [vmem:[#allocation3 + $0x18] sm:$0xf] %vm733_vm4, %v1060_v6  ;;  %v1706_v14 = vld [vmem:[#allocation2 + $0x60] sm:$0xe]  ;;  %v5814_v12 = vld [vmem:[#allocation2 + $0x64] sm:$0xf]  ;;  %v1812_v15 = vsel %vm5723_vm14, %v4868_v33, %v1811_v53 }
  0xb7   : > { %1611 = vrot.lane.b32.xlu2 %v1528_v60, %s5095_s30  ;;  %v4867_v43 = vrot.slane %v1691_v9, 9  ;;  %v1699_v52 = vld [vmem:[#allocation2 + $0x44] sm:$0x1]  ;;  %1090 = vst.msk [vmem:[#allocation3 + $0x10] sm:$0xf] %vm733_vm4, %v1058_v63  ;;  %v4872_v20 = vrot.slane %v1706_v14, 9 }
  0xb8   : > { %v1839_v21 = vrot.slane %v5814_v12, 5  ;;  %v5824_v31 = vld [vmem:[#allocation2 + $0x70] sm:$0xf]  ;;  %v1056_v24 = vld [vmem:[#allocation2 + $0xc] sm:$0xf]  ;;  %v1820_v60 = vrot.slane %v1818_v29, 4 }
  0xb9   : > { %v1066_v22 = vld [vmem:[#allocation2 + $0x48] sm:$0xf]  ;;  %v1821_v4 = vrot.slane %v1699_v52, 5  ;;  %v1805_v55 = vsel %vm5723_vm14, %v4867_v43, %v1804_v61  ;;  %1088 = vst.msk [vmem:[#allocation3 + $0x8] sm:$0xf] %vm733_vm4, %v1056_v24  ;;  %v1846_v8 = vrot.slane %v5824_v31, 5 }
  0xba   : > { %v1576_v1 = vpop.permute.xlu2 %1575  ;;  %1907 = vrot.lane.b32.xlu0 %v1808_v25, %s5096_s10  ;;  %v1696_v25 = vld [vmem:[#allocation2 + $0x38] sm:$0x1]  ;;  %v1062_v27 = vld [vmem:[#allocation2 + $0x30] sm:$0xf]  ;;  %1098 = vst.msk [vmem:[#allocation3 + $0x30] sm:$0xf] %vm733_vm4, %v1066_v22 }
  0xbb   : > { %1661 = vst.msk [vmem:[#allocation3 + $0x2c] sm:$0xf] %vm1649_vm15, %v1576_v1  ;;  %v1711_v36 = vld [vmem:[#allocation2 + $0x74] sm:$0x1]  ;;  %v1822_v61 = vsel %vm5723_vm14, %v1820_v60, %v1821_v4  ;;  %v1813_v1 = vrot.slane %v1811_v53, 4  ;;  %v1814_v47 = vrot.slane %v1696_v25, 5 }
  0xbc   : > { %1897 = vrot.lane.b32.xlu1 %v1791_v32, %s5096_s10  ;;  %v1566_v11 = vpop.permute.xlu0 %1565  ;;  %v1840_v32 = vsel %vm5723_vm14, %v4872_v20, %v1839_v21  ;;  %1094 = vst.msk [vmem:[#allocation3 + $0x20] sm:$0xf] %vm733_vm4, %v1062_v27  ;;  %v1703_v34 = vld [vmem:[#allocation2 + $0x54] sm:$0xe]  ;;  %v1704_v29 = vld [vmem:[#allocation2 + $0x58] sm:$0xf] }
  0xbd   : > { %v1580_v30 = vpop.permute.xlu1 %1579  ;;  %1656 = vst.msk [vmem:[#allocation3 + $0x18] sm:$0xf] %vm1649_vm15, %v1566_v11  ;;  %v1848_v39 = vrot.slane %v1846_v8, 4  ;;  %v1849_v23 = vrot.slane %v1711_v36, 5  ;;  %v1064_v45 = vld [vmem:[#allocation2 + $0x3c] sm:$0xf]  ;;  %v1815_v48 = vsel %vm5723_vm14, %v1813_v1, %v1814_v47 }
  0xbe   : > { %1663 = vst.msk [vmem:[#allocation3 + $0x34] sm:$0xf] %vm1649_vm15, %v1580_v30  ;;  %v1072_v40 = vld [vmem:[#allocation2 + $0x6c] sm:$0xf]  ;;  %v4871_v26 = vrot.slane %v1703_v34, 9  ;;  %vm3274_vm5 = vcmask 224448  }
  0xbf   : > { %1893 = vrot.lane.b32.xlu2 %v1784_v37, %s5096_s10  ;;  %v1832_v37 = vrot.slane %v1704_v29, 5  ;;  %1096 = vst.msk [vmem:[#allocation3 + $0x28] sm:$0xf] %vm733_vm4, %v1064_v45  ;;  %v1700_v49 = vld [vmem:[#allocation2 + $0x48] sm:$0xe]  ;;  %vm3835_vm9 = vcmask 257248  }
  0xc0   : > { %1104 = vst.msk [vmem:[#allocation3 + $0x48] sm:$0xf] %vm733_vm4, %v1072_v40  ;;  %v1715_v10 = vld [vmem:[#allocation2 + $0x84] sm:$0xe]  ;;  %v5853_v54 = vld [vmem:[#allocation2 + $0x88] sm:$0xf] }
  0xc1   : > { %v1833_v58 = vsel %vm5723_vm14, %v4871_v26, %v1832_v37  ;;  %v4870_v38 = vrot.slane %v1700_v49, 9  ;;  %v1708_v59 = vld [vmem:[#allocation2 + $0x68] sm:$0x1]  ;;  %v4875_v62 = vrot.slane %v1715_v10, 9  ;;  %v1860_v30 = vrot.slane %v5853_v54, 5 }
  0xc2   : > { %1913 = vrot.lane.b32.xlu0 %v1819_v51, %s5096_s10  ;;  %v1850_v51 = vsel %vm5723_vm14, %v1848_v39, %v1849_v23  ;;  %v5862_v11 = vld [vmem:[#allocation2 + $0x94] sm:$0xf]  ;;  %v1070_v6 = vld [vmem:[#allocation2 + $0x60] sm:$0xf]  ;;  %v1075_v33 = vld [vmem:[#allocation2 + $0x7c] sm:$0xf] }
  0xc3   : > { %v1074_v53 = vld [vmem:[#allocation2 + $0x78] sm:$0xf]  ;;  %v1842_v9 = vrot.slane %v1708_v59, 5  ;;  %1102 = vst.msk [vmem:[#allocation3 + $0x40] sm:$0xf] %vm733_vm4, %v1070_v6  ;;  %v1861_v63 = vsel %vm5723_vm14, %v4875_v62, %v1860_v30  ;;  %v1867_v14 = vrot.slane %v5862_v11, 5 }
  0xc4   : > { %1903 = vrot.lane.b32.xlu1 %v1801_v13, %s5096_s10  ;;  %v1068_v13 = vld [vmem:[#allocation2 + $0x54] sm:$0xf]  ;;  %1107 = vst.msk [vmem:[#allocation3 + $0x54] sm:$0xf] %vm733_vm4, %v1075_v33  ;;  %v1712_v52 = vld [vmem:[#allocation2 + $0x78] sm:$0xe] }
  0xc5   : > { %v1558_v42 = vpop.permute.xlu1 %1557  ;;  %1100 = vst.msk [vmem:[#allocation3 + $0x38] sm:$0xf] %vm733_vm4, %v1068_v13  ;;  %v1713_v20 = vld [vmem:[#allocation2 + $0x7c] sm:$0xf]  ;;  %v1073_v22 = vld [vmem:[#allocation2 + $0x70] sm:$0xf] }
  0xc6   : > { %1652 = vst.msk [vmem:[#allocation3 + $0x8] sm:$0xf] %vm1649_vm15, %v1558_v42  ;;  %v4874_v60 = vrot.slane %v1712_v52, 9  ;;  %v1853_v4 = vrot.slane %v1713_v20, 5  ;;  %v1709_v27 = vld [vmem:[#allocation2 + $0x6c] sm:$0xe] }
  0xc7   : > { %1899 = vrot.lane.b32.xlu2 %v1794_v50, %s5096_s10  ;;  %v1841_v50 = vrot.slane %v1839_v21, 4  ;;  %1106 = vst.msk [vmem:[#allocation3 + $0x50] sm:$0xf] %vm733_vm4, %v1074_v53  ;;  %v1869_v21 = vrot.slane %v1867_v14, 4  ;;  %v1725_v1 = vld [vmem:[#allocation2 + $0xac] sm:$0xf] }
  0xc8   : > { %v1578_v17 = vpop.permute.xlu0 %1577  ;;  %1105 = vst.msk [vmem:[#allocation3 + $0x4c] sm:$0xf] %vm733_vm4, %v1073_v22  ;;  %v1854_v47 = vsel %vm5723_vm14, %v4874_v60, %v1853_v4  ;;  %v4873_v34 = vrot.slane %v1709_v27, 9  ;;  %v1717_v29 = vld [vmem:[#allocation2 + $0x8c] sm:$0x1]  ;;  %v1881_v45 = vrot.slane %v1725_v1, 5 }
  0xc9   : > { %v1588_v18 = vpop.permute.xlu2 %1587  ;;  %1662 = vst.msk [vmem:[#allocation3 + $0x30] sm:$0xf] %vm1649_vm15, %v1578_v17  ;;  %v1843_v19 = vsel %vm5723_vm14, %v1841_v50, %v1842_v9  ;;  %v1078_v17 = vld [vmem:[#allocation2 + $0x90] sm:$0xf]  ;;  %v1076_v26 = vld [vmem:[#allocation2 + $0x84] sm:$0xf] }
  0xca   : > { %1667 = vst.msk [vmem:[#allocation3 + $0x44] sm:$0xf] %vm1649_vm15, %v1588_v18  ;;  %1919 = vrot.lane.b32.xlu0 %v1829_v41, %s5096_s10  ;;  %v1826_v41 = vsel %vm5723_vm14, %v4870_v38, %v1825_v28  ;;  %v1705_v18 = vld [vmem:[#allocation2 + $0x5c] sm:$0x1]  ;;  %v1834_v28 = vrot.slane %v1832_v37, 4  ;;  %v1863_v49 = vrot.slane %v1717_v29, 5 }
  0xcb   : > { %v1835_v43 = vrot.slane %v1705_v18, 5  ;;  %1110 = vst.msk [vmem:[#allocation3 + $0x60] sm:$0xf] %vm733_vm4, %v1078_v17  ;;  %v1081_v37 = vld [vmem:[#allocation2 + $0xa0] sm:$0xf]  ;;  %v1883_v20 = vrot.slane %v1881_v45, 4 }
  0xcc   : > { %1909 = vrot.lane.b32.xlu1 %v1812_v15, %s5096_s10  ;;  %v1720_v15 = vld [vmem:[#allocation2 + $0x98] sm:$0x1]  ;;  %v1714_v13 = vld [vmem:[#allocation2 + $0x80] sm:$0x1]  ;;  %1108 = vst.msk [vmem:[#allocation3 + $0x58] sm:$0xf] %vm733_vm4, %v1076_v26 }
  0xcd   : > { %v1870_v42 = vrot.slane %v1720_v15, 5  ;;  %1113 = vst.msk [vmem:[#allocation3 + $0x6c] sm:$0xf] %vm733_vm4, %v1081_v37  ;;  %v1721_v38 = vld [vmem:[#allocation2 + $0x9c] sm:$0xe]  ;;  %vm4172_vm10 = vcmask 290048  }
  0xce   : > { %v1722_v59 = vld [vmem:[#allocation2 + $0xa0] sm:$0xf]  ;;  %v1079_v6 = vld [vmem:[#allocation2 + $0x94] sm:$0xf]  ;;  %v4877_v53 = vrot.slane %v1721_v38, 9  ;;  %vm4337_vm12 = vcmask 293888  }
  0xcf   : > { %1905 = vrot.lane.b32.xlu2 %v1805_v55, %s5096_s10  ;;  %v1836_v55 = vsel %vm5723_vm14, %v1834_v28, %v1835_v43  ;;  %v1871_v36 = vsel %vm5723_vm14, %v1869_v21, %v1870_v42  ;;  %v1084_v33 = vld [vmem:[#allocation2 + $0xb4] sm:$0xf]  ;;  %v1874_v50 = vrot.slane %v1722_v59, 5  ;;  %1111 = vst.msk [vmem:[#allocation3 + $0x64] sm:$0xf] %vm733_vm4, %v1079_v6 }
  0xd0   : > { %v1718_v18 = vld [vmem:[#allocation2 + $0x90] sm:$0xe]  ;;  %1116 = vst.msk [vmem:[#allocation3 + $0x78] sm:$0xf] %vm733_vm4, %v1084_v33  ;;  %v1726_v43 = vld [vmem:[#allocation2 + $0xb0] sm:$0x1] }
  0xd1   : > { %v4876_v28 = vrot.slane %v1718_v18, 9  ;;  %v1082_v52 = vld [vmem:[#allocation2 + $0xa8] sm:$0xf]  ;;  %v1884_v21 = vrot.slane %v1726_v43, 5  ;;  %v2024_v22 = vld [vmem:[#allocation2 + $0x18] sm:$0xf] }
  0xd2   : > { %1925 = vrot.lane.b32.xlu0 %v1840_v32, %s5096_s10  ;;  %v1574_v46 = vpop.permute.xlu1 %1573  ;;  %v1077_v32 = vld [vmem:[#allocation2 + $0x88] sm:$0xf]  ;;  %1114 = vst.msk [vmem:[#allocation3 + $0x70] sm:$0xf] %vm733_vm4, %v1082_v52  ;;  %v2022_v1 = vld [vmem:[#allocation2 + $0xc] sm:$0xf] }
  0xd3   : > { %1660 = vst.msk [vmem:[#allocation3 + $0x28] sm:$0xf] %vm1649_vm15, %v1574_v46  ;;  %v5898_v46 = vld [vmem:[#allocation2 + $0xb8] sm:$0xf]  ;;  %v1868_v42 = vsel %vm5723_vm14, %v4876_v28, %v1867_v14  ;;  %v2023_v26 = vld [vmem:[#allocation2 + $0x10] sm:$0xf] }
  0xd4   : > { %1915 = vrot.lane.b32.xlu1 %v1822_v61, %s5096_s10  ;;  %v1724_v61 = vld [vmem:[#allocation2 + $0xa8] sm:$0xe]  ;;  %1109 = vst.msk [vmem:[#allocation3 + $0x5c] sm:$0xf] %vm733_vm4, %v1077_v32  ;;  %v1888_v54 = vrot.slane %v5898_v46, 5 }
  0xd5   : > { %v4878_v23 = vrot.slane %v1724_v61, 9  ;;  %v1085_v14 = vld [vmem:[#allocation2 + $0xb8] sm:$0xf]  ;;  %v1727_v32 = vld [vmem:[#allocation2 + $0xb4] sm:$0xe] }
  0xd6   : > { %v1890_v62 = vrot.slane %v1888_v54, 4  ;;  %1117 = vst.msk [vmem:[#allocation3 + $0x7c] sm:$0xf] %vm733_vm4, %v1085_v14  ;;  %v2033_v46 = vld [vmem:[#allocation2 + $0x4c] sm:$0xf] }
  0xd7   : > { %1911 = vrot.lane.b32.xlu2 %v1815_v48, %s5096_s10  ;;  %v1862_v48 = vrot.slane %v1860_v30, 4  ;;  %v1882_v10 = vsel %vm5723_vm14, %v4878_v23, %v1881_v45  ;;  %v2025_v23 = vld [vmem:[#allocation2 + $0x1c] sm:$0xf]  ;;  %v2028_v37 = vld [vmem:[#allocation2 + $0x30] sm:$0xf] }
  0xd8   : > { %v1562_v57 = vpop.permute.xlu2 %1561  ;;  %v2029_v6 = vld [vmem:[#allocation2 + $0x34] sm:$0xf]  ;;  %v2032_v28 = vld [vmem:[#allocation2 + $0x48] sm:$0xf]  ;;  %v2042_v52 = vld [vmem:[#allocation2 + $0x84] sm:$0xf] }
  0xd9   : > { %1654 = vst.msk [vmem:[#allocation3 + $0x10] sm:$0xf] %vm1649_vm15, %v1562_v57  ;;  %v1080_v57 = vld [vmem:[#allocation2 + $0x9c] sm:$0xf]  ;;  %v1864_v31 = vsel %vm5723_vm14, %v1862_v48, %v1863_v49  ;;  %v2034_v18 = vld [vmem:[#allocation2 + $0x54] sm:$0xf] }
  0xda   : > { %v1590_v56 = vpop.permute.xlu0 %1589  ;;  %1931 = vrot.lane.b32.xlu0 %v1850_v51, %s5096_s10  ;;  %v1847_v51 = vsel %vm5723_vm14, %v4873_v34, %v1846_v8  ;;  %1112 = vst.msk [vmem:[#allocation3 + $0x68] sm:$0xf] %vm733_vm4, %v1080_v57  ;;  %v1855_v8 = vrot.slane %v1853_v4, 4  ;;  %v305_v57 = vld [vmem:[%s5193_s27 + $0xf0] sm:$0xff] }
  0xdb   : > { %1668 = vst.msk [vmem:[#allocation3 + $0x48] sm:$0xf] %vm1649_vm15, %v1590_v56  ;;  %v1729_v56 = vld [vmem:[#allocation2 + $0xbc] sm:$0x1] }
  0xdc   : > { %1921 = vrot.lane.b32.xlu1 %v1833_v58, %s5096_s10  ;;  %v1856_v58 = vrot.slane %v1714_v13, 5  ;;  %v1891_v30 = vrot.slane %v1729_v56, 5  ;;  %v2036_v56 = vld [vmem:[#allocation2 + $0x60] sm:$0xf] }
  0xde   : > { %v1857_v9 = vsel %vm5723_vm14, %v1855_v8, %v1856_v58  ;;  %v2031_v58 = vld [vmem:[#allocation2 + $0x40] sm:$0xf] }
  0xdf   : > { %1917 = vrot.lane.b32.xlu2 %v1826_v41, %s5096_s10 }
  0xe0   : > { %v1570_v12 = vpop.permute.xlu2 %1569 }
  0xe1   : > { %1658 = vst.msk [vmem:[#allocation3 + $0x20] sm:$0xf] %vm1649_vm15, %v1570_v12  ;;  %v1892_v12 = vsel %vm5723_vm14, %v1890_v62, %v1891_v30 }
  0xe2   : > { %1937 = vrot.lane.b32.xlu0 %v1861_v63, %s5096_s10  ;;  %v1083_v63 = vld [vmem:[#allocation2 + $0xac] sm:$0xf] }
  0xe3   : > { %1115 = vst.msk [vmem:[#allocation3 + $0x74] sm:$0xf] %vm733_vm4, %v1083_v63  ;;  %v844_v63 = vld [vmem:[#allocation2 + $0xc0] sm:$0xf] }
  0xe4   : > { %1927 = vrot.lane.b32.xlu1 %v1843_v19, %s5096_s10  ;;  %v1875_v19 = vsel %vm5723_vm14, %v4877_v53, %v1874_v50 }
  0xe6   : > { %v1586_v24 = vpop.permute.xlu1 %1585  ;;  %v1596_v25 = vpop.permute.xlu0 %1595 }
  0xe7   : > { %1666 = vst.msk [vmem:[#allocation3 + $0x40] sm:$0xf] %vm1649_vm15, %v1586_v24  ;;  %1923 = vrot.lane.b32.xlu2 %v1836_v55, %s5096_s10  ;;  %v1723_v24 = vld [vmem:[#allocation2 + $0xa4] sm:$0x1]  ;;  %v1885_v55 = vsel %vm5723_vm14, %v1883_v20, %v1884_v21 }
  0xe8   : > { %1671 = vst.msk [vmem:[#allocation3 + $0x54] sm:$0xf] %vm1649_vm15, %v1596_v25  ;;  %v1876_v25 = vrot.slane %v1874_v50, 4  ;;  %v1877_v11 = vrot.slane %v1723_v24, 5  ;;  %v2037_v20 = vld [vmem:[#allocation2 + $0x64] sm:$0xf] }
  0xe9   : > { %v2035_v24 = vld [vmem:[#allocation2 + $0x58] sm:$0xf] }
  0xea   : > { %1943 = vrot.lane.b32.xlu0 %v1871_v36, %s5096_s10  ;;  %v1878_v17 = vsel %vm5723_vm14, %v1876_v25, %v1877_v11  ;;  %v2027_v36 = vld [vmem:[#allocation2 + $0x28] sm:$0xf]  ;;  %v306_v25 = vld [vmem:[%s5193_s27 + $0xf8] sm:$0xff] }
  0xeb   : > { %v1582_v39 = vpop.permute.xlu2 %1581  ;;  %v2040_v11 = vld [vmem:[#allocation2 + $0x78] sm:$0xf] }
  0xec   : > { %1664 = vst.msk [vmem:[#allocation3 + $0x38] sm:$0xf] %vm1649_vm15, %v1582_v39  ;;  %1933 = vrot.lane.b32.xlu1 %v1854_v47, %s5096_s10  ;;  %v4879_v47 = vrot.slane %v1727_v32, 9  ;;  %v2030_v39 = vld [vmem:[#allocation2 + $0x3c] sm:$0xf] }
  0xee   : > { %v1592_v40 = vpop.permute.xlu1 %1591  ;;  %v1889_v29 = vsel %vm5723_vm14, %v4879_v47, %v1888_v54 }
  0xef   : > { %1669 = vst.msk [vmem:[#allocation3 + $0x4c] sm:$0xf] %vm1649_vm15, %v1592_v40  ;;  %1929 = vrot.lane.b32.xlu2 %v1847_v51, %s5096_s10  ;;  %v2026_v51 = vld [vmem:[#allocation2 + $0x24] sm:$0xf] }
  0xf2   : > { %1949 = vrot.lane.b32.xlu0 %v1882_v10, %s5096_s10  ;;  %v5068_v10 = vld [vmem:[%s7138_s1] ss:$0 sm:$0xff] }
  0xf3   : > { %v340_v54 = vmul.f32 %v5068_v10, %v305_v57  ;;  %v341_v14 = vmul.f32 %v5068_v10, %v306_v25  ;;  %v2225_v25 = vld [vmem:[#allocation2 + $0x34] sm:$0xf] }
  0xf4   : > { %1939 = vrot.lane.b32.xlu1 %v1864_v31, %s5096_s10  ;;  %v5069_v31 = vld [vmem:[%s7139_s2] ss:$0 sm:$0xff] }
  0xf5   : > { %v375_v8 = vadd.f32 %v5069_v31, %v340_v54  ;;  %v376_v32 = vadd.f32 %v5069_v31, %v341_v14  ;;  %v2041_v54 = vld [vmem:[#allocation2 + $0x7c] sm:$0xf] }
  0xf7   : > { %v1602_v41 = vpop.permute.xlu0 %1601  ;;  %v1594_v15 = vpop.permute.xlu2 %1593  ;;  %1935 = vrot.lane.b32.xlu2 %v1857_v9, %s5096_s10  ;;  %v407_v59 = vpack.c.bf16 %v375_v8, %v375_v8  ;;  %v2039_v9 = vld [vmem:[#allocation2 + $0x70] sm:$0xf] }
  0xf8   : > { %1674 = vst.msk [vmem:[#allocation3 + $0x60] sm:$0xf] %vm1649_vm15, %v1602_v41 }
  0xf9   : > { %1670 = vst.msk [vmem:[#allocation3 + $0x50] sm:$0xf] %vm1649_vm15, %v1594_v15  ;;  %v668_v30 = vshrl.u32 %v407_v59, 16  ;;  %v671_v50 = vshll.u32 %v407_v59, 16 }
  0xfa   : > { %1955 = vrot.lane.b32.xlu0 %v1892_v12, %s5096_s10 }
  0xfb   : > { %v5980_v53 = vrot.slane %v668_v30, 7  ;;  %v2046_v30 = vld [vmem:[#allocation2 + $0x9c] sm:$0xf] }
  0xfc   : > { %1945 = vrot.lane.b32.xlu1 %v1875_v19, %s5096_s10 }
  0xfd   : > { %v673_v41 = vor.u32 %v671_v50, %v5980_v53 }
  0xff   : > { %1941 = vrot.lane.b32.xlu2 %v1868_v42, %s5096_s10  ;;  %v845_v15 = vsel %vm5169_vm7, %v673_v41, %v844_v63  ;;  %v2224_v41 = vld [vmem:[#allocation2 + $0x30] sm:$0xf] }
 0x100   : > { %v1600_v4 = vpop.permute.xlu2 %1599  ;;  %846 = vst [vmem:[#allocation2 + $0xc0] sm:$0xf] %v845_v15  ;;  %v2044_v63 = vld [vmem:[#allocation2 + $0x90] sm:$0xf] }
 0x101   : > { %v1598_v60 = vpop.permute.xlu1 %1597  ;;  %1673 = vst.msk [vmem:[#allocation3 + $0x5c] sm:$0xf] %vm1649_vm15, %v1600_v4 }
 0x102   : > { %1672 = vst.msk [vmem:[#allocation3 + $0x58] sm:$0xf] %vm1649_vm15, %v1598_v60  ;;  %2090 = vrot.lane.b32.xlu0 %v2024_v22, %s5097_s11 }
 0x104   : > { %1951 = vrot.lane.b32.xlu1 %v1885_v55, %s5096_s10  ;;  %v2045_v55 = vld [vmem:[#allocation2 + $0x94] sm:$0xf] }
 0x107   : > { %v1608_v27 = vpop.permute.xlu0 %1607  ;;  %1947 = vrot.lane.b32.xlu2 %v1878_v17, %s5096_s10  ;;  %v993_v22 = vld [vmem:[#allocation2 + $0xc0] sm:$0x1] }
 0x108   : > { %1677 = vst.msk [vmem:[#allocation3 + $0x6c] sm:$0xf] %vm1649_vm15, %v1608_v27  ;;  %v994_v4 = vsel %vm5158_vm6, 0, %v993_v22  ;;  %v2215_v27 = vld [vmem:[#allocation2 + $0xc] sm:$0xf] }
 0x109   : > { %v1604_v61 = vpop.permute.xlu1 %1603  ;;  %v1606_v34 = vpop.permute.xlu2 %1605  ;;  %995 = vst [vmem:[#allocation2 + $0xc0] sm:$0x1] %v994_v4  ;;  %v2267_v47 = vshll.u32 %v2215_v27, 16 }
 0x10a   : > { %1675 = vst.msk [vmem:[#allocation3 + $0x64] sm:$0xf] %vm1649_vm15, %v1604_v61  ;;  %2096 = vrot.lane.b32.xlu0 %v2027_v36, %s5097_s11  ;;  %v2038_v61 = vld [vmem:[#allocation2 + $0x6c] sm:$0xf] }
 0x10b   : > { %1676 = vst.msk [vmem:[#allocation3 + $0x68] sm:$0xf] %vm1649_vm15, %v1606_v34 }
 0x10c   : > { %2086 = vrot.lane.b32.xlu1 %v2022_v1, %s5097_s11  ;;  %v2264_v1 = vshrl.u32 %v2215_v27, 16  ;;  %v2047_v27 = vld [vmem:[#allocation2 + $0xa0] sm:$0xf] }
 0x10f   : > { %1953 = vrot.lane.b32.xlu2 %v1889_v29, %s5096_s10  ;;  %v408_v29 = vpack.c.bf16 %v376_v32, %v376_v32  ;;  %v2217_v32 = vld [vmem:[#allocation2 + $0x14] sm:$0x1]  ;;  %s4861_s10 = sshll.u32 %s7160_s18, 1 }
 0x110   : > { %s268_s13 = scalar_lea.vmem %s7142_s5, %s4861_s10 }
 0x111   : > { %v1612_v45 = vpop.permute.xlu2 %1611 }
 0x112   : > { %2102 = vrot.lane.b32.xlu0 %v2030_v39, %s5097_s11  ;;  %1679 = vst.msk [vmem:[#allocation3 + $0x74] sm:$0xf] %vm1649_vm15, %v1612_v45  ;;  %v2048_v39 = vld [vmem:[#allocation2 + $0xa8] sm:$0xf] }
 0x113   : > { %v2043_v45 = vld [vmem:[#allocation2 + $0x88] sm:$0xf] }
 0x114   : > { %2092 = vrot.lane.b32.xlu1 %v2025_v23, %s5097_s11  ;;  %v1614_v40 = vpop.permute.xlu0 %1613  ;;  %v676_v23 = vshrl.u32 %v408_v29, 16 }
 0x115   : > { %1680 = vst.msk [vmem:[#allocation3 + $0x78] sm:$0xf] %vm1649_vm15, %v1614_v40  ;;  %v2266_v40 = vrot.slane %v2264_v1, 4 }
 0x117   : > { %2088 = vrot.lane.b32.xlu2 %v2023_v26, %s5097_s11  ;;  %v2269_v26 = vrot.slane %v2267_v47, 5  ;;  %v2345_v47 = vshll.u32 %v2225_v25, 16 }
 0x119   : > { %v1894_v48 = vpop.permute.xlu2 %1893 }
 0x11a   : > { %2108 = vrot.lane.b32.xlu0 %v2033_v46, %s5097_s11  ;;  %1990 = vst.msk [vmem:[#allocation3] sm:$0xf] %vm1989_vm0, %v1894_v48  ;;  %v679_v46 = vshll.u32 %v408_v29, 16  ;;  %v6009_v48 = vrot.slane %v676_v23, 7 }
 0x11c   : > { %2098 = vrot.lane.b32.xlu1 %v2028_v37, %s5097_s11  ;;  %v1896_v49 = vpop.permute.xlu0 %1895  ;;  %v681_v10 = vor.u32 %v679_v46, %v6009_v48 }
 0x11d   : > { %1991 = vst.msk [vmem:[#allocation3 + $0x4] sm:$0xf] %vm1989_vm0, %v1896_v49  ;;  %v2216_v49 = vld [vmem:[#allocation2 + $0x10] sm:$0xf] }
 0x11e   : > { %v1610_v13 = vpop.permute.xlu1 %1609  ;;  %v2273_v8 = vshll.u32 %v2216_v49, 16 }
 0x11f   : > { %1678 = vst.msk [vmem:[#allocation3 + $0x70] sm:$0xf] %vm1649_vm15, %v1610_v13  ;;  %2094 = vrot.lane.b32.xlu2 %v2026_v51, %s5097_s11  ;;  %v2219_v51 = vld [vmem:[#allocation2 + $0x1c] sm:$0xf]  ;;  %v674_v13 = vrot.slane %v5980_v53, 4 }
 0x120   : > { %v2275_v53 = vrot.slane %v2273_v8, 5 }
 0x121   : > { %v1900_v38 = vpop.permute.xlu2 %1899  ;;  %v682_v59 = vsel %vm5151_vm3, %v674_v13, %v681_v10  ;;  %vm3080_vm3 = vcmask 191648  }
 0x122   : > { %2114 = vrot.lane.b32.xlu0 %v2036_v56, %s5097_s11  ;;  %1993 = vst.msk [vmem:[#allocation3 + $0xc] sm:$0xf] %vm1989_vm0, %v1900_v38  ;;  %v2270_v56 = vor.u32 %v2269_v26, %v2266_v40  ;;  %v2301_v38 = vshrl.u32 %v2219_v51, 16  ;;  %v2283_v40 = vshll.u32 %v2217_v32, 16  ;;  %v2052_v26 = vld [vmem:[#allocation2 + $0xc0] sm:$0xf] }
 0x123   : > { %847 = vst.msk [vmem:[#allocation2 + $0xc4] sm:$0xf] %vm733_vm4, %v682_v59  ;;  %v2349_v59 = vshrl.u32 %v2225_v25, 16  ;;  %vm4386_vm4 = vcmask 1041408  }
 0x124   : > { %2104 = vrot.lane.b32.xlu1 %v2031_v58, %s5097_s11  ;;  %v1902_v62 = vpop.permute.xlu0 %1901  ;;  %v2297_v58 = vshll.u32 %v2219_v51, 16 }
 0x125   : > { %1994 = vst.msk [vmem:[#allocation3 + $0x10] sm:$0xf] %vm1989_vm0, %v1902_v62  ;;  %v2051_v62 = vld [vmem:[#allocation2 + $0xb8] sm:$0xf] }
 0x126   : > { %v1616_v33 = vpop.permute.xlu1 %1615  ;;  %v6022_v50 = vrot.slane %v2297_v58, 5 }
 0x127   : > { %1681 = vst.msk [vmem:[#allocation3 + $0x7c] sm:$0xf] %vm1649_vm15, %v1616_v33  ;;  %2100 = vrot.lane.b32.xlu2 %v2029_v6, %s5097_s11  ;;  %v2271_v33 = vrot.slane %v2270_v56, 4  ;;  %v6042_v56 = vld [vmem:[#allocation2 + $0x28] sm:$0xf] }
 0x129   : > { %v1906_v12 = vpop.permute.xlu2 %1905 }
 0x12a   : > { %2120 = vrot.lane.b32.xlu0 %v2039_v9, %s5097_s11  ;;  %1996 = vst.msk [vmem:[#allocation3 + $0x18] sm:$0xf] %vm1989_vm0, %v1906_v12  ;;  %v2303_v9 = vrot.slane %v2301_v38, 4  ;;  %v2277_v12 = vshrl.u32 %v2216_v49, 16  ;;  %v2285_v38 = vrot.slane %v2283_v40, 5 }
 0x12c   : > { %2110 = vrot.lane.b32.xlu1 %v2034_v18, %s5097_s11  ;;  %v1908_v19 = vpop.permute.xlu0 %1907 }
 0x12d   : > { %1997 = vst.msk [vmem:[#allocation3 + $0x1c] sm:$0xf] %vm1989_vm0, %v1908_v19  ;;  %v2304_v19 = vor.u32 %v2303_v9, %v6022_v50 }
 0x12e   : > { %v1898_v43 = vpop.permute.xlu1 %1897 }
 0x12f   : > { %1992 = vst.msk [vmem:[#allocation3 + $0x8] sm:$0xf] %vm1989_vm0, %v1898_v43  ;;  %2106 = vrot.lane.b32.xlu2 %v2032_v28, %s5097_s11  ;;  %v2307_v28 = vshll.u32 %v2220_v0, 16  ;;  %v2336_v43 = vshrl.u32 %v2224_v41, 16  ;;  %v2305_v22 = vrot.slane %v2304_v19, 4  ;;  %v2351_v19 = vrot.slane %v2349_v59, 4 }
 0x130   : > { %v2238_v59 = vld [vmem:[#allocation2 + $0x68] sm:$0x1] }
 0x131   : > { %v1912_v21 = vpop.permute.xlu2 %1911  ;;  %v2338_v4 = vrot.slane %v2336_v43, 4 }
 0x132   : > { %2126 = vrot.lane.b32.xlu0 %v2042_v52, %s5097_s11  ;;  %1999 = vst.msk [vmem:[#allocation3 + $0x24] sm:$0xf] %vm1989_vm0, %v1912_v21  ;;  %v2339_v52 = vshll.u32 %v2224_v41, 16  ;;  %v2049_v21 = vld [vmem:[#allocation2 + $0xac] sm:$0xf] }
 0x134   : > { %2116 = vrot.lane.b32.xlu1 %v2037_v20, %s5097_s11  ;;  %v1914_v42 = vpop.permute.xlu0 %1913  ;;  %v2276_v20 = vsel %vm5282_vm11, %v2271_v33, %v2275_v53  ;;  %v2050_v33 = vld [vmem:[#allocation2 + $0xb4] sm:$0xf] }
 0x135   : > { %2000 = vst.msk [vmem:[#allocation3 + $0x28] sm:$0xf] %vm1989_vm0, %v1914_v42  ;;  %v2279_v42 = vrot.slane %v2277_v12, 4 }
 0x136   : > { %v1904_v60 = vpop.permute.xlu1 %1903 }
 0x137   : > { %1995 = vst.msk [vmem:[#allocation3 + $0x14] sm:$0xf] %vm1989_vm0, %v1904_v60  ;;  %2112 = vrot.lane.b32.xlu2 %v2035_v24, %s5097_s11  ;;  %v2309_v60 = vrot.slane %v2307_v28, 5 }
 0x139   : > { %v1918_v17 = vpop.permute.xlu2 %1917 }
 0x13a   : > { %2132 = vrot.lane.b32.xlu0 %v2045_v55, %s5097_s11  ;;  %2002 = vst.msk [vmem:[#allocation3 + $0x30] sm:$0xf] %vm1989_vm0, %v1918_v17  ;;  %v2341_v55 = vrot.slane %v2339_v52, 5  ;;  %v2228_v17 = vld [vmem:[#allocation2 + $0x40] sm:$0xf] }
 0x13b   : > { %v2369_v23 = vshll.u32 %v2228_v17, 16 }
 0x13c   : > { %2122 = vrot.lane.b32.xlu1 %v2040_v11, %s5097_s11  ;;  %v1920_v36 = vpop.permute.xlu0 %1919  ;;  %v2221_v11 = vld [vmem:[#allocation2 + $0x24] sm:$0xf]  ;;  %v2342_v1 = vor.u32 %v2341_v55, %v2338_v4  ;;  %v6059_v4 = vld [vmem:[#allocation2 + $0x58] sm:$0xf] }
 0x13d   : > { %2003 = vst.msk [vmem:[#allocation3 + $0x34] sm:$0xf] %vm1989_vm0, %v1920_v36  ;;  %v2280_v36 = vor.u32 %v2279_v42, %v2275_v53  ;;  %v2315_v29 = vshll.u32 %v2221_v11, 16 }
 0x13e   : > { %v1910_v34 = vpop.permute.xlu1 %1909  ;;  %v2343_v51 = vrot.slane %v2342_v1, 4 }
 0x13f   : > { %1998 = vst.msk [vmem:[#allocation3 + $0x20] sm:$0xf] %vm1989_vm0, %v1910_v34  ;;  %2118 = vrot.lane.b32.xlu2 %v2038_v61, %s5097_s11  ;;  %v2312_v34 = vshrl.u32 %v2221_v11, 16  ;;  %v2281_v46 = vrot.slane %v2280_v36, 4  ;;  %v2317_v10 = vrot.slane %v2315_v29, 5 }
 0x140   : > { %v2237_v11 = vld [vmem:[#allocation2 + $0x64] sm:$0xf] }
 0x141   : > { %v1924_v37 = vpop.permute.xlu2 %1923  ;;  %v2314_v13 = vrot.slane %v2312_v34, 4  ;;  %v2286_v52 = vsel %vm5282_vm11, %v2281_v46, %v2285_v38  ;;  %v2230_v34 = vld [vmem:[#allocation2 + $0x48] sm:$0xf]  ;;  %v2227_v38 = vld [vmem:[#allocation2 + $0x3c] sm:$0xf] }
 0x142   : > { %2138 = vrot.lane.b32.xlu0 %v2048_v39, %s5097_s11  ;;  %2005 = vst.msk [vmem:[#allocation3 + $0x3c] sm:$0xf] %vm1989_vm0, %v1924_v37  ;;  %v2310_v39 = vsel %vm5282_vm11, %v2305_v22, %v2309_v60  ;;  %v2218_v37 = vld [vmem:[#allocation2 + $0x18] sm:$0xf] }
 0x143   : > { %v2318_v41 = vor.u32 %v2317_v10, %v2314_v13  ;;  %v2226_v60 = vld [vmem:[#allocation2 + $0x38] sm:$0x1] }
 0x144   : > { %2128 = vrot.lane.b32.xlu1 %v2043_v45, %s5097_s11  ;;  %v1926_v57 = vpop.permute.xlu0 %1925  ;;  %v2373_v45 = vshrl.u32 %v2228_v17, 16  ;;  %v2325_v17 = vshrl.u32 %v6042_v56, 16 }
 0x145   : > { %2006 = vst.msk [vmem:[#allocation3 + $0x40] sm:$0xf] %vm1989_vm0, %v1926_v57  ;;  %v2347_v57 = vrot.slane %v2345_v47, 5  ;;  %v2417_v47 = vshll.u32 %v6059_v4, 16 }
 0x146   : > { %v1916_v31 = vpop.permute.xlu1 %1915  ;;  %v2375_v8 = vrot.slane %v2373_v45, 4  ;;  %v2327_v10 = vrot.slane %v2325_v17, 4 }
 0x147   : > { %2001 = vst.msk [vmem:[#allocation3 + $0x2c] sm:$0xf] %vm1989_vm0, %v1916_v31  ;;  %2124 = vrot.lane.b32.xlu2 %v2041_v54, %s5097_s11  ;;  %v2233_v54 = vld [vmem:[#allocation2 + $0x54] sm:$0xf]  ;;  %v6044_v31 = vrot.slane %v2369_v23, 5  ;;  %v2352_v32 = vor.u32 %v2351_v19, %v2347_v57  ;;  %v2445_v23 = vshrl.u32 %v2237_v11, 16 }
 0x148   : > { %v2408_v53 = vshrl.u32 %v2233_v54, 16  ;;  %v2411_v9 = vshll.u32 %v2233_v54, 16  ;;  %v6073_v13 = vrot.slane %v2417_v47, 5  ;;  %v2451_v19 = vshll.u32 %v2238_v59, 16  ;;  %v2239_v47 = vld [vmem:[#allocation2 + $0x6c] sm:$0xf] }
 0x149   : > { %v1930_v6 = vpop.permute.xlu2 %1929  ;;  %v2376_v12 = vor.u32 %v2375_v8, %v6044_v31 }
 0x14a   : > { %2144 = vrot.lane.b32.xlu0 %v2051_v62, %s5097_s11  ;;  %2008 = vst.msk [vmem:[#allocation3 + $0x48] sm:$0xf] %vm1989_vm0, %v1930_v6  ;;  %v2229_v62 = vld [vmem:[#allocation2 + $0x44] sm:$0x1]  ;;  %v2291_v6 = vshll.u32 %v2218_v37, 16 }
 0x14b   : > { %v2377_v55 = vrot.slane %v2376_v12, 4 }
 0x14c   : > { %2134 = vrot.lane.b32.xlu1 %v2046_v30, %s5097_s11  ;;  %v1932_v18 = vpop.permute.xlu0 %1931  ;;  %v2288_v30 = vshrl.u32 %v2218_v37, 16  ;;  %v2293_v43 = vrot.slane %v2291_v6, 5  ;;  %v2384_v37 = vshrl.u32 %v2230_v34, 16 }
 0x14d   : > { %2009 = vst.msk [vmem:[#allocation3 + $0x4c] sm:$0xf] %vm1989_vm0, %v1932_v18  ;;  %v2321_v18 = vshll.u32 %v6042_v56, 16  ;;  %v2223_v56 = vld [vmem:[#allocation2 + $0x2c] sm:$0x1] }
 0x14e   : > { %v1922_v15 = vpop.permute.xlu1 %1921  ;;  %v2290_v28 = vrot.slane %v2288_v30, 4 }
 0x14f   : > { %2004 = vst.msk [vmem:[#allocation3 + $0x38] sm:$0xf] %vm1989_vm0, %v1922_v15  ;;  %2130 = vrot.lane.b32.xlu2 %v2044_v63, %s5097_s11  ;;  %v2348_v63 = vsel %vm5282_vm11, %v2343_v51, %v2347_v57  ;;  %v2379_v15 = vshll.u32 %v2229_v62, 16  ;;  %v6057_v22 = vrot.slane %v2321_v18, 5  ;;  %v2242_v62 = vld [vmem:[#allocation2 + $0x78] sm:$0xf] }
 0x150   : > { %v2294_v36 = vor.u32 %v2293_v43, %v2290_v28  ;;  %v2360_v18 = vshrl.u32 %v2227_v38, 16  ;;  %v2480_v28 = vshrl.u32 %v2242_v62, 16  ;;  %v2483_v43 = vshll.u32 %v2242_v62, 16 }
 0x151   : > { %v1936_v24 = vpop.permute.xlu2 %1935  ;;  %v2381_v25 = vrot.slane %v2379_v15, 5 }
 0x152   : > { %2647 = vrot.lane.b32.xlu0 %v2276_v20, %s5098_s16  ;;  %2011 = vst.msk [vmem:[#allocation3 + $0x54] sm:$0xf] %vm1989_vm0, %v1936_v24  ;;  %v2410_v20 = vrot.slane %v2408_v53, 4  ;;  %v2319_v24 = vrot.slane %v2318_v41, 4  ;;  %v2295_v46 = vrot.slane %v2294_v36, 4  ;;  %v2386_v53 = vrot.slane %v2384_v37, 4 }
 0x153   : > { %v2382_v40 = vsel %vm5282_vm11, %v2377_v55, %v2381_v25  ;;  %v2331_v41 = vshll.u32 %v2223_v56, 16  ;;  %v2482_v17 = vrot.slane %v2480_v28, 4  ;;  %v2246_v36 = vld [vmem:[#allocation2 + $0x88] sm:$0xf] }
 0x154   : > { %2140 = vrot.lane.b32.xlu1 %v2049_v21, %s5097_s11  ;;  %v1938_v14 = vpop.permute.xlu0 %1937  ;;  %v2413_v21 = vrot.slane %v2411_v9, 5  ;;  %v2324_v45 = vsel %vm5282_vm11, %v2319_v24, %v6057_v22  ;;  %v2300_v6 = vsel %vm5282_vm11, %v2295_v46, %v6022_v50  ;;  %v2513_v37 = vshll.u32 %v2246_v36, 16 }
 0x155   : > { %2012 = vst.msk [vmem:[#allocation3 + $0x58] sm:$0xf] %vm1989_vm0, %v1938_v14 }
 0x156   : > { %v1928_v61 = vpop.permute.xlu1 %1927  ;;  %v2414_v1 = vor.u32 %v2413_v21, %v2410_v20  ;;  %v2421_v20 = vshrl.u32 %v6059_v4, 16 }
 0x157   : > { %2007 = vst.msk [vmem:[#allocation3 + $0x44] sm:$0xf] %vm1989_vm0, %v1928_v61  ;;  %2136 = vrot.lane.b32.xlu2 %v2047_v27, %s5097_s11  ;;  %v2053_v27 = vld [vmem:[#allocation2 + $0xc4] sm:$0xf]  ;;  %v2355_v61 = vshll.u32 %v2226_v60, 16  ;;  %v2362_v60 = vrot.slane %v2360_v18, 4 }
 0x158   : > { %v2415_v57 = vrot.slane %v2414_v1, 4  ;;  %v2423_v1 = vrot.slane %v2421_v20, 4  ;;  %v2247_v18 = vld [vmem:[#allocation2 + $0x8c] sm:$0x1]  ;;  %v2240_v20 = vld [vmem:[#allocation2 + $0x70] sm:$0xf] }
 0x159   : > { %v1942_v49 = vpop.permute.xlu2 %1941  ;;  %v2357_v51 = vrot.slane %v2355_v61, 5 }
 0x15a   : > { %2653 = vrot.lane.b32.xlu0 %v2310_v39, %s5098_s16  ;;  %2014 = vst.msk [vmem:[#allocation3 + $0x60] sm:$0xf] %vm1989_vm0, %v1942_v49  ;;  %v2441_v39 = vshll.u32 %v2237_v11, 16  ;;  %v2387_v49 = vshll.u32 %v2230_v34, 16 }
 0x15c   : > { %2146 = vrot.lane.b32.xlu1 %v2052_v26, %s5097_s11  ;;  %v1944_v58 = vpop.permute.xlu0 %1943  ;;  %v2353_v26 = vrot.slane %v2352_v32, 4  ;;  %v6076_v8 = vrot.slane %v2441_v39, 5  ;;  %v2389_v9 = vrot.slane %v2387_v49, 5  ;;  %v6096_v32 = vld [vmem:[#allocation2 + $0x7c] sm:$0xf]  ;;  %v2517_v49 = vshrl.u32 %v2246_v36, 16 }
 0x15d   : > { %2015 = vst.msk [vmem:[#allocation3 + $0x64] sm:$0xf] %vm1989_vm0, %v1944_v58  ;;  %v2447_v58 = vrot.slane %v2445_v23, 4  ;;  %v2235_v23 = vld [vmem:[#allocation2 + $0x5c] sm:$0x1]  ;;  %v2489_v46 = vshll.u32 %v6096_v32, 16 }
 0x15e   : > { %v1934_v0 = vpop.permute.xlu1 %1933  ;;  %v2358_v50 = vsel %vm5282_vm11, %v2353_v26, %v2357_v51  ;;  %v2390_v21 = vor.u32 %v2389_v9, %v2386_v53  ;;  %v2427_v56 = vshll.u32 %v2235_v23, 16  ;;  %v2232_v9 = vld [vmem:[#allocation2 + $0x50] sm:$0x1]  ;;  %v2244_v23 = vld [vmem:[#allocation2 + $0x80] sm:$0x1] }
 0x15f   : > { %2010 = vst.msk [vmem:[#allocation3 + $0x50] sm:$0xf] %vm1989_vm0, %v1934_v0  ;;  %2142 = vrot.lane.b32.xlu2 %v2050_v33, %s5097_s11  ;;  %v2231_v33 = vld [vmem:[#allocation2 + $0x4c] sm:$0xf]  ;;  %v2328_v0 = vor.u32 %v2327_v10, %v6057_v22  ;;  %v2448_v15 = vor.u32 %v2447_v58, %v6076_v8  ;;  %v2333_v22 = vrot.slane %v2331_v41, 5  ;;  %v2459_v10 = vshll.u32 %v2239_v47, 16 }
 0x160   : > { %v2397_v61 = vshrl.u32 %v2231_v33, 16  ;;  %v2391_v34 = vrot.slane %v2390_v21, 4  ;;  %v683_v58 = vrot.slane %v6009_v48, 4  ;;  %v6112_v53 = vrot.slane %v2489_v46, 5 }
 0x161   : > { %v1948_v42 = vpop.permute.xlu2 %1947  ;;  %v2329_v24 = vrot.slane %v2328_v0, 4  ;;  %v2449_v11 = vrot.slane %v2448_v15, 4  ;;  %v6114_v0 = vrot.slane %v2513_v37, 5  ;;  %v2519_v41 = vrot.slane %v2517_v49, 4 }
 0x162   : > { %2659 = vrot.lane.b32.xlu0 %v2348_v63, %s5098_s16  ;;  %2017 = vst.msk [vmem:[#allocation3 + $0x6c] sm:$0xf] %vm1989_vm0, %v1948_v42  ;;  %v2363_v63 = vshll.u32 %v2227_v38, 16  ;;  %v2393_v42 = vshll.u32 %v2231_v33, 16  ;;  %v2399_v62 = vrot.slane %v2397_v61, 4  ;;  %v2461_v48 = vrot.slane %v2459_v10, 5 }
 0x163   : > { %v2334_v39 = vsel %vm5282_vm11, %v2329_v24, %v2333_v22  ;;  %v2429_v15 = vrot.slane %v2427_v56, 5  ;;  %v2520_v22 = vor.u32 %v2519_v41, %v6114_v0  ;;  %v2469_v10 = vshrl.u32 %v2240_v20, 16 }
 0x164   : > { %2649 = vrot.lane.b32.xlu1 %v2286_v52, %s5098_s16  ;;  %v1950_v14 = vpop.permute.xlu0 %1949  ;;  %v2420_v52 = vsel %vm5282_vm11, %v2415_v57, %v6073_v13  ;;  %v2365_v55 = vrot.slane %v2363_v63, 5  ;;  %v2456_v57 = vshrl.u32 %v2239_v47, 16 }
 0x165   : > { %2018 = vst.msk [vmem:[#allocation3 + $0x70] sm:$0xf] %vm1989_vm0, %v1950_v14  ;;  %v2453_v14 = vrot.slane %v2451_v19, 5 }
 0x166   : > { %v1940_v29 = vpop.permute.xlu1 %1939 }
 0x167   : > { %2013 = vst.msk [vmem:[#allocation3 + $0x5c] sm:$0xf] %vm1989_vm0, %v1940_v29  ;;  %2148 = vrot.lane.b32.xlu2 %v2053_v27, %s5097_s11  ;;  %v2485_v27 = vrot.slane %v2483_v43, 5  ;;  %v2395_v29 = vrot.slane %v2393_v42, 5  ;;  %v2454_v51 = vsel %vm5282_vm11, %v2449_v11, %v2453_v14  ;;  %v2251_v43 = vld [vmem:[#allocation2 + $0x9c] sm:$0xf] }
 0x168   : > { %v2403_v42 = vshll.u32 %v2232_v9, 16  ;;  %v2552_v14 = vshrl.u32 %v2251_v43, 16 }
 0x169   : > { %v1954_v54 = vpop.permute.xlu2 %1953  ;;  %v2486_v26 = vor.u32 %v2485_v27, %v2482_v17  ;;  %v2396_v38 = vsel %vm5282_vm11, %v2391_v34, %v2395_v29  ;;  %v2400_v21 = vor.u32 %v2399_v62, %v2395_v29  ;;  %v2555_v17 = vshll.u32 %v2251_v43, 16  ;;  %v2241_v43 = vld [vmem:[#allocation2 + $0x74] sm:$0x1] }
 0x16a   : > { %2665 = vrot.lane.b32.xlu0 %v2382_v40, %s5098_s16  ;;  %2020 = vst.msk [vmem:[#allocation3 + $0x78] sm:$0xf] %vm1989_vm0, %v1954_v54  ;;  %v2424_v54 = vor.u32 %v2423_v1, %v6073_v13  ;;  %v2458_v13 = vrot.slane %v2456_v57, 4  ;;  %v2405_v1 = vrot.slane %v2403_v42, 5  ;;  %v2521_v29 = vrot.slane %v2520_v22, 4 }
 0x16b   : > { %v2487_v33 = vrot.slane %v2486_v26, 4  ;;  %v2401_v61 = vrot.slane %v2400_v21, 4  ;;  %v2255_v26 = vld [vmem:[#allocation2 + $0xac] sm:$0xf]  ;;  %v6138_v57 = vld [vmem:[#allocation2 + $0xa0] sm:$0xf] }
 0x16c   : > { %2655 = vrot.lane.b32.xlu1 %v2324_v45, %s5098_s16  ;;  %v1956_v30 = vpop.permute.xlu0 %1955  ;;  %v2366_v45 = vor.u32 %v2365_v55, %v2362_v60  ;;  %v2523_v60 = vshll.u32 %v2247_v18, 16  ;;  %v848_v55 = vld [vmem:[#allocation2 + $0xc8] sm:$0x1]  ;;  %v2462_v11 = vor.u32 %v2461_v48, %v2458_v13  ;;  %v2585_v62 = vshll.u32 %v2255_v26, 16 }
 0x16d   : > { %2021 = vst.msk [vmem:[#allocation3 + $0x7c] sm:$0xf] %vm1989_vm0, %v1956_v30  ;;  %v2236_v30 = vld [vmem:[#allocation2 + $0x60] sm:$0xf]  ;;  %v849_v36 = vsel %vm5158_vm6, %v683_v58, %v848_v55  ;;  %v2561_v9 = vshll.u32 %v6138_v57, 16 }
 0x16e   : > { %v1946_v12 = vpop.permute.xlu1 %1945  ;;  %v2367_v59 = vrot.slane %v2366_v45, 4  ;;  %v2432_v19 = vshrl.u32 %v2236_v30, 16  ;;  %v2435_v28 = vshll.u32 %v2236_v30, 16  ;;  %850 = vst [vmem:[#allocation2 + $0xc8] sm:$0x1] %v849_v36  ;;  %v2554_v45 = vrot.slane %v2552_v14, 4 }
 0x16f   : > { %2016 = vst.msk [vmem:[#allocation3 + $0x68] sm:$0xf] %vm1989_vm0, %v1946_v12  ;;  %2651 = vrot.lane.b32.xlu2 %v2300_v6, %s5098_s16  ;;  %v2425_v12 = vrot.slane %v2424_v54, 4  ;;  %v2463_v37 = vrot.slane %v2462_v11, 4  ;;  %v2406_v54 = vsel %vm5282_vm11, %v2401_v61, %v2405_v1  ;;  %v2589_v30 = vshrl.u32 %v2255_v26, 16 }
 0x170   : > { %v2434_v27 = vrot.slane %v2432_v19, 4  ;;  %v6158_v42 = vrot.slane %v2561_v9, 5  ;;  %v2260_v11 = vld [vmem:[#allocation2 + $0xc0] sm:$0xf]  ;;  %v2249_v36 = vld [vmem:[#allocation2 + $0x94] sm:$0xf] }
 0x171   : > { %v2089_v25 = vpop.permute.xlu2 %2088  ;;  %v2565_v1 = vshrl.u32 %v6138_v57, 16  ;;  %v2257_v9 = vld [vmem:[#allocation2 + $0xb4] sm:$0xf] }
 0x172   : > { %2671 = vrot.lane.b32.xlu0 %v2420_v52, %s5098_s16  ;;  %2184 = vst.msk [vmem:[#allocation3 + $0x4] sm:$0xf] %vm2182_vm1, %v2089_v25  ;;  %v2493_v52 = vshrl.u32 %v6096_v32, 16  ;;  %v2492_v25 = vsel %vm5282_vm11, %v2487_v33, %v6112_v53  ;;  %v2437_v32 = vrot.slane %v2435_v28, 5 }
 0x173   : > { %v2567_v57 = vrot.slane %v2565_v1, 4 }
 0x174   : > { %2661 = vrot.lane.b32.xlu1 %v2358_v50, %s5098_s16  ;;  %v2091_v4 = vpop.permute.xlu0 %2090  ;;  %v2372_v50 = vsel %vm5282_vm11, %v2367_v59, %v6044_v31  ;;  %v2465_v31 = vshll.u32 %v2240_v20, 16  ;;  %v2495_v47 = vrot.slane %v2493_v52, 4  ;;  %v2248_v59 = vld [vmem:[#allocation2 + $0x90] sm:$0xf]  ;;  %v2591_v52 = vrot.slane %v2589_v30, 4 }
 0x175   : > { %2185 = vst.msk [vmem:[#allocation3 + $0x8] sm:$0xf] %vm2182_vm1, %v2091_v4  ;;  %v2430_v4 = vsel %vm5282_vm11, %v2425_v12, %v2429_v15  ;;  %v1048_v13 = vld [vmem:[#allocation2 + $0xc8] sm:$0x1]  ;;  %v2528_v18 = vshrl.u32 %v2248_v59, 16  ;;  %v2471_v12 = vrot.slane %v2469_v10, 4 }
 0x176   : > { %v1952_v40 = vpop.permute.xlu1 %1951  ;;  %v6136_v49 = vrot.slane %v2465_v31, 5  ;;  %v2496_v56 = vor.u32 %v2495_v47, %v6112_v53  ;;  %v2245_v15 = vld [vmem:[#allocation2 + $0x84] sm:$0xf]  ;;  %v1049_v20 = vsel %vm5225_vm8, 0, %v1048_v13  ;;  %v2624_v47 = vshrl.u32 %v2260_v11, 16 }
 0x177   : > { %2019 = vst.msk [vmem:[#allocation3 + $0x74] sm:$0xf] %vm1989_vm0, %v1952_v40  ;;  %2657 = vrot.lane.b32.xlu2 %v2334_v39, %s5098_s16  ;;  %v2525_v39 = vrot.slane %v2523_v60, 5  ;;  %v2557_v40 = vrot.slane %v2555_v17, 5  ;;  %v2504_v55 = vshrl.u32 %v2245_v15, 16  ;;  %v2530_v14 = vrot.slane %v2528_v18, 4 }
 0x178   : > { %v2468_v41 = vsel %vm5282_vm11, %v2463_v37, %v6136_v49  ;;  %v2497_v48 = vrot.slane %v2496_v56, 4  ;;  %1050 = vst [vmem:[#allocation2 + $0xc8] sm:$0x1] %v1049_v20  ;;  %v2472_v31 = vor.u32 %v2471_v12, %v6136_v49  ;;  %v2626_v10 = vrot.slane %v2624_v47, 4  ;;  %v2250_v20 = vld [vmem:[#allocation2 + $0x98] sm:$0x1] }
 0x179   : > { %v2095_v6 = vpop.permute.xlu2 %2094  ;;  %v2558_v33 = vor.u32 %v2557_v40, %v2554_v45  ;;  %v2537_v40 = vshll.u32 %v2249_v36, 16  ;;  %v2568_v13 = vor.u32 %v2567_v57, %v6158_v42 }
 0x17a   : > { %2677 = vrot.lane.b32.xlu0 %v2454_v51, %s5098_s16  ;;  %2187 = vst.msk [vmem:[#allocation3 + $0x10] sm:$0xf] %vm2182_vm1, %v2095_v6  ;;  %v2438_v51 = vor.u32 %v2437_v32, %v2434_v27  ;;  %v2526_v6 = vsel %vm5282_vm11, %v2521_v29, %v2525_v39  ;;  %v2475_v27 = vshll.u32 %v2241_v43, 16  ;;  %v2506_v39 = vrot.slane %v2504_v55, 4 }
 0x17b   : > { %v2559_v21 = vrot.slane %v2558_v33, 4  ;;  %v2473_v26 = vrot.slane %v2472_v31, 4  ;;  %v6194_v31 = vld [vmem:[#allocation2 + $0x10] sm:$0xf] }
 0x17c   : > { %2667 = vrot.lane.b32.xlu1 %v2396_v38, %s5098_s16  ;;  %v2097_v63 = vpop.permute.xlu0 %2096  ;;  %v2499_v38 = vshll.u32 %v2244_v23, 16  ;;  %v2439_v53 = vrot.slane %v2438_v51, 4  ;;  %v2874_v1 = vrot.slane %v6194_v31, 5 }
 0x17d   : > { %2188 = vst.msk [vmem:[#allocation3 + $0x14] sm:$0xf] %vm2182_vm1, %v2097_v63  ;;  %v2531_v63 = vshll.u32 %v2248_v59, 16 }
 0x17e   : > { %v2087_v24 = vpop.permute.xlu1 %2086  ;;  %v2501_v28 = vrot.slane %v2499_v38, 5  ;;  %v2444_v60 = vsel %vm5282_vm11, %v2439_v53, %v6076_v8  ;;  %v2564_v8 = vsel %vm5282_vm11, %v2559_v21, %v6158_v42  ;;  %v2253_v38 = vld [vmem:[#allocation2 + $0xa4] sm:$0x1]  ;;  %v2254_v21 = vld [vmem:[#allocation2 + $0xa8] sm:$0xf]  ;;  %v2569_v42 = vrot.slane %v2568_v13, 4 }
 0x17f   : > { %2183 = vst.msk [vmem:[#allocation3] sm:$0xf] %vm2182_vm1, %v2087_v24  ;;  %2663 = vrot.lane.b32.xlu2 %v2372_v50, %s5098_s16  ;;  %v6153_v50 = vrot.slane %v2585_v62, 5  ;;  %v2256_v24 = vld [vmem:[#allocation2 + $0xb0] sm:$0x1]  ;;  %v2533_v17 = vrot.slane %v2531_v63, 5 }
 0x180   : > { %v2595_v61 = vshll.u32 %v2256_v24, 16  ;;  %v2502_v29 = vsel %vm5282_vm11, %v2497_v48, %v2501_v28  ;;  %v2261_v62 = vld [vmem:[#allocation2 + $0xc4] sm:$0xf]  ;;  %v2571_v48 = vshll.u32 %v2253_v38, 16 }
 0x181   : > { %v2101_v34 = vpop.permute.xlu2 %2100  ;;  %v2534_v45 = vor.u32 %v2533_v17, %v2530_v14  ;;  %v2633_v63 = vshll.u32 %v2261_v62, 16  ;;  %v2637_v47 = vshrl.u32 %v2261_v62, 16  ;;  %v2262_v62 = vld [vmem:[#allocation2 + $0xc8] sm:$0x1] }
 0x182   : > { %2683 = vrot.lane.b32.xlu0 %v2492_v25, %s5098_s16  ;;  %2190 = vst.msk [vmem:[#allocation3 + $0x1c] sm:$0xf] %vm2182_vm1, %v2101_v34  ;;  %v2507_v25 = vshll.u32 %v2245_v15, 16  ;;  %v2627_v34 = vshll.u32 %v2260_v11, 16  ;;  %v2597_v51 = vrot.slane %v2595_v61, 5  ;;  %v2600_v15 = vshrl.u32 %v2257_v9, 16 }
 0x183   : > { %v2535_v30 = vrot.slane %v2534_v45, 4  ;;  %v2573_v24 = vrot.slane %v2571_v48, 5  ;;  %v2258_v11 = vld [vmem:[#allocation2 + $0xb8] sm:$0xf] }
 0x184   : > { %2673 = vrot.lane.b32.xlu1 %v2430_v4, %s5098_s16  ;;  %v2103_v46 = vpop.permute.xlu0 %2102  ;;  %v2592_v4 = vor.u32 %v2591_v52, %v6153_v50  ;;  %v2509_v23 = vrot.slane %v2507_v25, 5  ;;  %v2602_v14 = vrot.slane %v2600_v15, 4  ;;  %v2613_v57 = vshrl.u32 %v2258_v11, 16 }
 0x185   : > { %2191 = vst.msk [vmem:[#allocation3 + $0x20] sm:$0xf] %vm2182_vm1, %v2103_v46  ;;  %v2477_v46 = vrot.slane %v2475_v27, 5 }
 0x186   : > { %v2093_v58 = vpop.permute.xlu1 %2092  ;;  %v2593_v49 = vrot.slane %v2592_v4, 4  ;;  %v2510_v59 = vor.u32 %v2509_v23, %v2506_v39  ;;  %v2579_v4 = vshll.u32 %v2254_v21, 16  ;;  %v2778_v39 = vld [vmem:[#allocation2 + $0x14] sm:$0x1]  ;;  %v2615_v48 = vrot.slane %v2613_v57, 4 }
 0x187   : > { %2186 = vst.msk [vmem:[#allocation3 + $0xc] sm:$0xf] %vm2182_vm1, %v2093_v58  ;;  %2669 = vrot.lane.b32.xlu2 %v2406_v54, %s5098_s16  ;;  %v2629_v54 = vrot.slane %v2627_v34, 5  ;;  %v2541_v58 = vshrl.u32 %v2249_v36, 16  ;;  %v2478_v33 = vsel %vm5282_vm11, %v2473_v26, %v2477_v46  ;;  %v2576_v36 = vshrl.u32 %v2254_v21, 16 }
 0x188   : > { %v2598_v53 = vsel %vm5282_vm11, %v2593_v49, %v2597_v51  ;;  %v2511_v12 = vrot.slane %v2510_v59, 4  ;;  %v2581_v26 = vrot.slane %v2579_v4, 5  ;;  %v2877_v49 = vrot.slane %v2778_v39, 5  ;;  %v2791_v39 = vld [vmem:[#allocation2 + $0x48] sm:$0xe] }
 0x189   : > { %v2107_v19 = vpop.permute.xlu2 %2106  ;;  %v2630_v18 = vor.u32 %v2629_v54, %v2626_v10  ;;  %v2543_v43 = vrot.slane %v2541_v58, 4  ;;  %v2639_v10 = vrot.slane %v2637_v47, 4  ;;  %v6251_v57 = vld [vmem:[#allocation2 + $0x58] sm:$0xf] }
 0x18a   : > { %2689 = vrot.lane.b32.xlu0 %v2526_v6, %s5098_s16  ;;  %2193 = vst.msk [vmem:[#allocation3 + $0x28] sm:$0xf] %vm2182_vm1, %v2107_v19  ;;  %v2539_v6 = vrot.slane %v2537_v40, 5  ;;  %v2603_v19 = vshll.u32 %v2257_v9, 16  ;;  %v2516_v25 = vsel %vm5282_vm11, %v2511_v12, %v6114_v0  ;;  %v2574_v0 = vsel %vm5282_vm11, %v2569_v42, %v2573_v24  ;;  %v2783_v9 = vld [vmem:[#allocation2 + $0x28] sm:$0xf] }
 0x18b   : > { %v2578_v40 = vrot.slane %v2576_v36, 4  ;;  %v2888_v15 = vrot.slane %v2783_v9, 5  ;;  %v2788_v9 = vld [vmem:[#allocation2 + $0x3c] sm:$0xe] }
 0x18c   : > { %2679 = vrot.lane.b32.xlu1 %v2468_v41, %s5098_s16  ;;  %v2109_v22 = vpop.permute.xlu0 %2108  ;;  %v2540_v28 = vsel %vm5282_vm11, %v2535_v30, %v2539_v6  ;;  %v2605_v17 = vrot.slane %v2603_v19, 5  ;;  %v2544_v27 = vor.u32 %v2543_v43, %v2539_v6  ;;  %v6221_v43 = vld [vmem:[#allocation2 + $0x34] sm:$0xf] }
 0x18d   : > { %2194 = vst.msk [vmem:[#allocation3 + $0x2c] sm:$0xf] %vm2182_vm1, %v2109_v22  ;;  %v2631_v22 = vrot.slane %v2630_v18, 4  ;;  %v2582_v38 = vor.u32 %v2581_v26, %v2578_v40 }
 0x18e   : > { %v2099_v32 = vpop.permute.xlu1 %2098  ;;  %v2606_v34 = vor.u32 %v2605_v17, %v2602_v14  ;;  %v2545_v23 = vrot.slane %v2544_v27, 4  ;;  %v2779_v17 = vld [vmem:[#allocation2 + $0x18] sm:$0xe]  ;;  %v2780_v27 = vld [vmem:[#allocation2 + $0x1c] sm:$0xf] }
 0x18f   : > { %2189 = vst.msk [vmem:[#allocation3 + $0x18] sm:$0xf] %vm2182_vm1, %v2099_v32  ;;  %2675 = vrot.lane.b32.xlu2 %v2444_v60, %s5098_s16  ;;  %v2635_v60 = vrot.slane %v2633_v63, 5  ;;  %v2547_v32 = vshll.u32 %v2250_v20, 16  ;;  %v2583_v13 = vrot.slane %v2582_v38, 4 }
 0x190   : > { %v2607_v54 = vrot.slane %v2606_v34, 4  ;;  %v2259_v63 = vld [vmem:[#allocation2 + $0xbc] sm:$0x1]  ;;  %v2776_v34 = vld [vmem:[#allocation2 + $0xc] sm:$0xe] }
 0x191   : > { %v2113_v37 = vpop.permute.xlu2 %2112  ;;  %v2549_v45 = vrot.slane %v2547_v32, 5  ;;  %v2640_v6 = vor.u32 %v2639_v10, %v2635_v60  ;;  %v2588_v20 = vsel %vm5282_vm11, %v2583_v13, %v6153_v50  ;;  %v2619_v42 = vshll.u32 %v2259_v63, 16  ;;  %v2781_v38 = vld [vmem:[#allocation2 + $0x20] sm:$0x1] }
 0x192   : > { %2695 = vrot.lane.b32.xlu0 %v2564_v8, %s5098_s16  ;;  %2196 = vst.msk [vmem:[#allocation3 + $0x34] sm:$0xf] %vm2182_vm1, %v2113_v37  ;;  %v2636_v8 = vsel %vm5282_vm11, %v2631_v22, %v2635_v60  ;;  %v2876_v37 = vrot.slane %v2874_v1, 4  ;;  %v2895_v60 = vrot.slane %v6221_v43, 5  ;;  %v4880_v40 = vrot.slane %v2776_v34, 9 }
 0x193   : > { %v2550_v58 = vsel %vm5282_vm11, %v2545_v23, %v2549_v45  ;;  %v2621_v14 = vrot.slane %v2619_v42, 5  ;;  %v2792_v23 = vld [vmem:[#allocation2 + $0x4c] sm:$0xf]  ;;  %v2890_v10 = vrot.slane %v2888_v15, 4  ;;  %v2884_v31 = vrot.slane %v2781_v38, 5 }
 0x194   : > { %2685 = vrot.lane.b32.xlu1 %v2502_v29, %s5098_s16  ;;  %v2115_v56 = vpop.permute.xlu0 %2114  ;;  %v2609_v29 = vshll.u32 %v2258_v11, 16  ;;  %v2878_v30 = vsel %vm5723_vm14, %v2876_v37, %v2877_v49  ;;  %v2897_v32 = vrot.slane %v2895_v60, 4  ;;  %v4885_v37 = vrot.slane %v2791_v39, 9  ;;  %v2797_v34 = vld [vmem:[#allocation2 + $0x60] sm:$0xe] }
 0x195   : > { %2197 = vst.msk [vmem:[#allocation3 + $0x38] sm:$0xf] %vm2182_vm1, %v2115_v56  ;;  %v2909_v49 = vrot.slane %v2792_v23, 5 }
 0x196   : > { %v2105_v41 = vpop.permute.xlu1 %2104  ;;  %v2611_v56 = vrot.slane %v2609_v29, 5 }
 0x197   : > { %2192 = vst.msk [vmem:[#allocation3 + $0x24] sm:$0xf] %vm2182_vm1, %v2105_v41  ;;  %2681 = vrot.lane.b32.xlu2 %v2478_v33, %s5098_s16  ;;  %v2782_v33 = vld [vmem:[#allocation2 + $0x24] sm:$0xe] }
 0x198   : > { %v2612_v41 = vsel %vm5282_vm11, %v2607_v54, %v2611_v56  ;;  %v4882_v12 = vrot.slane %v2782_v33, 9  ;;  %v2616_v21 = vor.u32 %v2615_v48, %v2611_v56  ;;  %v2875_v56 = vsel %vm5723_vm14, %v4880_v40, %v2874_v1 }
 0x199   : > { %v2119_v52 = vpop.permute.xlu2 %2118  ;;  %v4887_v40 = vrot.slane %v2797_v34, 9 }
 0x19a   : > { %2701 = vrot.lane.b32.xlu0 %v2598_v53, %s5098_s16  ;;  %2199 = vst.msk [vmem:[#allocation3 + $0x40] sm:$0xf] %vm2182_vm1, %v2119_v52  ;;  %v2643_v53 = vshll.u32 %v2262_v62, 16  ;;  %v2889_v22 = vsel %vm5723_vm14, %v4882_v12, %v2888_v15  ;;  %v2617_v11 = vrot.slane %v2616_v21, 4  ;;  %v2916_v62 = vrot.slane %v6251_v57, 5 }
 0x19c   : > { %2691 = vrot.lane.b32.xlu1 %v2540_v28, %s5098_s16  ;;  %v2121_v55 = vpop.permute.xlu0 %2120  ;;  %v2641_v28 = vrot.slane %v2640_v6, 4  ;;  %v2645_v52 = vrot.slane %v2643_v53, 5  ;;  %v2918_v53 = vrot.slane %v2916_v62, 4 }
 0x19d   : > { %2200 = vst.msk [vmem:[#allocation3 + $0x44] sm:$0xf] %vm2182_vm1, %v2121_v55  ;;  %v2787_v55 = vld [vmem:[#allocation2 + $0x38] sm:$0x1] }
 0x19e   : > { %v2111_v61 = vpop.permute.xlu1 %2110  ;;  %v2898_v36 = vrot.slane %v2787_v55, 5 }
 0x19f   : > { %2195 = vst.msk [vmem:[#allocation3 + $0x30] sm:$0xf] %vm2182_vm1, %v2111_v61  ;;  %2687 = vrot.lane.b32.xlu2 %v2516_v25, %s5098_s16  ;;  %v2646_v25 = vsel %vm5282_vm11, %v2641_v28, %v2645_v52  ;;  %v4881_v61 = vrot.slane %v2779_v17, 9  ;;  %v2800_v52 = vld [vmem:[#allocation2 + $0x6c] sm:$0xe] }
 0x1a0   : > { %v2899_v29 = vsel %vm5723_vm14, %v2897_v32, %v2898_v36  ;;  %v4888_v55 = vrot.slane %v2800_v52, 9  ;;  %v2790_v36 = vld [vmem:[#allocation2 + $0x44] sm:$0x1] }
 0x1a1   : > { %v2125_v46 = vpop.permute.xlu2 %2124  ;;  %v2905_v43 = vrot.slane %v2790_v36, 5  ;;  %v6342_v36 = vld [vmem:[#allocation2 + $0xb8] sm:$0xf] }
 0x1a2   : > { %2707 = vrot.lane.b32.xlu0 %v2636_v8, %s5098_s16  ;;  %2202 = vst.msk [vmem:[#allocation3 + $0x4c] sm:$0xf] %vm2182_vm1, %v2125_v46  ;;  %v2881_v8 = vrot.slane %v2780_v27, 5  ;;  %v2784_v46 = vld [vmem:[#allocation2 + $0x2c] sm:$0x1] }
 0x1a3   : > { %v2891_v54 = vrot.slane %v2784_v46, 5 }
 0x1a4   : > { %2697 = vrot.lane.b32.xlu1 %v2574_v0, %s5098_s16  ;;  %v2127_v51 = vpop.permute.xlu0 %2126  ;;  %v2622_v0 = vsel %vm5282_vm11, %v2617_v11, %v2621_v14  ;;  %v2882_v45 = vsel %vm5723_vm14, %v4881_v61, %v2881_v8  ;;  %v2883_v33 = vrot.slane %v2881_v8, 4  ;;  %v6282_v14 = vld [vmem:[#allocation2 + $0x7c] sm:$0xf]  ;;  %v2805_v8 = vld [vmem:[#allocation2 + $0x80] sm:$0x1] }
 0x1a5   : > { %2203 = vst.msk [vmem:[#allocation3 + $0x50] sm:$0xf] %vm2182_vm1, %v2127_v51  ;;  %v2892_v6 = vsel %vm5723_vm14, %v2890_v10, %v2891_v54  ;;  %v2937_v61 = vrot.slane %v6282_v14, 5  ;;  %v2940_v23 = vrot.slane %v2805_v8, 5  ;;  %v2809_v10 = vld [vmem:[#allocation2 + $0x90] sm:$0xe] }
 0x1a6   : > { %v2117_v59 = vpop.permute.xlu1 %2116  ;;  %v2885_v12 = vsel %vm5723_vm14, %v2883_v33, %v2884_v31  ;;  %v6308_v54 = vld [vmem:[#allocation2 + $0x94] sm:$0xf]  ;;  %v6316_v31 = vld [vmem:[#allocation2 + $0xa0] sm:$0xf] }
 0x1a7   : > { %2198 = vst.msk [vmem:[#allocation3 + $0x3c] sm:$0xf] %vm2182_vm1, %v2117_v59  ;;  %2693 = vrot.lane.b32.xlu2 %v2550_v58, %s5098_s16  ;;  %v2910_v59 = vsel %vm5723_vm14, %v4885_v37, %v2909_v49  ;;  %v2939_v39 = vrot.slane %v2937_v61, 4 }
 0x1a9   : > { %v2131_v18 = vpop.permute.xlu2 %2130 }
 0x1aa   : > { %2986 = vrot.lane.b32.xlu0 %v2878_v30, %s5099_s17  ;;  %2205 = vst.msk [vmem:[#allocation3 + $0x58] sm:$0xf] %vm2182_vm1, %v2131_v18  ;;  %v2796_v30 = vld [vmem:[#allocation2 + $0x5c] sm:$0x1]  ;;  %v4884_v18 = vrot.slane %v2788_v9, 9 }
 0x1ab   : > { %v2919_v13 = vrot.slane %v2796_v30, 5  ;;  %v4891_v30 = vrot.slane %v2809_v10, 9 }
 0x1ac   : > { %2703 = vrot.lane.b32.xlu1 %v2612_v41, %s5098_s16  ;;  %v2133_v19 = vpop.permute.xlu0 %2132  ;;  %v2789_v41 = vld [vmem:[#allocation2 + $0x40] sm:$0xf] }
 0x1ad   : > { %2206 = vst.msk [vmem:[#allocation3 + $0x5c] sm:$0xf] %vm2182_vm1, %v2133_v19  ;;  %v2902_v63 = vrot.slane %v2789_v41, 5  ;;  %v2785_v19 = vld [vmem:[#allocation2 + $0x30] sm:$0xe]  ;;  %v2920_v28 = vsel %vm5723_vm14, %v2918_v53, %v2919_v13 }
 0x1ae   : > { %v2123_v24 = vpop.permute.xlu1 %2122  ;;  %v4883_v42 = vrot.slane %v2785_v19, 9  ;;  %v2799_v13 = vld [vmem:[#allocation2 + $0x68] sm:$0x1]  ;;  %v2806_v19 = vld [vmem:[#allocation2 + $0x84] sm:$0xe] }
 0x1af   : > { %2201 = vst.msk [vmem:[#allocation3 + $0x48] sm:$0xf] %vm2182_vm1, %v2123_v24  ;;  %2699 = vrot.lane.b32.xlu2 %v2588_v20, %s5098_s16  ;;  %v2801_v20 = vld [vmem:[#allocation2 + $0x70] sm:$0xf]  ;;  %v2903_v21 = vsel %vm5723_vm14, %v4884_v18, %v2902_v63  ;;  %v2958_v18 = vrot.slane %v6316_v31, 5  ;;  %v2926_v57 = vrot.slane %v2799_v13, 5 }
 0x1b0   : > { %v2896_v27 = vsel %vm5723_vm14, %v4883_v42, %v2895_v60  ;;  %v3307_v42 = vld [vmem:[#allocation2 + $0x18] sm:$0xf]  ;;  %v2812_v13 = vld [vmem:[#allocation2 + $0x9c] sm:$0xe] }
 0x1b1   : > { %v2137_v50 = vpop.permute.xlu2 %2136  ;;  %v2960_v52 = vrot.slane %v2958_v18, 4 }
 0x1b2   : > { %2992 = vrot.lane.b32.xlu0 %v2889_v22, %s5099_s17  ;;  %2208 = vst.msk [vmem:[#allocation3 + $0x64] sm:$0xf] %vm2182_vm1, %v2137_v50  ;;  %v2793_v22 = vld [vmem:[#allocation2 + $0x50] sm:$0x1]  ;;  %v2911_v50 = vrot.slane %v2909_v49, 4 }
 0x1b3   : > { %v2912_v17 = vrot.slane %v2793_v22, 5  ;;  %v2794_v49 = vld [vmem:[#allocation2 + $0x54] sm:$0xe] }
 0x1b4   : > { %2709 = vrot.lane.b32.xlu1 %v2646_v25, %s5098_s16  ;;  %v2139_v4 = vpop.permute.xlu0 %2138  ;;  %v2930_v25 = vrot.slane %v2801_v20, 5 }
 0x1b5   : > { %2209 = vst.msk [vmem:[#allocation3 + $0x68] sm:$0xf] %vm2182_vm1, %v2139_v4 }
 0x1b6   : > { %v2129_v47 = vpop.permute.xlu1 %2128  ;;  %v2931_v4 = vsel %vm5723_vm14, %v4888_v55, %v2930_v25 }
 0x1b7   : > { %2204 = vst.msk [vmem:[#allocation3 + $0x54] sm:$0xf] %vm2182_vm1, %v2129_v47  ;;  %2705 = vrot.lane.b32.xlu2 %v2622_v0, %s5098_s16  ;;  %v2913_v0 = vsel %vm5723_vm14, %v2911_v50, %v2912_v17  ;;  %v2904_v47 = vrot.slane %v2902_v63, 4  ;;  %v2814_v63 = vld [vmem:[#allocation2 + $0xa4] sm:$0x1]  ;;  %v3356_v17 = vshrl.u32 %v3307_v42, 16 }
 0x1b8   : > { %v2961_v20 = vrot.slane %v2814_v63, 5 }
 0x1b9   : > { %v2143_v26 = vpop.permute.xlu2 %2142  ;;  %v2906_v46 = vsel %vm5723_vm14, %v2904_v47, %v2905_v43  ;;  %v2811_v47 = vld [vmem:[#allocation2 + $0x98] sm:$0x1]  ;;  %v3358_v34 = vrot.slane %v3356_v17, 4 }
 0x1ba   : > { %2998 = vrot.lane.b32.xlu0 %v2899_v29, %s5099_s17  ;;  %2211 = vst.msk [vmem:[#allocation3 + $0x70] sm:$0xf] %vm2182_vm1, %v2143_v26  ;;  %v2798_v29 = vld [vmem:[#allocation2 + $0x64] sm:$0xf]  ;;  %v2962_v50 = vsel %vm5723_vm14, %v2960_v52, %v2961_v20 }
 0x1bb   : > { %v2923_v26 = vrot.slane %v2798_v29, 5 }
 0x1bc   : > { %2988 = vrot.lane.b32.xlu1 %v2882_v45, %s5099_s17  ;;  %v2145_v51 = vpop.permute.xlu0 %2144 }
 0x1bd   : > { %2212 = vst.msk [vmem:[#allocation3 + $0x74] sm:$0xf] %vm2182_vm1, %v2145_v51  ;;  %v2941_v51 = vsel %vm5723_vm14, %v2939_v39, %v2940_v23  ;;  %v3308_v23 = vld [vmem:[#allocation2 + $0x1c] sm:$0xf] }
 0x1be   : > { %v2135_v58 = vpop.permute.xlu1 %2134  ;;  %v3365_v10 = vshll.u32 %v3308_v23, 16 }
 0x1bf   : > { %2207 = vst.msk [vmem:[#allocation3 + $0x60] sm:$0xf] %vm2182_vm1, %v2135_v58  ;;  %2984 = vrot.lane.b32.xlu2 %v2875_v56, %s5099_s17  ;;  %v2924_v56 = vsel %vm5723_vm14, %v4887_v40, %v2923_v26  ;;  %v4886_v58 = vrot.slane %v2794_v49, 9  ;;  %v2954_v40 = vrot.slane %v2811_v47, 5 }
 0x1c1   : > { %v2149_v1 = vpop.permute.xlu2 %2148  ;;  %v2917_v41 = vsel %vm5723_vm14, %v4886_v58, %v2916_v62  ;;  %v2815_v58 = vld [vmem:[#allocation2 + $0xa8] sm:$0xe] }
 0x1c2   : > { %3004 = vrot.lane.b32.xlu0 %v2910_v59, %s5099_s17  ;;  %2214 = vst.msk [vmem:[#allocation3 + $0x7c] sm:$0xf] %vm2182_vm1, %v2149_v1  ;;  %v2802_v59 = vld [vmem:[#allocation2 + $0x74] sm:$0x1]  ;;  %v2932_v1 = vrot.slane %v2930_v25, 4 }
 0x1c3   : > { %v2933_v9 = vrot.slane %v2802_v59, 5 }
 0x1c4   : > { %2994 = vrot.lane.b32.xlu1 %v2892_v6, %s5099_s17  ;;  %v2648_v48 = vpop.permute.xlu0 %2647  ;;  %v2951_v6 = vrot.slane %v6308_v54, 5 }
 0x1c5   : > { %2744 = vst.msk [vmem:[#allocation3] sm:$0xf] %vm2743_vm2, %v2648_v48 }
 0x1c6   : > { %v2141_v15 = vpop.permute.xlu1 %2140  ;;  %v2952_v48 = vsel %vm5723_vm14, %v4891_v30, %v2951_v6  ;;  %v3367_v30 = vrot.slane %v3365_v10, 5 }
 0x1c7   : > { %2210 = vst.msk [vmem:[#allocation3 + $0x6c] sm:$0xf] %vm2182_vm1, %v2141_v15  ;;  %2990 = vrot.lane.b32.xlu2 %v2885_v12, %s5099_s17  ;;  %v2934_v12 = vsel %vm5723_vm14, %v2932_v1, %v2933_v9  ;;  %v2925_v15 = vrot.slane %v2923_v26, 4  ;;  %v4893_v1 = vrot.slane %v2815_v58, 9  ;;  %v3319_v58 = vld [vmem:[#allocation2 + $0x48] sm:$0xf] }
 0x1c9   : > { %v2652_v24 = vpop.permute.xlu2 %2651  ;;  %v2927_v55 = vsel %vm5723_vm14, %v2925_v15, %v2926_v57  ;;  %v3369_v57 = vshrl.u32 %v3308_v23, 16 }
 0x1ca   : > { %3010 = vrot.lane.b32.xlu0 %v2920_v28, %s5099_s17  ;;  %2746 = vst.msk [vmem:[#allocation3 + $0x8] sm:$0xf] %vm2743_vm2, %v2652_v24  ;;  %v2807_v28 = vld [vmem:[#allocation2 + $0x88] sm:$0xf]  ;;  %v4890_v24 = vrot.slane %v2806_v19, 9 }
 0x1cb   : > { %v2944_v22 = vrot.slane %v2807_v28, 5 }
 0x1cc   : > { %3000 = vrot.lane.b32.xlu1 %v2903_v21, %s5099_s17  ;;  %v2654_v11 = vpop.permute.xlu0 %2653 }
 0x1cd   : > { %2747 = vst.msk [vmem:[#allocation3 + $0xc] sm:$0xf] %vm2743_vm2, %v2654_v11  ;;  %v2803_v11 = vld [vmem:[#allocation2 + $0x78] sm:$0xe]  ;;  %v2946_v14 = vrot.slane %v2944_v22, 4 }
 0x1ce   : > { %v2147_v32 = vpop.permute.xlu1 %2146  ;;  %v4889_v8 = vrot.slane %v2803_v11, 9 }
 0x1cf   : > { %2213 = vst.msk [vmem:[#allocation3 + $0x78] sm:$0xf] %vm2182_vm1, %v2147_v32  ;;  %2996 = vrot.lane.b32.xlu2 %v2896_v27, %s5099_s17  ;;  %v3359_v27 = vshll.u32 %v3307_v42, 16  ;;  %v2818_v32 = vld [vmem:[#allocation2 + $0xb4] sm:$0xe] }
 0x1d0   : > { %v4894_v43 = vrot.slane %v2818_v32, 9  ;;  %v2938_v26 = vsel %vm5723_vm14, %v4889_v8, %v2937_v61 }
 0x1d1   : > { %v2658_v60 = vpop.permute.xlu2 %2657  ;;  %v3361_v29 = vrot.slane %v3359_v27, 5  ;;  %v3114_v27 = vld [vmem:[#allocation2 + $0x18] sm:$0xf] }
 0x1d2   : > { %3016 = vrot.lane.b32.xlu0 %v2931_v4, %s5099_s17  ;;  %2749 = vst.msk [vmem:[#allocation3 + $0x14] sm:$0xf] %vm2743_vm2, %v2658_v60  ;;  %v2945_v4 = vsel %vm5723_vm14, %v4890_v24, %v2944_v22  ;;  %v2972_v60 = vrot.slane %v6342_v36, 5  ;;  %v3371_v24 = vrot.slane %v3369_v57, 4 }
 0x1d4   : > { %3006 = vrot.lane.b32.xlu1 %v2913_v0, %s5099_s17  ;;  %v2660_v45 = vpop.permute.xlu0 %2659  ;;  %v2973_v49 = vsel %vm5723_vm14, %v4894_v43, %v2972_v60  ;;  %v3372_v32 = vor.u32 %v3371_v24, %v3367_v30  ;;  %v3320_v24 = vld [vmem:[#allocation2 + $0x4c] sm:$0xf] }
 0x1d5   : > { %2750 = vst.msk [vmem:[#allocation3 + $0x18] sm:$0xf] %vm2743_vm2, %v2660_v45  ;;  %v2953_v45 = vrot.slane %v2951_v6, 4 }
 0x1d6   : > { %v2650_v37 = vpop.permute.xlu1 %2649 }
 0x1d7   : > { %2745 = vst.msk [vmem:[#allocation3 + $0x4] sm:$0xf] %vm2743_vm2, %v2650_v37  ;;  %3002 = vrot.lane.b32.xlu2 %v2906_v46, %s5099_s17  ;;  %v2808_v37 = vld [vmem:[#allocation2 + $0x8c] sm:$0x1]  ;;  %v2955_v54 = vsel %vm5723_vm14, %v2953_v45, %v2954_v40  ;;  %v3122_v40 = vld [vmem:[#allocation2 + $0x48] sm:$0xf] }
 0x1d9   : > { %v2664_v38 = vpop.permute.xlu2 %2663 }
 0x1da   : > { %3022 = vrot.lane.b32.xlu0 %v2941_v51, %s5099_s17  ;;  %2752 = vst.msk [vmem:[#allocation3 + $0x20] sm:$0xf] %vm2743_vm2, %v2664_v38  ;;  %v3362_v51 = vor.u32 %v3361_v29, %v3358_v34  ;;  %v2816_v38 = vld [vmem:[#allocation2 + $0xac] sm:$0xf]  ;;  %v3373_v29 = vrot.slane %v3372_v32, 4 }
 0x1db   : > { %v2965_v9 = vrot.slane %v2816_v38, 5  ;;  %v3312_v34 = vld [vmem:[#allocation2 + $0x2c] sm:$0x1] }
 0x1dc   : > { %3012 = vrot.lane.b32.xlu1 %v2924_v56, %s5099_s17  ;;  %v2666_v33 = vpop.permute.xlu0 %2665  ;;  %v2947_v56 = vrot.slane %v2808_v37, 5  ;;  %v3363_v59 = vrot.slane %v3362_v51, 4 }
 0x1dd   : > { %2753 = vst.msk [vmem:[#allocation3 + $0x24] sm:$0xf] %vm2743_vm2, %v2666_v33  ;;  %v6366_v33 = vld [vmem:[#allocation2 + $0x1c] sm:$0xf]  ;;  %v2966_v15 = vsel %vm5723_vm14, %v4893_v1, %v2965_v9  ;;  %v2967_v31 = vrot.slane %v2965_v9, 4  ;;  %v3452_v9 = vshrl.u32 %v3319_v58, 16 }
 0x1de   : > { %v2656_v53 = vpop.permute.xlu1 %2655  ;;  %v3966_v63 = vrot.slane %v6366_v33, 5  ;;  %v3116_v1 = vld [vmem:[#allocation2 + $0x24] sm:$0xf] }
 0x1df   : > { %2748 = vst.msk [vmem:[#allocation3 + $0x10] sm:$0xf] %vm2743_vm2, %v2656_v53  ;;  %3008 = vrot.lane.b32.xlu2 %v2917_v41, %s5099_s17  ;;  %v2948_v41 = vsel %vm5723_vm14, %v2946_v14, %v2947_v56  ;;  %v3115_v14 = vld [vmem:[#allocation2 + $0x1c] sm:$0xf]  ;;  %v3868_v56 = vld [vmem:[#allocation2 + $0x18] sm:$0xe] }
 0x1e0   : > { %v3968_v28 = vrot.slane %v3966_v63, 4 }
 0x1e1   : > { %v2670_v62 = vpop.permute.xlu2 %2669 }
 0x1e2   : > { %3028 = vrot.lane.b32.xlu0 %v2952_v48, %s5099_s17  ;;  %2755 = vst.msk [vmem:[#allocation3 + $0x2c] sm:$0xf] %vm2743_vm2, %v2670_v62  ;;  %v3368_v48 = vsel %vm5282_vm11, %v3363_v59, %v3367_v30  ;;  %v4892_v62 = vrot.slane %v2812_v13, 9  ;;  %v4896_v59 = vrot.slane %v3868_v56, 9  ;;  %v3871_v30 = vld [vmem:[#allocation2 + $0x24] sm:$0xe] }
 0x1e3   : > { %v3310_v13 = vld [vmem:[#allocation2 + $0x24] sm:$0xf]  ;;  %v3873_v56 = vld [vmem:[#allocation2 + $0x2c] sm:$0x1] }
 0x1e4   : > { %3018 = vrot.lane.b32.xlu1 %v2934_v12, %s5099_s17  ;;  %v2672_v21 = vpop.permute.xlu0 %2671  ;;  %v3870_v12 = vld [vmem:[#allocation2 + $0x20] sm:$0x1]  ;;  %v2959_v42 = vsel %vm5723_vm14, %v4892_v62, %v2958_v18  ;;  %v3967_v57 = vsel %vm5723_vm14, %v4896_v59, %v3966_v63  ;;  %v6423_v62 = vld [vmem:[#allocation2 + $0x4c] sm:$0xf] }
 0x1e5   : > { %2756 = vst.msk [vmem:[#allocation3 + $0x30] sm:$0xf] %vm2743_vm2, %v2672_v21  ;;  %v3969_v52 = vrot.slane %v3870_v12, 5  ;;  %v3311_v21 = vld [vmem:[#allocation2 + $0x28] sm:$0xf]  ;;  %v3994_v33 = vrot.slane %v6423_v62, 5 }
 0x1e6   : > { %v2662_v25 = vpop.permute.xlu1 %2661  ;;  %v3393_v17 = vshrl.u32 %v3311_v21, 16 }
 0x1e7   : > { %2751 = vst.msk [vmem:[#allocation3 + $0x1c] sm:$0xf] %vm2743_vm2, %v2662_v25  ;;  %3014 = vrot.lane.b32.xlu2 %v2927_v55, %s5099_s17  ;;  %v3309_v55 = vld [vmem:[#allocation2 + $0x20] sm:$0x1]  ;;  %v2817_v25 = vld [vmem:[#allocation2 + $0xb0] sm:$0x1]  ;;  %v3970_v11 = vsel %vm5723_vm14, %v3968_v28, %v3969_v52 }
 0x1e8   : > { %v2968_v8 = vrot.slane %v2817_v25, 5  ;;  %v3395_v47 = vrot.slane %v3393_v17, 4  ;;  %v3454_v28 = vrot.slane %v3452_v9, 4  ;;  %v3882_v25 = vld [vmem:[#allocation2 + $0x50] sm:$0x1]  ;;  %v3461_v17 = vshll.u32 %v3320_v24, 16 }
 0x1e9   : > { %v2676_v0 = vpop.permute.xlu2 %2675 }
 0x1ea   : > { %3034 = vrot.lane.b32.xlu0 %v2962_v50, %s5099_s17  ;;  %2758 = vst.msk [vmem:[#allocation3 + $0x38] sm:$0xf] %vm2743_vm2, %v2676_v0  ;;  %v3389_v50 = vshll.u32 %v3311_v21, 16  ;;  %v2969_v23 = vsel %vm5723_vm14, %v2967_v31, %v2968_v8  ;;  %v3383_v21 = vshll.u32 %v3310_v13, 16  ;;  %v3996_v31 = vrot.slane %v3994_v33, 4 }
 0x1eb   : > { %v3997_v8 = vrot.slane %v3882_v25, 5  ;;  %v3333_v25 = vld [vmem:[#allocation2 + $0x80] sm:$0x1] }
 0x1ec   : > { %3024 = vrot.lane.b32.xlu1 %v2945_v4, %s5099_s17  ;;  %v2678_v39 = vpop.permute.xlu0 %2677  ;;  %v3375_v4 = vshll.u32 %v3309_v55, 16  ;;  %v6394_v0 = vrot.slane %v3389_v50, 5  ;;  %v3385_v32 = vrot.slane %v3383_v21, 5 }
 0x1ed   : > { %2759 = vst.msk [vmem:[#allocation3 + $0x3c] sm:$0xf] %vm2743_vm2, %v2678_v39 }
 0x1ee   : > { %v2668_v46 = vpop.permute.xlu1 %2667  ;;  %v3377_v39 = vrot.slane %v3375_v4, 5 }
 0x1ef   : > { %2754 = vst.msk [vmem:[#allocation3 + $0x28] sm:$0xf] %vm2743_vm2, %v2668_v46  ;;  %3020 = vrot.lane.b32.xlu2 %v2938_v26, %s5099_s17  ;;  %v3396_v26 = vor.u32 %v3395_v47, %v6394_v0  ;;  %v3399_v46 = vshll.u32 %v3312_v34, 16  ;;  %v3465_v34 = vshrl.u32 %v3320_v24, 16  ;;  %v3314_v24 = vld [vmem:[#allocation2 + $0x34] sm:$0xf] }
 0x1f0   : > { %v3378_v37 = vsel %vm5282_vm11, %v3373_v29, %v3377_v39  ;;  %v3332_v29 = vld [vmem:[#allocation2 + $0x7c] sm:$0xf] }
 0x1f1   : > { %v2682_v61 = vpop.permute.xlu2 %2681  ;;  %v3397_v51 = vrot.slane %v3396_v26, 4  ;;  %v3401_v10 = vrot.slane %v3399_v46, 5  ;;  %v3998_v46 = vsel %vm5723_vm14, %v3996_v31, %v3997_v8  ;;  %v3567_v31 = vshll.u32 %v3333_v25, 16 }
 0x1f2   : > { %3040 = vrot.lane.b32.xlu0 %v2973_v49, %s5099_s17  ;;  %2761 = vst.msk [vmem:[#allocation3 + $0x44] sm:$0xf] %vm2743_vm2, %v2682_v61 }
 0x1f3   : > { %v3402_v38 = vsel %vm5282_vm11, %v3397_v51, %v3401_v10 }
 0x1f4   : > { %3030 = vrot.lane.b32.xlu1 %v2955_v54, %s5099_s17  ;;  %v2684_v6 = vpop.permute.xlu0 %2683 }
 0x1f5   : > { %2762 = vst.msk [vmem:[#allocation3 + $0x48] sm:$0xf] %vm2743_vm2, %v2684_v6  ;;  %v6413_v6 = vld [vmem:[#allocation2 + $0x28] sm:$0xf] }
 0x1f6   : > { %v2674_v53 = vpop.permute.xlu1 %2673  ;;  %v3973_v12 = vrot.slane %v6413_v6, 5  ;;  %v6446_v6 = vld [vmem:[#allocation2 + $0x7c] sm:$0xf] }
 0x1f7   : > { %2757 = vst.msk [vmem:[#allocation3 + $0x34] sm:$0xf] %vm2743_vm2, %v2674_v53  ;;  %3026 = vrot.lane.b32.xlu2 %v2948_v41, %s5099_s17  ;;  %v3455_v41 = vshll.u32 %v3319_v58, 16 }
 0x1f9   : > { %v2688_v19 = vpop.permute.xlu2 %2687  ;;  %v3457_v52 = vrot.slane %v3455_v41, 5 }
 0x1fa   : > { %3739 = vrot.lane.b32.xlu0 %v3368_v48, %s5100_s22  ;;  %2764 = vst.msk [vmem:[#allocation3 + $0x50] sm:$0xf] %vm2743_vm2, %v2688_v19  ;;  %v4897_v48 = vrot.slane %v3871_v30, 9  ;;  %v3331_v19 = vld [vmem:[#allocation2 + $0x78] sm:$0xf]  ;;  %v3975_v30 = vrot.slane %v3973_v12, 4 }
 0x1fb   : > { %v3548_v55 = vshrl.u32 %v3331_v19, 16  ;;  %v3551_v63 = vshll.u32 %v3331_v19, 16  ;;  %v3458_v50 = vor.u32 %v3457_v52, %v3454_v28  ;;  %v3561_v19 = vshrl.u32 %v3332_v29, 16 }
 0x1fc   : > { %3036 = vrot.lane.b32.xlu1 %v2966_v15, %s5099_s17  ;;  %v2690_v20 = vpop.permute.xlu0 %2689 }
 0x1fd   : > { %2765 = vst.msk [vmem:[#allocation3 + $0x54] sm:$0xf] %vm2743_vm2, %v2690_v20  ;;  %v3380_v20 = vshrl.u32 %v3310_v13, 16  ;;  %v3553_v47 = vrot.slane %v3551_v63, 5  ;;  %v3459_v39 = vrot.slane %v3458_v50, 4 }
 0x1fe   : > { %v2680_v22 = vpop.permute.xlu1 %2679 }
 0x1ff   : > { %2760 = vst.msk [vmem:[#allocation3 + $0x40] sm:$0xf] %vm2743_vm2, %v2680_v22  ;;  %3032 = vrot.lane.b32.xlu2 %v2959_v42, %s5099_s17  ;;  %v3974_v22 = vsel %vm5723_vm14, %v4897_v48, %v3973_v12  ;;  %v3894_v12 = vld [vmem:[#allocation2 + $0x80] sm:$0x1] }
 0x200   : > { %v4025_v21 = vrot.slane %v3894_v12, 5 }
 0x201   : > { %v2694_v18 = vpop.permute.xlu2 %2693 }
 0x202   : > { %4078 = vrot.lane.b32.xlu0 %v3970_v11, %s5101_s23  ;;  %2767 = vst.msk [vmem:[#allocation3 + $0x5c] sm:$0xf] %vm2743_vm2, %v2694_v18  ;;  %v3123_v11 = vld [vmem:[#allocation2 + $0x4c] sm:$0xf]  ;;  %v3550_v18 = vrot.slane %v3548_v55, 4  ;;  %v3563_v55 = vrot.slane %v3561_v19, 4 }
 0x204   : > { %3178 = vrot.lane.b32.xlu1 %v3114_v27, %s5102_s24  ;;  %v2696_v43 = vpop.permute.xlu0 %2695  ;;  %v3382_v27 = vrot.slane %v3380_v20, 4 }
 0x205   : > { %2768 = vst.msk [vmem:[#allocation3 + $0x60] sm:$0xf] %vm2743_vm2, %v2696_v43 }
 0x206   : > { %v2686_v45 = vpop.permute.xlu1 %2685 }
 0x207   : > { %2763 = vst.msk [vmem:[#allocation3 + $0x4c] sm:$0xf] %vm2743_vm2, %v2686_v45  ;;  %3038 = vrot.lane.b32.xlu2 %v2969_v23, %s5099_s17  ;;  %v3463_v23 = vrot.slane %v3461_v17, 5  ;;  %v3117_v45 = vld [vmem:[#allocation2 + $0x28] sm:$0xf]  ;;  %v3413_v17 = vshll.u32 %v3314_v24, 16 }
 0x209   : > { %v2700_v49 = vpop.permute.xlu2 %2699  ;;  %v3464_v51 = vsel %vm5282_vm11, %v3459_v39, %v3463_v23 }
 0x20a   : > { %3194 = vrot.lane.b32.xlu0 %v3122_v40, %s5102_s24  ;;  %2770 = vst.msk [vmem:[#allocation3 + $0x68] sm:$0xf] %vm2743_vm2, %v2700_v49  ;;  %v3386_v40 = vor.u32 %v3385_v32, %v3382_v27  ;;  %v3557_v49 = vshll.u32 %v3332_v29, 16  ;;  %v3417_v27 = vshrl.u32 %v3314_v24, 16  ;;  %v3130_v32 = vld [vmem:[#allocation2 + $0x78] sm:$0xf] }
 0x20b   : > { %v3315_v29 = vld [vmem:[#allocation2 + $0x38] sm:$0x1] }
 0x20c   : > { %3741 = vrot.lane.b32.xlu1 %v3378_v37, %s5100_s22  ;;  %v2702_v54 = vpop.permute.xlu0 %2701  ;;  %v3554_v37 = vor.u32 %v3553_v47, %v3550_v18  ;;  %v3387_v10 = vrot.slane %v3386_v40, 4  ;;  %v6473_v47 = vrot.slane %v3413_v17, 5  ;;  %v3323_v24 = vld [vmem:[#allocation2 + $0x58] sm:$0xf] }
 0x20d   : > { %2771 = vst.msk [vmem:[#allocation3 + $0x6c] sm:$0xf] %vm2743_vm2, %v2702_v54  ;;  %v3467_v54 = vrot.slane %v3465_v34, 4  ;;  %v3485_v25 = vshll.u32 %v3323_v24, 16 }
 0x20e   : > { %v2692_v61 = vpop.permute.xlu1 %2691  ;;  %v3555_v58 = vrot.slane %v3554_v37, 4  ;;  %v3392_v9 = vsel %vm5282_vm11, %v3387_v10, %v6394_v0  ;;  %v3423_v37 = vshll.u32 %v3315_v29, 16 }
 0x20f   : > { %2766 = vst.msk [vmem:[#allocation3 + $0x58] sm:$0xf] %vm2743_vm2, %v2692_v61  ;;  %3180 = vrot.lane.b32.xlu2 %v3115_v14, %s5102_s24  ;;  %v3321_v61 = vld [vmem:[#allocation2 + $0x50] sm:$0x1]  ;;  %v3468_v41 = vor.u32 %v3467_v54, %v3463_v23  ;;  %v3569_v23 = vrot.slane %v3567_v31, 5  ;;  %v3489_v31 = vshrl.u32 %v3323_v24, 16 }
 0x210   : > { %v3425_v10 = vrot.slane %v3423_v37, 5  ;;  %v3131_v54 = vld [vmem:[#allocation2 + $0x7c] sm:$0xf] }
 0x211   : > { %v2706_v53 = vpop.permute.xlu2 %2705  ;;  %v3469_v28 = vrot.slane %v3468_v41, 4  ;;  %v3491_v37 = vrot.slane %v3489_v31, 4  ;;  %v3334_v31 = vld [vmem:[#allocation2 + $0x84] sm:$0xf] }
 0x212   : > { %3745 = vrot.lane.b32.xlu0 %v3402_v38, %s5100_s22  ;;  %2773 = vst.msk [vmem:[#allocation3 + $0x74] sm:$0xf] %vm2743_vm2, %v2706_v53  ;;  %v3559_v38 = vrot.slane %v3557_v49, 5  ;;  %v3471_v53 = vshll.u32 %v3321_v61, 16  ;;  %v3322_v61 = vld [vmem:[#allocation2 + $0x54] sm:$0xf] }
 0x213   : > { %v3479_v41 = vshll.u32 %v3322_v61, 16 }
 0x214   : > { %3182 = vrot.lane.b32.xlu1 %v3116_v1, %s5102_s24  ;;  %v2708_v15 = vpop.permute.xlu0 %2707  ;;  %v3976_v1 = vrot.slane %v3873_v56, 5  ;;  %v3560_v48 = vsel %vm5282_vm11, %v3555_v58, %v3559_v38  ;;  %v3473_v52 = vrot.slane %v3471_v53, 5 }
 0x215   : > { %2774 = vst.msk [vmem:[#allocation3 + $0x78] sm:$0xf] %vm2743_vm2, %v2708_v15  ;;  %v4022_v15 = vrot.slane %v6446_v6, 5 }
 0x216   : > { %v2698_v42 = vpop.permute.xlu1 %2697 }
 0x217   : > { %2769 = vst.msk [vmem:[#allocation3 + $0x64] sm:$0xf] %vm2743_vm2, %v2698_v42  ;;  %4076 = vrot.lane.b32.xlu2 %v3967_v57, %s5101_s23  ;;  %v3977_v57 = vsel %vm5723_vm14, %v3975_v30, %v3976_v1  ;;  %v4024_v20 = vrot.slane %v4022_v15, 4  ;;  %v6494_v30 = vld [vmem:[#allocation2 + $0x34] sm:$0xf] }
 0x218   : > { %v3118_v1 = vld [vmem:[#allocation2 + $0x30] sm:$0xf]  ;;  %v3980_v12 = vrot.slane %v6494_v30, 5 }
 0x219   : > { %v2985_v4 = vpop.permute.xlu2 %2984  ;;  %v4026_v50 = vsel %vm5723_vm14, %v4024_v20, %v4025_v21 }
 0x21a   : > { %4080 = vrot.lane.b32.xlu0 %v3974_v22, %s5101_s23  ;;  %3081 = vst.msk [vmem:[#allocation3] sm:$0xf] %vm3080_vm3, %v2985_v4  ;;  %v3474_v22 = vsel %vm5282_vm11, %v3469_v28, %v3473_v52  ;;  %v3564_v4 = vor.u32 %v3563_v55, %v3559_v38  ;;  %v6504_v28 = vld [vmem:[#allocation2 + $0x58] sm:$0xf] }
 0x21b   : > { %v4001_v6 = vrot.slane %v6504_v28, 5  ;;  %v3125_v55 = vld [vmem:[#allocation2 + $0x58] sm:$0xf] }
 0x21c   : > { %3196 = vrot.lane.b32.xlu1 %v3123_v11, %s5102_s24  ;;  %v2987_v43 = vpop.permute.xlu0 %2986  ;;  %v3880_v11 = vld [vmem:[#allocation2 + $0x48] sm:$0xe]  ;;  %v3565_v39 = vrot.slane %v3564_v4, 4 }
 0x21d   : > { %3082 = vst.msk [vmem:[#allocation3 + $0x4] sm:$0xf] %vm3080_vm3, %v2987_v43  ;;  %v4900_v8 = vrot.slane %v3880_v11, 9  ;;  %v3419_v43 = vrot.slane %v3417_v27, 4  ;;  %v4003_v27 = vrot.slane %v4001_v6, 4 }
 0x21e   : > { %v2704_v26 = vpop.permute.xlu1 %2703  ;;  %v3570_v49 = vsel %vm5282_vm11, %v3565_v39, %v3569_v23 }
 0x21f   : > { %2772 = vst.msk [vmem:[#allocation3 + $0x70] sm:$0xf] %vm2743_vm2, %v2704_v26  ;;  %3184 = vrot.lane.b32.xlu2 %v3117_v45, %s5102_s24  ;;  %v3995_v45 = vsel %vm5723_vm14, %v4900_v8, %v3994_v33  ;;  %v3124_v26 = vld [vmem:[#allocation2 + $0x54] sm:$0xf]  ;;  %v3335_v8 = vld [vmem:[#allocation2 + $0x88] sm:$0xf] }
 0x221   : > { %v2991_v14 = vpop.permute.xlu2 %2990 }
 0x222   : > { %4094 = vrot.lane.b32.xlu0 %v3998_v46, %s5101_s23  ;;  %3084 = vst.msk [vmem:[#allocation3 + $0xc] sm:$0xf] %vm3080_vm3, %v2991_v14  ;;  %v3420_v46 = vor.u32 %v3419_v43, %v6473_v47  ;;  %v3892_v14 = vld [vmem:[#allocation2 + $0x78] sm:$0xe]  ;;  %v3487_v43 = vrot.slane %v3485_v25, 5 }
 0x223   : > { %v4904_v38 = vrot.slane %v3892_v14, 9  ;;  %v3982_v14 = vrot.slane %v3980_v12, 4  ;;  %v3895_v25 = vld [vmem:[#allocation2 + $0x84] sm:$0xe] }
 0x224   : > { %3755 = vrot.lane.b32.xlu1 %v3464_v51, %s5100_s22  ;;  %v2993_v59 = vpop.permute.xlu0 %2992  ;;  %v3421_v62 = vrot.slane %v3420_v46, 4 }
 0x225   : > { %3085 = vst.msk [vmem:[#allocation3 + $0x10] sm:$0xf] %vm3080_vm3, %v2993_v59  ;;  %v3874_v59 = vld [vmem:[#allocation2 + $0x30] sm:$0xe]  ;;  %v4023_v19 = vsel %vm5723_vm14, %v4904_v38, %v4022_v15  ;;  %v3885_v15 = vld [vmem:[#allocation2 + $0x5c] sm:$0x1]  ;;  %v3492_v38 = vor.u32 %v3491_v37, %v3487_v43 }
 0x226   : > { %v2710_v13 = vpop.permute.xlu1 %2709  ;;  %v3426_v58 = vsel %vm5282_vm11, %v3421_v62, %v3425_v10  ;;  %v3324_v62 = vld [vmem:[#allocation2 + $0x5c] sm:$0x1]  ;;  %v3344_v37 = vld [vmem:[#allocation2 + $0xac] sm:$0xf] }
 0x227   : > { %2775 = vst.msk [vmem:[#allocation3 + $0x7c] sm:$0xf] %vm2743_vm2, %v2710_v13  ;;  %3743 = vrot.lane.b32.xlu2 %v3392_v9, %s5100_s22  ;;  %v3476_v9 = vshrl.u32 %v3322_v61, 16  ;;  %v3313_v13 = vld [vmem:[#allocation2 + $0x30] sm:$0xf] }
 0x228   : > { %v3404_v20 = vshrl.u32 %v3313_v13, 16  ;;  %v3407_v21 = vshll.u32 %v3313_v13, 16 }
 0x229   : > { %v2997_v0 = vpop.permute.xlu2 %2996  ;;  %v3478_v52 = vrot.slane %v3476_v9, 4 }
 0x22a   : > { %3771 = vrot.lane.b32.xlu0 %v3560_v48, %s5100_s22  ;;  %3087 = vst.msk [vmem:[#allocation3 + $0x18] sm:$0xf] %vm3080_vm3, %v2997_v0  ;;  %v4898_v48 = vrot.slane %v3874_v59, 9  ;;  %v3481_v0 = vrot.slane %v3479_v41, 5  ;;  %v3406_v11 = vrot.slane %v3404_v20, 4  ;;  %v3495_v59 = vshll.u32 %v3324_v62, 16 }
 0x22c   : > { %4082 = vrot.lane.b32.xlu1 %v3977_v57, %s5101_s23  ;;  %v2999_v42 = vpop.permute.xlu0 %2998 }
 0x22d   : > { %3088 = vst.msk [vmem:[#allocation3 + $0x1c] sm:$0xf] %vm3080_vm3, %v2999_v42 }
 0x22e   : > { %v2989_v63 = vpop.permute.xlu1 %2988 }
 0x22f   : > { %3083 = vst.msk [vmem:[#allocation3 + $0x8] sm:$0xf] %vm3080_vm3, %v2989_v63  ;;  %3757 = vrot.lane.b32.xlu2 %v3474_v22, %s5100_s22  ;;  %v3981_v22 = vsel %vm5723_vm14, %v4898_v48, %v3980_v12  ;;  %v3482_v63 = vor.u32 %v3481_v0, %v3478_v52  ;;  %v3493_v48 = vrot.slane %v3492_v38, 4 }
 0x231   : > { %v3003_v18 = vpop.permute.xlu2 %3002 }
 0x232   : > { %4110 = vrot.lane.b32.xlu0 %v4026_v50, %s5101_s23  ;;  %3090 = vst.msk [vmem:[#allocation3 + $0x24] sm:$0xf] %vm3080_vm3, %v3003_v18  ;;  %v3409_v50 = vrot.slane %v3407_v21, 5  ;;  %v3483_v18 = vrot.slane %v3482_v63, 4 }
 0x234   : > { %3210 = vrot.lane.b32.xlu1 %v3130_v32, %s5102_s24  ;;  %v3005_v34 = vpop.permute.xlu0 %3004  ;;  %v4004_v32 = vrot.slane %v3885_v15, 5  ;;  %v3410_v29 = vor.u32 %v3409_v50, %v3406_v11  ;;  %v3343_v15 = vld [vmem:[#allocation2 + $0xa8] sm:$0xf] }
 0x235   : > { %3091 = vst.msk [vmem:[#allocation3 + $0x28] sm:$0xf] %vm3080_vm3, %v3005_v34  ;;  %v3119_v34 = vld [vmem:[#allocation2 + $0x34] sm:$0xf]  ;;  %v6551_v11 = vld [vmem:[#allocation2 + $0x88] sm:$0xf] }
 0x236   : > { %v2995_v40 = vpop.permute.xlu1 %2994  ;;  %v4005_v23 = vsel %vm5723_vm14, %v4003_v27, %v4004_v32  ;;  %v3411_v46 = vrot.slane %v3410_v29, 4  ;;  %v5021_v50 = vld [vmem:[%s7140_s3 + $0x8] sm:$0xff]  ;;  %v3644_v27 = vshrl.u32 %v3343_v15, 16  ;;  %v3647_v32 = vshll.u32 %v3343_v15, 16 }
 0x237   : > { %3086 = vst.msk [vmem:[#allocation3 + $0x14] sm:$0xf] %vm3080_vm3, %v2995_v40  ;;  %4092 = vrot.lane.b32.xlu2 %v3995_v45, %s5101_s23  ;;  %v3581_v45 = vshll.u32 %v3335_v8, 16  ;;  %v3585_v40 = vshrl.u32 %v3335_v8, 16  ;;  %v4905_v8 = vrot.slane %v3895_v25, 9 }
 0x238   : > { %v6564_v29 = vld [vmem:[#allocation2 + $0xac] sm:$0xf] }
 0x239   : > { %v3009_v51 = vpop.permute.xlu2 %3008  ;;  %v6526_v10 = vrot.slane %v3581_v45, 5  ;;  %v3649_v45 = vrot.slane %v3647_v32, 5 }
 0x23a   : > { %3198 = vrot.lane.b32.xlu0 %v3124_v26, %s5102_s24  ;;  %3093 = vst.msk [vmem:[#allocation3 + $0x30] sm:$0xf] %vm3080_vm3, %v3009_v51  ;;  %v3488_v26 = vsel %vm5282_vm11, %v3483_v18, %v3487_v43  ;;  %v3876_v51 = vld [vmem:[#allocation2 + $0x38] sm:$0x1]  ;;  %v4029_v18 = vrot.slane %v6551_v11, 5 }
 0x23b   : > { %v3983_v61 = vrot.slane %v3876_v51, 5  ;;  %v3139_v51 = vld [vmem:[#allocation2 + $0xac] sm:$0xf] }
 0x23c   : > { %3773 = vrot.lane.b32.xlu1 %v3570_v49, %s5100_s22  ;;  %v3011_v33 = vpop.permute.xlu0 %3010  ;;  %v4030_v28 = vsel %vm5723_vm14, %v4905_v8, %v4029_v18  ;;  %v4031_v15 = vrot.slane %v4029_v18, 4 }
 0x23d   : > { %3094 = vst.msk [vmem:[#allocation3 + $0x34] sm:$0xf] %vm3080_vm3, %v3011_v33  ;;  %v3587_v33 = vrot.slane %v3585_v40, 4  ;;  %v3984_v13 = vsel %vm5723_vm14, %v3982_v14, %v3983_v61  ;;  %v3572_v40 = vshrl.u32 %v3334_v31, 16 }
 0x23e   : > { %v3001_v56 = vpop.permute.xlu1 %3000 }
 0x23f   : > { %3089 = vst.msk [vmem:[#allocation3 + $0x20] sm:$0xf] %vm3080_vm3, %v3001_v56  ;;  %3212 = vrot.lane.b32.xlu2 %v3131_v54, %s5102_s24  ;;  %v3336_v56 = vld [vmem:[#allocation2 + $0x8c] sm:$0x1]  ;;  %v3588_v9 = vor.u32 %v3587_v33, %v6526_v10  ;;  %v3653_v33 = vshll.u32 %v3344_v37, 16 }
 0x240   : > { %v3591_v41 = vshll.u32 %v3336_v56, 16 }
 0x241   : > { %v3015_v53 = vpop.permute.xlu2 %3014 }
 0x242   : > { %3749 = vrot.lane.b32.xlu0 %v3426_v58, %s5100_s22  ;;  %3096 = vst.msk [vmem:[#allocation3 + $0x3c] sm:$0xf] %vm3080_vm3, %v3015_v53  ;;  %v3416_v58 = vsel %vm5282_vm11, %v3411_v46, %v6473_v47  ;;  %v4241_v53 = vld [vmem:[%s7140_s3 + $0x10] sm:$0x3]  ;;  %v3497_v47 = vrot.slane %v3495_v59, 5  ;;  %v3593_v52 = vrot.slane %v3591_v41, 5 }
 0x243   : > { %v4331_v12 = vunpack.c.l.b16 %v4241_v53  ;;  %v3317_v59 = vld [vmem:[#allocation2 + $0x40] sm:$0xf]  ;;  %v3133_v41 = vld [vmem:[#allocation2 + $0x88] sm:$0xf] }
 0x244   : > { %3186 = vrot.lane.b32.xlu1 %v3118_v1, %s5102_s24  ;;  %v3017_v57 = vpop.permute.xlu0 %3016  ;;  %v3138_v1 = vld [vmem:[#allocation2 + $0xa8] sm:$0xf]  ;;  %v3498_v21 = vsel %vm5282_vm11, %v3493_v48, %v3497_v47  ;;  %v3437_v47 = vshll.u32 %v3317_v59, 16 }
 0x245   : > { %3097 = vst.msk [vmem:[#allocation3 + $0x40] sm:$0xf] %vm3080_vm3, %v3017_v57  ;;  %v4334_v0 = vpack.c.b16 %v4331_v12, %v4331_v12  ;;  %v3441_v12 = vshrl.u32 %v3317_v59, 16  ;;  %v6620_v59 = vld [vmem:[#allocation2 + $0x64] sm:$0xf] }
 0x246   : > { %v3007_v42 = vpop.permute.xlu1 %3006 }
 0x247   : > { %3092 = vst.msk [vmem:[#allocation3 + $0x2c] sm:$0xf] %vm3080_vm3, %v3007_v42  ;;  %4108 = vrot.lane.b32.xlu2 %v4023_v19, %s5101_s23  ;;  %v3589_v19 = vrot.slane %v3588_v9, 4  ;;  %v3883_v42 = vld [vmem:[#allocation2 + $0x54] sm:$0xe]  ;;  %v4388_v24 = vsel %vm4386_vm4, %v4334_v0, 0 }
 0x248   : > { %4395 = vmatpush.bf16.msra.mxu0 %v4388_v24  ;;  %5022 = vmatpush.bf16.msra.mxu1 %v4388_v24  ;;  %v4901_v63 = vrot.slane %v3883_v42, 9  ;;  %v3657_v9 = vshrl.u32 %v3344_v37, 16  ;;  %v6587_v42 = vrot.slane %v3437_v47, 5  ;;  %v3877_v37 = vld [vmem:[#allocation2 + $0x3c] sm:$0xe]  ;;  %v4008_v47 = vrot.slane %v6620_v59, 5 }
 0x249   : > { %v3021_v17 = vpop.permute.xlu2 %3020  ;;  %5023 = vmatpush.bf16.msra.mxu2 %v4388_v24  ;;  %5024 = vmatpush.bf16.msra.mxu3 %v4388_v24  ;;  %v3443_v24 = vrot.slane %v3441_v12, 4  ;;  %v3127_v12 = vld [vmem:[#allocation2 + $0x64] sm:$0xf] }
 0x24a   : > { %4084 = vrot.lane.b32.xlu0 %v3981_v22, %s5101_s23  ;;  %3099 = vst.msk [vmem:[#allocation3 + $0x48] sm:$0xf] %vm3080_vm3, %v3021_v17  ;;  %v3132_v17 = vld [vmem:[#allocation2 + $0x84] sm:$0xf] }
 0x24b   : > { %v3444_v32 = vor.u32 %v3443_v24, %v6587_v42 }
 0x24c   : > { %3200 = vrot.lane.b32.xlu1 %v3125_v55, %s5102_s24  ;;  %v3023_v4 = vpop.permute.xlu0 %3022  ;;  %v3594_v55 = vsel %vm5282_vm11, %v3589_v19, %v3593_v52  ;;  %4396 = vmatpush.bf16.msra.mxu0 %v5021_v50  ;;  %v3659_v52 = vrot.slane %v3657_v9, 4 }
 0x24d   : > { %3100 = vst.msk [vmem:[#allocation3 + $0x4c] sm:$0xf] %vm3080_vm3, %v3023_v4  ;;  %5025 = vmatpush.bf16.msra.mxu1 %v5021_v50  ;;  %5026 = vmatpush.bf16.msra.mxu2 %v5021_v50 }
 0x24e   : > { %v3013_v39 = vpop.permute.xlu1 %3012  ;;  %5027 = vmatpush.bf16.msra.mxu3 %v5021_v50 }
 0x24f   : > { %3095 = vst.msk [vmem:[#allocation3 + $0x38] sm:$0xf] %vm3080_vm3, %v3013_v39  ;;  %3188 = vrot.lane.b32.xlu2 %v3119_v34, %s5102_s24  ;;  %v4002_v34 = vsel %vm5723_vm14, %v4901_v63, %v4001_v6  ;;  %v5020_v39 = vld [vmem:[%s7140_s3] sm:$0xff]  ;;  %v4050_v6 = vrot.slane %v6564_v29, 5 }
 0x250   : > { %4397 = vmatpush.bf16.msra.mxu0 %v5020_v39 }
 0x251   : > { %v3027_v49 = vpop.permute.xlu2 %3026  ;;  %5028 = vmatpush.bf16.msra.mxu1 %v5020_v39  ;;  %5029 = vmatpush.bf16.msra.mxu2 %v5020_v39  ;;  %v4052_v61 = vrot.slane %v4050_v6, 4 }
 0x252   : > { %4098 = vrot.lane.b32.xlu0 %v4005_v23, %s5101_s23  ;;  %3102 = vst.msk [vmem:[#allocation3 + $0x54] sm:$0xf] %vm3080_vm3, %v3027_v49  ;;  %v3646_v23 = vrot.slane %v3644_v27, 4  ;;  %v3906_v49 = vld [vmem:[#allocation2 + $0xb0] sm:$0x1]  ;;  %5030 = vmatpush.bf16.msra.mxu3 %v5020_v39 }
 0x253   : > { %v3126_v27 = vld [vmem:[#allocation2 + $0x60] sm:$0xf] }
 0x254   : > { %3759 = vrot.lane.b32.xlu1 %v3488_v26, %s5100_s22  ;;  %v3029_v54 = vpop.permute.xlu0 %3028  ;;  %v3575_v26 = vshll.u32 %v3334_v31, 16  ;;  %v3650_v62 = vor.u32 %v3649_v45, %v3646_v23  ;;  %v3904_v45 = vld [vmem:[#allocation2 + $0xa8] sm:$0xe] }
 0x255   : > { %3103 = vst.msk [vmem:[#allocation3 + $0x58] sm:$0xf] %vm3080_vm3, %v3029_v54  ;;  %v3574_v54 = vrot.slane %v3572_v40, 4 }
 0x256   : > { %v3019_v30 = vpop.permute.xlu1 %3018  ;;  %v3577_v14 = vrot.slane %v3575_v26, 5  ;;  %v3325_v26 = vld [vmem:[#allocation2 + $0x60] sm:$0xf] }
 0x257   : > { %3098 = vst.msk [vmem:[#allocation3 + $0x44] sm:$0xf] %vm3080_vm3, %v3019_v30  ;;  %3747 = vrot.lane.b32.xlu2 %v3416_v58, %s5100_s22  ;;  %v4053_v58 = vrot.slane %v3906_v49, 5  ;;  %v3651_v30 = vrot.slane %v3650_v62, 4  ;;  %v6611_v49 = vld [vmem:[#allocation2 + $0x40] sm:$0xf] }
 0x258   : > { %v3578_v53 = vor.u32 %v3577_v14, %v3574_v54  ;;  %v3500_v62 = vshrl.u32 %v3325_v26, 16  ;;  %v3316_v14 = vld [vmem:[#allocation2 + $0x3c] sm:$0xf] }
 0x259   : > { %v3033_v57 = vpop.permute.xlu2 %3032  ;;  %v4054_v48 = vsel %vm5723_vm14, %v4052_v61, %v4053_v58  ;;  %v3987_v61 = vrot.slane %v6611_v49, 5  ;;  %v3428_v9 = vshrl.u32 %v3316_v14, 16 }
 0x25a   : > { %3226 = vrot.lane.b32.xlu0 %v3138_v1, %s5102_s24  ;;  %3105 = vst.msk [vmem:[#allocation3 + $0x60] sm:$0xf] %vm3080_vm3, %v3033_v57  ;;  %v3655_v1 = vrot.slane %v3653_v33, 5  ;;  %v3579_v19 = vrot.slane %v3578_v53, 4  ;;  %v3503_v33 = vshll.u32 %v3325_v26, 16 }
 0x25b   : > { %v3339_v26 = vld [vmem:[#allocation2 + $0x98] sm:$0x1] }
 0x25c   : > { %4086 = vrot.lane.b32.xlu1 %v3984_v13, %s5101_s23  ;;  %v3035_v20 = vpop.permute.xlu0 %3034  ;;  %v3656_v57 = vsel %vm5282_vm11, %v3651_v30, %v3655_v1  ;;  %v3584_v25 = vsel %vm5282_vm11, %v3579_v19, %v6526_v10  ;;  %v3660_v11 = vor.u32 %v3659_v52, %v3655_v1  ;;  %v3502_v30 = vrot.slane %v3500_v62, 4  ;;  %v3140_v62 = vld [vmem:[#allocation2 + $0xb4] sm:$0xf] }
 0x25d   : > { %3106 = vst.msk [vmem:[#allocation3 + $0x64] sm:$0xf] %vm3080_vm3, %v3035_v20  ;;  %v3897_v20 = vld [vmem:[#allocation2 + $0x8c] sm:$0x1]  ;;  %v3505_v1 = vrot.slane %v3503_v33, 5  ;;  %v3430_v52 = vrot.slane %v3428_v9, 4 }
 0x25e   : > { %v3025_v22 = vpop.permute.xlu1 %3024  ;;  %v4032_v63 = vrot.slane %v3897_v20, 5  ;;  %v3661_v10 = vrot.slane %v3660_v11, 4  ;;  %v3121_v11 = vld [vmem:[#allocation2 + $0x40] sm:$0xf] }
 0x25f   : > { %3101 = vst.msk [vmem:[#allocation3 + $0x50] sm:$0xf] %vm3080_vm3, %v3025_v22  ;;  %3761 = vrot.lane.b32.xlu2 %v3498_v21, %s5100_s22  ;;  %v3345_v21 = vld [vmem:[#allocation2 + $0xb0] sm:$0x1]  ;;  %v3886_v9 = vld [vmem:[#allocation2 + $0x60] sm:$0xe] }
 0x260   : > { %v3663_v50 = vshll.u32 %v3345_v21, 16  ;;  %v4033_v31 = vsel %vm5723_vm14, %v4031_v15, %v4032_v63  ;;  %v4010_v21 = vrot.slane %v4008_v47, 4 }
 0x261   : > { %v3039_v4 = vpop.permute.xlu2 %3038 }
 0x262   : > { %3777 = vrot.lane.b32.xlu0 %v3594_v55, %s5100_s22  ;;  %3108 = vst.msk [vmem:[#allocation3 + $0x6c] sm:$0xf] %vm3080_vm3, %v3039_v4  ;;  %v3318_v55 = vld [vmem:[#allocation2 + $0x44] sm:$0x1]  ;;  %v3665_v8 = vrot.slane %v3663_v50, 5 }
 0x263   : > { %v3447_v4 = vshll.u32 %v3318_v55, 16  ;;  %v3338_v55 = vld [vmem:[#allocation2 + $0x94] sm:$0xf] }
 0x264   : > { %3214 = vrot.lane.b32.xlu1 %v3132_v17, %s5102_s24  ;;  %v3041_v43 = vpop.permute.xlu0 %3040  ;;  %v3666_v23 = vsel %vm5282_vm11, %v3661_v10, %v3665_v8 }
 0x265   : > { %3109 = vst.msk [vmem:[#allocation3 + $0x70] sm:$0xf] %vm3080_vm3, %v3041_v43  ;;  %v3445_v43 = vrot.slane %v3444_v32, 4  ;;  %v3605_v32 = vshll.u32 %v3338_v55, 16 }
 0x266   : > { %v3031_v46 = vpop.permute.xlu1 %3030 }
 0x267   : > { %3104 = vst.msk [vmem:[#allocation3 + $0x5c] sm:$0xf] %vm3080_vm3, %v3031_v46  ;;  %4096 = vrot.lane.b32.xlu2 %v4002_v34, %s5101_s23  ;;  %v3449_v34 = vrot.slane %v3447_v4, 5  ;;  %v3609_v4 = vshrl.u32 %v3338_v55, 16  ;;  %v6675_v55 = vld [vmem:[#allocation2 + $0xb8] sm:$0xf] }
 0x268   : > { %v4057_v59 = vrot.slane %v6675_v55, 5  ;;  %v2820_v55 = vld [vmem:[#allocation2 + $0xbc] sm:$0x1] }
 0x269   : > { %v3181_v56 = vpop.permute.xlu2 %3180  ;;  %v3450_v46 = vsel %vm5282_vm11, %v3445_v43, %v3449_v34  ;;  %v3879_v43 = vld [vmem:[#allocation2 + $0x44] sm:$0x1]  ;;  %v3327_v34 = vld [vmem:[#allocation2 + $0x68] sm:$0x1] }
 0x26a   : > { %4112 = vrot.lane.b32.xlu0 %v4030_v28, %s5101_s23  ;;  %3276 = vst.msk [vmem:[#allocation3 + $0x4] sm:$0xf] %vm3274_vm5, %v3181_v56  ;;  %v4908_v28 = vrot.slane %v3904_v45, 9  ;;  %v4899_v56 = vrot.slane %v3877_v37, 9  ;;  %v3519_v49 = vshll.u32 %v3327_v34, 16 }
 0x26c   : > { %3228 = vrot.lane.b32.xlu1 %v3139_v51, %s5102_s24  ;;  %v3740_v38 = vpop.permute.xlu0 %3739  ;;  %v3120_v51 = vld [vmem:[#allocation2 + $0x3c] sm:$0xf]  ;;  %v3988_v29 = vsel %vm5723_vm14, %v4899_v56, %v3987_v61 }
 0x26e   : > { %v3037_v13 = vpop.permute.xlu1 %3036 }
 0x26f   : > { %3107 = vst.msk [vmem:[#allocation3 + $0x68] sm:$0xf] %vm3080_vm3, %v3037_v13  ;;  %3216 = vrot.lane.b32.xlu2 %v3133_v41, %s5102_s24  ;;  %v3431_v41 = vshll.u32 %v3316_v14, 16  ;;  %v3326_v13 = vld [vmem:[#allocation2 + $0x64] sm:$0xf] }
 0x270   : > { %v3509_v19 = vshll.u32 %v3326_v13, 16  ;;  %v3513_v15 = vshrl.u32 %v3326_v13, 16 }
 0x271   : > { %v4077_v0 = vpop.permute.xlu2 %4076 }
 0x272   : > { %4126 = vrot.lane.b32.xlu0 %v4054_v48, %s5101_s23  ;;  %v3515_v8 = vrot.slane %v3513_v15, 4 }
 0x274   : > { %3787 = vrot.lane.b32.xlu1 %v3656_v57, %s5100_s22  ;;  %v4079_v22 = vpop.permute.xlu0 %4078  ;;  %v3506_v57 = vor.u32 %v3505_v1, %v3502_v30 }
 0x276   : > { %v3179_v17 = vpop.permute.xlu1 %3178  ;;  %v3507_v63 = vrot.slane %v3506_v57, 4  ;;  %v3134_v57 = vld [vmem:[#allocation2 + $0x90] sm:$0xf] }
 0x277   : > { %3275 = vst.msk [vmem:[#allocation3] sm:$0xf] %vm3274_vm5, %v3179_v17  ;;  %3775 = vrot.lane.b32.xlu2 %v3584_v25, %s5100_s22  ;;  %v3511_v25 = vrot.slane %v3509_v19, 5 }
 0x278   : > { %3836 = vst.msk [vmem:[#allocation3] sm:$0xf] %vm3835_vm9, %v3740_v38  ;;  %v4051_v38 = vsel %vm5723_vm14, %v4908_v28, %v4050_v6  ;;  %v3888_v6 = vld [vmem:[#allocation2 + $0x68] sm:$0x1] }
 0x279   : > { %4173 = vst.msk [vmem:[#allocation3] sm:$0xf] %vm4172_vm10, %v4077_v0  ;;  %v3185_v18 = vpop.permute.xlu2 %3184  ;;  %v3433_v0 = vrot.slane %v3431_v41, 5  ;;  %v4011_v24 = vrot.slane %v3888_v6, 5  ;;  %v3516_v28 = vor.u32 %v3515_v8, %v3511_v25  ;;  %v3898_v6 = vld [vmem:[#allocation2 + $0x90] sm:$0xe] }
 0x27a   : > { %3202 = vrot.lane.b32.xlu0 %v3126_v27, %s5102_s24  ;;  %3278 = vst.msk [vmem:[#allocation3 + $0xc] sm:$0xf] %vm3274_vm5, %v3185_v18 }
 0x27b   : > { %v3434_v50 = vor.u32 %v3433_v0, %v3430_v52  ;;  %v4012_v27 = vsel %vm5723_vm14, %v4010_v21, %v4011_v24  ;;  %v3517_v56 = vrot.slane %v3516_v28, 4  ;;  %v4906_v21 = vrot.slane %v3898_v6, 9 }
 0x27c   : > { %4114 = vrot.lane.b32.xlu1 %v4033_v31, %s5101_s23  ;;  %v3195_v39 = vpop.permute.xlu0 %3194  ;;  %v3512_v31 = vsel %vm5282_vm11, %v3507_v63, %v3511_v25  ;;  %v3328_v63 = vld [vmem:[#allocation2 + $0x6c] sm:$0xf] }
 0x27d   : > { %3283 = vst.msk [vmem:[#allocation3 + $0x20] sm:$0xf] %vm3274_vm5, %v3195_v39  ;;  %v3435_v10 = vrot.slane %v3434_v50, 4  ;;  %v6643_v39 = vrot.slane %v3605_v32, 5  ;;  %v3527_v8 = vshll.u32 %v3328_v63, 16 }
 0x27e   : > { %v3742_v40 = vpop.permute.xlu1 %3741 }
 0x27f   : > { %3837 = vst.msk [vmem:[#allocation3 + $0x4] sm:$0xf] %vm3835_vm9, %v3742_v40  ;;  %3789 = vrot.lane.b32.xlu2 %v3666_v23, %s5100_s22  ;;  %v3611_v23 = vrot.slane %v3609_v4, 4  ;;  %v3989_v40 = vrot.slane %v3987_v61, 4  ;;  %v3440_v37 = vsel %vm5282_vm11, %v3435_v10, %v6587_v42  ;;  %v3521_v61 = vrot.slane %v3519_v49, 5 }
 0x280   : > { %4174 = vst.msk [vmem:[#allocation3 + $0x4] sm:$0xf] %vm4172_vm10, %v4079_v22  ;;  %v3347_v4 = vld [vmem:[#allocation2 + $0xb8] sm:$0xf]  ;;  %v3524_v10 = vshrl.u32 %v3328_v63, 16  ;;  %v3529_v28 = vrot.slane %v3527_v8, 5 }
 0x281   : > { %v3744_v54 = vpop.permute.xlu2 %3743  ;;  %v3612_v33 = vor.u32 %v3611_v23, %v6643_v39  ;;  %v3522_v1 = vsel %vm5282_vm11, %v3517_v56, %v3521_v61  ;;  %v3677_v34 = vshll.u32 %v3347_v4, 16  ;;  %v3891_v63 = vld [vmem:[#allocation2 + $0x74] sm:$0x1] }
 0x282   : > { %3753 = vrot.lane.b32.xlu0 %v3450_v46, %s5100_s22  ;;  %v3990_v46 = vrot.slane %v3879_v43, 5 }
 0x284   : > { %3190 = vrot.lane.b32.xlu1 %v3120_v51, %s5102_s24  ;;  %v3746_v58 = vpop.permute.xlu0 %3745  ;;  %v3991_v14 = vsel %vm5723_vm14, %v3989_v40, %v3990_v46 }
 0x285   : > { %3839 = vst.msk [vmem:[#allocation3 + $0xc] sm:$0xf] %vm3835_vm9, %v3746_v58  ;;  %v3613_v58 = vrot.slane %v3612_v33, 4 }
 0x286   : > { %v3183_v53 = vpop.permute.xlu1 %3182 }
 0x287   : > { %3277 = vst.msk [vmem:[#allocation3 + $0x8] sm:$0xf] %vm3274_vm5, %v3183_v53  ;;  %v5004_v48 = vld [vmem:[#allocation3] sm:$0xff]  ;;  %4124 = vrot.lane.b32.xlu2 %v4051_v38, %s5101_s23  ;;  %v3346_v53 = vld [vmem:[#allocation2 + $0xb4] sm:$0xf] }
 0x288   : > { %3838 = vst.msk [vmem:[#allocation3 + $0x8] sm:$0xf] %vm3835_vm9, %v3744_v54  ;;  %4984 = vmatmul.msk.bf16.vlgmr.msra.gmra.mxu0 %vm4337_vm12, %v5004_v48  ;;  %v3615_v54 = vshll.u32 %v3339_v26, 16  ;;  %v3668_v19 = vshrl.u32 %v3346_v53, 16  ;;  %v3671_v52 = vshll.u32 %v3346_v53, 16  ;;  %v4059_v26 = vrot.slane %v4057_v59, 4 }
 0x289   : > { %v3758_v20 = vpop.permute.xlu2 %3757  ;;  %v3900_v53 = vld [vmem:[#allocation2 + $0x98] sm:$0x1] }
 0x28a   : > { %4088 = vrot.lane.b32.xlu0 %v3988_v29, %s5101_s23  ;;  %v3617_v38 = vrot.slane %v3615_v54, 5  ;;  %v4902_v29 = vrot.slane %v3886_v9, 9  ;;  %v3670_v25 = vrot.slane %v3668_v19, 4  ;;  %v3679_v54 = vrot.slane %v3677_v34, 5 }
 0x28b   : > { %v4039_v19 = vrot.slane %v3900_v53, 5 }
 0x28c   : > { %3204 = vrot.lane.b32.xlu1 %v3127_v12, %s5102_s24  ;;  %v4081_v22 = vpop.permute.xlu0 %4080  ;;  %v3618_v48 = vsel %vm5282_vm11, %v3613_v58, %v3617_v38  ;;  %v6665_v12 = vld [vmem:[#allocation2 + $0x94] sm:$0xf]  ;;  %v4009_v15 = vsel %vm5723_vm14, %v4902_v29, %v4008_v47  ;;  %v3141_v47 = vld [vmem:[#allocation2 + $0xb8] sm:$0xf] }
 0x28d   : > { %4175 = vst.msk [vmem:[#allocation3 + $0x8] sm:$0xf] %vm4172_vm10, %v4081_v22  ;;  %v4036_v24 = vrot.slane %v6665_v12, 5 }
 0x28e   : > { %v3197_v17 = vpop.permute.xlu1 %3196 }
 0x28f   : > { %3284 = vst.msk [vmem:[#allocation3 + $0x24] sm:$0xf] %vm3274_vm5, %v3197_v17  ;;  %3192 = vrot.lane.b32.xlu2 %v3121_v11, %s5102_s24  ;;  %v3673_v11 = vrot.slane %v3671_v52, 5  ;;  %v4038_v12 = vrot.slane %v4036_v24, 4 }
 0x290   : > { %3845 = vst.msk [vmem:[#allocation3 + $0x24] sm:$0xf] %vm3835_vm9, %v3758_v20  ;;  %v3337_v20 = vld [vmem:[#allocation2 + $0x90] sm:$0xf] }
 0x291   : > { %v4093_v18 = vpop.permute.xlu2 %4092  ;;  %v3596_v50 = vshrl.u32 %v3337_v20, 16  ;;  %v3599_v17 = vshll.u32 %v3337_v20, 16  ;;  %v3674_v43 = vor.u32 %v3673_v11, %v3670_v25 }
 0x292   : > { %4102 = vrot.lane.b32.xlu0 %v4012_v27, %s5101_s23 }
 0x293   : > { %v3598_v23 = vrot.slane %v3596_v50, 4  ;;  %v3675_v33 = vrot.slane %v3674_v43, 4  ;;  %v3907_v43 = vld [vmem:[#allocation2 + $0xb4] sm:$0xe] }
 0x294   : > { %3763 = vrot.lane.b32.xlu1 %v3512_v31, %s5100_s22  ;;  %v4095_v45 = vpop.permute.xlu0 %4094  ;;  %v4037_v31 = vsel %vm5723_vm14, %v4906_v21, %v4036_v24 }
 0x295   : > { %4182 = vst.msk [vmem:[#allocation3 + $0x24] sm:$0xf] %vm4172_vm10, %v4095_v45  ;;  %v3601_v45 = vrot.slane %v3599_v17, 5 }
 0x296   : > { %v3756_v51 = vpop.permute.xlu1 %3755 }
 0x297   : > { %3844 = vst.msk [vmem:[#allocation3 + $0x20] sm:$0xf] %vm3835_vm9, %v3756_v51  ;;  %3751 = vrot.lane.b32.xlu2 %v3440_v37, %s5100_s22  ;;  %v3526_v37 = vrot.slane %v3524_v10, 4  ;;  %v3681_v51 = vshrl.u32 %v3347_v4, 16  ;;  %v3602_v56 = vor.u32 %v3601_v45, %v3598_v23  ;;  %v3340_v4 = vld [vmem:[#allocation2 + $0x9c] sm:$0xf] }
 0x298   : > { %4181 = vst.msk [vmem:[#allocation3 + $0x20] sm:$0xf] %vm4172_vm10, %v4093_v18  ;;  %v3909_v18 = vld [vmem:[#allocation2 + $0xbc] sm:$0x1]  ;;  %v3620_v34 = vshrl.u32 %v3340_v4, 16  ;;  %v3623_v23 = vshll.u32 %v3340_v4, 16 }
 0x299   : > { %v3213_v42 = vpop.permute.xlu2 %3212  ;;  %v4060_v46 = vrot.slane %v3909_v18, 5  ;;  %v3530_v58 = vor.u32 %v3529_v28, %v3526_v37  ;;  %v3683_v9 = vrot.slane %v3681_v51, 4  ;;  %v3330_v18 = vld [vmem:[#allocation2 + $0x74] sm:$0x1]  ;;  %v4909_v37 = vrot.slane %v3907_v43, 9 }
 0x29a   : > { %3230 = vrot.lane.b32.xlu0 %v3140_v62, %s5102_s24  ;;  %3292 = vst.msk [vmem:[#allocation3 + $0x44] sm:$0xf] %vm3274_vm5, %v3213_v42  ;;  %v3329_v62 = vld [vmem:[#allocation2 + $0x70] sm:$0xf]  ;;  %v938_v28 = vld [vmem:[#allocation2 + $0xcc] sm:$0xf] }
 0x29b   : > { %v4061_v42 = vsel %vm5723_vm14, %v4059_v26, %v4060_v46  ;;  %v3533_v38 = vshll.u32 %v3329_v62, 16  ;;  %v3537_v25 = vshrl.u32 %v3329_v62, 16  ;;  %v3543_v46 = vshll.u32 %v3330_v18, 16 }
 0x29c   : > { %4090 = vrot.lane.b32.xlu1 %v3991_v14, %s5101_s23  ;;  %v3772_v30 = vpop.permute.xlu0 %3771  ;;  %v3135_v14 = vld [vmem:[#allocation2 + $0x94] sm:$0xf]  ;;  %v3622_v51 = vrot.slane %v3620_v34, 4  ;;  %v3625_v62 = vrot.slane %v3623_v23, 5 }
 0x29d   : > { %v3535_v29 = vrot.slane %v3533_v38, 5  ;;  %v3539_v8 = vrot.slane %v3537_v25, 4 }
 0x29e   : > { %v4083_v41 = vpop.permute.xlu1 %4082 }
 0x29f   : > { %4176 = vst.msk [vmem:[#allocation3 + $0xc] sm:$0xf] %vm4172_vm10, %v4083_v41  ;;  %v5008_v13 = vld [vmem:[#allocation3 + $0x20] sm:$0xff]  ;;  %3765 = vrot.lane.b32.xlu2 %v3522_v1, %s5100_s22  ;;  %v3603_v1 = vrot.slane %v3602_v56, 4  ;;  %v3540_v26 = vor.u32 %v3539_v8, %v3535_v29  ;;  %v3350_v56 = vld [vmem:[#allocation2 + $0xc4] sm:$0xf] }
 0x2a0   : > { %4988 = vmatmul.msk.bf16.vlgmr.msra.gmra.mxu1 %vm4337_vm12, %v5008_v13  ;;  %v3348_v13 = vld [vmem:[#allocation2 + $0xbc] sm:$0x1]  ;;  %v3701_v7 = vshll.u32 %v3350_v56, 16 }
 0x2a1   : > { %v4109_v0 = vpop.permute.xlu2 %4108  ;;  %v3608_v52 = vsel %vm5282_vm11, %v3603_v1, %v6643_v39  ;;  %v3687_v20 = vshll.u32 %v3348_v13, 16  ;;  %v4040_v39 = vsel %vm5723_vm14, %v4038_v12, %v4039_v19  ;;  %v3626_v1 = vor.u32 %v3625_v62, %v3622_v51 }
 0x2a2   : > { %3781 = vrot.lane.b32.xlu0 %v3618_v48, %s5100_s22  ;;  %v3531_v48 = vrot.slane %v3530_v58, 4  ;;  %v4058_v58 = vsel %vm5723_vm14, %v4909_v37, %v4057_v59 }
 0x2a3   : > { %v3689_v50 = vrot.slane %v3687_v20, 5  ;;  %v3627_v59 = vrot.slane %v3626_v1, 4  ;;  %v2974_v20 = vrot.slane %v2972_v60, 4 }
 0x2a4   : > { %3218 = vrot.lane.b32.xlu1 %v3134_v57, %s5102_s24  ;;  %v4111_v22 = vpop.permute.xlu0 %4110  ;;  %v6700_v57 = vld [vmem:[#allocation2 + $0x70] sm:$0xf] }
 0x2a5   : > { %v4015_v24 = vrot.slane %v6700_v57, 5 }
 0x2a6   : > { %v3211_v27 = vpop.permute.xlu1 %3210  ;;  %v5005_v32 = vld [vmem:[#allocation3 + $0x8] sm:$0xff] }
 0x2a7   : > { %3291 = vst.msk [vmem:[#allocation3 + $0x40] sm:$0xf] %vm3274_vm5, %v3211_v27  ;;  %4985 = vmatmul.msk.bf16.gmra.mxu0 %vm4337_vm12, %v5005_v32  ;;  %4100 = vrot.lane.b32.xlu2 %v4009_v15, %s5101_s23  ;;  %v3536_v15 = vsel %vm5282_vm11, %v3531_v48, %v3535_v29  ;;  %v4017_v27 = vrot.slane %v4015_v24, 4  ;;  %v4018_v32 = vrot.slane %v3891_v63, 5  ;;  %v6744_v29 = vrot.slane %v3701_v7, 5 }
 0x2a8   : > { %3852 = vst.msk [vmem:[#allocation3 + $0x40] sm:$0xf] %vm3835_vm9, %v3772_v30  ;;  %v3680_v30 = vsel %vm5282_vm11, %v3675_v33, %v3679_v54  ;;  %v939_v33 = vsel %vm5169_vm7, %v5155_v2, %v938_v28  ;;  %vm4544_vm7 = vcmask 64512  }
 0x2a9   : > { %4189 = vst.msk [vmem:[#allocation3 + $0x40] sm:$0xf] %vm4172_vm10, %v4109_v0  ;;  %v3189_v40 = vpop.permute.xlu2 %3188  ;;  %v3684_v0 = vor.u32 %v3683_v9, %v3679_v54  ;;  %v4019_v45 = vsel %vm5723_vm14, %v4017_v27, %v4018_v32  ;;  %v3705_v9 = vshrl.u32 %v3350_v56, 16 }
 0x2aa   : > { %4116 = vrot.lane.b32.xlu0 %v4037_v31, %s5101_s23  ;;  %3280 = vst.msk [vmem:[#allocation3 + $0x14] sm:$0xf] %vm3274_vm5, %v3189_v40  ;;  %v3128_v40 = vld [vmem:[#allocation2 + $0x6c] sm:$0xf] }
 0x2ab   : > { %v3685_v11 = vrot.slane %v3684_v0, 4  ;;  %940 = vst [vmem:[#allocation2 + $0xcc] sm:$0xf] %v939_v33  ;;  %v942_v0 = vld [vmem:[#allocation2 + $0xd4] sm:$0x1] }
 0x2ac   : > { %3232 = vrot.lane.b32.xlu1 %v3141_v47, %s5102_s24  ;;  %v3199_v49 = vpop.permute.xlu0 %3198  ;;  %v6783_v33 = vld [vmem:[#allocation2 + $0xc4] sm:$0xf] }
 0x2ad   : > { %3285 = vst.msk [vmem:[#allocation3 + $0x28] sm:$0xf] %vm3274_vm5, %v3199_v49  ;;  %v3690_v10 = vsel %vm5282_vm11, %v3685_v11, %v3689_v50 }
 0x2ae   : > { %v3774_v61 = vpop.permute.xlu1 %3773 }
 0x2af   : > { %3853 = vst.msk [vmem:[#allocation3 + $0x44] sm:$0xf] %vm3835_vm9, %v3774_v61  ;;  %3220 = vrot.lane.b32.xlu2 %v3135_v14, %s5102_s24  ;;  %v3341_v14 = vld [vmem:[#allocation2 + $0xa0] sm:$0xf]  ;;  %v3541_v61 = vrot.slane %v3540_v26, 4 }
 0x2b0   : > { %4190 = vst.msk [vmem:[#allocation3 + $0x44] sm:$0xf] %vm4172_vm10, %v4111_v22  ;;  %v3629_v2 = vshll.u32 %v3341_v14, 16  ;;  %v3633_v36 = vshrl.u32 %v3341_v14, 16  ;;  %v3142_v26 = vld [vmem:[#allocation2 + $0xc0] sm:$0xf] }
 0x2b1   : > { %v3748_v41 = vpop.permute.xlu2 %3747  ;;  %v3136_v14 = vld [vmem:[#allocation2 + $0x9c] sm:$0xf] }
 0x2b2   : > { %4130 = vrot.lane.b32.xlu0 %v4061_v42, %s5101_s23  ;;  %v3545_v42 = vrot.slane %v3543_v46, 5  ;;  %v996_v13 = vld [vmem:[#allocation2 + $0xcc] sm:$0x1]  ;;  %v3631_v48 = vrot.slane %v3629_v2, 5  ;;  %v3349_v46 = vld [vmem:[#allocation2 + $0xc0] sm:$0xf] }
 0x2b3   : > { %v997_v12 = vsel %vm5158_vm6, 0, %v996_v13  ;;  %v3692_v56 = vshrl.u32 %v3349_v46, 16  ;;  %v2823_v2 = vld [vmem:[#allocation2 + $0xc8] sm:$0x1] }
 0x2b4   : > { %3791 = vrot.lane.b32.xlu1 %v3680_v30, %s5100_s22  ;;  %v3750_v6 = vpop.permute.xlu0 %3749  ;;  %v3137_v30 = vld [vmem:[#allocation2 + $0xa0] sm:$0xf]  ;;  %998 = vst [vmem:[#allocation2 + $0xcc] sm:$0x1] %v997_v12  ;;  %v3632_v11 = vsel %vm5282_vm11, %v3627_v59, %v3631_v48 }
 0x2b5   : > { %3841 = vst.msk [vmem:[#allocation3 + $0x14] sm:$0xf] %vm3835_vm9, %v3750_v6  ;;  %v3707_v6 = vrot.slane %v3705_v9, 4  ;;  %v3694_v9 = vrot.slane %v3692_v56, 4  ;;  %v3902_v59 = vld [vmem:[#allocation2 + $0xa0] sm:$0xf] }
 0x2b6   : > { %v3187_v21 = vpop.permute.xlu1 %3186 }
 0x2b7   : > { %3279 = vst.msk [vmem:[#allocation3 + $0x10] sm:$0xf] %vm3274_vm5, %v3187_v21  ;;  %v5012_v22 = vld [vmem:[#allocation3 + $0x40] sm:$0xff]  ;;  %3779 = vrot.lane.b32.xlu2 %v3608_v52, %s5100_s22  ;;  %v3351_v52 = vld [vmem:[#allocation2 + $0xc8] sm:$0x1]  ;;  %v2975_v21 = vrot.slane %v2820_v55, 5  ;;  %v3708_v50 = vor.u32 %v3707_v6, %v6744_v29 }
 0x2b8   : > { %3840 = vst.msk [vmem:[#allocation3 + $0x10] sm:$0xf] %vm3835_vm9, %v3748_v41  ;;  %4992 = vmatmul.msk.bf16.vlgmr.msra.gmra.mxu2 %vm4337_vm12, %v5012_v22  ;;  %v3546_v41 = vsel %vm5282_vm11, %v3541_v61, %v3545_v42  ;;  %v3129_v22 = vld [vmem:[#allocation2 + $0x70] sm:$0xf]  ;;  %v3695_v61 = vshll.u32 %v3349_v46, 16 }
 0x2b9   : > { %v3762_v17 = vpop.permute.xlu2 %3761  ;;  %v2976_v3 = vsel %vm5723_vm14, %v2974_v20, %v2975_v21  ;;  %v3709_v27 = vrot.slane %v3708_v50, 4  ;;  %v3901_v55 = vld [vmem:[#allocation2 + $0x9c] sm:$0xe]  ;;  %v4043_v20 = vrot.slane %v3902_v59, 5  ;;  %v3143_v21 = vld [vmem:[#allocation2 + $0xc4] sm:$0xf] }
 0x2ba   : > { %3767 = vrot.lane.b32.xlu0 %v3536_v15, %s5100_s22  ;;  %v943_v15 = vsel %vm5158_vm6, %v5163_v5, %v942_v0  ;;  %v4907_v0 = vrot.slane %v3901_v55, 9  ;;  %vm4511_vm6 = vcmask 60416  }
 0x2bb   : > { %944 = vst [vmem:[#allocation2 + $0xd4] sm:$0x1] %v943_v15 }
 0x2bc   : > { %4118 = vrot.lane.b32.xlu1 %v4040_v39, %s5101_s23  ;;  %v4085_v31 = vpop.permute.xlu0 %4084  ;;  %v3889_v39 = vld [vmem:[#allocation2 + $0x6c] sm:$0xe] }
 0x2bd   : > { %4177 = vst.msk [vmem:[#allocation3 + $0x10] sm:$0xf] %vm4172_vm10, %v4085_v31  ;;  %v4903_v5 = vrot.slane %v3889_v39, 9  ;;  %v3342_v31 = vld [vmem:[#allocation2 + $0xa4] sm:$0x1] }
 0x2be   : > { %v3201_v47 = vpop.permute.xlu1 %3200  ;;  %v3639_v23 = vshll.u32 %v3342_v31, 16 }
 0x2bf   : > { %3286 = vst.msk [vmem:[#allocation3 + $0x2c] sm:$0xf] %vm3274_vm5, %v3201_v47  ;;  %3793 = vrot.lane.b32.xlu2 %v3690_v10, %s5100_s22  ;;  %v3635_v10 = vrot.slane %v3633_v36, 4  ;;  %v4016_v8 = vsel %vm5723_vm14, %v4903_v5, %v4015_v24  ;;  %v3910_v24 = vld [vmem:[#allocation2 + $0xc0] sm:$0xe] }
 0x2c0   : > { %3847 = vst.msk [vmem:[#allocation3 + $0x2c] sm:$0xf] %vm3835_vm9, %v3762_v17  ;;  %v3711_v17 = vshll.u32 %v3351_v52, 16  ;;  %v4910_v37 = vrot.slane %v3910_v24, 9  ;;  %v3641_v62 = vrot.slane %v3639_v23, 5 }
 0x2c1   : > { %v4097_v49 = vpop.permute.xlu2 %4096  ;;  %v3636_v57 = vor.u32 %v3635_v10, %v3631_v48  ;;  %v2982_v48 = vrot.slane %v2823_v2, 5  ;;  %v3353_v52 = vld [vmem:[#allocation2 + $0xd0] sm:$0xf]  ;;  %v3912_v36 = vld [vmem:[#allocation2 + $0xc8] sm:$0x1] }
 0x2c2   : > { %4106 = vrot.lane.b32.xlu0 %v4019_v45, %s5101_s23  ;;  %v3713_v32 = vrot.slane %v3711_v17, 5  ;;  %v1051_v47 = vld [vmem:[#allocation2 + $0xd4] sm:$0x1] }
 0x2c3   : > { %v1052_v34 = vsel %vm5225_vm8, 0, %v1051_v47  ;;  %v3637_v51 = vrot.slane %v3636_v57, 4  ;;  %vm4614_vm8 = vcmask 57344  }
 0x2c4   : > { %3206 = vrot.lane.b32.xlu1 %v3128_v40, %s5102_s24  ;;  %v4099_v54 = vpop.permute.xlu0 %4098  ;;  %v3714_v45 = vsel %vm5282_vm11, %v3709_v27, %v3713_v32  ;;  %v6778_v40 = vld [vmem:[#allocation2 + $0xc4] sm:$0xf]  ;;  %1053 = vst [vmem:[#allocation2 + $0xd4] sm:$0x1] %v1052_v34  ;;  %v6809_v27 = vld [vmem:[#allocation2 + $0xd0] sm:$0xf] }
 0x2c5   : > { %4184 = vst.msk [vmem:[#allocation3 + $0x2c] sm:$0xf] %vm4172_vm10, %v4099_v54  ;;  %v4064_v28 = vrot.slane %v6778_v40, 5  ;;  %v3352_v54 = vld [vmem:[#allocation2 + $0xcc] sm:$0xf]  ;;  %v3642_v7 = vsel %vm5282_vm11, %v3637_v51, %v3641_v62 }
 0x2c6   : > { %v3760_v38 = vpop.permute.xlu1 %3759  ;;  %v3719_v1 = vshll.u32 %v3352_v54, 16  ;;  %v2821_v62 = vld [vmem:[#allocation2 + $0xc0] sm:$0xe] }
 0x2c7   : > { %3846 = vst.msk [vmem:[#allocation3 + $0x28] sm:$0xf] %vm3835_vm9, %v3760_v38  ;;  %4128 = vrot.lane.b32.xlu2 %v4058_v58, %s5101_s23  ;;  %v4065_v58 = vsel %vm5723_vm14, %v4910_v37, %v4064_v28  ;;  %v2979_v38 = vrot.slane %v6783_v33, 5  ;;  %v4066_v32 = vrot.slane %v4064_v28, 4  ;;  %v3145_v33 = vld [vmem:[#allocation2 + $0xd0] sm:$0xf] }
 0x2c8   : > { %4183 = vst.msk [vmem:[#allocation3 + $0x28] sm:$0xf] %vm4172_vm10, %v4097_v49  ;;  %v3721_v12 = vrot.slane %v3719_v1, 5 }
 0x2c9   : > { %v3217_v53 = vpop.permute.xlu2 %3216  ;;  %v2981_v13 = vrot.slane %v2979_v38, 4 }
 0x2ca   : > { %3224 = vrot.lane.b32.xlu0 %v3137_v30, %s5102_s24  ;;  %3294 = vst.msk [vmem:[#allocation3 + $0x4c] sm:$0xf] %vm3274_vm5, %v3217_v53  ;;  %v3716_v30 = vshrl.u32 %v3352_v54, 16 }
 0x2cb   : > { %v3915_v34 = vld [vmem:[#allocation2 + $0xd4] sm:$0x1] }
 0x2cc   : > { %3769 = vrot.lane.b32.xlu1 %v3546_v41, %s5100_s22  ;;  %v3227_v19 = vpop.permute.xlu0 %3226  ;;  %v3697_v41 = vrot.slane %v3695_v61, 5  ;;  %v3718_v6 = vrot.slane %v3716_v30, 4  ;;  %v3354_v51 = vld [vmem:[#allocation2 + $0xd4] sm:$0x1] }
 0x2cd   : > { %3299 = vst.msk [vmem:[#allocation3 + $0x60] sm:$0xf] %vm3274_vm5, %v3227_v19  ;;  %v3735_v61 = vshll.u32 %v3354_v51, 16 }
 0x2ce   : > { %v4087_v63 = vpop.permute.xlu1 %4086  ;;  %v3722_v39 = vor.u32 %v3721_v12, %v3718_v6 }
 0x2cf   : > { %4178 = vst.msk [vmem:[#allocation3 + $0x14] sm:$0xf] %vm4172_vm10, %v4087_v63  ;;  %v5009_v25 = vld [vmem:[#allocation3 + $0x28] sm:$0xff]  ;;  %3208 = vrot.lane.b32.xlu2 %v3129_v22, %s5102_s24  ;;  %v3698_v22 = vor.u32 %v3697_v41, %v3694_v9  ;;  %v2983_v63 = vsel %vm5723_vm14, %v2981_v13, %v2982_v48  ;;  %v3737_v2 = vrot.slane %v3735_v61, 5  ;;  %v3913_v13 = vld [vmem:[#allocation2 + $0xcc] sm:$0xe] }
 0x2d0   : > { %4989 = vmatmul.msk.bf16.gmra.mxu1 %vm4337_vm12, %v5009_v25  ;;  %v3725_v25 = vshll.u32 %v3353_v52, 16  ;;  %v4911_v48 = vrot.slane %v3913_v13, 9 }
 0x2d1   : > { %v3776_v60 = vpop.permute.xlu2 %3775  ;;  %v3699_v50 = vrot.slane %v3698_v22, 4 }
 0x2d2   : > { %3783 = vrot.lane.b32.xlu0 %v3632_v11, %s5100_s22  ;;  %v4044_v11 = vsel %vm5723_vm14, %v4907_v0, %v4043_v20  ;;  %v3727_v5 = vrot.slane %v3725_v25, 5 }
 0x2d3   : > { %v3704_v31 = vsel %vm5282_vm11, %v3699_v50, %v6744_v29  ;;  %v4045_v29 = vrot.slane %v4043_v20, 4 }
 0x2d4   : > { %3042 = vrot.lane.b32.xlu1 %v2976_v3, %s5099_s17  ;;  %v3778_v4 = vpop.permute.xlu0 %3777  ;;  %v3723_v3 = vrot.slane %v3722_v39, 4 }
 0x2d5   : > { %3855 = vst.msk [vmem:[#allocation3 + $0x4c] sm:$0xf] %vm3835_vm9, %v3778_v4  ;;  %v4067_v4 = vrot.slane %v3912_v36, 5 }
 0x2d6   : > { %v3215_v18 = vpop.permute.xlu1 %3214  ;;  %v5006_v43 = vld [vmem:[#allocation3 + $0x10] sm:$0xff] }
 0x2d7   : > { %3293 = vst.msk [vmem:[#allocation3 + $0x48] sm:$0xf] %vm3274_vm5, %v3215_v18  ;;  %4986 = vmatmul.msk.bf16.gmra.mxu0 %vm4337_vm12, %v5006_v43  ;;  %4104 = vrot.lane.b32.xlu2 %v4016_v8, %s5101_s23  ;;  %v3903_v8 = vld [vmem:[#allocation2 + $0xa4] sm:$0x1]  ;;  %v3728_v18 = vsel %vm5282_vm11, %v3723_v3, %v3727_v5  ;;  %v4071_v43 = vrot.slane %v6809_v27, 5  ;;  %v4068_v23 = vsel %vm5723_vm14, %v4066_v32, %v4067_v4 }
 0x2d8   : > { %3854 = vst.msk [vmem:[#allocation3 + $0x48] sm:$0xf] %vm3835_vm9, %v3776_v60  ;;  %v4046_v57 = vrot.slane %v3903_v8, 5 }
 0x2d9   : > { %v3790_v35 = vpop.permute.xlu2 %3789  ;;  %v4073_v40 = vrot.slane %v4071_v43, 4 }
 0x2da   : > { %3797 = vrot.lane.b32.xlu0 %v3714_v45, %s5100_s22  ;;  %v3729_v45 = vshrl.u32 %v3353_v52, 16  ;;  %v4047_v46 = vsel %vm5723_vm14, %v4045_v29, %v4046_v57  ;;  %v4072_v52 = vsel %vm5723_vm14, %v4911_v48, %v4071_v43 }
 0x2dc   : > { %3234 = vrot.lane.b32.xlu1 %v3142_v26, %s5102_s24  ;;  %v4113_v49 = vpop.permute.xlu0 %4112  ;;  %v4074_v26 = vrot.slane %v3915_v34, 5  ;;  %v3731_v37 = vrot.slane %v3729_v45, 4 }
 0x2dd   : > { %4191 = vst.msk [vmem:[#allocation3 + $0x48] sm:$0xf] %vm4172_vm10, %v4113_v49 }
 0x2de   : > { %v3229_v42 = vpop.permute.xlu1 %3228  ;;  %v4075_v54 = vsel %vm5723_vm14, %v4073_v40, %v4074_v26  ;;  %v3732_v56 = vor.u32 %v3731_v37, %v3727_v5 }
 0x2df   : > { %3300 = vst.msk [vmem:[#allocation3 + $0x64] sm:$0xf] %vm3274_vm5, %v3229_v42  ;;  %3222 = vrot.lane.b32.xlu2 %v3136_v14, %s5102_s24  ;;  %v3144_v14 = vld [vmem:[#allocation2 + $0xcc] sm:$0xf]  ;;  %v4895_v42 = vrot.slane %v2821_v62, 9 }
 0x2e0   : > { %3861 = vst.msk [vmem:[#allocation3 + $0x64] sm:$0xf] %vm3835_vm9, %v3790_v35  ;;  %v3733_v1 = vrot.slane %v3732_v56, 4 }
 0x2e1   : > { %v4125_v53 = vpop.permute.xlu2 %4124 }
 0x2e2   : > { %4132 = vrot.lane.b32.xlu0 %v4065_v58, %s5101_s23  ;;  %v3738_v41 = vsel %vm5282_vm11, %v3733_v1, %v3737_v2 }
 0x2e4   : > { %3785 = vrot.lane.b32.xlu1 %v3642_v7, %s5100_s22  ;;  %v4127_v19 = vpop.permute.xlu0 %4126  ;;  %v2980_v7 = vsel %vm5723_vm14, %v4895_v42, %v2979_v38 }
 0x2e5   : > { %4198 = vst.msk [vmem:[#allocation3 + $0x64] sm:$0xf] %vm4172_vm10, %v4127_v19 }
 0x2e6   : > { %v3788_v15 = vpop.permute.xlu1 %3787 }
 0x2e7   : > { %3860 = vst.msk [vmem:[#allocation3 + $0x60] sm:$0xf] %vm3835_vm9, %v3788_v15  ;;  %3236 = vrot.lane.b32.xlu2 %v3143_v21, %s5102_s24 }
 0x2e8   : > { %4197 = vst.msk [vmem:[#allocation3 + $0x60] sm:$0xf] %vm4172_vm10, %v4125_v53 }
 0x2e9   : > { %v3193_v17 = vpop.permute.xlu2 %3192 }
 0x2ea   : > { %3046 = vrot.lane.b32.xlu0 %v2983_v63, %s5099_s17  ;;  %3282 = vst.msk [vmem:[#allocation3 + $0x1c] sm:$0xf] %vm3274_vm5, %v3193_v17 }
 0x2ec   : > { %4120 = vrot.lane.b32.xlu1 %v4044_v11, %s5101_s23  ;;  %v3203_v60 = vpop.permute.xlu0 %3202 }
 0x2ed   : > { %3287 = vst.msk [vmem:[#allocation3 + $0x30] sm:$0xf] %vm3274_vm5, %v3203_v60 }
 0x2ee   : > { %v4115_v10 = vpop.permute.xlu1 %4114 }
 0x2ef   : > { %4192 = vst.msk [vmem:[#allocation3 + $0x4c] sm:$0xf] %vm4172_vm10, %v4115_v10  ;;  %v5016_v47 = vld [vmem:[#allocation3 + $0x60] sm:$0xff]  ;;  %3795 = vrot.lane.b32.xlu2 %v3704_v31, %s5100_s22 }
 0x2f0   : > { %4996 = vmatmul.msk.bf16.vlgmr.msra.gmra.mxu3 %vm4337_vm12, %v5016_v47 }
 0x2f1   : > { %v3752_v24 = vpop.permute.xlu2 %3751 }
 0x2f2   : > { %3799 = vrot.lane.b32.xlu0 %v3728_v18, %s5100_s22 }
 0x2f4   : > { %4134 = vrot.lane.b32.xlu1 %v4068_v23, %s5101_s23  ;;  %v3754_v35 = vpop.permute.xlu0 %3753 }
 0x2f5   : > { %3843 = vst.msk [vmem:[#allocation3 + $0x1c] sm:$0xf] %vm3835_vm9, %v3754_v35 }
 0x2f6   : > { %v3191_v28 = vpop.permute.xlu1 %3190  ;;  %v5013_v49 = vld [vmem:[#allocation3 + $0x48] sm:$0xff] }
 0x2f7   : > { %3281 = vst.msk [vmem:[#allocation3 + $0x18] sm:$0xf] %vm3274_vm5, %v3191_v28  ;;  %4993 = vmatmul.msk.bf16.gmra.mxu2 %vm4337_vm12, %v5013_v49  ;;  %4122 = vrot.lane.b32.xlu2 %v4047_v46, %s5101_s23 }
 0x2f8   : > { %3842 = vst.msk [vmem:[#allocation3 + $0x18] sm:$0xf] %vm3835_vm9, %v3752_v24 }
 0x2f9   : > { %v3766_v58 = vpop.permute.xlu2 %3765 }
 0x2fa   : > { %4138 = vrot.lane.b32.xlu0 %v4075_v54, %s5101_s23 }
 0x2fc   : > { %3238 = vrot.lane.b32.xlu1 %v3144_v14, %s5102_s24  ;;  %v4089_v30 = vpop.permute.xlu0 %4088 }
 0x2fd   : > { %4179 = vst.msk [vmem:[#allocation3 + $0x18] sm:$0xf] %vm4172_vm10, %v4089_v30 }
 0x2fe   : > { %v3205_v9 = vpop.permute.xlu1 %3204 }
 0x2ff   : > { %3288 = vst.msk [vmem:[#allocation3 + $0x34] sm:$0xf] %vm3274_vm5, %v3205_v9  ;;  %3044 = vrot.lane.b32.xlu2 %v2980_v7, %s5099_s17 }
 0x300   : > { %3849 = vst.msk [vmem:[#allocation3 + $0x34] sm:$0xf] %vm3835_vm9, %v3766_v58 }
 0x301   : > { %v4101_v53 = vpop.permute.xlu2 %4100 }
 0x304   : > { %3801 = vrot.lane.b32.xlu1 %v3738_v41, %s5100_s22  ;;  %v4103_v55 = vpop.permute.xlu0 %4102 }
 0x305   : > { %4186 = vst.msk [vmem:[#allocation3 + $0x34] sm:$0xf] %vm4172_vm10, %v4103_v55  ;;  %v4399_v38 = vpop.f32.mrf.mxu0 }
 0x306   : > { %v3764_v59 = vpop.permute.xlu1 %3763  ;;  %v4479_v44 = vpack.c.bf16 %v4399_v38, %v4399_v38  ;;  %v4616_v19 = vmul.f32 %v4399_v38, %v4399_v38  ;;  %v4545_v21 = vsel %vm4544_vm7, %v4399_v38, 0.0 }
 0x307   : > { %3848 = vst.msk [vmem:[#allocation3 + $0x30] sm:$0xf] %vm3835_vm9, %v3764_v59  ;;  %3240 = vrot.lane.b32.xlu2 %v3145_v33, %s5102_s24 }
 0x308   : > { %4185 = vst.msk [vmem:[#allocation3 + $0x30] sm:$0xf] %vm4172_vm10, %v4101_v53  ;;  %v4648_v11 = vsel %vm4544_vm7, %v4616_v19, 0.0 }
 0x309   : > { %4512 = vst.msk [vmem:[%s6854_s9] sm:$0xf] %vm4511_vm6, %v4479_v44  ;;  %v3221_v6 = vpop.permute.xlu2 %3220 }
 0x30a   : > { %3296 = vst.msk [vmem:[#allocation3 + $0x54] sm:$0xf] %vm3274_vm5, %v3221_v6 }
 0x30c   : > { %v3231_v12 = vpop.permute.xlu0 %3230 }
 0x30d   : > { %3301 = vst.msk [vmem:[#allocation3 + $0x68] sm:$0xf] %vm3274_vm5, %v3231_v12  ;;  %v4401_v20 = vpop.f32.mrf.mxu0 }
 0x30e   : > { %v4091_v0 = vpop.permute.xlu1 %4090  ;;  %v4480_v22 = vpack.c.bf16 %v4401_v20, %v4401_v20  ;;  %v4546_v15 = vsel %vm4544_vm7, %v4401_v20, 0.0  ;;  %v4617_v63 = vmul.f32 %v4401_v20, %v4401_v20 }
 0x30f   : > { %4180 = vst.msk [vmem:[#allocation3 + $0x1c] sm:$0xf] %vm4172_vm10, %v4091_v0  ;;  %v5010_v39 = vld [vmem:[#allocation3 + $0x30] sm:$0xff]  ;;  %v4547_v25 = vadd.f32 %v4546_v15, %v4545_v21  ;;  %4136 = vrot.lane.b32.xlu2 %v4072_v52, %s5101_s23 }
 0x310   : > { %4513 = vst.msk [vmem:[%s6854_s9 + $0x4] sm:$0xf] %vm4511_vm6, %v4480_v22  ;;  %v4649_v16 = vsel %vm4544_vm7, %v4617_v63, 0.0  ;;  %4990 = vmatmul.msk.bf16.gmra.mxu1 %vm4337_vm12, %v5010_v39 }
 0x311   : > { %v4650_v50 = vadd.f32 %v4649_v16, %v4648_v11  ;;  %v3780_v17 = vpop.permute.xlu2 %3779 }
 0x314   : > { %v3782_v36 = vpop.permute.xlu0 %3781 }
 0x315   : > { %3857 = vst.msk [vmem:[#allocation3 + $0x54] sm:$0xf] %vm3835_vm9, %v3782_v36 }
 0x316   : > { %v3219_v3 = vpop.permute.xlu1 %3218  ;;  %v5007_v5 = vld [vmem:[#allocation3 + $0x18] sm:$0xff] }
 0x317   : > { %3295 = vst.msk [vmem:[#allocation3 + $0x50] sm:$0xf] %vm3274_vm5, %v3219_v3  ;;  %4987 = vmatmul.msk.bf16.gmra.mxu0 %vm4337_vm12, %v5007_v5 }
 0x318   : > { %3856 = vst.msk [vmem:[#allocation3 + $0x50] sm:$0xf] %vm3835_vm9, %v3780_v17 }
 0x319   : > { %v3794_v60 = vpop.permute.xlu2 %3793 }
 0x31c   : > { %v4117_v27 = vpop.permute.xlu0 %4116 }
 0x31d   : > { %4193 = vst.msk [vmem:[#allocation3 + $0x50] sm:$0xf] %vm4172_vm10, %v4117_v27  ;;  %v6881_v4 = vpop.f32.mrf.mxu1 }
 0x31e   : > { %v3233_v32 = vpop.permute.xlu1 %3232  ;;  %v4487_v31 = vpack.c.bf16 %v6881_v4, %v6881_v4 }
 0x31f   : > { %3302 = vst.msk [vmem:[#allocation3 + $0x6c] sm:$0xf] %vm3274_vm5, %v3233_v32 }
 0x320   : > { %3863 = vst.msk [vmem:[#allocation3 + $0x6c] sm:$0xf] %vm3835_vm9, %v3794_v60 }
 0x321   : > { %4520 = vst.msk [vmem:[%s6854_s9 + $0x20] sm:$0xf] %vm4511_vm6, %v4487_v31  ;;  %v4129_v10 = vpop.permute.xlu2 %4128 }
 0x324   : > { %v4131_v8 = vpop.permute.xlu0 %4130  ;;  %v4404_v47 = vpop.f32.mrf.mxu0 }
 0x325   : > { %4200 = vst.msk [vmem:[#allocation3 + $0x6c] sm:$0xf] %vm4172_vm10, %v4131_v8  ;;  %v4481_v43 = vpack.c.bf16 %v4404_v47, %v4404_v47  ;;  %v4548_v34 = vsel %vm4544_vm7, %v4404_v47, 0.0  ;;  %v4618_v23 = vmul.f32 %v4404_v47, %v4404_v47  ;;  %v6891_v45 = vpop.f32.mrf.mxu1 }
 0x326   : > { %v3792_v18 = vpop.permute.xlu1 %3791  ;;  %v4549_v29 = vadd.f32 %v4548_v34, %v4547_v25  ;;  %v4488_v57 = vpack.c.bf16 %v6891_v45, %v6891_v45 }
 0x327   : > { %3862 = vst.msk [vmem:[#allocation3 + $0x68] sm:$0xf] %vm3835_vm9, %v3792_v18  ;;  %v4651_v24 = vsel %vm4544_vm7, %v4618_v23, 0.0 }
 0x328   : > { %4514 = vst.msk [vmem:[%s6854_s9 + $0x8] sm:$0xf] %vm4511_vm6, %v4481_v43  ;;  %v4652_v40 = vadd.f32 %v4651_v24, %v4650_v50 }
 0x329   : > { %4199 = vst.msk [vmem:[#allocation3 + $0x68] sm:$0xf] %vm4172_vm10, %v4129_v10  ;;  %v3209_v26 = vpop.permute.xlu2 %3208 }
 0x32a   : > { %4521 = vst.msk [vmem:[%s6854_s9 + $0x24] sm:$0xf] %vm4511_vm6, %v4488_v57 }
 0x32b   : > { %3290 = vst.msk [vmem:[#allocation3 + $0x3c] sm:$0xf] %vm3274_vm5, %v3209_v26 }
 0x32c   : > { %v3768_v35 = vpop.permute.xlu0 %3767  ;;  %v4406_v46 = vpop.f32.mrf.mxu0 }
 0x32d   : > { %v4482_v28 = vpack.c.bf16 %v4406_v46, %v4406_v46  ;;  %v4550_v49 = vsel %vm4544_vm7, %v4406_v46, 0.0  ;;  %v4619_v51 = vmul.f32 %v4406_v46, %v4406_v46 }
 0x32e   : > { %v4119_v37 = vpop.permute.xlu1 %4118  ;;  %v4551_v62 = vadd.f32 %v4550_v49, %v4549_v29 }
 0x32f   : > { %4194 = vst.msk [vmem:[#allocation3 + $0x54] sm:$0xf] %vm4172_vm10, %v4119_v37  ;;  %v4653_v54 = vsel %vm4544_vm7, %v4619_v51, 0.0 }
 0x330   : > { %4515 = vst.msk [vmem:[%s6854_s9 + $0xc] sm:$0xf] %vm4511_vm6, %v4482_v28  ;;  %v5017_v14 = vld [vmem:[#allocation3 + $0x68] sm:$0xff]  ;;  %v4654_v56 = vadd.f32 %v4653_v54, %v4652_v40 }
 0x331   : > { %4997 = vmatmul.msk.bf16.gmra.mxu3 %vm4337_vm12, %v5017_v14  ;;  %v4105_v61 = vpop.permute.xlu2 %4104 }
 0x334   : > { %v4107_v42 = vpop.permute.xlu0 %4106 }
 0x336   : > { %v3207_v58 = vpop.permute.xlu1 %3206  ;;  %v5014_v30 = vld [vmem:[#allocation3 + $0x50] sm:$0xff] }
 0x337   : > { %3289 = vst.msk [vmem:[#allocation3 + $0x38] sm:$0xf] %vm3274_vm5, %v3207_v58  ;;  %4994 = vmatmul.msk.bf16.gmra.mxu2 %vm4337_vm12, %v5014_v30 }
 0x338   : > { %3850 = vst.msk [vmem:[#allocation3 + $0x38] sm:$0xf] %vm3835_vm9, %v3768_v35 }
 0x339   : > { %4187 = vst.msk [vmem:[#allocation3 + $0x38] sm:$0xf] %vm4172_vm10, %v4105_v61  ;;  %v3223_v1 = vpop.permute.xlu2 %3222 }
 0x33a   : > { %3297 = vst.msk [vmem:[#allocation3 + $0x58] sm:$0xf] %vm3274_vm5, %v3223_v1 }
 0x33b   : > { %v6914_v2 = vpop.f32.mrf.mxu2 }
 0x33c   : > { %v3225_v7 = vpop.permute.xlu0 %3224  ;;  %v4495_v9 = vpack.c.bf16 %v6914_v2, %v6914_v2 }
 0x33d   : > { %3298 = vst.msk [vmem:[#allocation3 + $0x5c] sm:$0xf] %vm3274_vm5, %v3225_v7 }
 0x33e   : > { %v3770_v41 = vpop.permute.xlu1 %3769  ;;  %4528 = vst.msk [vmem:[%s6854_s9 + $0x40] sm:$0xf] %vm4511_vm6, %v4495_v9 }
 0x33f   : > { %3851 = vst.msk [vmem:[#allocation3 + $0x3c] sm:$0xf] %vm3835_vm9, %v3770_v41 }
 0x340   : > { %4188 = vst.msk [vmem:[#allocation3 + $0x3c] sm:$0xf] %vm4172_vm10, %v4107_v42 }
 0x341   : > { %v3237_v53 = vpop.permute.xlu2 %3236 }
 0x343   : > { %v6923_v55 = vpop.f32.mrf.mxu2 }
 0x344   : > { %v3784_v33 = vpop.permute.xlu0 %3783  ;;  %v4496_v59 = vpack.c.bf16 %v6923_v55, %v6923_v55 }
 0x345   : > { %3858 = vst.msk [vmem:[#allocation3 + $0x58] sm:$0xf] %vm3835_vm9, %v3784_v33 }
 0x346   : > { %v3043_v38 = vpop.permute.xlu1 %3042  ;;  %4529 = vst.msk [vmem:[%s6854_s9 + $0x44] sm:$0xf] %vm4511_vm6, %v4496_v59  ;;  %v4624_v59 = vmul.f32 %v6881_v4, %v6881_v4 }
 0x347   : > { %3110 = vst.msk [vmem:[#allocation3 + $0x74] sm:$0xf] %vm3080_vm3, %v3043_v38  ;;  %v5011_v13 = vld [vmem:[#allocation3 + $0x38] sm:$0xff] }
 0x348   : > { %3304 = vst.msk [vmem:[#allocation3 + $0x74] sm:$0xf] %vm3274_vm5, %v3237_v53  ;;  %4991 = vmatmul.msk.bf16.gmra.mxu1 %vm4337_vm12, %v5011_v13 }
 0x349   : > { %v3796_v44 = vpop.permute.xlu2 %3795 }
 0x34c   : > { %v3798_v48 = vpop.permute.xlu0 %3797 }
 0x34d   : > { %3865 = vst.msk [vmem:[#allocation3 + $0x74] sm:$0xf] %vm3835_vm9, %v3798_v48  ;;  %v6934_v12 = vpop.f32.mrf.mxu1 }
 0x34e   : > { %v3235_v6 = vpop.permute.xlu1 %3234  ;;  %v4489_v19 = vpack.c.bf16 %v6934_v12, %v6934_v12 }
 0x34f   : > { %3303 = vst.msk [vmem:[#allocation3 + $0x70] sm:$0xf] %vm3274_vm5, %v3235_v6  ;;  %v4560_v6 = vsel %vm4544_vm7, %v6881_v4, 0.0 }
 0x350   : > { %3864 = vst.msk [vmem:[#allocation3 + $0x70] sm:$0xf] %vm3835_vm9, %v3796_v44 }
 0x351   : > { %4522 = vst.msk [vmem:[%s6854_s9 + $0x28] sm:$0xf] %vm4511_vm6, %v4489_v19  ;;  %v4123_v52 = vpop.permute.xlu2 %4122  ;;  %v4625_v19 = vmul.f32 %v6891_v45, %v6891_v45 }
 0x353   : > { %v4665_v4 = vsel %vm4544_vm7, %v4625_v19, 0.0 }
 0x354   : > { %v4133_v0 = vpop.permute.xlu0 %4132  ;;  %v4409_v20 = vpop.f32.mrf.mxu0 }
 0x355   : > { %4201 = vst.msk [vmem:[#allocation3 + $0x70] sm:$0xf] %vm4172_vm10, %v4133_v0  ;;  %v4483_v22 = vpack.c.bf16 %v4409_v20, %v4409_v20  ;;  %v4552_v15 = vsel %vm4544_vm7, %v4409_v20, 0.0  ;;  %v4620_v63 = vmul.f32 %v4409_v20, %v4409_v20  ;;  %v6944_v39 = vpop.f32.mrf.mxu1 }
 0x356   : > { %v3786_v21 = vpop.permute.xlu1 %3785  ;;  %v4553_v25 = vadd.f32 %v4552_v15, %v4551_v62  ;;  %v4490_v11 = vpack.c.bf16 %v6944_v39, %v6944_v39  ;;  %v4626_v15 = vmul.f32 %v6934_v12, %v6934_v12 }
 0x357   : > { %3859 = vst.msk [vmem:[#allocation3 + $0x5c] sm:$0xf] %vm3835_vm9, %v3786_v21  ;;  %v4655_v16 = vsel %vm4544_vm7, %v4620_v63, 0.0  ;;  %v4663_v21 = vsel %vm4544_vm7, %v4624_v59, 0.0  ;;  %v4633_v59 = vmul.f32 %v6923_v55, %v6923_v55 }
 0x358   : > { %4516 = vst.msk [vmem:[%s6854_s9 + $0x10] sm:$0xf] %vm4511_vm6, %v4483_v22  ;;  %v4656_v50 = vadd.f32 %v4655_v16, %v4654_v56  ;;  %v4562_v22 = vsel %vm4544_vm7, %v6891_v45, 0.0  ;;  %v4627_v16 = vmul.f32 %v6944_v39, %v6944_v39  ;;  %v4566_v45 = vsel %vm4544_vm7, %v6944_v39, 0.0 }
 0x359   : > { %4523 = vst.msk [vmem:[%s6854_s9 + $0x2c] sm:$0xf] %vm4511_vm6, %v4490_v11  ;;  %v3045_v17 = vpop.permute.xlu2 %3044  ;;  %v4564_v11 = vsel %vm4544_vm7, %v6934_v12, 0.0 }
 0x35a   : > { %4196 = vst.msk [vmem:[#allocation3 + $0x5c] sm:$0xf] %vm4172_vm10, %v4123_v52 }
 0x35b   : > { %3111 = vst.msk [vmem:[#allocation3 + $0x78] sm:$0xf] %vm3080_vm3, %v3045_v17 }
 0x35c   : > { %v3047_v36 = vpop.permute.xlu0 %3046  ;;  %v4411_v3 = vpop.f32.mrf.mxu0 }
 0x35d   : > { %3112 = vst.msk [vmem:[#allocation3 + $0x7c] sm:$0xf] %vm3080_vm3, %v3047_v36  ;;  %v4484_v60 = vpack.c.bf16 %v4411_v3, %v4411_v3  ;;  %v4554_v27 = vsel %vm4544_vm7, %v4411_v3, 0.0  ;;  %v4621_v32 = vmul.f32 %v4411_v3, %v4411_v3  ;;  %v4667_v36 = vsel %vm4544_vm7, %v4626_v15, 0.0 }
 0x35e   : > { %v4121_v5 = vpop.permute.xlu1 %4120  ;;  %v4555_v31 = vadd.f32 %v4554_v27, %v4553_v25  ;;  %v4669_v27 = vsel %vm4544_vm7, %v4627_v16, 0.0 }
 0x35f   : > { %4195 = vst.msk [vmem:[#allocation3 + $0x58] sm:$0xf] %vm4172_vm10, %v4121_v5  ;;  %v4657_v10 = vsel %vm4544_vm7, %v4621_v32, 0.0 }
 0x360   : > { %4517 = vst.msk [vmem:[%s6854_s9 + $0x14] sm:$0xf] %vm4511_vm6, %v4484_v60  ;;  %v4658_v8 = vadd.f32 %v4657_v10, %v4656_v50 }
 0x361   : > { %v3241_v47 = vpop.permute.xlu2 %3240 }
 0x362   : > { %3306 = vst.msk [vmem:[#allocation3 + $0x7c] sm:$0xf] %vm3274_vm5, %v3241_v47 }
 0x364   : > { %v3800_v34 = vpop.permute.xlu0 %3799 }
 0x366   : > { %v4135_v18 = vpop.permute.xlu1 %4134  ;;  %v5015_v43 = vld [vmem:[#allocation3 + $0x58] sm:$0xff] }
 0x367   : > { %4202 = vst.msk [vmem:[#allocation3 + $0x74] sm:$0xf] %vm4172_vm10, %v4135_v18  ;;  %4995 = vmatmul.msk.bf16.gmra.mxu2 %vm4337_vm12, %v5015_v43 }
 0x369   : > { %v4137_v57 = vpop.permute.xlu2 %4136 }
 0x36c   : > { %v4139_v35 = vpop.permute.xlu0 %4138 }
 0x36e   : > { %v3239_v23 = vpop.permute.xlu1 %3238  ;;  %v5018_v29 = vld [vmem:[#allocation3 + $0x70] sm:$0xff] }
 0x36f   : > { %3305 = vst.msk [vmem:[#allocation3 + $0x78] sm:$0xf] %vm3274_vm5, %v3239_v23  ;;  %4998 = vmatmul.msk.bf16.gmra.mxu3 %vm4337_vm12, %v5018_v29 }
 0x370   : > { %3866 = vst.msk [vmem:[#allocation3 + $0x78] sm:$0xf] %vm3835_vm9, %v3800_v34 }
 0x371   : > { %4203 = vst.msk [vmem:[#allocation3 + $0x78] sm:$0xf] %vm4172_vm10, %v4137_v57 }
 0x373   : > { %v6969_v24 = vpop.f32.mrf.mxu3 }
 0x374   : > { %v4503_v40 = vpack.c.bf16 %v6969_v24, %v6969_v24 }
 0x376   : > { %v3802_v26 = vpop.permute.xlu1 %3801  ;;  %4536 = vst.msk [vmem:[%s6854_s9 + $0x60] sm:$0xf] %vm4511_vm6, %v4503_v40 }
 0x377   : > { %3867 = vst.msk [vmem:[#allocation3 + $0x7c] sm:$0xf] %vm3835_vm9, %v3802_v26 }
 0x378   : > { %4204 = vst.msk [vmem:[#allocation3 + $0x7c] sm:$0xf] %vm4172_vm10, %v4139_v35 }
 0x37a   : > { %v6977_v46 = vpop.f32.mrf.mxu2 }
 0x37b   : > { %v4497_v37 = vpack.c.bf16 %v6977_v46, %v6977_v46  ;;  %v6981_v28 = vpop.f32.mrf.mxu3  ;;  %v4634_v19 = vmul.f32 %v6977_v46, %v6977_v46 }
 0x37c   : > { %v4504_v49 = vpack.c.bf16 %v6981_v28, %v6981_v28 }
 0x37d   : > { %4530 = vst.msk [vmem:[%s6854_s9 + $0x48] sm:$0xf] %vm4511_vm6, %v4497_v37 }
 0x37e   : > { %4537 = vst.msk [vmem:[%s6854_s9 + $0x64] sm:$0xf] %vm4511_vm6, %v4504_v49 }
 0x37f   : > { %v5019_v51 = vld [vmem:[#allocation3 + $0x78] sm:$0xff] }
 0x380   : > { %4999 = vmatmul.msk.bf16.gmra.mxu3 %vm4337_vm12, %v5019_v51 }
 0x382   : > { %v6990_v62 = vpop.f32.mrf.mxu2 }
 0x383   : > { %v4498_v54 = vpack.c.bf16 %v6990_v62, %v6990_v62 }
 0x385   : > { %4531 = vst.msk [vmem:[%s6854_s9 + $0x4c] sm:$0xf] %vm4511_vm6, %v4498_v54 }
 0x38d   : > { %v4429_v14 = vpop.f32.mrf.mxu1 }
 0x38e   : > { %v4491_v56 = vpack.c.bf16 %v4429_v14, %v4429_v14  ;;  %v4628_v3 = vmul.f32 %v4429_v14, %v4429_v14  ;;  %v4568_v32 = vsel %vm4544_vm7, %v4429_v14, 0.0 }
 0x390   : > { %4524 = vst.msk [vmem:[%s6854_s9 + $0x30] sm:$0xf] %vm4511_vm6, %v4491_v56 }
 0x394   : > { %v4414_v61 = vpop.f32.mrf.mxu0 }
 0x395   : > { %v4485_v42 = vpack.c.bf16 %v4414_v61, %v4414_v61  ;;  %v4556_v58 = vsel %vm4544_vm7, %v4414_v61, 0.0  ;;  %v4622_v30 = vmul.f32 %v4414_v61, %v4414_v61  ;;  %v4431_v1 = vpop.f32.mrf.mxu1 }
 0x396   : > { %v4557_v7 = vadd.f32 %v4556_v58, %v4555_v31  ;;  %v4492_v9 = vpack.c.bf16 %v4431_v1, %v4431_v1  ;;  %v4629_v12 = vmul.f32 %v4431_v1, %v4431_v1  ;;  %v4570_v47 = vsel %vm4544_vm7, %v4431_v1, 0.0 }
 0x397   : > { %4518 = vst.msk [vmem:[%s6854_s9 + $0x18] sm:$0xf] %vm4511_vm6, %v4485_v42  ;;  %v4659_v41 = vsel %vm4544_vm7, %v4622_v30, 0.0  ;;  %v4632_v30 = vmul.f32 %v6914_v2, %v6914_v2 }
 0x398   : > { %v4660_v53 = vadd.f32 %v4659_v41, %v4658_v8  ;;  %4525 = vst.msk [vmem:[%s6854_s9 + $0x34] sm:$0xf] %vm4511_vm6, %v4492_v9  ;;  %v4671_v8 = vsel %vm4544_vm7, %v4628_v3, 0.0  ;;  %v4673_v43 = vsel %vm4544_vm7, %v4629_v12, 0.0 }
 0x39c   : > { %v4416_v33 = vpop.f32.mrf.mxu0 }
 0x39d   : > { %v4486_v38 = vpack.c.bf16 %v4416_v33, %v4416_v33  ;;  %v4558_v13 = vsel %vm4544_vm7, %v4416_v33, 0.0  ;;  %v4623_v44 = vmul.f32 %v4416_v33, %v4416_v33  ;;  %v4576_v33 = vsel %vm4544_vm7, %v6914_v2, 0.0 }
 0x39e   : > { %v4559_v48 = vadd.f32 %v4558_v13, %v4557_v7  ;;  %v4681_v2 = vsel %vm4544_vm7, %v4633_v59, 0.0 }
 0x39f   : > { %4519 = vst.msk [vmem:[%s6854_s9 + $0x1c] sm:$0xf] %vm4511_vm6, %v4486_v38  ;;  %v4661_v52 = vsel %vm4544_vm7, %v4623_v44, 0.0 }
 0x3a0   : > { %v4561_v0 = vadd.f32 %v4560_v6, %v4559_v48  ;;  %v4662_v20 = vadd.f32 %v4661_v52, %v4660_v53  ;;  %v4679_v48 = vsel %vm4544_vm7, %v4632_v30, 0.0  ;;  %v4578_v6 = vsel %vm4544_vm7, %v6923_v55, 0.0 }
 0x3a1   : > { %v4582_v55 = vsel %vm4544_vm7, %v6990_v62, 0.0 }
 0x3a2   : > { %v4563_v63 = vadd.f32 %v4562_v22, %v4561_v0  ;;  %v4664_v25 = vadd.f32 %v4663_v21, %v4662_v20  ;;  %v4580_v20 = vsel %vm4544_vm7, %v6977_v46, 0.0  ;;  %v4635_v21 = vmul.f32 %v6990_v62, %v6990_v62 }
 0x3a4   : > { %v4565_v50 = vadd.f32 %v4564_v11, %v4563_v63  ;;  %v4666_v17 = vadd.f32 %v4665_v4, %v4664_v25  ;;  %v4683_v63 = vsel %vm4544_vm7, %v4634_v19, 0.0  ;;  %v4685_v11 = vsel %vm4544_vm7, %v4635_v21, 0.0 }
 0x3a6   : > { %v4668_v5 = vadd.f32 %v4667_v36, %v4666_v17  ;;  %v4567_v60 = vadd.f32 %v4566_v45, %v4565_v50 }
 0x3a8   : > { %v4569_v31 = vadd.f32 %v4568_v32, %v4567_v60  ;;  %v4670_v10 = vadd.f32 %v4669_v27, %v4668_v5 }
 0x3aa   : > { %v4571_v18 = vadd.f32 %v4570_v47, %v4569_v31  ;;  %v4672_v39 = vadd.f32 %v4671_v8, %v4670_v10  ;;  %v4640_v8 = vmul.f32 %v6969_v24, %v6969_v24 }
 0x3ac   : > { %v4674_v34 = vadd.f32 %v4673_v43, %v4672_v39 }
 0x3b4   : > { %v7032_v23 = vpop.f32.mrf.mxu3 }
 0x3b5   : > { %v4505_v29 = vpack.c.bf16 %v7032_v23, %v7032_v23 }
 0x3b7   : > { %4538 = vst.msk [vmem:[%s6854_s9 + $0x68] sm:$0xf] %vm4511_vm6, %v4505_v29 }
 0x3ba   : > { %v4449_v57 = vpop.f32.mrf.mxu2 }
 0x3bb   : > { %v4499_v40 = vpack.c.bf16 %v4449_v57, %v4449_v57  ;;  %v4636_v50 = vmul.f32 %v4449_v57, %v4449_v57  ;;  %v4584_v46 = vsel %vm4544_vm7, %v4449_v57, 0.0 }
 0x3bc   : > { %v7038_v26 = vpop.f32.mrf.mxu3 }
 0x3bd   : > { %4532 = vst.msk [vmem:[%s6854_s9 + $0x50] sm:$0xf] %vm4511_vm6, %v4499_v40  ;;  %v4506_v35 = vpack.c.bf16 %v7038_v26, %v7038_v26  ;;  %v4687_v3 = vsel %vm4544_vm7, %v4636_v50, 0.0  ;;  %v4598_v59 = vsel %vm4544_vm7, %v7038_v26, 0.0 }
 0x3bf   : > { %4539 = vst.msk [vmem:[%s6854_s9 + $0x6c] sm:$0xf] %vm4511_vm6, %v4506_v35 }
 0x3c2   : > { %v4451_v37 = vpop.f32.mrf.mxu2 }
 0x3c3   : > { %v4500_v49 = vpack.c.bf16 %v4451_v37, %v4451_v37  ;;  %v4637_v5 = vmul.f32 %v4451_v37, %v4451_v37  ;;  %v4586_v62 = vsel %vm4544_vm7, %v4451_v37, 0.0 }
 0x3c5   : > { %4533 = vst.msk [vmem:[%s6854_s9 + $0x54] sm:$0xf] %vm4511_vm6, %v4500_v49  ;;  %v4434_v51 = vpop.f32.mrf.mxu1  ;;  %v4689_v31 = vsel %vm4544_vm7, %v4637_v5, 0.0  ;;  %v4592_v49 = vsel %vm4544_vm7, %v6969_v24, 0.0  ;;  %v4642_v24 = vmul.f32 %v7032_v23, %v7032_v23 }
 0x3c6   : > { %v4493_v54 = vpack.c.bf16 %v4434_v51, %v4434_v51  ;;  %v4630_v14 = vmul.f32 %v4434_v51, %v4434_v51  ;;  %v4572_v56 = vsel %vm4544_vm7, %v4434_v51, 0.0  ;;  %v4641_v51 = vmul.f32 %v6981_v28, %v6981_v28 }
 0x3c7   : > { %v4573_v42 = vadd.f32 %v4572_v56, %v4571_v18 }
 0x3c8   : > { %4526 = vst.msk [vmem:[%s6854_s9 + $0x38] sm:$0xf] %vm4511_vm6, %v4493_v54  ;;  %v4675_v61 = vsel %vm4544_vm7, %v4630_v14, 0.0 }
 0x3c9   : > { %v4676_v41 = vadd.f32 %v4675_v61, %v4674_v34  ;;  %v4695_v61 = vsel %vm4544_vm7, %v4640_v8, 0.0 }
 0x3cd   : > { %v4436_v58 = vpop.f32.mrf.mxu1 }
 0x3ce   : > { %v4494_v1 = vpack.c.bf16 %v4436_v58, %v4436_v58  ;;  %v4574_v7 = vsel %vm4544_vm7, %v4436_v58, 0.0  ;;  %v4631_v9 = vmul.f32 %v4436_v58, %v4436_v58 }
 0x3cf   : > { %v4575_v53 = vadd.f32 %v4574_v7, %v4573_v42  ;;  %v4594_v42 = vsel %vm4544_vm7, %v6981_v28, 0.0  ;;  %v4596_v7 = vsel %vm4544_vm7, %v7032_v23, 0.0  ;;  %v4699_v28 = vsel %vm4544_vm7, %v4642_v24, 0.0 }
 0x3d0   : > { %4527 = vst.msk [vmem:[%s6854_s9 + $0x3c] sm:$0xf] %vm4511_vm6, %v4494_v1  ;;  %v4677_v38 = vsel %vm4544_vm7, %v4631_v9, 0.0  ;;  %v4697_v1 = vsel %vm4544_vm7, %v4641_v51, 0.0  ;;  %v4643_v9 = vmul.f32 %v7038_v26, %v7038_v26 }
 0x3d1   : > { %v4577_v13 = vadd.f32 %v4576_v33, %v4575_v53  ;;  %v4678_v44 = vadd.f32 %v4677_v38, %v4676_v41 }
 0x3d3   : > { %v4579_v52 = vadd.f32 %v4578_v6, %v4577_v13  ;;  %v4680_v0 = vadd.f32 %v4679_v48, %v4678_v44  ;;  %v4701_v48 = vsel %vm4544_vm7, %v4643_v9, 0.0 }
 0x3d5   : > { %v4581_v22 = vadd.f32 %v4580_v20, %v4579_v52  ;;  %v4682_v15 = vadd.f32 %v4681_v2, %v4680_v0 }
 0x3d7   : > { %v4684_v25 = vadd.f32 %v4683_v63, %v4682_v15  ;;  %v4583_v4 = vadd.f32 %v4582_v55, %v4581_v22 }
 0x3d9   : > { %v4686_v16 = vadd.f32 %v4685_v11, %v4684_v25  ;;  %v4585_v45 = vadd.f32 %v4584_v46, %v4583_v4 }
 0x3db   : > { %v4688_v27 = vadd.f32 %v4687_v3, %v4686_v16  ;;  %v4587_v12 = vadd.f32 %v4586_v62, %v4585_v45 }
 0x3dd   : > { %v4690_v18 = vadd.f32 %v4689_v31, %v4688_v27 }
 0x3ea   : > { %v4454_v17 = vpop.f32.mrf.mxu2 }
 0x3eb   : > { %v4501_v36 = vpack.c.bf16 %v4454_v17, %v4454_v17  ;;  %v4638_v60 = vmul.f32 %v4454_v17, %v4454_v17  ;;  %v4588_v32 = vsel %vm4544_vm7, %v4454_v17, 0.0 }
 0x3ec   : > { %v4589_v47 = vadd.f32 %v4588_v32, %v4587_v12 }
 0x3ed   : > { %4534 = vst.msk [vmem:[%s6854_s9 + $0x58] sm:$0xf] %vm4511_vm6, %v4501_v36  ;;  %v4691_v10 = vsel %vm4544_vm7, %v4638_v60, 0.0 }
 0x3ee   : > { %v4692_v35 = vadd.f32 %v4691_v10, %v4690_v18 }
 0x3f2   : > { %v4456_v39 = vpop.f32.mrf.mxu2  ;;  %v4469_v43 = vpop.f32.mrf.mxu3 }
 0x3f3   : > { %v4502_v34 = vpack.c.bf16 %v4456_v39, %v4456_v39  ;;  %v4590_v29 = vsel %vm4544_vm7, %v4456_v39, 0.0  ;;  %v4639_v57 = vmul.f32 %v4456_v39, %v4456_v39  ;;  %v4507_v40 = vpack.c.bf16 %v4469_v43, %v4469_v43 }
 0x3f4   : > { %v4591_v37 = vadd.f32 %v4590_v29, %v4589_v47  ;;  %v4644_v6 = vmul.f32 %v4469_v43, %v4469_v43  ;;  %v4600_v52 = vsel %vm4544_vm7, %v4469_v43, 0.0 }
 0x3f5   : > { %4535 = vst.msk [vmem:[%s6854_s9 + $0x5c] sm:$0xf] %vm4511_vm6, %v4502_v34  ;;  %v4693_v54 = vsel %vm4544_vm7, %v4639_v57, 0.0 }
 0x3f6   : > { %v4593_v14 = vadd.f32 %v4592_v49, %v4591_v37  ;;  %v4694_v56 = vadd.f32 %v4693_v54, %v4692_v35  ;;  %4540 = vst.msk [vmem:[%s6854_s9 + $0x70] sm:$0xf] %vm4511_vm6, %v4507_v40  ;;  %v4703_v20 = vsel %vm4544_vm7, %v4644_v6, 0.0 }
 0x3f8   : > { %v4595_v58 = vadd.f32 %v4594_v42, %v4593_v14  ;;  %v4696_v30 = vadd.f32 %v4695_v61, %v4694_v56 }
 0x3fa   : > { %v4698_v41 = vadd.f32 %v4697_v1, %v4696_v30  ;;  %v4597_v53 = vadd.f32 %v4596_v7, %v4595_v58  ;;  %v4471_v33 = vpop.f32.mrf.mxu3 }
 0x3fb   : > { %v4508_v38 = vpack.c.bf16 %v4471_v33, %v4471_v33  ;;  %v4645_v21 = vmul.f32 %v4471_v33, %v4471_v33  ;;  %v4602_v15 = vsel %vm4544_vm7, %v4471_v33, 0.0 }
 0x3fc   : > { %v4599_v13 = vadd.f32 %v4598_v59, %v4597_v53  ;;  %v4700_v44 = vadd.f32 %v4699_v28, %v4698_v41 }
 0x3fd   : > { %4541 = vst.msk [vmem:[%s6854_s9 + $0x74] sm:$0xf] %vm4511_vm6, %v4508_v38  ;;  %v4705_v25 = vsel %vm4544_vm7, %v4645_v21, 0.0 }
 0x3fe   : > { %v4702_v23 = vadd.f32 %v4701_v48, %v4700_v44  ;;  %v4601_v2 = vadd.f32 %v4600_v52, %v4599_v13 }
 0x400   : > { %v4704_v22 = vadd.f32 %v4703_v20, %v4702_v23  ;;  %v4603_v55 = vadd.f32 %v4602_v15, %v4601_v2 }
 0x402   : > { %v4706_v11 = vadd.f32 %v4705_v25, %v4704_v22 }
 0x403   : > { %v4474_v19 = vpop.f32.mrf.mxu3 }
 0x404   : > { %v4509_v0 = vpack.c.bf16 %v4474_v19, %v4474_v19  ;;  %v4646_v26 = vmul.f32 %v4474_v19, %v4474_v19  ;;  %v4604_v63 = vsel %vm4544_vm7, %v4474_v19, 0.0 }
 0x405   : > { %v4605_v16 = vadd.f32 %v4604_v63, %v4603_v55 }
 0x406   : > { %4542 = vst.msk [vmem:[%s6854_s9 + $0x78] sm:$0xf] %vm4511_vm6, %v4509_v0  ;;  %v4707_v4 = vsel %vm4544_vm7, %v4646_v26, 0.0 }
 0x407   : > { %v4708_v45 = vadd.f32 %v4707_v4, %v4706_v11 }
 0x40b   : > { %v4476_v50 = vpop.f32.mrf.mxu3 }
 0x40c   : > { %v4510_v17 = vpack.c.bf16 %v4476_v50, %v4476_v50  ;;  %v4606_v46 = vsel %vm4544_vm7, %v4476_v50, 0.0  ;;  %v4647_v36 = vmul.f32 %v4476_v50, %v4476_v50 }
 0x40d   : > { %v4607_v3 = vadd.f32 %v4606_v46, %v4605_v16 }
 0x40e   : > { %4543 = vst.msk [vmem:[%s6854_s9 + $0x7c] sm:$0xf] %vm4511_vm6, %v4510_v17  ;;  %v4709_v5 = vsel %vm4544_vm7, %v4647_v36, 0.0 }
 0x40f   : > { %v4608_v60 = vrot.slane %v4607_v3, 4  ;;  %v4710_v27 = vadd.f32 %v4709_v5, %v4708_v45 }
 0x411   : > { %v4609_v62 = vadd.f32 %v4608_v60, %v4607_v3  ;;  %v4711_v32 = vrot.slane %v4710_v27, 4 }
 0x413   : > { %v4610_v12 = vrot.slane %v4609_v62, 2  ;;  %v4712_v31 = vadd.f32 %v4711_v32, %v4710_v27 }
 0x415   : > { %v4611_v10 = vadd.f32 %v4610_v12, %v4609_v62  ;;  %v4713_v8 = vrot.slane %v4712_v31, 2 }
 0x417   : > { %v4612_v47 = vrot.slane %v4611_v10, 1  ;;  %v4714_v18 = vadd.f32 %v4713_v8, %v4712_v31 }
 0x419   : > { %v4613_v39 = vadd.f32 %v4612_v47, %v4611_v10  ;;  %v4715_v43 = vrot.slane %v4714_v18, 1 }
 0x41b   : > { %4615 = vst.msk [vmem:[%s268_s13] sm:$0x1] %vm4614_vm8, %v4613_v39  ;;  %v4716_v34 = vadd.f32 %v4715_v43, %v4714_v18 }
 0x41d   : > { %4717 = vst.msk [vmem:[%s268_s13 + $0x1] sm:$0x1] %vm4614_vm8, %v4716_v34 }
 0x41e PF: > { %s16_s20 = sadd.s32 1, %s5092_s20   ;;  %s7155_s18 = smov %s5088_s19 }
 0x41f   : > { %p13_p5 = scmp.ge.s32.totalorder %s16_s20, 4   ;;  %s7156_s19 = smov %s7158_s21 }
 0x421   :  { %15 = sbr.rel (!%p13_p5) target bundleno = 2 (0x2), region = 84 }

// kernel: _lambda_.4
= control target key start
LH: loop header
LB: loop body
LE: loop exit
PB: predicated region body
PF: predicated region fallthrough
CT: control target
= control target key end

     0   :  { %s5286_s18 = smov 0   ;;  %s5288_s19 = smov 0   ;;  %s7312_s0 = inlined_call_operand.vmem [shape: bf16[2,16,16,8], index: 0, kind: input, shape index: {}]   ;;  %s7313_s1 = inlined_call_operand.vmem [shape: f32[1,8], index: 1, kind: input, shape index: {}]   ;;  %s7314_s2 = inlined_call_operand.vmem [shape: f32[1,8], index: 2, kind: input, shape index: {}]   ;;  %s7315_s3 = inlined_call_operand.vmem [shape: bf16[72,8], index: 3, kind: input, shape index: {}]   ;;  %s7316_s4 = inlined_call_operand.vmem [shape: f32[2,16,16,8], index: 4, kind: output, shape index: {0}]   ;;  %s7317_s5 = inlined_call_operand.vmem [shape: f32[2,1,2,8], index: 5, kind: output, shape index: {1}]  }
   0x1   :  { %s5290_s20 = smov 0  }
   0x2 LB: > { %s28_s21 = sadd.s32 1, %s5241_s19  ;;  %p4914_p0 = scmp.ge.s32.totalorder %s5245_s20, 1  ;;  %s5245_s20 = sphi %s5290_s20, %s16_s20   ;;  %s5241_s19 = sphi %s5288_s19, %s7331_s19   ;;  %s5237_s18 = sphi %s5286_s18, %s7330_s18  }
   0x3   : > { %p30_p1 = scmp.ge.s32.totalorder %s28_s21, 2  ;;  %p206_p2 = scmp.lt.s32.totalorder %s5245_s20, 3 }
   0x5   : > { %s7333_s21 = smov (%p30_p1, %s28_s21), 0  ;;  %p207_p3 = pnand %p4914_p0, %p206_p2 }
   0x6   : > { %p246_p4 = scmp.lt.s32.totalorder (!%p207_p3), %s5237_s18, 1  ;;  %s5248_s30 = smov (!%p207_p3), 8  }
   0x7   : > { %210 = sbr.rel (%p207_p3) target bundleno = 1070 (0x42e), region = 36  ;;  %s5249_s10 = smov (!%p207_p3), 16  }
   0x8   : > { %s5250_s11 = smov (!%p207_p3), 24   ;;  %s5251_s16 = smov (!%p207_p3), 32  }
   0x9   : > { %s5252_s17 = smov (!%p207_p3), 40   ;;  %s5254_s23 = smov (!%p207_p3), 64  }
   0xa   : > { %s5255_s24 = smov (!%p207_p3), 48  }
   0xc   : > { %vm474_vm0 = vsmask.f32 256  ;;  %vm475_vm1 = vsmask.f32 4368  ;;  %vm806_vm2 = vcmask 57344   ;;  %vm798_vm4 = vcmask 60416  }
   0xd   : > { %vm5304_vm3 = vmor %vm474_vm0, %vm475_vm1  ;;  %vm799_vm5 = vsmask.f32 7938  ;;  %v5247_v1 = vmov 0   ;;  %v982_v4 = vld [vmem:[#allocation2 + $0x8] sm:$0x1]  ;;  %s7335_s18 = smov (!%p246_p4, %s5237_s18), 1 }
   0xe   : > { %v5308_v2 = vrot.slane %v5247_v1, 7  ;;  %vm5311_vm6 = vmand %vm806_vm2, %vm474_vm0  ;;  %v978_v6 = vld [vmem:[#allocation2] sm:$0xf]  ;;  %s5068_s22 = sshll.u32 %s7335_s18, 7  ;;  %vm1241_vm9 = vsmask.f32 3328 }
   0xf   : > { %vm5322_vm7 = vmand %vm798_vm4, %vm799_vm5  ;;  %s5341_s25 = scalar_lea.vmem %s7312_s0, %s5068_s22  ;;  %v5346_v11 = vld [vmem:[%s7313_s1] ss:$0 sm:$0xff]  ;;  %vm1242_vm10 = vsmask.f32 7440  ;;  %vm1853_vm12 = vcmask 1042432   ;;  %vm1854_vm13 = vcmask 1046532  }
  0x10   : > { %v5316_v5 = vrot.slane %v5308_v2, 4  ;;  %v979_v10 = vsel %vm5322_vm7, %v5308_v2, %v978_v6  ;;  %v5091_v12 = vld [vmem:[%s5341_s25] sm:$0xff]   ;;  %v5156_v13 = vld [vmem:[%s5341_s25 + $0x18] sm:$0xff]   ;;  %v5155_v14 = vld [vmem:[%s5341_s25 + $0x10] sm:$0xff]   ;;  %vm1724_vm15 = vcmask 126016   ;;  %vm2064_vm0 = vcmask 191616  }
  0x11   : > { %v5092_v15 = vunpack.c.l.bf16 %v5091_v12  ;;  %v5093_v16 = vunpack.c.h.bf16 %v5091_v12  ;;  %v5355_v17 = vld [vmem:[%s7314_s2] ss:$0 sm:$0xff]  ;;  %v5104_v18 = vunpack.c.l.bf16 %v5156_v13  ;;  %v5105_v19 = vunpack.c.h.bf16 %v5156_v13  ;;  %v5159_v20 = vld [vmem:[%s5341_s25 + $0x30] sm:$0xff]   ;;  %980 = vst [vmem:[#allocation2] sm:$0xf] %v979_v10  ;;  %vm5368_vm8 = vmand %vm806_vm2, %vm799_vm5  ;;  %s5253_s22 = smov 56  }
  0x12   : > { %v973_v8 = vsel %vm5304_vm3, %v5316_v5, %v5308_v2  ;;  %v983_v9 = vsel %vm5311_vm6, %v5316_v5, %v982_v4  ;;  %v5100_v21 = vunpack.c.l.bf16 %v5155_v14  ;;  %v5101_v22 = vunpack.c.h.bf16 %v5155_v14  ;;  %vm5414_vm11 = vmor %vm1241_vm9, %vm1242_vm10  ;;  %s4919_s14 = sshll.u32 %s7335_s18, 1 }
  0x13   : > { %981 = vst.msk [vmem:[#allocation2 + $0x4] sm:$0xf] %vm798_vm4, %v973_v8  ;;  %v5116_v23 = vunpack.c.l.bf16 %v5159_v20  ;;  %v5117_v24 = vunpack.c.h.bf16 %v5159_v20  ;;  %v343_v25 = vmul.f32 %v5346_v11, %v5092_v15  ;;  %v344_v26 = vmul.f32 %v5346_v11, %v5093_v16  ;;  %v808_v15 = vld [vmem:[#allocation2 + $0x14] sm:$0x1]  ;;  %vm5872_vm14 = vmor %vm1853_vm12, %vm1854_vm13 }
  0x14   : > { %984 = vst [vmem:[#allocation2 + $0x8] sm:$0x1] %v983_v9  ;;  %v349_v27 = vmul.f32 %v5346_v11, %v5104_v18  ;;  %v350_v28 = vmul.f32 %v5346_v11, %v5105_v19  ;;  %v347_v29 = vmul.f32 %v5346_v11, %v5100_v21  ;;  %v348_v30 = vmul.f32 %v5346_v11, %v5101_v22 }
  0x15   : > { %1016 = vst.msk [vmem:[#allocation2 + $0xd0] sm:$0xf] %vm798_vm4, %v973_v8  ;;  %v355_v31 = vmul.f32 %v5346_v11, %v5116_v23  ;;  %v356_v32 = vmul.f32 %v5346_v11, %v5117_v24  ;;  %v378_v34 = vadd.f32 %v5355_v17, %v343_v25  ;;  %v379_v35 = vadd.f32 %v5355_v17, %v344_v26  ;;  %v829_v24 = vld [vmem:[#allocation2 + $0x38] sm:$0x1] }
  0x16   : > { %v384_v36 = vadd.f32 %v5355_v17, %v349_v27  ;;  %v385_v37 = vadd.f32 %v5355_v17, %v350_v28  ;;  %v382_v39 = vadd.f32 %v5355_v17, %v347_v29  ;;  %v383_v40 = vadd.f32 %v5355_v17, %v348_v30 }
  0x17   : > { %v5379_v41 = vadd.f32 %v5355_v17, %v355_v31  ;;  %v5382_v42 = vadd.f32 %v5355_v17, %v356_v32  ;;  %v410_v46 = vmax.f32 %v378_v34, 0.0  ;;  %v411_v47 = vmax.f32 %v379_v35, 0.0 }
  0x18   : > { %v416_v49 = vmax.f32 %v384_v36, 0.0  ;;  %v417_v50 = vmax.f32 %v385_v37, 0.0  ;;  %v414_v51 = vmax.f32 %v382_v39, 0.0  ;;  %v1020_v54 = vld [vmem:[#allocation2] sm:$0x1]  ;;  %v415_v60 = vmax.f32 %v383_v40, 0.0 }
  0x19   : > { %v5388_v55 = vpack.c.bf16 %v410_v46, %v410_v46  ;;  %v443_v56 = vpack.c.bf16 %v411_v47, %v411_v47  ;;  %v1021_v57 = vsel %vm5311_vm6, 0, %v1020_v54  ;;  %v422_v20 = vmax.f32 %v5379_v41, 0.0  ;;  %v822_v36 = vld [vmem:[#allocation2 + $0x2c] sm:$0x1] }
  0x1a   : > { %v1194_v38 = vld [vmem:[#allocation2 + $0x4] sm:$0xf]  ;;  %v5392_v58 = vpack.c.bf16 %v416_v49, %v416_v49  ;;  %v449_v59 = vpack.c.bf16 %v417_v50, %v417_v50  ;;  %1022 = vst [vmem:[#allocation2] sm:$0x1] %v1021_v57  ;;  %v5397_v9 = vpack.c.bf16 %v414_v51, %v414_v51  ;;  %v447_v14 = vpack.c.bf16 %v415_v60, %v415_v60  ;;  %v5158_v37 = vld [vmem:[%s5341_s25 + $0x28] sm:$0xff]  }
  0x1b   : > { %v1075_v43 = vld [vmem:[#allocation2 + $0x8] sm:$0x1]  ;;  %v1254_v44 = vshll.u32 %v1194_v38, 16  ;;  %v1258_v45 = vshrl.u32 %v1194_v38, 16  ;;  %v478_v62 = vshrl.u32 %v5388_v55, 16  ;;  %v486_v63 = vshrl.u32 %v443_v56, 16 }
  0x1c   : > { %v1076_v48 = vsel %vm5368_vm8, 0, %v1075_v43  ;;  %v489_v1 = vshll.u32 %v443_v56, 16  ;;  %v529_v4 = vshrl.u32 %v5392_v58, 16  ;;  %v537_v6 = vshrl.u32 %v449_v59, 16  ;;  %v3220_v38 = vld [vmem:[#allocation2 + $0xd0] sm:$0xf] }
  0x1d   : > { %1077 = vst [vmem:[#allocation2 + $0x8] sm:$0x1] %v1076_v48  ;;  %v5386_v52 = vrot.slane %v1254_v44, 5  ;;  %v1260_v53 = vrot.slane %v1258_v45, 4  ;;  %v540_v8 = vshll.u32 %v449_v59, 16  ;;  %v5399_v12 = vrot.slane %v478_v62, 7 }
  0x1e   : > { %v488_v13 = vrot.slane %v486_v63, 7  ;;  %v5401_v16 = vrot.slane %v529_v4, 7  ;;  %v539_v18 = vrot.slane %v537_v6, 7  ;;  %v512_v19 = vshrl.u32 %v5397_v9, 16  ;;  %v5436_v63 = vld [vmem:[%s5341_s25 + $0x8] sm:$0xff]  }
  0x1f   : > { %v1261_v61 = vor.u32 %v1260_v53, %v5386_v52  ;;  %v484_v21 = vrot.slane %v5399_v12, 4  ;;  %v520_v25 = vshrl.u32 %v447_v14, 16  ;;  %v523_v44 = vshll.u32 %v447_v14, 16 }
  0x20   : > { %v491_v22 = vor.u32 %v489_v1, %v488_v13  ;;  %v493_v23 = vrot.slane %v488_v13, 4  ;;  %v535_v27 = vrot.slane %v5401_v16, 4  ;;  %v542_v28 = vor.u32 %v540_v8, %v539_v18 }
  0x21   : > { %v1262_v10 = vrot.slane %v1261_v61, 4  ;;  %v544_v29 = vrot.slane %v539_v18, 4  ;;  %v514_v30 = vrot.slane %v512_v19, 7  ;;  %v522_v35 = vrot.slane %v520_v25, 7  ;;  %v1193_v39 = vld [vmem:[#allocation2] sm:$0xf] }
  0x22   : > { %v492_v32 = vsel %vm5304_vm3, %v484_v21, %v491_v22  ;;  %v809_v34 = vsel %vm5311_vm6, %v493_v23, %v808_v15  ;;  %v543_v40 = vsel %vm5304_vm3, %v535_v27, %v542_v28  ;;  %v1245_v46 = vshrl.u32 %v1193_v39, 16  ;;  %v818_v22 = vld [vmem:[#allocation2 + $0x24] sm:$0xf] }
  0x23   : > { %805 = vst.msk [vmem:[#allocation2 + $0x10] sm:$0xf] %vm798_vm4, %v492_v32  ;;  %v830_v41 = vsel %vm5311_vm6, %v544_v29, %v829_v24  ;;  %v518_v43 = vrot.slane %v514_v30, 4  ;;  %v1248_v47 = vshll.u32 %v1193_v39, 16  ;;  %v527_v48 = vrot.slane %v522_v35, 4 }
  0x24   : > { %v1195_v26 = vld [vmem:[#allocation2 + $0x8] sm:$0x1]  ;;  %810 = vst [vmem:[#allocation2 + $0x14] sm:$0x1] %v809_v34  ;;  %v525_v49 = vor.u32 %v523_v44, %v522_v35  ;;  %v423_v50 = vmax.f32 %v5382_v42, 0.0  ;;  %v5425_v51 = vpack.c.bf16 %v422_v20, %v422_v20  ;;  %v5112_v53 = vunpack.c.l.bf16 %v5158_v37 }
  0x25   : > { %v1264_v31 = vshll.u32 %v1195_v26, 16  ;;  %828 = vst.msk [vmem:[#allocation2 + $0x34] sm:$0xf] %vm798_vm4, %v543_v40  ;;  %v1247_v56 = vrot.slane %v1245_v46, 4  ;;  %v1250_v57 = vrot.slane %v1248_v47, 5  ;;  %v823_v59 = vsel %vm5311_vm6, %v527_v48, %v822_v36 }
  0x26   : > { %831 = vst [vmem:[#allocation2 + $0x38] sm:$0x1] %v830_v41  ;;  %v526_v60 = vsel %vm5304_vm3, %v518_v43, %v525_v49  ;;  %v455_v42 = vpack.c.bf16 %v423_v50, %v423_v50  ;;  %v580_v61 = vshrl.u32 %v5425_v51, 16  ;;  %v5113_v62 = vunpack.c.h.bf16 %v5158_v37  ;;  %v850_v32 = vld [vmem:[#allocation2 + $0x5c] sm:$0x1] }
  0x27   : > { %v1266_v45 = vrot.slane %v1264_v31, 5  ;;  %824 = vst [vmem:[#allocation2 + $0x2c] sm:$0x1] %v823_v59  ;;  %v1251_v1 = vor.u32 %v1250_v57, %v1247_v56  ;;  %v353_v4 = vmul.f32 %v5346_v11, %v5112_v53  ;;  %v515_v6 = vshll.u32 %v5397_v9, 16 }
  0x28   : > { %821 = vst.msk [vmem:[#allocation2 + $0x28] sm:$0xf] %vm798_vm4, %v526_v60  ;;  %v5096_v8 = vunpack.c.l.bf16 %v5436_v63  ;;  %v588_v13 = vshrl.u32 %v455_v42, 16  ;;  %v591_v14 = vshll.u32 %v455_v42, 16  ;;  %v354_v15 = vmul.f32 %v5346_v11, %v5113_v62 }
  0x29   : > { %v1267_v54 = vsel %vm5414_vm11, %v1262_v10, %v1266_v45  ;;  %v5442_v10 = vrot.slane %v580_v61, 7  ;;  %v1252_v18 = vrot.slane %v1251_v1, 4  ;;  %v388_v20 = vadd.f32 %v5355_v17, %v353_v4 }
  0x2a   : > { %1630 = vrot.lane.b32.xlu0 %v1267_v54, %s5248_s30  ;;  %v1197_v19 = vld [vmem:[#allocation2 + $0x10] sm:$0xf]  ;;  %v517_v21 = vor.u32 %v515_v6, %v514_v30  ;;  %v5097_v23 = vunpack.c.h.bf16 %v5436_v63  ;;  %v590_v27 = vrot.slane %v588_v13, 7  ;;  %v389_v30 = vadd.f32 %v5355_v17, %v354_v15 }
  0x2b   : > { %v1078_v24 = vld [vmem:[#allocation2 + $0x14] sm:$0x1]  ;;  %v1278_v25 = vshll.u32 %v1197_v19, 16  ;;  %v1282_v26 = vshrl.u32 %v1197_v19, 16  ;;  %v586_v9 = vrot.slane %v5442_v10, 4  ;;  %v1257_v28 = vsel %vm5414_vm11, %v1252_v18, %v5386_v52  ;;  %v5161_v18 = vld [vmem:[%s5341_s25 + $0x40] sm:$0xff]  }
  0x2c   : > { %v1079_v29 = vsel %vm5368_vm8, 0, %v1078_v24  ;;  %v1206_v31 = vld [vmem:[#allocation2 + $0x34] sm:$0xf]  ;;  %v420_v34 = vmax.f32 %v388_v20, 0.0  ;;  %v593_v39 = vor.u32 %v591_v14, %v590_v27  ;;  %v819_v40 = vsel %vm5322_vm7, %v517_v21, %v818_v22 }
  0x2d   : > { %1080 = vst [vmem:[#allocation2 + $0x14] sm:$0x1] %v1079_v29  ;;  %v5454_v35 = vrot.slane %v1278_v25, 5  ;;  %v1284_v36 = vrot.slane %v1282_v26, 4  ;;  %v1087_v37 = vld [vmem:[#allocation2 + $0x38] sm:$0x1]  ;;  %v345_v4 = vmul.f32 %v5346_v11, %v5096_v8  ;;  %v346_v15 = vmul.f32 %v5346_v11, %v5097_v23 }
  0x2e   : > { %v1088_v52 = vsel %vm5368_vm8, 0, %v1087_v37  ;;  %v1350_v41 = vshll.u32 %v1206_v31, 16  ;;  %v1354_v43 = vshrl.u32 %v1206_v31, 16  ;;  %v1084_v44 = vld [vmem:[#allocation2 + $0x2c] sm:$0x1]  ;;  %v595_v45 = vrot.slane %v590_v27, 4 }
  0x2f   : > { %v1285_v46 = vor.u32 %v1284_v36, %v5454_v35  ;;  %1089 = vst [vmem:[#allocation2 + $0x38] sm:$0x1] %v1088_v52  ;;  %v1085_v47 = vsel %vm5368_vm8, 0, %v1084_v44  ;;  %v1203_v48 = vld [vmem:[#allocation2 + $0x28] sm:$0xf]  ;;  %v594_v49 = vsel %vm5304_vm3, %v586_v9, %v593_v39  ;;  %v421_v50 = vmax.f32 %v389_v30, 0.0 }
  0x30   : > { %v5466_v53 = vrot.slane %v1350_v41, 5  ;;  %v1356_v54 = vrot.slane %v1354_v43, 4  ;;  %1086 = vst [vmem:[#allocation2 + $0x2c] sm:$0x1] %v1085_v47  ;;  %v1326_v56 = vshll.u32 %v1203_v48, 16  ;;  %v1330_v57 = vshrl.u32 %v1203_v48, 16 }
  0x31   : > { %v1286_v59 = vrot.slane %v1285_v46, 4  ;;  %849 = vst.msk [vmem:[#allocation2 + $0x58] sm:$0xf] %vm798_vm4, %v594_v49  ;;  %v851_v60 = vsel %vm5311_vm6, %v595_v45, %v850_v32  ;;  %v5471_v42 = vpack.c.bf16 %v420_v34, %v420_v34  ;;  %v453_v61 = vpack.c.bf16 %v421_v50, %v421_v50  ;;  %v843_v29 = vld [vmem:[#allocation2 + $0x50] sm:$0x1] }
  0x32   : > { %1628 = vrot.lane.b32.xlu0 %v1257_v28, %s5248_s30  ;;  %v1357_v62 = vor.u32 %v1356_v54, %v5466_v53  ;;  %v5474_v63 = vrot.slane %v1326_v56, 5  ;;  %v1332_v1 = vrot.slane %v1330_v57, 4  ;;  %852 = vst [vmem:[#allocation2 + $0x5c] sm:$0x1] %v851_v60  ;;  %v380_v22 = vadd.f32 %v5355_v17, %v345_v4 }
  0x33   : > { %v563_v6 = vshrl.u32 %v5471_v42, 16  ;;  %v571_v13 = vshrl.u32 %v453_v61, 16  ;;  %v574_v14 = vshll.u32 %v453_v61, 16  ;;  %820 = vst [vmem:[#allocation2 + $0x24] sm:$0xf] %v819_v40  ;;  %v5124_v24 = vunpack.c.l.bf16 %v5161_v18 }
  0x34   : > { %v1198_v19 = vld [vmem:[#allocation2 + $0x14] sm:$0x1]  ;;  %v1358_v20 = vrot.slane %v1357_v62, 4  ;;  %v1333_v21 = vor.u32 %v1332_v1, %v5474_v63  ;;  %v381_v8 = vadd.f32 %v5355_v17, %v346_v15  ;;  %v412_v31 = vmax.f32 %v380_v22, 0.0  ;;  %v5157_v15 = vld [vmem:[%s5341_s25 + $0x20] sm:$0xff]  }
  0x35   : > { %v1288_v25 = vshll.u32 %v1198_v19, 16  ;;  %v565_v26 = vrot.slane %v563_v6, 7  ;;  %v573_v9 = vrot.slane %v571_v13, 7  ;;  %v5125_v32 = vunpack.c.h.bf16 %v5161_v18 }
  0x36   : > { %v1207_v27 = vld [vmem:[#allocation2 + $0x38] sm:$0x1]  ;;  %v5483_v28 = vrot.slane %v1333_v21, 4  ;;  %v359_v23 = vmul.f32 %v5346_v11, %v5124_v24  ;;  %v413_v43 = vmax.f32 %v381_v8, 0.0  ;;  %v5486_v44 = vpack.c.bf16 %v412_v31, %v412_v31  ;;  %v839_v21 = vld [vmem:[#allocation2 + $0x48] sm:$0xf] }
  0x37   : > { %v1290_v30 = vrot.slane %v1288_v25, 5  ;;  %v1360_v34 = vshll.u32 %v1207_v27, 16  ;;  %v1204_v36 = vld [vmem:[#allocation2 + $0x2c] sm:$0x1]  ;;  %v569_v37 = vrot.slane %v565_v26, 4  ;;  %v576_v39 = vor.u32 %v574_v14, %v573_v9 }
  0x38   : > { %v1336_v40 = vshll.u32 %v1204_v36, 16  ;;  %v1215_v52 = vld [vmem:[#allocation2 + $0x58] sm:$0xf]  ;;  %v578_v41 = vrot.slane %v573_v9, 4  ;;  %v445_v6 = vpack.c.bf16 %v413_v43, %v413_v43  ;;  %v495_v13 = vshrl.u32 %v5486_v44, 16 }
  0x39   : > { %v1291_v45 = vsel %vm5414_vm11, %v1286_v59, %v1290_v30  ;;  %v1362_v46 = vrot.slane %v1360_v34, 5  ;;  %v1096_v47 = vld [vmem:[#allocation2 + $0x5c] sm:$0x1]  ;;  %v1422_v48 = vshll.u32 %v1215_v52, 16  ;;  %v1426_v49 = vshrl.u32 %v1215_v52, 16 }
  0x3a   : > { %1634 = vrot.lane.b32.xlu1 %v1291_v45, %s5248_s30  ;;  %v1338_v50 = vrot.slane %v1336_v40, 5  ;;  %v1097_v54 = vsel %vm5368_vm8, 0, %v1096_v47  ;;  %v577_v56 = vsel %vm5304_vm3, %v569_v37, %v576_v39  ;;  %v844_v57 = vsel %vm5311_vm6, %v578_v41, %v843_v29  ;;  %v1029_v60 = vld [vmem:[#allocation2 + $0x24] sm:$0x1]  ;;  %v801_v52 = vld [vmem:[#allocation2 + $0xc] sm:$0xf] }
  0x3b   : > { %v1363_v59 = vsel %vm5414_vm11, %v1358_v20, %v1362_v46  ;;  %1098 = vst [vmem:[#allocation2 + $0x5c] sm:$0x1] %v1097_v54  ;;  %v5499_v61 = vrot.slane %v1422_v48, 5  ;;  %v1428_v62 = vrot.slane %v1426_v49, 4  ;;  %v1030_v1 = vsel %vm5311_vm6, 0, %v1029_v60 }
  0x3c   : > { %1646 = vrot.lane.b32.xlu0 %v1363_v59, %s5248_s30  ;;  %v1339_v4 = vsel %vm5414_vm11, %v5483_v28, %v1338_v50  ;;  %842 = vst.msk [vmem:[#allocation2 + $0x4c] sm:$0xf] %vm798_vm4, %v577_v56  ;;  %v360_v14 = vmul.f32 %v5346_v11, %v5125_v32  ;;  %v394_v19 = vadd.f32 %v5355_v17, %v359_v23  ;;  %v566_v20 = vshll.u32 %v5471_v42, 16  ;;  %v815_v42 = vld [vmem:[#allocation2 + $0x20] sm:$0x1] }
  0x3d   : > { %v1429_v18 = vor.u32 %v1428_v62, %v5499_v61  ;;  %845 = vst [vmem:[#allocation2 + $0x50] sm:$0x1] %v844_v57  ;;  %v5108_v22 = vunpack.c.l.bf16 %v5157_v15  ;;  %v5514_v24 = vrot.slane %v495_v13, 7  ;;  %v503_v25 = vshrl.u32 %v445_v6, 16  ;;  %v5532_v62 = vld [vmem:[%s5341_s25 + $0x38] sm:$0xff]  }
  0x3e   : > { %1031 = vst [vmem:[#allocation2 + $0x24] sm:$0x1] %v1030_v1  ;;  %v506_v9 = vshll.u32 %v445_v6, 16  ;;  %v395_v8 = vadd.f32 %v5355_v17, %v360_v14  ;;  %v426_v28 = vmax.f32 %v394_v19, 0.0  ;;  %v568_v29 = vor.u32 %v566_v20, %v565_v26 }
  0x3f   : > { %v1430_v27 = vrot.slane %v1429_v18, 4  ;;  %v5109_v31 = vunpack.c.h.bf16 %v5157_v15  ;;  %v501_v32 = vrot.slane %v5514_v24, 4  ;;  %v505_v30 = vrot.slane %v503_v25, 7 }
  0x40   : > { %v427_v34 = vmax.f32 %v395_v8, 0.0  ;;  %v351_v23 = vmul.f32 %v5346_v11, %v5108_v22  ;;  %v458_v36 = vpack.c.bf16 %v426_v28, %v426_v28  ;;  %v840_v37 = vsel %vm5322_vm7, %v568_v29, %v839_v21 }
  0x41   : > { %v352_v39 = vmul.f32 %v5346_v11, %v5109_v31  ;;  %v481_v40 = vshll.u32 %v5388_v55, 16  ;;  %v508_v41 = vor.u32 %v506_v9, %v505_v30  ;;  %v510_v43 = vrot.slane %v505_v30, 4  ;;  %841 = vst [vmem:[#allocation2 + $0x48] sm:$0xf] %v840_v37 }
  0x42   : > { %1642 = vrot.lane.b32.xlu1 %v1339_v4, %s5248_s30  ;;  %v1216_v26 = vld [vmem:[#allocation2 + $0x5c] sm:$0x1]  ;;  %v459_v45 = vpack.c.bf16 %v427_v34, %v427_v34  ;;  %v386_v46 = vadd.f32 %v5355_v17, %v351_v23  ;;  %v614_v49 = vshrl.u32 %v458_v36, 16  ;;  %v5120_v13 = vunpack.c.l.bf16 %v5532_v62 }
  0x43   : > { %v1432_v47 = vshll.u32 %v1216_v26, 16  ;;  %v1212_v48 = vld [vmem:[#allocation2 + $0x4c] sm:$0xf]  ;;  %v387_v50 = vadd.f32 %v5355_v17, %v352_v39  ;;  %v483_v54 = vor.u32 %v481_v40, %v5399_v12  ;;  %v509_v60 = vsel %vm5304_vm3, %v501_v32, %v508_v41 }
  0x44   : > { %v1093_v56 = vld [vmem:[#allocation2 + $0x50] sm:$0x1]  ;;  %v1398_v55 = vshll.u32 %v1212_v48, 16  ;;  %v1402_v57 = vshrl.u32 %v1212_v48, 16  ;;  %v816_v59 = vsel %vm5311_vm6, %v510_v43, %v815_v42  ;;  %814 = vst.msk [vmem:[#allocation2 + $0x1c] sm:$0xf] %vm798_vm4, %v509_v60 }
  0x45   : > { %v1434_v1 = vrot.slane %v1432_v47, 5  ;;  %v1094_v4 = vsel %vm5368_vm8, 0, %v1093_v56  ;;  %v1202_v6 = vld [vmem:[#allocation2 + $0x24] sm:$0xf]  ;;  %v802_v12 = vsel %vm5322_vm7, %v483_v54, %v801_v52  ;;  %817 = vst [vmem:[#allocation2 + $0x20] sm:$0x1] %v816_v59 }
  0x46   : > { %1095 = vst [vmem:[#allocation2 + $0x50] sm:$0x1] %v1094_v4  ;;  %v5540_v14 = vrot.slane %v1398_v55, 5  ;;  %v1404_v15 = vrot.slane %v1402_v57, 4  ;;  %v1317_v18 = vshrl.u32 %v1202_v6, 16  ;;  %v1320_v19 = vshll.u32 %v1202_v6, 16 }
  0x47   : > { %v1435_v20 = vsel %vm5414_vm11, %v1430_v27, %v1434_v1  ;;  %v616_v21 = vrot.slane %v614_v49, 7  ;;  %v622_v22 = vshrl.u32 %v459_v45, 16  ;;  %v625_v25 = vshll.u32 %v459_v45, 16  ;;  %803 = vst [vmem:[#allocation2 + $0xc] sm:$0xf] %v802_v12 }
  0x48   : > { %1658 = vrot.lane.b32.xlu0 %v1435_v20, %s5248_s30  ;;  %v1405_v9 = vor.u32 %v1404_v15, %v5540_v14  ;;  %v1319_v8 = vrot.slane %v1317_v18, 4  ;;  %v1322_v28 = vrot.slane %v1320_v19, 5  ;;  %v418_v29 = vmax.f32 %v386_v46, 0.0  ;;  %v1038_v30 = vld [vmem:[#allocation2 + $0x48] sm:$0x1] }
  0x49   : > { %v620_v31 = vrot.slane %v616_v21, 4  ;;  %v624_v32 = vrot.slane %v622_v22, 7  ;;  %v419_v34 = vmax.f32 %v387_v50, 0.0  ;;  %v617_v23 = vshll.u32 %v458_v36, 16  ;;  %v864_v27 = vld [vmem:[#allocation2 + $0x74] sm:$0x1] }
  0x4a   : > { %v1406_v42 = vrot.slane %v1405_v9, 4  ;;  %v1323_v37 = vor.u32 %v1322_v28, %v1319_v8  ;;  %v1039_v39 = vsel %vm5311_vm6, 0, %v1038_v30  ;;  %v450_v40 = vpack.c.bf16 %v418_v29, %v418_v29  ;;  %v860_v45 = vld [vmem:[#allocation2 + $0x6c] sm:$0xf] }
  0x4b   : > { %v627_v52 = vor.u32 %v625_v25, %v624_v32  ;;  %v629_v26 = vrot.slane %v624_v32, 4  ;;  %1040 = vst [vmem:[#allocation2 + $0x48] sm:$0x1] %v1039_v39  ;;  %v451_v41 = vpack.c.bf16 %v419_v34, %v419_v34  ;;  %v619_v43 = vor.u32 %v617_v23, %v616_v21  ;;  %v1200_v47 = vld [vmem:[#allocation2 + $0x1c] sm:$0xf]  ;;  %v5567_v21 = vld [vmem:[%s5341_s25 + $0x48] sm:$0xff]  }
  0x4c   : > { %v1324_v46 = vrot.slane %v1323_v37, 4  ;;  %v546_v48 = vshrl.u32 %v450_v40, 16  ;;  %v5121_v49 = vunpack.c.h.bf16 %v5532_v62  ;;  %v357_v36 = vmul.f32 %v5346_v11, %v5120_v13  ;;  %v1081_v1 = vld [vmem:[#allocation2 + $0x20] sm:$0x1]  ;;  %v836_v32 = vld [vmem:[#allocation2 + $0x44] sm:$0x1] }
  0x4d   : > { %v1213_v50 = vld [vmem:[#allocation2 + $0x50] sm:$0x1]  ;;  %v1302_v54 = vshll.u32 %v1200_v47, 16  ;;  %v1306_v56 = vshrl.u32 %v1200_v47, 16  ;;  %v628_v55 = vsel %vm5304_vm3, %v620_v31, %v627_v52  ;;  %v865_v57 = vsel %vm5311_vm6, %v629_v26, %v864_v27 }
  0x4e   : > { %v1408_v60 = vshll.u32 %v1213_v50, 16  ;;  %v1329_v59 = vsel %vm5414_vm11, %v1324_v46, %v5474_v63  ;;  %863 = vst.msk [vmem:[#allocation2 + $0x70] sm:$0xf] %vm798_vm4, %v628_v55  ;;  %v548_v62 = vrot.slane %v546_v48, 7  ;;  %v861_v4 = vsel %vm5322_vm7, %v619_v43, %v860_v45  ;;  %v1023_v9 = vld [vmem:[#allocation2 + $0xc] sm:$0x1] }
  0x4f   : > { %v1082_v6 = vsel %vm5368_vm8, 0, %v1081_v1  ;;  %v5562_v12 = vrot.slane %v1302_v54, 5  ;;  %v1308_v13 = vrot.slane %v1306_v56, 4  ;;  %866 = vst [vmem:[#allocation2 + $0x74] sm:$0x1] %v865_v57  ;;  %v554_v15 = vshrl.u32 %v451_v41, 16 }
  0x50   : > { %v1410_v18 = vrot.slane %v1408_v60, 5  ;;  %1640 = vrot.lane.b32.xlu0 %v1329_v59, %s5248_s30  ;;  %1083 = vst [vmem:[#allocation2 + $0x20] sm:$0x1] %v1082_v6  ;;  %v552_v63 = vrot.slane %v548_v62, 4  ;;  %v557_v19 = vshll.u32 %v451_v41, 16  ;;  %v358_v20 = vmul.f32 %v5346_v11, %v5121_v49 }
  0x51   : > { %v1309_v22 = vor.u32 %v1308_v13, %v5562_v12  ;;  %v556_v25 = vrot.slane %v554_v15, 7  ;;  %862 = vst [vmem:[#allocation2 + $0x6c] sm:$0xf] %v861_v4  ;;  %v392_v8 = vadd.f32 %v5355_v17, %v357_v36  ;;  %v549_v28 = vshll.u32 %v450_v40, 16  ;;  %v832_v43 = vld [vmem:[#allocation2 + $0x3c] sm:$0xf] }
  0x52   : > { %v1411_v29 = vsel %vm5414_vm11, %v1406_v42, %v1410_v18  ;;  %v1211_v31 = vld [vmem:[#allocation2 + $0x48] sm:$0xf]  ;;  %v1024_v30 = vsel %vm5311_vm6, 0, %v1023_v9  ;;  %v393_v34 = vadd.f32 %v5355_v17, %v358_v20  ;;  %v5128_v23 = vunpack.c.l.bf16 %v5567_v21 }
  0x53   : > { %1654 = vrot.lane.b32.xlu1 %v1411_v29, %s5248_s30  ;;  %v1310_v37 = vrot.slane %v1309_v22, 4  ;;  %v1389_v27 = vshrl.u32 %v1211_v31, 16  ;;  %v1392_v39 = vshll.u32 %v1211_v31, 16  ;;  %v559_v52 = vor.u32 %v557_v19, %v556_v25  ;;  %1025 = vst [vmem:[#allocation2 + $0xc] sm:$0x1] %v1024_v30 }
  0x54   : > { %v561_v40 = vrot.slane %v556_v25, 4  ;;  %v424_v26 = vmax.f32 %v392_v8, 0.0  ;;  %v425_v41 = vmax.f32 %v393_v34, 0.0  ;;  %v551_v42 = vor.u32 %v549_v28, %v548_v62 }
  0x55   : > { %v1221_v45 = vld [vmem:[#allocation2 + $0x70] sm:$0xf]  ;;  %v1391_v46 = vrot.slane %v1389_v27, 4  ;;  %v1394_v47 = vrot.slane %v1392_v39, 5  ;;  %v560_v48 = vsel %vm5304_vm3, %v552_v63, %v559_v52  ;;  %v5129_v49 = vunpack.c.h.bf16 %v5567_v21  ;;  %v857_v39 = vld [vmem:[#allocation2 + $0x68] sm:$0x1] }
  0x56   : > { %v1102_v36 = vld [vmem:[#allocation2 + $0x74] sm:$0x1]  ;;  %v1470_v50 = vshll.u32 %v1221_v45, 16  ;;  %v1474_v54 = vshrl.u32 %v1221_v45, 16  ;;  %835 = vst.msk [vmem:[#allocation2 + $0x40] sm:$0xf] %vm798_vm4, %v560_v48  ;;  %v837_v56 = vsel %vm5311_vm6, %v561_v40, %v836_v32  ;;  %v5584_v55 = vpack.c.bf16 %v424_v26, %v424_v26 }
  0x57   : > { %v1201_v57 = vld [vmem:[#allocation2 + $0x20] sm:$0x1]  ;;  %v1103_v60 = vsel %vm5368_vm8, 0, %v1102_v36  ;;  %v1395_v59 = vor.u32 %v1394_v47, %v1391_v46  ;;  %838 = vst [vmem:[#allocation2 + $0x44] sm:$0x1] %v837_v56  ;;  %v457_v1 = vpack.c.bf16 %v425_v41, %v425_v41  ;;  %v833_v62 = vsel %vm5322_vm7, %v551_v42, %v832_v43  ;;  %v5164_v56 = vld [vmem:[%s5341_s25 + $0x58] sm:$0xff]  }
  0x58   : > { %v1312_v4 = vshll.u32 %v1201_v57, 16  ;;  %1104 = vst [vmem:[#allocation2 + $0x74] sm:$0x1] %v1103_v60  ;;  %v5590_v6 = vrot.slane %v1470_v50, 5  ;;  %v1476_v13 = vrot.slane %v1474_v54, 4  ;;  %v597_v15 = vshrl.u32 %v5584_v55, 16 }
  0x59   : > { %v1396_v18 = vrot.slane %v1395_v59, 4  ;;  %v1047_v63 = vld [vmem:[#allocation2 + $0x6c] sm:$0x1]  ;;  %v605_v19 = vshrl.u32 %v457_v1, 16  ;;  %v608_v20 = vshll.u32 %v457_v1, 16  ;;  %v361_v21 = vmul.f32 %v5346_v11, %v5128_v23 }
  0x5a   : > { %v1314_v22 = vrot.slane %v1312_v4, 5  ;;  %v1477_v25 = vor.u32 %v1476_v13, %v5590_v6  ;;  %v1196_v9 = vld [vmem:[#allocation2 + $0xc] sm:$0xf]  ;;  %v1048_v8 = vsel %vm5311_vm6, 0, %v1047_v63  ;;  %v5597_v28 = vrot.slane %v597_v15, 7 }
  0x5b   : > { %v1401_v29 = vsel %vm5414_vm11, %v1396_v18, %v5540_v14  ;;  %v1269_v31 = vshrl.u32 %v1196_v9, 16  ;;  %v1272_v32 = vshll.u32 %v1196_v9, 16  ;;  %1049 = vst [vmem:[#allocation2 + $0x6c] sm:$0x1] %v1048_v8  ;;  %v607_v30 = vrot.slane %v605_v19, 7 }
  0x5c   : > { %v1315_v34 = vsel %vm5414_vm11, %v1310_v37, %v1314_v22  ;;  %v1478_v23 = vrot.slane %v1477_v25, 4  ;;  %1652 = vrot.lane.b32.xlu0 %v1401_v29, %s5248_s30  ;;  %v603_v27 = vrot.slane %v5597_v28, 4  ;;  %834 = vst [vmem:[#allocation2 + $0x3c] sm:$0xf] %v833_v62  ;;  %v362_v52 = vmul.f32 %v5346_v11, %v5129_v49 }
  0x5d   : > { %1638 = vrot.lane.b32.xlu2 %v1315_v34, %s5248_s30  ;;  %v1209_v14 = vld [vmem:[#allocation2 + $0x40] sm:$0xf]  ;;  %v1271_v40 = vrot.slane %v1269_v31, 4  ;;  %v1274_v26 = vrot.slane %v1272_v32, 5  ;;  %v610_v41 = vor.u32 %v608_v20, %v607_v30  ;;  %v612_v42 = vrot.slane %v607_v30, 4 }
  0x5e   : > { %v1090_v43 = vld [vmem:[#allocation2 + $0x44] sm:$0x1]  ;;  %v1374_v45 = vshll.u32 %v1209_v14, 16  ;;  %v1378_v37 = vshrl.u32 %v1209_v14, 16  ;;  %v396_v46 = vadd.f32 %v5355_v17, %v361_v21  ;;  %v397_v47 = vadd.f32 %v5355_v17, %v362_v52  ;;  %v853_v34 = vld [vmem:[#allocation2 + $0x60] sm:$0xf] }
  0x5f   : > { %v1222_v48 = vld [vmem:[#allocation2 + $0x74] sm:$0x1]  ;;  %v1091_v36 = vsel %vm5368_vm8, 0, %v1090_v43  ;;  %v1275_v49 = vor.u32 %v1274_v26, %v1271_v40  ;;  %v611_v50 = vsel %vm5304_vm3, %v603_v27, %v610_v41  ;;  %v858_v54 = vsel %vm5311_vm6, %v612_v42, %v857_v39 }
  0x60   : > { %v1480_v57 = vshll.u32 %v1222_v48, 16  ;;  %1092 = vst [vmem:[#allocation2 + $0x44] sm:$0x1] %v1091_v36  ;;  %v5617_v60 = vrot.slane %v1374_v45, 5  ;;  %v1380_v59 = vrot.slane %v1378_v37, 4  ;;  %v428_v1 = vmax.f32 %v396_v46, 0.0 }
  0x61   : > { %v5619_v62 = vrot.slane %v1275_v49, 4  ;;  %856 = vst.msk [vmem:[#allocation2 + $0x64] sm:$0xf] %vm798_vm4, %v611_v50  ;;  %v429_v4 = vmax.f32 %v397_v47, 0.0  ;;  %v498_v13 = vshll.u32 %v5486_v44, 16  ;;  %v600_v15 = vshll.u32 %v5584_v55, 16 }
  0x62   : > { %v1482_v18 = vrot.slane %v1480_v57, 5  ;;  %v1381_v63 = vor.u32 %v1380_v59, %v5617_v60  ;;  %v1220_v19 = vld [vmem:[#allocation2 + $0x6c] sm:$0xf]  ;;  %859 = vst [vmem:[#allocation2 + $0x68] sm:$0x1] %v858_v54  ;;  %v5625_v20 = vpack.c.bf16 %v428_v1, %v428_v1  ;;  %v5136_v21 = vunpack.c.l.bf16 %v5164_v56  ;;  %v5163_v59 = vld [vmem:[%s5341_s25 + $0x50] sm:$0xff]  }
  0x63   : > { %v1281_v22 = vsel %vm5414_vm11, %v5619_v62, %v5454_v35  ;;  %v1461_v25 = vshrl.u32 %v1220_v19, 16  ;;  %v1464_v9 = vshll.u32 %v1220_v19, 16  ;;  %v1035_v8 = vld [vmem:[#allocation2 + $0x3c] sm:$0x1]  ;;  %v461_v29 = vpack.c.bf16 %v429_v4, %v429_v4  ;;  %v811_v44 = vld [vmem:[#allocation2 + $0x18] sm:$0xf] }
  0x64   : > { %v1483_v55 = vsel %vm5414_vm11, %v1478_v23, %v1482_v18  ;;  %v1382_v31 = vrot.slane %v1381_v63, 4  ;;  %v1036_v32 = vsel %vm5311_vm6, 0, %v1035_v8  ;;  %v631_v30 = vshrl.u32 %v5625_v20, 16  ;;  %v871_v36 = vld [vmem:[#allocation2 + $0x80] sm:$0x1] }
  0x65   : > { %1666 = vrot.lane.b32.xlu1 %v1483_v55, %s5248_s30  ;;  %v1463_v27 = vrot.slane %v1461_v25, 4  ;;  %v1466_v39 = vrot.slane %v1464_v9, 5  ;;  %1037 = vst [vmem:[#allocation2 + $0x3c] sm:$0x1] %v1036_v32  ;;  %v639_v35 = vshrl.u32 %v461_v29, 16  ;;  %v642_v52 = vshll.u32 %v461_v29, 16 }
  0x66   : > { %v5637_v14 = vrot.slane %v631_v30, 7  ;;  %v500_v40 = vor.u32 %v498_v13, %v5514_v24  ;;  %v602_v23 = vor.u32 %v600_v15, %v5597_v28  ;;  %v5137_v26 = vunpack.c.h.bf16 %v5164_v56 }
  0x67   : > { %v1210_v41 = vld [vmem:[#allocation2 + $0x44] sm:$0x1]  ;;  %v1467_v42 = vor.u32 %v1466_v39, %v1463_v27  ;;  %v641_v43 = vrot.slane %v639_v35, 7  ;;  %v365_v45 = vmul.f32 %v5346_v11, %v5136_v21  ;;  %v532_v37 = vshll.u32 %v5392_v58, 16 }
  0x68   : > { %v1384_v46 = vshll.u32 %v1210_v41, 16  ;;  %v1218_v47 = vld [vmem:[#allocation2 + $0x64] sm:$0xf]  ;;  %v637_v48 = vrot.slane %v5637_v14, 4  ;;  %v812_v49 = vsel %vm5322_vm7, %v500_v40, %v811_v44  ;;  %v854_v24 = vsel %vm5322_vm7, %v602_v23, %v853_v34  ;;  %v5678_v41 = vld [vmem:[%s7313_s1] ss:$0 sm:$0xff] }
  0x69   : > { %v1468_v28 = vrot.slane %v1467_v42, 4  ;;  %v1099_v50 = vld [vmem:[#allocation2 + $0x68] sm:$0x1]  ;;  %v1446_v54 = vshll.u32 %v1218_v47, 16  ;;  %v1450_v56 = vshrl.u32 %v1218_v47, 16  ;;  %v644_v57 = vor.u32 %v642_v52, %v641_v43  ;;  %v5165_v39 = vld [vmem:[%s5341_s25 + $0x60] sm:$0xff]  }
  0x6a   : > { %v1386_v1 = vrot.slane %v1384_v46, 5  ;;  %v1100_v58 = vsel %vm5368_vm8, 0, %v1099_v50  ;;  %v646_v62 = vrot.slane %v641_v43, 4  ;;  %813 = vst [vmem:[#allocation2 + $0x18] sm:$0xf] %v812_v49  ;;  %v366_v4 = vmul.f32 %v5346_v11, %v5137_v26 }
  0x6b   : > { %v1473_v13 = vsel %vm5414_vm11, %v1468_v28, %v5590_v6  ;;  %1101 = vst [vmem:[#allocation2 + $0x68] sm:$0x1] %v1100_v58  ;;  %v5655_v15 = vrot.slane %v1446_v54, 5  ;;  %v1452_v18 = vrot.slane %v1450_v56, 4  ;;  %v645_v63 = vsel %vm5304_vm3, %v637_v48, %v644_v57  ;;  %v881_v56 = vld [vmem:[#allocation2 + $0x90] sm:$0xf] }
  0x6c   : > { %v1387_v19 = vsel %vm5414_vm11, %v1382_v31, %v1386_v1  ;;  %1664 = vrot.lane.b32.xlu0 %v1473_v13, %s5248_s30  ;;  %v1208_v21 = vld [vmem:[#allocation2 + $0x3c] sm:$0xf]  ;;  %870 = vst.msk [vmem:[#allocation2 + $0x7c] sm:$0xf] %vm798_vm4, %v645_v63  ;;  %v872_v25 = vsel %vm5311_vm6, %v646_v62, %v871_v36  ;;  %v400_v6 = vadd.f32 %v5355_v17, %v365_v45  ;;  %v5132_v9 = vunpack.c.l.bf16 %v5163_v59  ;;  %v825_v31 = vld [vmem:[#allocation2 + $0x30] sm:$0xf] }
  0x6d   : > { %1650 = vrot.lane.b32.xlu2 %v1387_v19, %s5248_s30  ;;  %1632 = vrot.lane.b32.xlu1 %v1281_v22, %s5248_s30  ;;  %v1453_v8 = vor.u32 %v1452_v18, %v5655_v15  ;;  %v1365_v29 = vshrl.u32 %v1208_v21, 16  ;;  %v1368_v44 = vshll.u32 %v1208_v21, 16  ;;  %873 = vst [vmem:[#allocation2 + $0x80] sm:$0x1] %v872_v25  ;;  %v401_v55 = vadd.f32 %v5355_v17, %v366_v4 }
  0x6e   : > { %855 = vst [vmem:[#allocation2 + $0x60] sm:$0xf] %v854_v24  ;;  %v432_v32 = vmax.f32 %v400_v6, 0.0  ;;  %v534_v30 = vor.u32 %v532_v37, %v5401_v16  ;;  %v5133_v34 = vunpack.c.h.bf16 %v5163_v59  ;;  %v363_v27 = vmul.f32 %v5346_v11, %v5132_v9  ;;  %v5687_v24 = vld [vmem:[%s7314_s2] ss:$0 sm:$0xff] }
  0x6f   : > { %v1454_v35 = vrot.slane %v1453_v8, 4  ;;  %v1367_v52 = vrot.slane %v1365_v29, 4  ;;  %v1370_v40 = vrot.slane %v1368_v44, 5  ;;  %v433_v22 = vmax.f32 %v401_v55, 0.0 }
  0x70   : > { %v464_v23 = vpack.c.bf16 %v432_v32, %v432_v32  ;;  %v826_v26 = vsel %vm5322_vm7, %v534_v30, %v825_v31  ;;  %v364_v42 = vmul.f32 %v5678_v41, %v5133_v34  ;;  %v398_v16 = vadd.f32 %v5355_v17, %v363_v27 }
  0x71   : > { %v1371_v43 = vor.u32 %v1370_v40, %v1367_v52  ;;  %v1026_v11 = vld [vmem:[#allocation2 + $0x18] sm:$0x1]  ;;  %v465_v45 = vpack.c.bf16 %v433_v22, %v433_v22  ;;  %827 = vst [vmem:[#allocation2 + $0x30] sm:$0xf] %v826_v26  ;;  %v5140_v37 = vunpack.c.l.bf16 %v5165_v39  ;;  %v5141_v46 = vunpack.c.h.bf16 %v5165_v39 }
  0x72   : > { %v1219_v47 = vld [vmem:[#allocation2 + $0x68] sm:$0x1]  ;;  %v1027_v48 = vsel %vm5311_vm6, 0, %v1026_v11  ;;  %v665_v36 = vshrl.u32 %v464_v23, 16  ;;  %v668_v49 = vshll.u32 %v464_v23, 16  ;;  %v399_v28 = vadd.f32 %v5687_v24, %v364_v42 }
  0x73   : > { %v1456_v17 = vshll.u32 %v1219_v47, 16  ;;  %v1372_v50 = vrot.slane %v1371_v43, 4  ;;  %v1224_v54 = vld [vmem:[#allocation2 + $0x7c] sm:$0xf]  ;;  %1028 = vst [vmem:[#allocation2 + $0x18] sm:$0x1] %v1027_v48  ;;  %v367_v57 = vmul.f32 %v5678_v41, %v5140_v37  ;;  %v368_v59 = vmul.f32 %v5678_v41, %v5141_v46 }
  0x74   : > { %v1105_v1 = vld [vmem:[#allocation2 + $0x80] sm:$0x1]  ;;  %v1494_v58 = vshll.u32 %v1224_v54, 16  ;;  %v1498_v62 = vshrl.u32 %v1224_v54, 16  ;;  %v667_v4 = vrot.slane %v665_v36, 7  ;;  %v673_v13 = vshrl.u32 %v465_v45, 16 }
  0x75   : > { %v1458_v18 = vrot.slane %v1456_v17, 5  ;;  %v1377_v63 = vsel %vm5414_vm11, %v1372_v50, %v5617_v60  ;;  %v1106_v19 = vsel %vm5368_vm8, 0, %v1105_v1  ;;  %v1044_v21 = vld [vmem:[#allocation2 + $0x60] sm:$0x1]  ;;  %v676_v25 = vshll.u32 %v465_v45, 16 }
  0x76   : > { %1648 = vrot.lane.b32.xlu1 %v1377_v63, %s5248_s30  ;;  %1107 = vst [vmem:[#allocation2 + $0x80] sm:$0x1] %v1106_v19  ;;  %v5698_v6 = vrot.slane %v1494_v58, 5  ;;  %v1500_v9 = vrot.slane %v1498_v62, 4  ;;  %v1045_v8 = vsel %vm5311_vm6, 0, %v1044_v21  ;;  %v670_v29 = vor.u32 %v668_v49, %v667_v4 }
  0x77   : > { %v1459_v44 = vsel %vm5414_vm11, %v1454_v35, %v1458_v18  ;;  %1046 = vst [vmem:[#allocation2 + $0x60] sm:$0x1] %v1045_v8  ;;  %v671_v60 = vrot.slane %v667_v4, 4  ;;  %v5704_v55 = vrot.slane %v673_v13, 7  ;;  %v430_v31 = vmax.f32 %v398_v16, 0.0 }
  0x78   : > { %1662 = vrot.lane.b32.xlu2 %v1459_v44, %s5248_s30  ;;  %v1501_v32 = vor.u32 %v1500_v9, %v5698_v6  ;;  %v882_v30 = vsel %vm5322_vm7, %v670_v29, %v881_v56  ;;  %v1032_v34 = vld [vmem:[#allocation2 + $0x30] sm:$0x1]  ;;  %v431_v27 = vmax.f32 %v399_v28, 0.0  ;;  %v402_v39 = vadd.f32 %v5687_v24, %v367_v57  ;;  %v874_v63 = vld [vmem:[#allocation2 + $0x84] sm:$0xf] }
  0x79   : > { %v678_v52 = vor.u32 %v676_v25, %v5704_v55  ;;  %883 = vst [vmem:[#allocation2 + $0x90] sm:$0xf] %v882_v30  ;;  %v1033_v35 = vsel %vm5311_vm6, 0, %v1032_v34  ;;  %v462_v40 = vpack.c.bf16 %v430_v31, %v430_v31  ;;  %v403_v22 = vadd.f32 %v5687_v24, %v368_v59  ;;  %v5167_v29 = vld [vmem:[%s5341_s25 + $0x70] sm:$0xff]  }
  0x7a   : > { %v1502_v23 = vrot.slane %v1501_v32, 4  ;;  %v1199_v26 = vld [vmem:[#allocation2 + $0x18] sm:$0xf]  ;;  %1034 = vst [vmem:[#allocation2 + $0x30] sm:$0x1] %v1033_v35  ;;  %v463_v42 = vpack.c.bf16 %v431_v27, %v431_v27  ;;  %v434_v16 = vmax.f32 %v402_v39, 0.0 }
  0x7b   : > { %v1293_v43 = vshrl.u32 %v1199_v26, 16  ;;  %v1296_v11 = vshll.u32 %v1199_v26, 16  ;;  %v679_v45 = vsel %vm5304_vm3, %v671_v60, %v678_v52  ;;  %v648_v37 = vshrl.u32 %v462_v40, 16 }
  0x7c   : > { %884 = vst.msk [vmem:[#allocation2 + $0x94] sm:$0xf] %vm798_vm4, %v679_v45  ;;  %v651_v46 = vshll.u32 %v462_v40, 16  ;;  %v656_v47 = vshrl.u32 %v463_v42, 16  ;;  %v659_v48 = vshll.u32 %v463_v42, 16  ;;  %v435_v36 = vmax.f32 %v403_v22, 0.0 }
  0x7d   : > { %v1225_v49 = vld [vmem:[#allocation2 + $0x80] sm:$0x1]  ;;  %v1295_v28 = vrot.slane %v1293_v43, 4  ;;  %v1298_v17 = vrot.slane %v1296_v11, 5  ;;  %v650_v50 = vrot.slane %v648_v37, 7  ;;  %v5718_v54 = vpack.c.bf16 %v434_v16, %v434_v16 }
  0x7e   : > { %v1504_v56 = vshll.u32 %v1225_v49, 16  ;;  %v1217_v57 = vld [vmem:[#allocation2 + $0x60] sm:$0xf]  ;;  %v5720_v59 = vrot.slane %v656_v47, 7  ;;  %v467_v1 = vpack.c.bf16 %v435_v36, %v435_v36  ;;  %v583_v58 = vshll.u32 %v5425_v51, 16 }
  0x7f   : > { %v1299_v62 = vor.u32 %v1298_v17, %v1295_v28  ;;  %v1437_v4 = vshrl.u32 %v1217_v57, 16  ;;  %v1440_v13 = vshll.u32 %v1217_v57, 16  ;;  %v653_v18 = vor.u32 %v651_v46, %v650_v50  ;;  %v846_v16 = vld [vmem:[#allocation2 + $0x54] sm:$0xf]  ;;  %v885_v46 = vld [vmem:[#allocation2 + $0x98] sm:$0x1] }
  0x80   : > { %v1506_v19 = vrot.slane %v1504_v56, 5  ;;  %v1056_v21 = vld [vmem:[#allocation2 + $0x90] sm:$0x1]  ;;  %v654_v25 = vrot.slane %v650_v50, 4  ;;  %v661_v9 = vor.u32 %v659_v48, %v5720_v59  ;;  %v682_v8 = vshrl.u32 %v5718_v54, 16 }
  0x81   : > { %v1300_v44 = vrot.slane %v1299_v62, 4  ;;  %v1439_v60 = vrot.slane %v1437_v4, 4  ;;  %v1442_v31 = vrot.slane %v1440_v13, 5  ;;  %v1057_v32 = vsel %vm5311_vm6, 0, %v1056_v21  ;;  %v1205_v51 = vld [vmem:[#allocation2 + $0x30] sm:$0xf] }
  0x82   : > { %v1507_v30 = vsel %vm5414_vm11, %v1502_v23, %v1506_v19  ;;  %1058 = vst [vmem:[#allocation2 + $0x90] sm:$0x1] %v1057_v32  ;;  %v1341_v34 = vshrl.u32 %v1205_v51, 16  ;;  %v1344_v27 = vshll.u32 %v1205_v51, 16  ;;  %v662_v39 = vsel %vm5304_vm3, %v654_v25, %v661_v9  ;;  %v892_v62 = vld [vmem:[#allocation2 + $0xa4] sm:$0x1] }
  0x83   : > { %1670 = vrot.lane.b32.xlu0 %v1507_v30, %s5248_s30  ;;  %v1305_v52 = vsel %vm5414_vm11, %v1300_v44, %v5562_v12  ;;  %v1443_v35 = vor.u32 %v1442_v31, %v1439_v60  ;;  %v1230_v40 = vld [vmem:[#allocation2 + $0x94] sm:$0xf]  ;;  %v875_v22 = vsel %vm5322_vm7, %v653_v18, %v874_v63  ;;  %877 = vst.msk [vmem:[#allocation2 + $0x88] sm:$0xf] %vm798_vm4, %v662_v39  ;;  %v5739_v23 = vrot.slane %v682_v8, 7  ;;  %v5166_v44 = vld [vmem:[%s5341_s25 + $0x68] sm:$0xff]  }
  0x84   : > { %1636 = vrot.lane.b32.xlu2 %v1305_v52, %s5248_s30  ;;  %v1343_v26 = vrot.slane %v1341_v34, 4  ;;  %v1346_v42 = vrot.slane %v1344_v27, 5  ;;  %876 = vst [vmem:[#allocation2 + $0x84] sm:$0xf] %v875_v22  ;;  %v5148_v43 = vunpack.c.l.bf16 %v5167_v29  ;;  %v1542_v45 = vshll.u32 %v1230_v40, 16 }
  0x85   : > { %v1444_v11 = vrot.slane %v1443_v35, 4  ;;  %v690_v37 = vshrl.u32 %v467_v1, 16  ;;  %v693_v12 = vshll.u32 %v467_v1, 16  ;;  %v1546_v47 = vshrl.u32 %v1230_v40, 16 }
  0x86   : > { %v1347_v48 = vor.u32 %v1346_v42, %v1343_v26  ;;  %v585_v36 = vor.u32 %v583_v58, %v5442_v10  ;;  %v680_v49 = vrot.slane %v5704_v55, 4  ;;  %v688_v17 = vrot.slane %v5739_v23, 4 }
  0x87   : > { %v1449_v28 = vsel %vm5414_vm11, %v1444_v11, %v5655_v15  ;;  %v692_v50 = vrot.slane %v690_v37, 7  ;;  %v5149_v56 = vunpack.c.h.bf16 %v5167_v29  ;;  %v371_v55 = vmul.f32 %v5678_v41, %v5148_v43 }
  0x88   : > { %1660 = vrot.lane.b32.xlu1 %v1449_v28, %s5248_s30  ;;  %v1348_v57 = vrot.slane %v1347_v48, 4  ;;  %v847_v1 = vsel %vm5322_vm7, %v585_v36, %v846_v16  ;;  %v886_v10 = vsel %vm5311_vm6, %v680_v49, %v885_v46  ;;  %v5763_v29 = vrot.slane %v1546_v47, 4  ;;  %v902_v28 = vld [vmem:[#allocation2 + $0xb4] sm:$0xf] }
  0x89   : > { %v1229_v58 = vld [vmem:[#allocation2 + $0x90] sm:$0xf]  ;;  %v695_v4 = vor.u32 %v693_v12, %v692_v50  ;;  %v697_v15 = vrot.slane %v692_v50, 4  ;;  %848 = vst [vmem:[#allocation2 + $0x54] sm:$0xf] %v847_v1  ;;  %v372_v13 = vmul.f32 %v5678_v41, %v5149_v56  ;;  %v406_v21 = vadd.f32 %v5687_v24, %v371_v55 }
  0x8a   : > { %v1533_v18 = vshrl.u32 %v1229_v58, 16  ;;  %v1536_v63 = vshll.u32 %v1229_v58, 16  ;;  %v1353_v19 = vsel %vm5414_vm11, %v1348_v57, %v5466_v53  ;;  %887 = vst [vmem:[#allocation2 + $0x98] sm:$0x1] %v886_v10  ;;  %v5766_v32 = vrot.slane %v1542_v45, 5 }
  0x8b   : > { %v1053_v25 = vld [vmem:[#allocation2 + $0x84] sm:$0x1]  ;;  %v696_v9 = vsel %vm5304_vm3, %v688_v17, %v695_v4  ;;  %v893_v8 = vsel %vm5311_vm6, %v697_v15, %v892_v62  ;;  %v5772_v51 = vld [vmem:[#allocation2 + $0x88] sm:$0xf]  ;;  %v407_v30 = vadd.f32 %v5687_v24, %v372_v13  ;;  %v438_v34 = vmax.f32 %v406_v21, 0.0 }
  0x8c   : > { %v1535_v60 = vrot.slane %v1533_v18, 4  ;;  %v1538_v31 = vrot.slane %v1536_v63, 5  ;;  %1644 = vrot.lane.b32.xlu2 %v1353_v19, %s5248_s30  ;;  %v1054_v53 = vsel %vm5311_vm6, 0, %v1053_v25  ;;  %891 = vst.msk [vmem:[#allocation2 + $0xa0] sm:$0xf] %vm798_vm4, %v696_v9  ;;  %v634_v27 = vshll.u32 %v5625_v20, 16 }
  0x8d   : > { %1055 = vst [vmem:[#allocation2 + $0x84] sm:$0x1] %v1054_v53  ;;  %v5144_v52 = vunpack.c.l.bf16 %v5166_v44  ;;  %v5145_v35 = vunpack.c.h.bf16 %v5166_v44  ;;  %v1549_v40 = vor.u32 %v5763_v29, %v5766_v32  ;;  %v439_v22 = vmax.f32 %v407_v30, 0.0  ;;  %v867_v45 = vld [vmem:[#allocation2 + $0x78] sm:$0xf] }
  0x8e   : > { %v1539_v39 = vor.u32 %v1538_v31, %v1535_v60  ;;  %894 = vst [vmem:[#allocation2 + $0xa4] sm:$0x1] %v893_v8  ;;  %v470_v26 = vpack.c.bf16 %v438_v34, %v438_v34  ;;  %v636_v42 = vor.u32 %v634_v27, %v5637_v14  ;;  %v1518_v43 = vshll.u32 %v5772_v51, 16  ;;  %v878_v13 = vld [vmem:[#allocation2 + $0x8c] sm:$0x1] }
  0x8f   : > { %v369_v37 = vmul.f32 %v5678_v41, %v5144_v52  ;;  %v370_v20 = vmul.f32 %v5678_v41, %v5145_v35  ;;  %v471_v47 = vpack.c.bf16 %v439_v22, %v439_v22  ;;  %v663_v41 = vrot.slane %v5720_v59, 4 }
  0x90   : > { %v1540_v16 = vrot.slane %v1539_v39, 4  ;;  %v1041_v11 = vld [vmem:[#allocation2 + $0x54] sm:$0x1]  ;;  %v716_v48 = vshrl.u32 %v470_v26, 16  ;;  %v719_v36 = vshll.u32 %v470_v26, 16  ;;  %v868_v62 = vsel %vm5322_vm7, %v636_v42, %v867_v45 }
  0x91   : > { %v1042_v12 = vsel %vm5311_vm6, 0, %v1041_v11  ;;  %v1111_v46 = vld [vmem:[#allocation2 + $0x98] sm:$0x1]  ;;  %v404_v17 = vadd.f32 %v5687_v24, %v369_v37  ;;  %v724_v57 = vshrl.u32 %v471_v47, 16  ;;  %v405_v1 = vadd.f32 %v5687_v24, %v370_v20  ;;  %869 = vst [vmem:[#allocation2 + $0x78] sm:$0xf] %v868_v62 }
  0x92   : > { %v1545_v14 = vsel %vm5414_vm11, %v1540_v16, %v5766_v32  ;;  %1043 = vst [vmem:[#allocation2 + $0x54] sm:$0x1] %v1042_v12  ;;  %v1112_v49 = vsel %vm5368_vm8, 0, %v1111_v46  ;;  %v718_v56 = vrot.slane %v716_v48, 7  ;;  %v727_v4 = vshll.u32 %v471_v47, 16 }
  0x93   : > { %1676 = vrot.lane.b32.xlu0 %v1545_v14, %s5248_s30  ;;  %v1233_v50 = vld [vmem:[#allocation2 + $0xa0] sm:$0xf]  ;;  %1113 = vst [vmem:[#allocation2 + $0x98] sm:$0x1] %v1112_v49  ;;  %v436_v15 = vmax.f32 %v404_v17, 0.0  ;;  %v5799_v29 = vrot.slane %v724_v57, 7  ;;  %v879_v22 = vsel %vm5311_vm6, %v663_v41, %v878_v13 }
  0x94   : > { %v1226_v10 = vld [vmem:[#allocation2 + $0x84] sm:$0xf]  ;;  %v1566_v55 = vshll.u32 %v1233_v50, 16  ;;  %v1570_v58 = vshrl.u32 %v1233_v50, 16  ;;  %v721_v19 = vor.u32 %v719_v36, %v718_v56  ;;  %v722_v21 = vrot.slane %v718_v56, 4 }
  0x95   : > { %v1509_v18 = vshrl.u32 %v1226_v10, 16  ;;  %v1512_v63 = vshll.u32 %v1226_v10, 16  ;;  %v1114_v59 = vld [vmem:[#allocation2 + $0xa4] sm:$0x1]  ;;  %v437_v31 = vmax.f32 %v405_v1, 0.0  ;;  %v5803_v32 = vrot.slane %v1518_v43, 5 }
  0x96   : > { %v1115_v25 = vsel %vm5368_vm8, 0, %v1114_v59  ;;  %v5797_v9 = vrot.slane %v1566_v55, 5  ;;  %v1572_v8 = vrot.slane %v1570_v58, 4  ;;  %v903_v60 = vsel %vm5322_vm7, %v721_v19, %v902_v28  ;;  %v895_v36 = vld [vmem:[#allocation2 + $0xa8] sm:$0xf] }
  0x97   : > { %v1511_v24 = vrot.slane %v1509_v18, 4  ;;  %v1514_v44 = vrot.slane %v1512_v63, 5  ;;  %1116 = vst [vmem:[#allocation2 + $0xa4] sm:$0x1] %v1115_v25  ;;  %v5805_v53 = vrot.slane %v1549_v40, 4  ;;  %v729_v30 = vor.u32 %v727_v4, %v5799_v29 }
  0x98   : > { %904 = vst [vmem:[#allocation2 + $0xb4] sm:$0xf] %v903_v60  ;;  %v468_v34 = vpack.c.bf16 %v436_v15, %v436_v15  ;;  %v1573_v39 = vor.u32 %v1572_v8, %v5797_v9  ;;  %v469_v35 = vpack.c.bf16 %v437_v31, %v437_v31  ;;  %v685_v40 = vshll.u32 %v5718_v54, 16  ;;  %v1050_v28 = vld [vmem:[#allocation2 + $0x78] sm:$0x1] }
  0x99   : > { %v1515_v27 = vor.u32 %v1514_v44, %v1511_v24  ;;  %v1214_v52 = vld [vmem:[#allocation2 + $0x54] sm:$0xf]  ;;  %v730_v43 = vsel %vm5304_vm3, %v722_v21, %v729_v30  ;;  %880 = vst [vmem:[#allocation2 + $0x8c] sm:$0x1] %v879_v22  ;;  %v731_v54 = vrot.slane %v5799_v29, 4  ;;  %v1051_v62 = vsel %vm5311_vm6, 0, %v1050_v28 }
  0x9a   : > { %v1413_v26 = vshrl.u32 %v1214_v52, 16  ;;  %v1416_v42 = vshll.u32 %v1214_v52, 16  ;;  %v1231_v16 = vld [vmem:[#allocation2 + $0x98] sm:$0x1]  ;;  %905 = vst.msk [vmem:[#allocation2 + $0xb8] sm:$0xf] %vm798_vm4, %v730_v43  ;;  %v687_v15 = vor.u32 %v685_v40, %v5739_v23 }
  0x9b   : > { %v1516_v11 = vrot.slane %v1515_v27, 4  ;;  %v1552_v45 = vshll.u32 %v1231_v16, 16  ;;  %v699_v37 = vshrl.u32 %v468_v34, 16  ;;  %v702_v20 = vshll.u32 %v468_v34, 16  ;;  %v906_v41 = vld [vmem:[#allocation2 + $0xbc] sm:$0x1] }
  0x9c   : > { %v1415_v12 = vrot.slane %v1413_v26, 4  ;;  %v1418_v46 = vrot.slane %v1416_v42, 5  ;;  %v707_v47 = vshrl.u32 %v469_v35, 16  ;;  %v710_v48 = vshll.u32 %v469_v35, 16  ;;  %1052 = vst [vmem:[#allocation2 + $0x78] sm:$0x1] %v1051_v62 }
  0x9d   : > { %v1521_v14 = vsel %vm5414_vm11, %v1516_v11, %v5803_v32  ;;  %v1574_v49 = vrot.slane %v1573_v39, 4  ;;  %v701_v17 = vrot.slane %v699_v37, 7  ;;  %v1554_v57 = vrot.slane %v1552_v45, 5  ;;  %v888_v59 = vld [vmem:[#allocation2 + $0x9c] sm:$0xf] }
  0x9e   : > { %1672 = vrot.lane.b32.xlu1 %v1521_v14, %s5248_s30  ;;  %v1234_v50 = vld [vmem:[#allocation2 + $0xa4] sm:$0x1]  ;;  %v1419_v56 = vor.u32 %v1418_v46, %v1415_v12  ;;  %v709_v1 = vrot.slane %v707_v47, 7  ;;  %v907_v23 = vsel %vm5311_vm6, %v731_v54, %v906_v41  ;;  %v1522_v29 = vshrl.u32 %v5772_v51, 16  ;;  %v899_v22 = vld [vmem:[#allocation2 + $0xb0] sm:$0x1] }
  0x9f   : > { %v1576_v10 = vshll.u32 %v1234_v50, 16  ;;  %v1065_v55 = vld [vmem:[#allocation2 + $0xb4] sm:$0x1]  ;;  %v704_v58 = vor.u32 %v702_v20, %v701_v17  ;;  %v705_v4 = vrot.slane %v701_v17, 4  ;;  %v1555_v44 = vsel %vm5414_vm11, %v5805_v53, %v1554_v57  ;;  %908 = vst [vmem:[#allocation2 + $0xbc] sm:$0x1] %v907_v23 }
  0xa0   : > { %v1420_v13 = vrot.slane %v1419_v56, 4  ;;  %v1066_v18 = vsel %vm5311_vm6, 0, %v1065_v55  ;;  %v712_v63 = vor.u32 %v710_v48, %v709_v1  ;;  %v889_v60 = vsel %vm5322_vm7, %v687_v15, %v888_v59  ;;  %v5850_v12 = vld [vmem:[#allocation2 + $0x4] sm:$0xf]  ;;  %v1759_v62 = vld [vmem:[#allocation2 + $0x8] sm:$0x1] }
  0xa1   : > { %v1578_v19 = vrot.slane %v1576_v10, 5  ;;  %1067 = vst [vmem:[#allocation2 + $0xb4] sm:$0x1] %v1066_v18  ;;  %v896_v21 = vsel %vm5322_vm7, %v704_v58, %v895_v36  ;;  %v1239_v31 = vld [vmem:[#allocation2 + $0xb8] sm:$0xf]  ;;  %v1524_v27 = vrot.slane %v1522_v29, 4 }
  0xa2   : > { %v1425_v25 = vsel %vm5414_vm11, %v1420_v13, %v5499_v61  ;;  %v713_v8 = vsel %vm5304_vm3, %v705_v4, %v712_v63  ;;  %897 = vst [vmem:[#allocation2 + $0xa8] sm:$0xf] %v896_v21  ;;  %v1108_v61 = vld [vmem:[#allocation2 + $0x8c] sm:$0x1]  ;;  %v1614_v52 = vshll.u32 %v1239_v31, 16  ;;  %v714_v35 = vrot.slane %v709_v1, 4 }
  0xa3   : > { %v1579_v24 = vsel %vm5414_vm11, %v1574_v49, %v1578_v19  ;;  %1656 = vrot.lane.b32.xlu2 %v1425_v25, %s5248_s30  ;;  %898 = vst.msk [vmem:[#allocation2 + $0xac] sm:$0xf] %vm798_vm4, %v713_v8  ;;  %v1109_v51 = vsel %vm5368_vm8, 0, %v1108_v61  ;;  %v1223_v30 = vld [vmem:[#allocation2 + $0x78] sm:$0xf]  ;;  %v1525_v48 = vor.u32 %v1524_v27, %v5803_v32  ;;  %v1858_v41 = vrot.slane %v5850_v12, 5  ;;  %v1631_v25 = vpop.permute.xlu0 %1630 }
  0xa4   : > { %1682 = vrot.lane.b32.xlu0 %v1579_v24, %s5248_s30  ;;  %1110 = vst [vmem:[#allocation2 + $0x8c] sm:$0x1] %v1109_v51  ;;  %v1485_v34 = vshrl.u32 %v1223_v30, 16  ;;  %v1488_v53 = vshll.u32 %v1223_v30, 16  ;;  %v900_v46 = vsel %vm5311_vm6, %v714_v35, %v899_v22  ;;  %v5855_v49 = vrot.slane %v1614_v52, 5 }
  0xa5   : > { %890 = vst [vmem:[#allocation2 + $0x9c] sm:$0xf] %v889_v60  ;;  %v1618_v1 = vshrl.u32 %v1239_v31, 16  ;;  %v1526_v58 = vrot.slane %v1525_v48, 4  ;;  %v1861_v59 = vrot.slane %v1759_v62, 5  ;;  %vm2257_vm1 = vcmask 257216  }
  0xa6   : > { %1678 = vrot.lane.b32.xlu1 %v1555_v44, %s5248_s30  ;;  %v1487_v16 = vrot.slane %v1485_v34, 4  ;;  %v1490_v43 = vrot.slane %v1488_v53, 5  ;;  %v1120_v36 = vld [vmem:[#allocation2 + $0xbc] sm:$0x1]  ;;  %901 = vst [vmem:[#allocation2 + $0xb0] sm:$0x1] %v900_v46 }
  0xa7   : > { %v1121_v50 = vsel %vm5368_vm8, 0, %v1120_v36  ;;  %v1620_v21 = vrot.slane %v1618_v1, 4  ;;  %v1130_v8 = vld [vmem:[#allocation2 + $0x4] sm:$0xf]  ;;  %v1763_v27 = vld [vmem:[#allocation2 + $0x18] sm:$0xe] }
  0xa8   : > { %v1238_v39 = vld [vmem:[#allocation2 + $0xb4] sm:$0xf]  ;;  %v1491_v20 = vor.u32 %v1490_v43, %v1487_v16  ;;  %1122 = vst [vmem:[#allocation2 + $0xbc] sm:$0x1] %v1121_v50  ;;  %v5893_v46 = vld [vmem:[#allocation2 + $0x28] sm:$0xf] }
  0xa9   : > { %v1605_v26 = vshrl.u32 %v1238_v39, 16  ;;  %v1608_v42 = vshll.u32 %v1238_v39, 16  ;;  %v1062_v40 = vld [vmem:[#allocation2 + $0xa8] sm:$0x1]  ;;  %1162 = vst.msk [vmem:[#allocation3 + $0x4] sm:$0xf] %vm798_vm4, %v1130_v8 }
  0xaa   : > { %v1063_v11 = vsel %vm5311_vm6, 0, %v1062_v40  ;;  %v1492_v28 = vrot.slane %v1491_v20, 4  ;;  %v1236_v10 = vld [vmem:[#allocation2 + $0xac] sm:$0xf]  ;;  %1726 = vst.msk [vmem:[#allocation3 + $0x4] sm:$0xf] %vm1724_vm15, %v1631_v25 }
  0xab   : > { %v1607_v45 = vrot.slane %v1605_v26, 4  ;;  %v1610_v37 = vrot.slane %v1608_v42, 5  ;;  %1064 = vst [vmem:[#allocation2 + $0xa8] sm:$0x1] %v1063_v11  ;;  %v1228_v47 = vld [vmem:[#allocation2 + $0x8c] sm:$0x1]  ;;  %v1621_v26 = vor.u32 %v1620_v21, %v5855_v49  ;;  %v1629_v48 = vpop.permute.xlu0 %1628 }
  0xac   : > { %v1528_v17 = vshll.u32 %v1228_v47, 16  ;;  %v1059_v54 = vld [vmem:[#allocation2 + $0x9c] sm:$0x1]  ;;  %v1497_v32 = vsel %vm5414_vm11, %v1492_v28, %v5698_v6  ;;  %v1860_v6 = vrot.slane %v1858_v41, 4  ;;  %v1590_v63 = vshll.u32 %v1236_v10, 16 }
  0xad   : > { %v1611_v14 = vor.u32 %v1610_v37, %v1607_v45  ;;  %v1060_v56 = vsel %vm5311_vm6, 0, %v1059_v54  ;;  %1668 = vrot.lane.b32.xlu2 %v1497_v32, %s5248_s30  ;;  %v1117_v44 = vld [vmem:[#allocation2 + $0xb0] sm:$0x1]  ;;  %v1594_v61 = vshrl.u32 %v1236_v10, 16  ;;  %v5885_v39 = vld [vmem:[#allocation2 + $0x1c] sm:$0xf] }
  0xae   : > { %1061 = vst [vmem:[#allocation2 + $0x9c] sm:$0x1] %v1060_v56  ;;  %v1530_v4 = vrot.slane %v1528_v17, 5  ;;  %v1118_v51 = vsel %vm5368_vm8, 0, %v1117_v44  ;;  %v1592_v30 = vrot.slane %v1590_v63, 5  ;;  %v1862_v34 = vsel %vm5872_vm14, %v1860_v6, %v1861_v59 }
  0xaf   : > { %v1612_v57 = vrot.slane %v1611_v14, 4  ;;  %v1240_v60 = vld [vmem:[#allocation2 + $0xbc] sm:$0x1]  ;;  %1119 = vst [vmem:[#allocation2 + $0xb0] sm:$0x1] %v1118_v51  ;;  %v1596_v40 = vrot.slane %v1594_v61, 4 }
  0xb0   : > { %v1531_v24 = vsel %vm5414_vm11, %v1526_v58, %v1530_v4  ;;  %v1624_v42 = vshll.u32 %v1240_v60, 16  ;;  %v4924_v45 = vrot.slane %v1763_v27, 9  ;;  %v1872_v37 = vrot.slane %v5885_v39, 5  ;;  %v1129_v47 = vld [vmem:[#allocation2] sm:$0xf] }
  0xb1   : > { %v1617_v55 = vsel %vm5414_vm11, %v1612_v57, %v5855_v49  ;;  %v1134_v36 = vld [vmem:[#allocation2 + $0x1c] sm:$0xf]  ;;  %v1622_v14 = vrot.slane %v1621_v26, 4  ;;  %1161 = vst.msk [vmem:[#allocation3] sm:$0xf] %vm798_vm4, %v1129_v47  ;;  %v1597_v54 = vor.u32 %v1596_v40, %v1592_v30  ;;  %v1879_v57 = vrot.slane %v5893_v46, 5 }
  0xb2   : > { %1688 = vrot.lane.b32.xlu0 %v1617_v55, %s5248_s30  ;;  %v1235_v15 = vld [vmem:[#allocation2 + $0xa8] sm:$0xf]  ;;  %v1626_v49 = vrot.slane %v1624_v42, 5  ;;  %1725 = vst.msk [vmem:[#allocation3] sm:$0xf] %vm1724_vm15, %v1629_v48  ;;  %v1873_v56 = vsel %vm5872_vm14, %v4924_v45, %v1872_v37  ;;  %v1874_v42 = vrot.slane %v1872_v37, 4 }
  0xb3   : > { %v1581_v13 = vshrl.u32 %v1235_v15, 16  ;;  %v1584_v18 = vshll.u32 %v1235_v15, 16  ;;  %1166 = vst.msk [vmem:[#allocation3 + $0x14] sm:$0xf] %vm798_vm4, %v1134_v36  ;;  %v1768_v1 = vld [vmem:[#allocation2 + $0x2c] sm:$0x1]  ;;  %v1647_v63 = vpop.permute.xlu0 %1646 }
  0xb4   : > { %v1627_v10 = vsel %vm5414_vm11, %v1622_v14, %v1626_v49  ;;  %v1760_v55 = vld [vmem:[#allocation2 + $0xc] sm:$0xe]  ;;  %v1761_v58 = vld [vmem:[#allocation2 + $0x10] sm:$0xf]  ;;  %v1598_v4 = vrot.slane %v1597_v54, 4  ;;  %v1881_v6 = vrot.slane %v1879_v57, 4 }
  0xb5   : > { %v1583_v23 = vrot.slane %v1581_v13, 4  ;;  %v1586_v29 = vrot.slane %v1584_v18, 5  ;;  %v1232_v53 = vld [vmem:[#allocation2 + $0x9c] sm:$0xf]  ;;  %1674 = vrot.lane.b32.xlu2 %v1531_v24, %s5248_s30  ;;  %v1882_v13 = vrot.slane %v1768_v1, 5  ;;  %v4923_v21 = vrot.slane %v1760_v55, 9 }
  0xb6   : > { %v1557_v52 = vshrl.u32 %v1232_v53, 16  ;;  %v1560_v35 = vshll.u32 %v1232_v53, 16  ;;  %v1237_v17 = vld [vmem:[#allocation2 + $0xb0] sm:$0x1]  ;;  %v1138_v59 = vld [vmem:[#allocation2 + $0x34] sm:$0xf] }
  0xb7   : > { %v1587_v31 = vor.u32 %v1586_v29, %v1583_v23  ;;  %v1639_v50 = vpop.permute.xlu2 %1638  ;;  %v1600_v32 = vshll.u32 %v1237_v17, 16  ;;  %v1132_v18 = vld [vmem:[#allocation2 + $0x10] sm:$0xf]  ;;  %v1865_v25 = vrot.slane %v1761_v58, 5  ;;  %v1140_v23 = vld [vmem:[#allocation2 + $0x40] sm:$0xf]  ;;  %v1883_v29 = vsel %vm5872_vm14, %v1881_v6, %v1882_v13 }
  0xb8   : > { %v1559_v16 = vrot.slane %v1557_v52, 4  ;;  %v1562_v43 = vrot.slane %v1560_v35, 5  ;;  %1730 = vst.msk [vmem:[#allocation3 + $0x14] sm:$0xf] %vm1724_vm15, %v1639_v50  ;;  %v1757_v24 = vld [vmem:[#allocation2] sm:$0xe] }
  0xb9   : > { %v1588_v22 = vrot.slane %v1587_v31, 4  ;;  %v1602_v15 = vrot.slane %v1600_v32, 5  ;;  %1164 = vst.msk [vmem:[#allocation3 + $0xc] sm:$0xf] %vm798_vm4, %v1132_v18  ;;  %v1772_v44 = vld [vmem:[#allocation2 + $0x3c] sm:$0xe]  ;;  %v1866_v51 = vsel %vm5872_vm14, %v4923_v21, %v1865_v25 }
  0xba   : > { %1970 = vrot.lane.b32.xlu0 %v1862_v34, %s5249_s10  ;;  %v1563_v20 = vor.u32 %v1562_v43, %v1559_v16  ;;  %1170 = vst.msk [vmem:[#allocation3 + $0x24] sm:$0xf] %vm798_vm4, %v1138_v59  ;;  %v5921_v61 = vld [vmem:[#allocation2 + $0x40] sm:$0xf]  ;;  %v4927_v34 = vrot.slane %v1772_v44, 9  ;;  %v1867_v47 = vrot.slane %v1865_v25, 4 }
  0xbb   : > { %v1593_v11 = vsel %vm5414_vm11, %v1588_v22, %v1592_v30  ;;  %v1603_v8 = vsel %vm5414_vm11, %v1598_v4, %v1602_v15  ;;  %1734 = vst.msk [vmem:[#allocation3 + $0x24] sm:$0xf] %vm1724_vm15, %v1647_v63  ;;  %v1765_v31 = vld [vmem:[#allocation2 + $0x20] sm:$0x1]  ;;  %v4922_v30 = vrot.slane %v1757_v24, 9  ;;  %v1893_v53 = vrot.slane %v5921_v61, 5  ;;  %v1659_v26 = vpop.permute.xlu0 %1658 }
  0xbc   : > { %1684 = vrot.lane.b32.xlu1 %v1593_v11, %s5248_s30  ;;  %v1564_v28 = vrot.slane %v1563_v20, 4  ;;  %1172 = vst.msk [vmem:[#allocation3 + $0x2c] sm:$0xf] %vm798_vm4, %v1140_v23  ;;  %v5932_v27 = vld [vmem:[#allocation2 + $0x4c] sm:$0xf]  ;;  %v1875_v16 = vrot.slane %v1765_v31, 5 }
  0xbd   : > { %v1136_v52 = vld [vmem:[#allocation2 + $0x28] sm:$0xf]  ;;  %v1144_v22 = vld [vmem:[#allocation2 + $0x58] sm:$0xf]  ;;  %v1859_v43 = vsel %vm5872_vm14, %v4922_v30, %v1858_v41  ;;  %v1146_v40 = vld [vmem:[#allocation2 + $0x64] sm:$0xf]  ;;  %v1894_v11 = vsel %vm5872_vm14, %v4927_v34, %v1893_v53 }
  0xbe   : > { %v1569_v62 = vsel %vm5414_vm11, %v1564_v28, %v5797_v9  ;;  %v1635_v9 = vpop.permute.xlu1 %1634  ;;  %1168 = vst.msk [vmem:[#allocation3 + $0x1c] sm:$0xf] %vm798_vm4, %v1136_v52  ;;  %v1900_v45 = vrot.slane %v5932_v27, 5  ;;  %v1762_v20 = vld [vmem:[#allocation2 + $0x14] sm:$0x1]  ;;  %v1876_v12 = vsel %vm5872_vm14, %v1874_v42, %v1875_v16  ;;  %v1895_v25 = vrot.slane %v1893_v53, 4 }
  0xbf   : > { %1680 = vrot.lane.b32.xlu2 %v1569_v62, %s5248_s30  ;;  %1728 = vst.msk [vmem:[#allocation3 + $0xc] sm:$0xf] %vm1724_vm15, %v1635_v9  ;;  %v1777_v39 = vld [vmem:[#allocation2 + $0x50] sm:$0x1]  ;;  %v1769_v41 = vld [vmem:[#allocation2 + $0x30] sm:$0xe] }
  0xc0   : > { %1176 = vst.msk [vmem:[#allocation3 + $0x3c] sm:$0xf] %vm798_vm4, %v1144_v22  ;;  %v1770_v37 = vld [vmem:[#allocation2 + $0x34] sm:$0xf]  ;;  %v1868_v48 = vrot.slane %v1762_v20, 5  ;;  %v1902_v14 = vrot.slane %v1900_v45, 4 }
  0xc1   : > { %1740 = vst.msk [vmem:[#allocation3 + $0x3c] sm:$0xf] %vm1724_vm15, %v1659_v26  ;;  %v1903_v49 = vrot.slane %v1777_v39, 5  ;;  %v1142_v28 = vld [vmem:[#allocation2 + $0x4c] sm:$0xf]  ;;  %v1886_v32 = vrot.slane %v1770_v37, 5 }
  0xc2   : > { %1976 = vrot.lane.b32.xlu0 %v1873_v56, %s5249_s10  ;;  %1178 = vst.msk [vmem:[#allocation3 + $0x44] sm:$0xf] %vm798_vm4, %v1146_v40  ;;  %v1135_v50 = vld [vmem:[#allocation2 + $0x24] sm:$0xf]  ;;  %v4926_v56 = vrot.slane %v1769_v41, 9  ;;  %v1869_v62 = vsel %vm5872_vm14, %v1867_v47, %v1868_v48  ;;  %vm4477_vm5 = vcmask 1043456  }
  0xc3   : > { %v1641_v54 = vpop.permute.xlu0 %1640  ;;  %1174 = vst.msk [vmem:[#allocation3 + $0x34] sm:$0xf] %vm798_vm4, %v1142_v28  ;;  %v1133_v1 = vld [vmem:[#allocation2 + $0x18] sm:$0xf]  ;;  %v1766_v55 = vld [vmem:[#allocation2 + $0x24] sm:$0xe] }
  0xc4   : > { %1690 = vrot.lane.b32.xlu1 %v1627_v10, %s5248_s30  ;;  %v1904_v10 = vsel %vm5872_vm14, %v1902_v14, %v1903_v49  ;;  %1167 = vst.msk [vmem:[#allocation3 + $0x18] sm:$0xf] %vm798_vm4, %v1135_v50  ;;  %v1781_v58 = vld [vmem:[#allocation2 + $0x60] sm:$0xe]  ;;  %v5963_v4 = vld [vmem:[#allocation2 + $0x64] sm:$0xf]  ;;  %v1887_v15 = vsel %vm5872_vm14, %v4926_v56, %v1886_v32 }
  0xc5   : > { %1731 = vst.msk [vmem:[#allocation3 + $0x18] sm:$0xf] %vm1724_vm15, %v1641_v54  ;;  %v1774_v6 = vld [vmem:[#allocation2 + $0x44] sm:$0x1]  ;;  %v4925_v13 = vrot.slane %v1766_v55, 9  ;;  %v4930_v9 = vrot.slane %v1781_v58, 9 }
  0xc6   : > { %v1643_v35 = vpop.permute.xlu1 %1642  ;;  %1165 = vst.msk [vmem:[#allocation3 + $0x10] sm:$0xf] %vm798_vm4, %v1133_v1  ;;  %v1914_v18 = vrot.slane %v5963_v4, 5  ;;  %v5972_v63 = vld [vmem:[#allocation2 + $0x70] sm:$0xf]  ;;  %v1888_v53 = vrot.slane %v1886_v32, 4 }
  0xc7   : > { %v1651_v60 = vpop.permute.xlu2 %1650  ;;  %1686 = vrot.lane.b32.xlu2 %v1603_v8, %s5248_s30  ;;  %1732 = vst.msk [vmem:[#allocation3 + $0x1c] sm:$0xf] %vm1724_vm15, %v1643_v35  ;;  %v1148_v59 = vld [vmem:[#allocation2 + $0x70] sm:$0xf]  ;;  %v1896_v8 = vrot.slane %v1774_v6, 5  ;;  %v1921_v24 = vrot.slane %v5972_v63, 5 }
  0xc8   : > { %1736 = vst.msk [vmem:[#allocation3 + $0x2c] sm:$0xf] %vm1724_vm15, %v1651_v60  ;;  %v1141_v23 = vld [vmem:[#allocation2 + $0x48] sm:$0xf]  ;;  %v1915_v60 = vsel %vm5872_vm14, %v4930_v9, %v1914_v18  ;;  %v1137_v31 = vld [vmem:[#allocation2 + $0x30] sm:$0xf] }
  0xc9   : > { %1180 = vst.msk [vmem:[#allocation3 + $0x4c] sm:$0xf] %vm798_vm4, %v1148_v59  ;;  %v1786_v30 = vld [vmem:[#allocation2 + $0x74] sm:$0x1]  ;;  %v1897_v46 = vsel %vm5872_vm14, %v1895_v25, %v1896_v8  ;;  %v1779_v34 = vld [vmem:[#allocation2 + $0x58] sm:$0xf] }
  0xca   : > { %1982 = vrot.lane.b32.xlu0 %v1883_v29, %s5249_s10  ;;  %v1880_v29 = vsel %vm5872_vm14, %v4925_v13, %v1879_v57  ;;  %1173 = vst.msk [vmem:[#allocation3 + $0x30] sm:$0xf] %vm798_vm4, %v1141_v23  ;;  %v1778_v57 = vld [vmem:[#allocation2 + $0x54] sm:$0xe]  ;;  %v1923_v35 = vrot.slane %v1921_v24, 4  ;;  %v1924_v22 = vrot.slane %v1786_v30, 5 }
  0xcb   : > { %1169 = vst.msk [vmem:[#allocation3 + $0x20] sm:$0xf] %vm798_vm4, %v1137_v31  ;;  %v1131_v42 = vld [vmem:[#allocation2 + $0xc] sm:$0xf]  ;;  %v4929_v16 = vrot.slane %v1778_v57, 9  ;;  %vm3349_vm9 = vcmask 454016  }
  0xcc   : > { %1972 = vrot.lane.b32.xlu1 %v1866_v51, %s5249_s10  ;;  %v1771_v51 = vld [vmem:[#allocation2 + $0x38] sm:$0x1]  ;;  %1163 = vst.msk [vmem:[#allocation3 + $0x8] sm:$0xf] %vm798_vm4, %v1131_v42  ;;  %v1147_v40 = vld [vmem:[#allocation2 + $0x6c] sm:$0xf]  ;;  %v1925_v39 = vsel %vm5872_vm14, %v1923_v35, %v1924_v22 }
  0xcd   : > { %v1889_v52 = vrot.slane %v1771_v51, 5  ;;  %v1143_v41 = vld [vmem:[#allocation2 + $0x54] sm:$0xf]  ;;  %v1790_v37 = vld [vmem:[#allocation2 + $0x84] sm:$0xe]  ;;  %vm3910_vm10 = vcmask 519616  }
  0xce   : > { %v1655_v17 = vpop.permute.xlu1 %1654  ;;  %v1653_v61 = vpop.permute.xlu0 %1652  ;;  %v6002_v47 = vld [vmem:[#allocation2 + $0x88] sm:$0xf]  ;;  %1179 = vst.msk [vmem:[#allocation3 + $0x48] sm:$0xf] %vm798_vm4, %v1147_v40  ;;  %v4933_v28 = vrot.slane %v1790_v37, 9  ;;  %vm4247_vm12 = vcmask 585216  }
  0xcf   : > { %1968 = vrot.lane.b32.xlu2 %v1859_v43, %s5249_s10  ;;  %1738 = vst.msk [vmem:[#allocation3 + $0x34] sm:$0xf] %vm1724_vm15, %v1655_v17  ;;  %v1907_v43 = vrot.slane %v1779_v34, 5  ;;  %v1783_v14 = vld [vmem:[#allocation2 + $0x68] sm:$0x1]  ;;  %v1935_v17 = vrot.slane %v6002_v47, 5 }
  0xd0   : > { %1737 = vst.msk [vmem:[#allocation3 + $0x30] sm:$0xf] %vm1724_vm15, %v1653_v61  ;;  %v6013_v54 = vld [vmem:[#allocation2 + $0x94] sm:$0xf]  ;;  %v1139_v50 = vld [vmem:[#allocation2 + $0x3c] sm:$0xf] }
  0xd1   : > { %1175 = vst.msk [vmem:[#allocation3 + $0x38] sm:$0xf] %vm798_vm4, %v1143_v41  ;;  %v1150_v32 = vld [vmem:[#allocation2 + $0x7c] sm:$0xf]  ;;  %v1917_v1 = vrot.slane %v1783_v14, 5  ;;  %v1936_v58 = vsel %vm5872_vm14, %v4933_v28, %v1935_v17  ;;  %v1942_v4 = vrot.slane %v6013_v54, 5 }
  0xd2   : > { %1988 = vrot.lane.b32.xlu0 %v1894_v11, %s5249_s10  ;;  %v1663_v36 = vpop.permute.xlu2 %1662  ;;  %v1890_v11 = vsel %vm5872_vm14, %v1888_v53, %v1889_v52  ;;  %1171 = vst.msk [vmem:[#allocation3 + $0x28] sm:$0xf] %vm798_vm4, %v1139_v50  ;;  %v1795_v6 = vld [vmem:[#allocation2 + $0x98] sm:$0x1]  ;;  %v1787_v27 = vld [vmem:[#allocation2 + $0x78] sm:$0xe] }
  0xd3   : > { %1742 = vst.msk [vmem:[#allocation3 + $0x44] sm:$0xf] %vm1724_vm15, %v1663_v36  ;;  %v1908_v36 = vsel %vm5872_vm14, %v4929_v16, %v1907_v43  ;;  %v1909_v9 = vrot.slane %v1907_v43, 4  ;;  %v1944_v59 = vrot.slane %v1942_v4, 4  ;;  %v1145_v25 = vld [vmem:[#allocation2 + $0x60] sm:$0xf] }
  0xd4   : > { %1978 = vrot.lane.b32.xlu1 %v1876_v12, %s5249_s10  ;;  %v1775_v12 = vld [vmem:[#allocation2 + $0x48] sm:$0xe]  ;;  %1182 = vst.msk [vmem:[#allocation3 + $0x54] sm:$0xf] %vm798_vm4, %v1150_v32  ;;  %v1153_v8 = vld [vmem:[#allocation2 + $0x90] sm:$0xf] }
  0xd5   : > { %v4928_v49 = vrot.slane %v1775_v12, 9  ;;  %v4932_v23 = vrot.slane %v1787_v27, 9  ;;  %1177 = vst.msk [vmem:[#allocation3 + $0x40] sm:$0xf] %vm798_vm4, %v1145_v25  ;;  %v1152_v61 = vld [vmem:[#allocation2 + $0x88] sm:$0xf] }
  0xd6   : > { %v1784_v31 = vld [vmem:[#allocation2 + $0x6c] sm:$0xe]  ;;  %1185 = vst.msk [vmem:[#allocation3 + $0x60] sm:$0xf] %vm798_vm4, %v1153_v8  ;;  %v1799_v30 = vld [vmem:[#allocation2 + $0xa8] sm:$0xe] }
  0xd7   : > { %1974 = vrot.lane.b32.xlu2 %v1869_v62, %s5249_s10  ;;  %v1667_v21 = vpop.permute.xlu1 %1666  ;;  %v1916_v62 = vrot.slane %v1914_v18, 4  ;;  %v1901_v55 = vsel %vm5872_vm14, %v4928_v49, %v1900_v45  ;;  %v1788_v45 = vld [vmem:[#allocation2 + $0x7c] sm:$0xf]  ;;  %1184 = vst.msk [vmem:[#allocation3 + $0x5c] sm:$0xf] %vm798_vm4, %v1152_v61  ;;  %v4931_v53 = vrot.slane %v1784_v31, 9 }
  0xd8   : > { %1744 = vst.msk [vmem:[#allocation3 + $0x4c] sm:$0xf] %vm1724_vm15, %v1667_v21  ;;  %v1945_v21 = vrot.slane %v1795_v6, 5  ;;  %v1792_v34 = vld [vmem:[#allocation2 + $0x8c] sm:$0x1]  ;;  %v4936_v35 = vrot.slane %v1799_v30, 9 }
  0xd9   : > { %v1918_v13 = vsel %vm5872_vm14, %v1916_v62, %v1917_v1  ;;  %v1151_v42 = vld [vmem:[#allocation2 + $0x84] sm:$0xf]  ;;  %v1156_v16 = vld [vmem:[#allocation2 + $0xa0] sm:$0xf]  ;;  %v1937_v43 = vrot.slane %v1935_v17, 4  ;;  %v1938_v40 = vrot.slane %v1792_v34, 5 }
  0xda   : > { %1994 = vrot.lane.b32.xlu0 %v1904_v10, %s5249_s10  ;;  %v1149_v10 = vld [vmem:[#allocation2 + $0x78] sm:$0xf]  ;;  %v1946_v51 = vsel %vm5872_vm14, %v1944_v59, %v1945_v21  ;;  %1183 = vst.msk [vmem:[#allocation3 + $0x58] sm:$0xf] %vm798_vm4, %v1151_v42  ;;  %v1789_v37 = vld [vmem:[#allocation2 + $0x80] sm:$0x1] }
  0xdb   : > { %1181 = vst.msk [vmem:[#allocation3 + $0x50] sm:$0xf] %vm798_vm4, %v1149_v10  ;;  %v1804_v47 = vld [vmem:[#allocation2 + $0xbc] sm:$0x1]  ;;  %v1796_v63 = vld [vmem:[#allocation2 + $0x9c] sm:$0xe] }
  0xdc   : > { %1984 = vrot.lane.b32.xlu1 %v1887_v15, %s5249_s10  ;;  %v1780_v15 = vld [vmem:[#allocation2 + $0x5c] sm:$0x1]  ;;  %1188 = vst.msk [vmem:[#allocation3 + $0x6c] sm:$0xf] %vm798_vm4, %v1156_v16  ;;  %v1931_v14 = vrot.slane %v1789_v37, 5  ;;  %v1966_v28 = vrot.slane %v1804_v47, 5 }
  0xdd   : > { %v1910_v18 = vrot.slane %v1780_v15, 5  ;;  %v1154_v17 = vld [vmem:[#allocation2 + $0x94] sm:$0xf]  ;;  %v1158_v1 = vld [vmem:[#allocation2 + $0xac] sm:$0xf]  ;;  %vm4428_vm13 = vcmask 588800  }
  0xde   : > { %v1637_v44 = vpop.permute.xlu2 %1636  ;;  %v1665_v48 = vpop.permute.xlu0 %1664  ;;  %v1159_v50 = vld [vmem:[#allocation2 + $0xb4] sm:$0xf]  ;;  %1186 = vst.msk [vmem:[#allocation3 + $0x64] sm:$0xf] %vm798_vm4, %v1154_v17  ;;  %v2099_v21 = vld [vmem:[#allocation2 + $0x18] sm:$0xf] }
  0xdf   : > { %1729 = vst.msk [vmem:[#allocation3 + $0x10] sm:$0xf] %vm1724_vm15, %v1637_v44  ;;  %1980 = vrot.lane.b32.xlu2 %v1880_v29, %s5249_s10  ;;  %v1633_v26 = vpop.permute.xlu1 %1632  ;;  %v1928_v29 = vrot.slane %v1788_v45, 5  ;;  %v1157_v45 = vld [vmem:[#allocation2 + $0xa8] sm:$0xf] }
  0xe0   : > { %1727 = vst.msk [vmem:[#allocation3 + $0x8] sm:$0xf] %vm1724_vm15, %v1633_v26  ;;  %v6047_v26 = vld [vmem:[#allocation2 + $0xb8] sm:$0xf]  ;;  %v1798_v25 = vld [vmem:[#allocation2 + $0xa4] sm:$0x1] }
  0xe1   : > { %1743 = vst.msk [vmem:[#allocation3 + $0x48] sm:$0xf] %vm1724_vm15, %v1665_v48  ;;  %v1929_v57 = vsel %vm5872_vm14, %v4932_v23, %v1928_v29  ;;  %v1963_v41 = vrot.slane %v6047_v26, 5  ;;  %v1939_v48 = vsel %vm5872_vm14, %v1937_v43, %v1938_v40  ;;  %v1952_v61 = vrot.slane %v1798_v25, 5  ;;  %v1160_v54 = vld [vmem:[#allocation2 + $0xb8] sm:$0xf] }
  0xe2   : > { %2000 = vrot.lane.b32.xlu0 %v1915_v60, %s5249_s10  ;;  %v1911_v60 = vsel %vm5872_vm14, %v1909_v9, %v1910_v18  ;;  %1191 = vst.msk [vmem:[#allocation3 + $0x78] sm:$0xf] %vm798_vm4, %v1159_v50  ;;  %v1802_v31 = vld [vmem:[#allocation2 + $0xb4] sm:$0xe]  ;;  %v2098_v16 = vld [vmem:[#allocation2 + $0x10] sm:$0xf] }
  0xe3   : > { %v1965_v49 = vrot.slane %v1963_v41, 4  ;;  %1190 = vst.msk [vmem:[#allocation3 + $0x74] sm:$0xf] %vm798_vm4, %v1158_v1  ;;  %v2108_v26 = vld [vmem:[#allocation2 + $0x4c] sm:$0xf]  ;;  %v6113_v40 = vld [vmem:[%s5341_s25 + $0x78] sm:$0xff]  }
  0xe4   : > { %1990 = vrot.lane.b32.xlu1 %v1897_v46, %s5249_s10  ;;  %v1800_v46 = vld [vmem:[#allocation2 + $0xac] sm:$0xf]  ;;  %1189 = vst.msk [vmem:[#allocation3 + $0x70] sm:$0xf] %vm798_vm4, %v1157_v45  ;;  %v2103_v43 = vld [vmem:[#allocation2 + $0x30] sm:$0xf] }
  0xe5   : > { %v1956_v22 = vrot.slane %v1800_v46, 5  ;;  %1192 = vst.msk [vmem:[#allocation3 + $0x7c] sm:$0xf] %vm798_vm4, %v1160_v54  ;;  %v2097_v46 = vld [vmem:[#allocation2 + $0xc] sm:$0xf] }
  0xe6   : > { %v1645_v20 = vpop.permute.xlu2 %1644  ;;  %v2101_v47 = vld [vmem:[#allocation2 + $0x24] sm:$0xf]  ;;  %v2114_v1 = vld [vmem:[#allocation2 + $0x70] sm:$0xf] }
  0xe7   : > { %1733 = vst.msk [vmem:[#allocation3 + $0x20] sm:$0xf] %vm1724_vm15, %v1645_v20  ;;  %1986 = vrot.lane.b32.xlu2 %v1890_v11, %s5249_s10  ;;  %v1155_v20 = vld [vmem:[#allocation2 + $0x9c] sm:$0xf]  ;;  %v1957_v12 = vsel %vm5872_vm14, %v4936_v35, %v1956_v22  ;;  %v1958_v9 = vrot.slane %v1956_v22, 4 }
  0xe8   : > { %v1649_v56 = vpop.permute.xlu1 %1648  ;;  %1187 = vst.msk [vmem:[#allocation3 + $0x68] sm:$0xf] %vm798_vm4, %v1155_v20  ;;  %v2100_v35 = vld [vmem:[#allocation2 + $0x1c] sm:$0xf] }
  0xe9   : > { %1735 = vst.msk [vmem:[#allocation3 + $0x28] sm:$0xf] %vm1724_vm15, %v1649_v56  ;;  %v4935_v56 = vrot.slane %v1796_v63, 9 }
  0xea   : > { %2006 = vrot.lane.b32.xlu0 %v1925_v39, %s5249_s10  ;;  %v1922_v39 = vsel %vm5872_vm14, %v4931_v53, %v1921_v24  ;;  %v1797_v24 = vld [vmem:[#allocation2 + $0xa0] sm:$0xf] }
  0xeb   : > { %v1949_v32 = vrot.slane %v1797_v24, 5  ;;  %v2111_v24 = vld [vmem:[#allocation2 + $0x60] sm:$0xf] }
  0xec   : > { %1996 = vrot.lane.b32.xlu1 %v1908_v36, %s5249_s10  ;;  %v1930_v36 = vrot.slane %v1928_v29, 4 }
  0xed   : > { %v1950_v15 = vsel %vm5872_vm14, %v4935_v56, %v1949_v32 }
  0xee   : > { %v1932_v10 = vsel %vm5872_vm14, %v1930_v36, %v1931_v14  ;;  %v2106_v14 = vld [vmem:[#allocation2 + $0x40] sm:$0xf] }
  0xef   : > { %1992 = vrot.lane.b32.xlu2 %v1901_v55, %s5249_s10  ;;  %v1967_v55 = vsel %vm5872_vm14, %v1965_v49, %v1966_v28 }
  0xf2   : > { %2012 = vrot.lane.b32.xlu0 %v1936_v58, %s5249_s10  ;;  %v1793_v58 = vld [vmem:[#allocation2 + $0x90] sm:$0xe] }
  0xf3   : > { %v4934_v27 = vrot.slane %v1793_v58, 9 }
  0xf4   : > { %2002 = vrot.lane.b32.xlu1 %v1918_v13, %s5249_s10  ;;  %v1801_v13 = vld [vmem:[#allocation2 + $0xb0] sm:$0x1] }
  0xf5   : > { %v1671_v44 = vpop.permute.xlu0 %1670  ;;  %v1959_v18 = vrot.slane %v1801_v13, 5  ;;  %v1943_v59 = vsel %vm5872_vm14, %v4934_v27, %v1942_v4 }
  0xf6   : > { %1746 = vst.msk [vmem:[#allocation3 + $0x54] sm:$0xf] %vm1724_vm15, %v1671_v44  ;;  %v1951_v44 = vrot.slane %v1949_v32, 4  ;;  %v2104_v32 = vld [vmem:[#allocation2 + $0x34] sm:$0xf] }
  0xf7   : > { %1998 = vrot.lane.b32.xlu2 %v1911_v60, %s5249_s10  ;;  %v1960_v23 = vsel %vm5872_vm14, %v1958_v9, %v1959_v18  ;;  %v2107_v9 = vld [vmem:[#allocation2 + $0x48] sm:$0xf]  ;;  %v2117_v18 = vld [vmem:[#allocation2 + $0x84] sm:$0xf] }
  0xf8   : > { %v1953_v4 = vsel %vm5872_vm14, %v1951_v44, %v1952_v61  ;;  %v2110_v44 = vld [vmem:[#allocation2 + $0x58] sm:$0xf] }
  0xfa   : > { %2018 = vrot.lane.b32.xlu0 %v1946_v51, %s5249_s10  ;;  %v1661_v52 = vpop.permute.xlu1 %1660  ;;  %v2102_v51 = vld [vmem:[#allocation2 + $0x28] sm:$0xf] }
  0xfb   : > { %1741 = vst.msk [vmem:[#allocation3 + $0x40] sm:$0xf] %vm1724_vm15, %v1661_v52  ;;  %v2105_v52 = vld [vmem:[#allocation2 + $0x3c] sm:$0xf] }
  0xfc   : > { %2008 = vrot.lane.b32.xlu1 %v1929_v57, %s5249_s10  ;;  %v4937_v57 = vrot.slane %v1802_v31, 9 }
  0xfd   : > { %v1657_v11 = vpop.permute.xlu2 %1656 }
  0xfe   : > { %1739 = vst.msk [vmem:[#allocation3 + $0x38] sm:$0xf] %vm1724_vm15, %v1657_v11  ;;  %v1964_v53 = vsel %vm5872_vm14, %v4937_v57, %v1963_v41  ;;  %v5152_v11 = vunpack.c.l.bf16 %v6113_v40  ;;  %v2290_v57 = vld [vmem:[#allocation2 + $0xc] sm:$0xf] }
  0xff   : > { %2004 = vrot.lane.b32.xlu2 %v1922_v39, %s5249_s10 }
 0x102   : > { %2024 = vrot.lane.b32.xlu0 %v1957_v12, %s5249_s10  ;;  %v5221_v12 = vld [vmem:[%s7313_s1] ss:$0 sm:$0xff] }
 0x103   : > { %v373_v41 = vmul.f32 %v5221_v12, %v5152_v11 }
 0x104   : > { %2014 = vrot.lane.b32.xlu1 %v1939_v48, %s5249_s10  ;;  %v5222_v48 = vld [vmem:[%s7314_s2] ss:$0 sm:$0xff] }
 0x105   : > { %v1677_v62 = vpop.permute.xlu0 %1676  ;;  %v408_v63 = vadd.f32 %v5222_v48, %v373_v41 }
 0x106   : > { %1749 = vst.msk [vmem:[#allocation3 + $0x60] sm:$0xf] %vm1724_vm15, %v1677_v62 }
 0x107   : > { %2010 = vrot.lane.b32.xlu2 %v1932_v10, %s5249_s10  ;;  %v1669_v6 = vpop.permute.xlu2 %1668  ;;  %v440_v36 = vmax.f32 %v408_v63, 0.0 }
 0x108   : > { %1745 = vst.msk [vmem:[#allocation3 + $0x50] sm:$0xf] %vm1724_vm15, %v1669_v6 }
 0x109   : > { %v472_v49 = vpack.c.bf16 %v440_v36, %v440_v36  ;;  %v2116_v36 = vld [vmem:[#allocation2 + $0x7c] sm:$0xf] }
 0x10a   : > { %2030 = vrot.lane.b32.xlu0 %v1967_v55, %s5249_s10  ;;  %v2109_v55 = vld [vmem:[#allocation2 + $0x54] sm:$0xf] }
 0x10b   : > { %v733_v50 = vshrl.u32 %v472_v49, 16  ;;  %v736_v62 = vshll.u32 %v472_v49, 16 }
 0x10c   : > { %2020 = vrot.lane.b32.xlu1 %v1950_v15, %s5249_s10  ;;  %v909_v15 = vld [vmem:[#allocation2 + $0xc0] sm:$0xf] }
 0x10d   : > { %v6133_v10 = vrot.slane %v733_v50, 7 }
 0x10f   : > { %2016 = vrot.lane.b32.xlu2 %v1943_v59, %s5249_s10  ;;  %v1675_v29 = vpop.permute.xlu2 %1674  ;;  %v738_v58 = vor.u32 %v736_v62, %v6133_v10  ;;  %v2112_v59 = vld [vmem:[#allocation2 + $0x64] sm:$0xf]  ;;  %v739_v11 = vrot.slane %v6133_v10, 4 }
 0x110   : > { %v1673_v8 = vpop.permute.xlu1 %1672  ;;  %1748 = vst.msk [vmem:[#allocation3 + $0x5c] sm:$0xf] %vm1724_vm15, %v1675_v29 }
 0x111   : > { %1747 = vst.msk [vmem:[#allocation3 + $0x58] sm:$0xf] %vm1724_vm15, %v1673_v8  ;;  %v910_v13 = vsel %vm5322_vm7, %v738_v58, %v909_v15  ;;  %v5153_v8 = vunpack.c.h.bf16 %v6113_v40  ;;  %v2118_v40 = vld [vmem:[#allocation2 + $0x88] sm:$0xf]  ;;  %v2299_v15 = vld [vmem:[#allocation2 + $0x30] sm:$0xf] }
 0x112   : > { %2165 = vrot.lane.b32.xlu0 %v2099_v21, %s5250_s11  ;;  %911 = vst [vmem:[#allocation2 + $0xc0] sm:$0xf] %v910_v13  ;;  %v2119_v13 = vld [vmem:[#allocation2 + $0x90] sm:$0xf] }
 0x113   : > { %v374_v54 = vmul.f32 %v5221_v12, %v5153_v8 }
 0x114   : > { %2026 = vrot.lane.b32.xlu1 %v1960_v23, %s5249_s10 }
 0x116   : > { %v1683_v60 = vpop.permute.xlu0 %1682 }
 0x117   : > { %1752 = vst.msk [vmem:[#allocation3 + $0x6c] sm:$0xf] %vm1724_vm15, %v1683_v60  ;;  %2022 = vrot.lane.b32.xlu2 %v1953_v4, %s5249_s10  ;;  %v2120_v4 = vld [vmem:[#allocation2 + $0x94] sm:$0xf]  ;;  %v409_v60 = vadd.f32 %v5222_v48, %v374_v54  ;;  %v2291_v48 = vld [vmem:[#allocation2 + $0x10] sm:$0xf] }
 0x118   : > { %v1679_v30 = vpop.permute.xlu1 %1678  ;;  %v2348_v50 = vshll.u32 %v2291_v48, 16 }
 0x119   : > { %1750 = vst.msk [vmem:[#allocation3 + $0x64] sm:$0xf] %vm1724_vm15, %v1679_v30  ;;  %v1681_v34 = vpop.permute.xlu2 %1680  ;;  %v1068_v23 = vld [vmem:[#allocation2 + $0xc0] sm:$0x1]  ;;  %v441_v31 = vmax.f32 %v409_v60, 0.0 }
 0x11a   : > { %2171 = vrot.lane.b32.xlu0 %v2102_v51, %s5250_s11  ;;  %1751 = vst.msk [vmem:[#allocation3 + $0x68] sm:$0xf] %vm1724_vm15, %v1681_v34  ;;  %v1069_v61 = vsel %vm5311_vm6, 0, %v1068_v23  ;;  %v2115_v51 = vld [vmem:[#allocation2 + $0x78] sm:$0xf]  ;;  %v2350_v10 = vrot.slane %v2348_v50, 5 }
 0x11b   : > { %1070 = vst [vmem:[#allocation2 + $0xc0] sm:$0x1] %v1069_v61  ;;  %v473_v34 = vpack.c.bf16 %v441_v31, %v441_v31  ;;  %v2296_v31 = vld [vmem:[#allocation2 + $0x24] sm:$0xf]  ;;  %v2297_v50 = vld [vmem:[#allocation2 + $0x28] sm:$0xf] }
 0x11c   : > { %2161 = vrot.lane.b32.xlu1 %v2097_v46, %s5250_s11 }
 0x11f   : > { %2028 = vrot.lane.b32.xlu2 %v1964_v53, %s5249_s10  ;;  %s5069_s10 = sshll.u32 %s7335_s18, 8 }
 0x120   : > { %s7039_s13 = scalar_lea.vmem %s7316_s4, %s5069_s10 }
 0x121   : > { %v1687_v22 = vpop.permute.xlu2 %1686 }
 0x122   : > { %2177 = vrot.lane.b32.xlu0 %v2105_v52, %s5250_s11  ;;  %1754 = vst.msk [vmem:[#allocation3 + $0x74] sm:$0xf] %vm1724_vm15, %v1687_v22  ;;  %v2113_v52 = vld [vmem:[#allocation2 + $0x6c] sm:$0xf]  ;;  %v2123_v22 = vld [vmem:[#allocation2 + $0xa8] sm:$0xf] }
 0x124   : > { %2167 = vrot.lane.b32.xlu1 %v2100_v35, %s5250_s11  ;;  %v1689_v42 = vpop.permute.xlu0 %1688  ;;  %v741_v35 = vshrl.u32 %v473_v34, 16 }
 0x125   : > { %1755 = vst.msk [vmem:[#allocation3 + $0x78] sm:$0xf] %vm1724_vm15, %v1689_v42  ;;  %v2339_v42 = vshrl.u32 %v2290_v57, 16 }
 0x127   : > { %2163 = vrot.lane.b32.xlu2 %v2098_v16, %s5250_s11  ;;  %v2342_v16 = vshll.u32 %v2290_v57, 16  ;;  %v2341_v12 = vrot.slane %v2339_v42, 4 }
 0x129   : > { %v1969_v20 = vpop.permute.xlu2 %1968  ;;  %v2344_v41 = vrot.slane %v2342_v16, 5  ;;  %v2387_v16 = vshrl.u32 %v2296_v31, 16 }
 0x12a   : > { %2183 = vrot.lane.b32.xlu0 %v2108_v26, %s5250_s11  ;;  %2065 = vst.msk [vmem:[#allocation3] sm:$0xf] %vm2064_vm0, %v1969_v20  ;;  %v6159_v26 = vrot.slane %v741_v35, 7 }
 0x12c   : > { %2173 = vrot.lane.b32.xlu1 %v2103_v43, %s5250_s11  ;;  %v1971_v39 = vpop.permute.xlu0 %1970  ;;  %v744_v43 = vshll.u32 %v473_v34, 16 }
 0x12d   : > { %2066 = vst.msk [vmem:[#allocation3 + $0x4] sm:$0xf] %vm2064_vm0, %v1971_v39 }
 0x12e   : > { %v1685_v37 = vpop.permute.xlu1 %1684  ;;  %v746_v20 = vor.u32 %v744_v43, %v6159_v26  ;;  %v2390_v43 = vshll.u32 %v2296_v31, 16  ;;  %v2305_v31 = vld [vmem:[#allocation2 + $0x48] sm:$0xf] }
 0x12f   : > { %1753 = vst.msk [vmem:[#allocation3 + $0x70] sm:$0xf] %vm1724_vm15, %v1685_v37  ;;  %2169 = vrot.lane.b32.xlu2 %v2101_v47, %s5250_s11  ;;  %v2294_v37 = vld [vmem:[#allocation2 + $0x1c] sm:$0xf] }
 0x130   : > { %v747_v63 = vsel %vm5304_vm3, %v739_v11, %v746_v20  ;;  %v2376_v49 = vshrl.u32 %v2294_v37, 16  ;;  %v2127_v11 = vld [vmem:[#allocation2 + $0xc0] sm:$0xf]  ;;  %vm2818_vm3 = vcmask 322816  }
 0x131   : > { %v1975_v28 = vpop.permute.xlu2 %1974  ;;  %912 = vst.msk [vmem:[#allocation2 + $0xc4] sm:$0xf] %vm798_vm4, %v747_v63  ;;  %vm3155_vm4 = vcmask 388416  }
 0x132   : > { %2189 = vrot.lane.b32.xlu0 %v2111_v24, %s5250_s11  ;;  %2068 = vst.msk [vmem:[#allocation3 + $0xc] sm:$0xf] %vm2064_vm0, %v1975_v28  ;;  %v2126_v28 = vld [vmem:[#allocation2 + $0xb8] sm:$0xf] }
 0x134   : > { %2179 = vrot.lane.b32.xlu1 %v2106_v14, %s5250_s11  ;;  %v1977_v17 = vpop.permute.xlu0 %1976  ;;  %v2372_v14 = vshll.u32 %v2294_v37, 16  ;;  %v2293_v37 = vld [vmem:[#allocation2 + $0x18] sm:$0xf] }
 0x135   : > { %2069 = vst.msk [vmem:[#allocation3 + $0x10] sm:$0xf] %vm2064_vm0, %v1977_v17  ;;  %v2345_v17 = vor.u32 %v2344_v41, %v2341_v12  ;;  %v2304_v41 = vld [vmem:[#allocation2 + $0x44] sm:$0x1] }
 0x136   : > { %v1691_v56 = vpop.permute.xlu1 %1690  ;;  %v6174_v0 = vrot.slane %v2372_v14, 5  ;;  %v2308_v14 = vld [vmem:[#allocation2 + $0x54] sm:$0xf] }
 0x137   : > { %1756 = vst.msk [vmem:[#allocation3 + $0x7c] sm:$0xf] %vm1724_vm15, %v1691_v56  ;;  %2175 = vrot.lane.b32.xlu2 %v2104_v32, %s5250_s11  ;;  %v2121_v56 = vld [vmem:[#allocation2 + $0x9c] sm:$0xf]  ;;  %v2378_v32 = vrot.slane %v2376_v49, 4 }
 0x139   : > { %v1981_v6 = vpop.permute.xlu2 %1980 }
 0x13a   : > { %2195 = vrot.lane.b32.xlu0 %v2114_v1, %s5250_s11  ;;  %2071 = vst.msk [vmem:[#allocation3 + $0x18] sm:$0xf] %vm2064_vm0, %v1981_v6  ;;  %v2346_v1 = vrot.slane %v2345_v17, 4 }
 0x13c   : > { %2185 = vrot.lane.b32.xlu1 %v2109_v55, %s5250_s11  ;;  %v1983_v27 = vpop.permute.xlu0 %1982  ;;  %v2295_v55 = vld [vmem:[#allocation2 + $0x20] sm:$0x1] }
 0x13d   : > { %2072 = vst.msk [vmem:[#allocation3 + $0x1c] sm:$0xf] %vm2064_vm0, %v1983_v27  ;;  %v2352_v27 = vshrl.u32 %v2291_v48, 16 }
 0x13e   : > { %v1973_v45 = vpop.permute.xlu1 %1972 }
 0x13f   : > { %2067 = vst.msk [vmem:[#allocation3 + $0x8] sm:$0xf] %vm2064_vm0, %v1973_v45  ;;  %2181 = vrot.lane.b32.xlu2 %v2107_v9, %s5250_s11  ;;  %v2379_v45 = vor.u32 %v2378_v32, %v6174_v0  ;;  %v2382_v9 = vshll.u32 %v2295_v55, 16  ;;  %v2454_v32 = vshll.u32 %v2304_v41, 16  ;;  %v2125_v55 = vld [vmem:[#allocation2 + $0xb4] sm:$0xf] }
 0x141   : > { %v1987_v21 = vpop.permute.xlu2 %1986  ;;  %v2380_v8 = vrot.slane %v2379_v45, 4  ;;  %v2384_v23 = vrot.slane %v2382_v9, 5 }
 0x142   : > { %2201 = vrot.lane.b32.xlu0 %v2117_v18, %s5250_s11  ;;  %2074 = vst.msk [vmem:[#allocation3 + $0x24] sm:$0xf] %vm2064_vm0, %v1987_v21  ;;  %v2351_v18 = vsel %vm5414_vm11, %v2346_v1, %v2350_v10  ;;  %v2414_v21 = vshll.u32 %v2299_v15, 16  ;;  %v2366_v1 = vshll.u32 %v2293_v37, 16 }
 0x144   : > { %2191 = vrot.lane.b32.xlu1 %v2112_v59, %s5250_s11  ;;  %v1989_v25 = vpop.permute.xlu0 %1988  ;;  %v2411_v59 = vshrl.u32 %v2299_v15, 16  ;;  %v2486_v15 = vshll.u32 %v2308_v14, 16 }
 0x145   : > { %2075 = vst.msk [vmem:[#allocation3 + $0x28] sm:$0xf] %vm2064_vm0, %v1989_v25  ;;  %v2124_v25 = vld [vmem:[#allocation2 + $0xac] sm:$0xf] }
 0x146   : > { %v1979_v29 = vpop.permute.xlu1 %1978  ;;  %v2413_v54 = vrot.slane %v2411_v59, 4  ;;  %v2456_v59 = vrot.slane %v2454_v32, 5  ;;  %v2317_v32 = vld [vmem:[#allocation2 + $0x78] sm:$0xf] }
 0x147   : > { %2070 = vst.msk [vmem:[#allocation3 + $0x14] sm:$0xf] %vm2064_vm0, %v1979_v29  ;;  %2187 = vrot.lane.b32.xlu2 %v2110_v44, %s5250_s11  ;;  %v2354_v29 = vrot.slane %v2352_v27, 4  ;;  %v2303_v44 = vld [vmem:[#allocation2 + $0x40] sm:$0xf]  ;;  %v2396_v27 = vshll.u32 %v2297_v50, 16 }
 0x148   : > { %v2448_v57 = vshrl.u32 %v2303_v44, 16 }
 0x149   : > { %v1993_v30 = vpop.permute.xlu2 %1992  ;;  %v2355_v35 = vor.u32 %v2354_v29, %v2350_v10 }
 0x14a   : > { %2207 = vrot.lane.b32.xlu0 %v2120_v4, %s5250_s11  ;;  %2077 = vst.msk [vmem:[#allocation3 + $0x30] sm:$0xf] %vm2064_vm0, %v1993_v30  ;;  %v2416_v4 = vrot.slane %v2414_v21, 5  ;;  %v2292_v30 = vld [vmem:[#allocation2 + $0x14] sm:$0x1] }
 0x14b   : > { %v2356_v12 = vrot.slane %v2355_v35, 4  ;;  %v2128_v35 = vld [vmem:[#allocation2 + $0xc4] sm:$0xf] }
 0x14c   : > { %2197 = vrot.lane.b32.xlu1 %v2115_v51, %s5250_s11  ;;  %v1995_v46 = vpop.permute.xlu0 %1994  ;;  %v2300_v51 = vld [vmem:[#allocation2 + $0x34] sm:$0xf] }
 0x14d   : > { %2078 = vst.msk [vmem:[#allocation3 + $0x34] sm:$0xf] %vm2064_vm0, %v1995_v46  ;;  %v2444_v46 = vshll.u32 %v2303_v44, 16  ;;  %v2420_v42 = vshll.u32 %v2300_v51, 16  ;;  %v2424_v17 = vshrl.u32 %v2300_v51, 16  ;;  %v2488_v44 = vrot.slane %v2486_v15, 5 }
 0x14e   : > { %v1985_v53 = vpop.permute.xlu1 %1984 }
 0x14f   : > { %2073 = vst.msk [vmem:[#allocation3 + $0x20] sm:$0xf] %vm2064_vm0, %v1985_v53  ;;  %2193 = vrot.lane.b32.xlu2 %v2113_v52, %s5250_s11  ;;  %v2122_v53 = vld [vmem:[#allocation2 + $0xa0] sm:$0xf]  ;;  %v2385_v52 = vsel %vm5414_vm11, %v2380_v8, %v2384_v23  ;;  %v6192_v20 = vrot.slane %v2444_v46, 5  ;;  %v2422_v63 = vrot.slane %v2420_v42, 5 }
 0x150   : > { %v2426_v9 = vrot.slane %v2424_v17, 4  ;;  %v2301_v8 = vld [vmem:[#allocation2 + $0x38] sm:$0x1]  ;;  %v2400_v46 = vshrl.u32 %v2297_v50, 16 }
 0x151   : > { %v1999_v39 = vpop.permute.xlu2 %1998  ;;  %v6206_v23 = vld [vmem:[#allocation2 + $0x58] sm:$0xf] }
 0x152   : > { %2213 = vrot.lane.b32.xlu0 %v2123_v22, %s5250_s11  ;;  %2080 = vst.msk [vmem:[#allocation3 + $0x3c] sm:$0xf] %vm2064_vm0, %v1999_v39  ;;  %v2417_v22 = vor.u32 %v2416_v4, %v2413_v54  ;;  %v2450_v39 = vrot.slane %v2448_v57, 4  ;;  %v6208_v4 = vrot.slane %v2396_v27, 5  ;;  %v2427_v51 = vor.u32 %v2426_v9, %v2422_v63 }
 0x153   : > { %v2430_v57 = vshll.u32 %v2301_v8, 16  ;;  %v2558_v9 = vshll.u32 %v2317_v32, 16 }
 0x154   : > { %2203 = vrot.lane.b32.xlu1 %v2118_v40, %s5250_s11  ;;  %v2001_v47 = vpop.permute.xlu0 %2000  ;;  %v2358_v40 = vshll.u32 %v2292_v30, 16  ;;  %v2418_v48 = vrot.slane %v2417_v22, 4  ;;  %v2312_v30 = vld [vmem:[#allocation2 + $0x64] sm:$0xf] }
 0x155   : > { %2081 = vst.msk [vmem:[#allocation3 + $0x40] sm:$0xf] %vm2064_vm0, %v2001_v47  ;;  %v2432_v41 = vrot.slane %v2430_v57, 5  ;;  %v2321_v57 = vld [vmem:[#allocation2 + $0x88] sm:$0xf] }
 0x156   : > { %v1991_v24 = vpop.permute.xlu1 %1990 }
 0x157   : > { %2076 = vst.msk [vmem:[#allocation3 + $0x2c] sm:$0xf] %vm2064_vm0, %v1991_v24  ;;  %2199 = vrot.lane.b32.xlu2 %v2116_v36, %s5250_s11  ;;  %v2389_v24 = vrot.slane %v2387_v16, 4  ;;  %v2392_v36 = vrot.slane %v2390_v43, 5  ;;  %v2459_v16 = vshrl.u32 %v2305_v31, 16  ;;  %v2462_v43 = vshll.u32 %v2305_v31, 16 }
 0x159   : > { %v2005_v62 = vpop.permute.xlu2 %2004  ;;  %v2464_v17 = vrot.slane %v2462_v43, 5  ;;  %v2310_v43 = vld [vmem:[#allocation2 + $0x5c] sm:$0x1] }
 0x15a   : > { %2219 = vrot.lane.b32.xlu0 %v2126_v28, %s5250_s11  ;;  %2083 = vst.msk [vmem:[#allocation3 + $0x48] sm:$0xf] %vm2064_vm0, %v2005_v62  ;;  %v2360_v28 = vrot.slane %v2358_v40, 5  ;;  %v2363_v62 = vshrl.u32 %v2293_v37, 16  ;;  %v2516_v40 = vshll.u32 %v2312_v30, 16 }
 0x15c   : > { %2209 = vrot.lane.b32.xlu1 %v2121_v56, %s5250_s11  ;;  %v2007_v58 = vpop.permute.xlu0 %2006  ;;  %v2451_v56 = vor.u32 %v2450_v39, %v6192_v20  ;;  %v2361_v45 = vsel %vm5414_vm11, %v2356_v12, %v2360_v28  ;;  %v2365_v21 = vrot.slane %v2363_v62, 4  ;;  %v2428_v12 = vrot.slane %v2427_v51, 4 }
 0x15d   : > { %2084 = vst.msk [vmem:[#allocation3 + $0x4c] sm:$0xf] %vm2064_vm0, %v2007_v58  ;;  %v2483_v58 = vshrl.u32 %v2308_v14, 16  ;;  %v2302_v14 = vld [vmem:[#allocation2 + $0x3c] sm:$0xf]  ;;  %v2461_v28 = vrot.slane %v2459_v16, 4 }
 0x15e   : > { %v1997_v6 = vpop.permute.xlu1 %1996  ;;  %v6225_v50 = vrot.slane %v2516_v40, 5  ;;  %v2435_v15 = vshrl.u32 %v2302_v14, 16 }
 0x15f   : > { %2079 = vst.msk [vmem:[#allocation3 + $0x38] sm:$0xf] %vm2064_vm0, %v1997_v6  ;;  %2205 = vrot.lane.b32.xlu2 %v2119_v13, %s5250_s11  ;;  %v2423_v6 = vsel %vm5414_vm11, %v2418_v48, %v2422_v63  ;;  %v2393_v13 = vor.u32 %v2392_v36, %v2389_v24  ;;  %v2485_v29 = vrot.slane %v2483_v58, 4  ;;  %v2402_v48 = vrot.slane %v2400_v46, 4  ;;  %v2298_v36 = vld [vmem:[#allocation2 + $0x2c] sm:$0x1] }
 0x160   : > { %v2496_v24 = vshrl.u32 %v6206_v23, 16  ;;  %v2406_v58 = vshll.u32 %v2298_v36, 16  ;;  %v2465_v8 = vor.u32 %v2464_v17, %v2461_v28  ;;  %v6243_v46 = vld [vmem:[#allocation2 + $0x7c] sm:$0xf]  ;;  %v2307_v17 = vld [vmem:[#allocation2 + $0x50] sm:$0x1] }
 0x161   : > { %v2011_v61 = vpop.permute.xlu2 %2010  ;;  %v2394_v54 = vrot.slane %v2393_v13, 4  ;;  %v2489_v42 = vor.u32 %v2488_v44, %v2485_v29 }
 0x162   : > { %2722 = vrot.lane.b32.xlu0 %v2351_v18, %s5251_s16  ;;  %2086 = vst.msk [vmem:[#allocation3 + $0x54] sm:$0xf] %vm2064_vm0, %v2011_v61  ;;  %v2452_v18 = vrot.slane %v2451_v56, 4  ;;  %v2498_v29 = vrot.slane %v2496_v24, 4  ;;  %v2408_v44 = vrot.slane %v2406_v58, 5  ;;  %v748_v24 = vrot.slane %v6159_v26, 4 }
 0x163   : > { %v2399_v39 = vsel %vm5414_vm11, %v2394_v54, %v6208_v4  ;;  %v2490_v63 = vrot.slane %v2489_v42, 4  ;;  %v2326_v26 = vld [vmem:[#allocation2 + $0x9c] sm:$0xf] }
 0x164   : > { %2215 = vrot.lane.b32.xlu1 %v2124_v25, %s5250_s11  ;;  %v2013_v60 = vpop.permute.xlu0 %2012  ;;  %v2368_v25 = vrot.slane %v2366_v1, 5  ;;  %v2457_v22 = vsel %vm5414_vm11, %v2452_v18, %v2456_v59  ;;  %v2306_v1 = vld [vmem:[#allocation2 + $0x4c] sm:$0xf]  ;;  %v2433_v18 = vsel %vm5414_vm11, %v2428_v12, %v2432_v41  ;;  %v2564_v12 = vshll.u32 %v6243_v46, 16 }
 0x165   : > { %2087 = vst.msk [vmem:[#allocation3 + $0x58] sm:$0xf] %vm2064_vm0, %v2013_v60  ;;  %v2588_v41 = vshll.u32 %v2321_v57, 16 }
 0x166   : > { %v2003_v34 = vpop.permute.xlu1 %2002 }
 0x167   : > { %2082 = vst.msk [vmem:[#allocation3 + $0x44] sm:$0xf] %vm2064_vm0, %v2003_v34  ;;  %2211 = vrot.lane.b32.xlu2 %v2122_v53, %s5250_s11  ;;  %v2369_v34 = vor.u32 %v2368_v25, %v2365_v21  ;;  %v2492_v53 = vshll.u32 %v6206_v23, 16  ;;  %v2468_v23 = vshll.u32 %v2306_v1, 16 }
 0x169   : > { %v2017_v47 = vpop.permute.xlu2 %2016  ;;  %v2370_v37 = vrot.slane %v2369_v34, 4  ;;  %v2470_v42 = vrot.slane %v2468_v23, 5  ;;  %v2630_v23 = vshll.u32 %v2326_v26, 16 }
 0x16a   : > { %2728 = vrot.lane.b32.xlu0 %v2385_v52, %s5251_s16  ;;  %2089 = vst.msk [vmem:[#allocation3 + $0x60] sm:$0xf] %vm2064_vm0, %v2017_v47  ;;  %v6221_v47 = vrot.slane %v2492_v53, 5  ;;  %v2472_v53 = vshrl.u32 %v2306_v1, 16  ;;  %v6260_v1 = vrot.slane %v2564_v12, 5 }
 0x16b   : > { %v2375_v27 = vsel %vm5414_vm11, %v2370_v37, %v6174_v0  ;;  %v2592_v37 = vshrl.u32 %v2321_v57, 16 }
 0x16c   : > { %2221 = vrot.lane.b32.xlu1 %v2127_v11, %s5250_s11  ;;  %v2019_v49 = vpop.permute.xlu0 %2018  ;;  %v2520_v11 = vshrl.u32 %v2312_v30, 16  ;;  %v2495_v59 = vsel %vm5414_vm11, %v2490_v63, %v6221_v47 }
 0x16d   : > { %2090 = vst.msk [vmem:[#allocation3 + $0x64] sm:$0xf] %vm2064_vm0, %v2019_v49 }
 0x16e   : > { %v2009_v10 = vpop.permute.xlu1 %2008  ;;  %v2522_v56 = vrot.slane %v2520_v11, 4 }
 0x16f   : > { %2085 = vst.msk [vmem:[#allocation3 + $0x50] sm:$0xf] %vm2064_vm0, %v2009_v10  ;;  %2217 = vrot.lane.b32.xlu2 %v2125_v55, %s5250_s11  ;;  %v2313_v10 = vld [vmem:[#allocation2 + $0x68] sm:$0x1]  ;;  %v2403_v55 = vor.u32 %v2402_v48, %v6208_v4 }
 0x170   : > { %v2523_v21 = vor.u32 %v2522_v56, %v6225_v50  ;;  %v2526_v25 = vshll.u32 %v2313_v10, 16  ;;  %v2474_v56 = vrot.slane %v2472_v53, 4  ;;  %v6262_v10 = vrot.slane %v2588_v41, 5 }
 0x171   : > { %v2023_v61 = vpop.permute.xlu2 %2022  ;;  %v2404_v0 = vrot.slane %v2403_v55, 4  ;;  %v2594_v55 = vrot.slane %v2592_v37, 4  ;;  %v2319_v37 = vld [vmem:[#allocation2 + $0x80] sm:$0x1] }
 0x172   : > { %2734 = vrot.lane.b32.xlu0 %v2423_v6, %s5251_s16  ;;  %2092 = vst.msk [vmem:[#allocation3 + $0x6c] sm:$0xf] %vm2064_vm0, %v2023_v61  ;;  %v2438_v6 = vshll.u32 %v2302_v14, 16  ;;  %v2437_v61 = vrot.slane %v2435_v15, 4  ;;  %v2524_v31 = vrot.slane %v2523_v21, 4  ;;  %v2528_v30 = vrot.slane %v2526_v25, 5 }
 0x173   : > { %v2409_v16 = vsel %vm5414_vm11, %v2404_v0, %v2408_v44  ;;  %v2502_v14 = vshll.u32 %v2310_v43, 16  ;;  %v6264_v15 = vld [vmem:[#allocation2 + $0x70] sm:$0xf]  ;;  %v2475_v25 = vor.u32 %v2474_v56, %v2470_v42 }
 0x174   : > { %2724 = vrot.lane.b32.xlu1 %v2361_v45, %s5251_s16  ;;  %v2025_v60 = vpop.permute.xlu0 %2024  ;;  %v2555_v45 = vshrl.u32 %v2317_v32, 16  ;;  %v2440_v54 = vrot.slane %v2438_v6, 5  ;;  %v2311_v32 = vld [vmem:[#allocation2 + $0x60] sm:$0xf]  ;;  %v2323_v43 = vld [vmem:[#allocation2 + $0x90] sm:$0xf] }
 0x175   : > { %2093 = vst.msk [vmem:[#allocation3 + $0x70] sm:$0xf] %vm2064_vm0, %v2025_v60  ;;  %v2560_v60 = vrot.slane %v2558_v9, 5  ;;  %v2504_v9 = vrot.slane %v2502_v14, 5  ;;  %v2510_v21 = vshll.u32 %v2311_v32, 16  ;;  %v2476_v53 = vrot.slane %v2475_v25, 4 }
 0x176   : > { %v2015_v52 = vpop.permute.xlu1 %2014  ;;  %v2557_v4 = vrot.slane %v2555_v45, 4  ;;  %v2441_v40 = vor.u32 %v2440_v54, %v2437_v61  ;;  %v2595_v61 = vor.u32 %v2594_v55, %v6262_v10  ;;  %v2606_v56 = vshll.u32 %v2323_v43, 16 }
 0x177   : > { %2088 = vst.msk [vmem:[#allocation3 + $0x5c] sm:$0xf] %vm2064_vm0, %v2015_v52  ;;  %2223 = vrot.lane.b32.xlu2 %v2128_v35, %s5250_s11  ;;  %v2499_v52 = vor.u32 %v2498_v29, %v6221_v47  ;;  %v2314_v35 = vld [vmem:[#allocation2 + $0x6c] sm:$0xf]  ;;  %v2529_v47 = vsel %vm5414_vm11, %v2524_v31, %v2528_v30  ;;  %v913_v29 = vld [vmem:[#allocation2 + $0xc8] sm:$0x1] }
 0x178   : > { %v2531_v48 = vshrl.u32 %v2314_v35, 16  ;;  %v2534_v63 = vshll.u32 %v2314_v35, 16  ;;  %v2442_v28 = vrot.slane %v2441_v40, 4  ;;  %v2540_v30 = vshll.u32 %v6264_v15, 16 }
 0x179   : > { %v2029_v49 = vpop.permute.xlu2 %2028  ;;  %v2500_v36 = vrot.slane %v2499_v52, 4 }
 0x17a   : > { %2740 = vrot.lane.b32.xlu0 %v2457_v22, %s5251_s16  ;;  %2095 = vst.msk [vmem:[#allocation3 + $0x78] sm:$0xf] %vm2064_vm0, %v2029_v49  ;;  %v2466_v22 = vrot.slane %v2465_v8, 4  ;;  %v2533_v6 = vrot.slane %v2531_v48, 4  ;;  %v2627_v8 = vshrl.u32 %v2326_v26, 16  ;;  %v2447_v44 = vsel %vm5414_vm11, %v2442_v28, %v6192_v20 }
 0x17b   : > { %v2505_v20 = vsel %vm5414_vm11, %v2500_v36, %v2504_v9  ;;  %v2330_v48 = vld [vmem:[#allocation2 + $0xac] sm:$0xf]  ;;  %v2603_v36 = vshrl.u32 %v2323_v43, 16 }
 0x17c   : > { %2730 = vrot.lane.b32.xlu1 %v2399_v39, %s5251_s16  ;;  %v2031_v62 = vpop.permute.xlu0 %2030  ;;  %v2561_v39 = vor.u32 %v2560_v60, %v2557_v4  ;;  %v2471_v49 = vsel %vm5414_vm11, %v2466_v22, %v2470_v42  ;;  %v914_v4 = vsel %vm5311_vm6, %v748_v24, %v913_v29  ;;  %v2629_v35 = vrot.slane %v2627_v8, 4 }
 0x17d   : > { %2096 = vst.msk [vmem:[#allocation3 + $0x7c] sm:$0xf] %vm2064_vm0, %v2031_v62  ;;  %v2632_v22 = vrot.slane %v2630_v23, 5  ;;  %v2596_v42 = vrot.slane %v2595_v61, 4  ;;  %v2660_v55 = vshll.u32 %v2330_v48, 16  ;;  %v2664_v26 = vshrl.u32 %v2330_v48, 16 }
 0x17e   : > { %v2021_v13 = vpop.permute.xlu1 %2020  ;;  %v2562_v62 = vrot.slane %v2561_v39, 4  ;;  %915 = vst [vmem:[#allocation2 + $0xc8] sm:$0x1] %v914_v4  ;;  %v6287_v39 = vrot.slane %v2540_v30, 5  ;;  %v2316_v23 = vld [vmem:[#allocation2 + $0x74] sm:$0x1] }
 0x17f   : > { %2091 = vst.msk [vmem:[#allocation3 + $0x68] sm:$0xf] %vm2064_vm0, %v2021_v13  ;;  %2726 = vrot.lane.b32.xlu2 %v2375_v27, %s5251_s16  ;;  %v2536_v13 = vrot.slane %v2534_v63, 5  ;;  %v2322_v27 = vld [vmem:[#allocation2 + $0x8c] sm:$0x1]  ;;  %v2633_v63 = vor.u32 %v2632_v22, %v2629_v35  ;;  %v6309_v29 = vrot.slane %v2660_v55, 5 }
 0x180   : > { %v2598_v54 = vshll.u32 %v2322_v27, 16  ;;  %v2567_v60 = vsel %vm5414_vm11, %v2562_v62, %v6260_v1  ;;  %v2574_v62 = vshll.u32 %v2319_v37, 16  ;;  %v2331_v61 = vld [vmem:[#allocation2 + $0xb0] sm:$0x1]  ;;  %v2332_v55 = vld [vmem:[#allocation2 + $0xb4] sm:$0xf] }
 0x181   : > { %v2164_v51 = vpop.permute.xlu2 %2163  ;;  %v2537_v31 = vor.u32 %v2536_v13, %v2533_v6  ;;  %v2634_v13 = vrot.slane %v2633_v63, 4  ;;  %v2670_v35 = vshll.u32 %v2331_v61, 16  ;;  %v6348_v61 = vld [vmem:[#allocation2 + $0x10] sm:$0xf] }
 0x182   : > { %2746 = vrot.lane.b32.xlu0 %v2495_v59, %s5251_s16  ;;  %2259 = vst.msk [vmem:[#allocation3 + $0x4] sm:$0xf] %vm2257_vm1, %v2164_v51  ;;  %v2507_v59 = vshrl.u32 %v2311_v32, 16  ;;  %v2568_v51 = vshrl.u32 %v6243_v46, 16  ;;  %v6285_v46 = vld [vmem:[#allocation2 + $0xa0] sm:$0xf] }
 0x183   : > { %v2636_v24 = vshll.u32 %v6285_v46, 16  ;;  %v2576_v8 = vrot.slane %v2574_v62, 5  ;;  %v2672_v48 = vrot.slane %v2670_v35, 5  ;;  %v2328_v62 = vld [vmem:[#allocation2 + $0xa4] sm:$0x1]  ;;  %v2949_v35 = vrot.slane %v6348_v61, 5 }
 0x184   : > { %2736 = vrot.lane.b32.xlu1 %v2433_v18, %s5251_s16  ;;  %v2166_v34 = vpop.permute.xlu0 %2165  ;;  %v2478_v18 = vshll.u32 %v2307_v17, 16  ;;  %v2509_v57 = vrot.slane %v2507_v59, 4  ;;  %v2570_v12 = vrot.slane %v2568_v51, 4  ;;  %v2320_v59 = vld [vmem:[#allocation2 + $0x84] sm:$0xf] }
 0x185   : > { %2260 = vst.msk [vmem:[#allocation3 + $0x8] sm:$0xf] %vm2257_vm1, %v2166_v34  ;;  %v2512_v34 = vrot.slane %v2510_v21, 5  ;;  %v6304_v27 = vrot.slane %v2636_v24, 5  ;;  %v2579_v51 = vshrl.u32 %v2320_v59, 16 }
 0x186   : > { %v2027_v11 = vpop.permute.xlu1 %2026  ;;  %v2480_v52 = vrot.slane %v2478_v18, 5  ;;  %v2571_v32 = vor.u32 %v2570_v12, %v6260_v1  ;;  %v2608_v1 = vrot.slane %v2606_v56, 5  ;;  %v2863_v61 = vld [vmem:[#allocation2 + $0x3c] sm:$0xe] }
 0x187   : > { %2094 = vst.msk [vmem:[#allocation3 + $0x74] sm:$0xf] %vm2064_vm0, %v2027_v11  ;;  %2732 = vrot.lane.b32.xlu2 %v2409_v16, %s5251_s16  ;;  %v2600_v16 = vrot.slane %v2598_v54, 5  ;;  %v2538_v11 = vrot.slane %v2537_v31, 4  ;;  %v2335_v54 = vld [vmem:[#allocation2 + $0xc0] sm:$0xf] }
 0x188   : > { %v2481_v28 = vsel %vm5414_vm11, %v2476_v53, %v2480_v52  ;;  %v2572_v25 = vrot.slane %v2571_v32, 4  ;;  %v2582_v31 = vshll.u32 %v2320_v59, 16  ;;  %v2550_v53 = vshll.u32 %v2316_v23, 16  ;;  %v2325_v23 = vld [vmem:[#allocation2 + $0x98] sm:$0x1] }
 0x189   : > { %v2170_v58 = vpop.permute.xlu2 %2169  ;;  %v2601_v17 = vsel %vm5414_vm11, %v2596_v42, %v2600_v16  ;;  %v2699_v22 = vshrl.u32 %v2335_v54, 16  ;;  %v2702_v42 = vshll.u32 %v2335_v54, 16 }
 0x18a   : > { %2752 = vrot.lane.b32.xlu0 %v2529_v47, %s5251_s16  ;;  %2262 = vst.msk [vmem:[#allocation3 + $0x10] sm:$0xf] %vm2257_vm1, %v2170_v58  ;;  %v2513_v47 = vor.u32 %v2512_v34, %v2509_v57  ;;  %v2543_v58 = vsel %vm5414_vm11, %v2538_v11, %v6287_v39  ;;  %v2577_v43 = vsel %vm5414_vm11, %v2572_v25, %v2576_v8  ;;  %v2584_v11 = vrot.slane %v2582_v31, 5 }
 0x18b   : > { %v2701_v63 = vrot.slane %v2699_v22, 4  ;;  %v2704_v24 = vrot.slane %v2702_v42, 5  ;;  %v2853_v22 = vld [vmem:[#allocation2 + $0x14] sm:$0x1] }
 0x18c   : > { %2742 = vrot.lane.b32.xlu1 %v2471_v49, %s5251_s16  ;;  %v2172_v45 = vpop.permute.xlu0 %2171  ;;  %v2544_v49 = vshrl.u32 %v6264_v15, 16  ;;  %v2514_v6 = vrot.slane %v2513_v47, 4  ;;  %v1123_v15 = vld [vmem:[#allocation2 + $0xc8] sm:$0x1] }
 0x18d   : > { %2263 = vst.msk [vmem:[#allocation3 + $0x14] sm:$0xf] %vm2257_vm1, %v2172_v45  ;;  %v2605_v45 = vrot.slane %v2603_v36, 4  ;;  %v1124_v9 = vsel %vm5368_vm8, 0, %v1123_v15 }
 0x18e   : > { %v2162_v0 = vpop.permute.xlu1 %2161  ;;  %v2546_v18 = vrot.slane %v2544_v49, 4  ;;  %1125 = vst [vmem:[#allocation2 + $0xc8] sm:$0x1] %v1124_v9  ;;  %v2519_v4 = vsel %vm5414_vm11, %v2514_v6, %v6225_v50  ;;  %v2640_v50 = vshrl.u32 %v6285_v46, 16  ;;  %v6330_v49 = vld [vmem:[#allocation2 + $0xc4] sm:$0xf] }
 0x18f   : > { %2258 = vst.msk [vmem:[#allocation3] sm:$0xf] %vm2257_vm1, %v2162_v0  ;;  %2738 = vrot.lane.b32.xlu2 %v2447_v44, %s5251_s16  ;;  %v2666_v0 = vrot.slane %v2664_v26, 4  ;;  %v2609_v57 = vor.u32 %v2608_v1, %v2605_v45  ;;  %v2708_v6 = vshll.u32 %v6330_v49, 16  ;;  %v2646_v45 = vshll.u32 %v2328_v62, 16 }
 0x190   : > { %v2547_v34 = vor.u32 %v2546_v18, %v6287_v39  ;;  %v2675_v1 = vshrl.u32 %v2332_v55, 16  ;;  %v2678_v18 = vshll.u32 %v2332_v55, 16  ;;  %v2712_v42 = vshrl.u32 %v6330_v49, 16 }
 0x191   : > { %v2176_v40 = vpop.permute.xlu2 %2175  ;;  %v2667_v52 = vor.u32 %v2666_v0, %v6309_v29  ;;  %v2610_v39 = vrot.slane %v2609_v57, 4  ;;  %v6344_v8 = vrot.slane %v2708_v6, 5  ;;  %v2329_v0 = vld [vmem:[#allocation2 + $0xa8] sm:$0xf]  ;;  %v2648_v54 = vrot.slane %v2646_v45, 5 }
 0x192   : > { %2758 = vrot.lane.b32.xlu0 %v2567_v60, %s5251_s16  ;;  %2265 = vst.msk [vmem:[#allocation3 + $0x1c] sm:$0xf] %vm2257_vm1, %v2176_v40  ;;  %v2324_v60 = vld [vmem:[#allocation2 + $0x94] sm:$0xf]  ;;  %v2581_v40 = vrot.slane %v2579_v51, 4  ;;  %v2548_v12 = vrot.slane %v2547_v34, 4 }
 0x193   : > { %v2612_v16 = vshll.u32 %v2324_v60, 16  ;;  %v2668_v47 = vrot.slane %v2667_v52, 4  ;;  %v2616_v56 = vshrl.u32 %v2324_v60, 16  ;;  %v2677_v60 = vrot.slane %v2675_v1, 4 }
 0x194   : > { %2748 = vrot.lane.b32.xlu1 %v2505_v20, %s5251_s16  ;;  %v2178_v41 = vpop.permute.xlu0 %2177  ;;  %v2639_v20 = vsel %vm5414_vm11, %v2634_v13, %v6304_v27  ;;  %v2680_v51 = vrot.slane %v2678_v18, 5  ;;  %v2622_v57 = vshll.u32 %v2325_v23, 16  ;;  %v2651_v34 = vshrl.u32 %v2329_v0, 16  ;;  %v6384_v18 = vld [vmem:[#allocation2 + $0x34] sm:$0xf] }
 0x195   : > { %2266 = vst.msk [vmem:[#allocation3 + $0x20] sm:$0xf] %vm2257_vm1, %v2178_v41  ;;  %v2552_v41 = vrot.slane %v2550_v53, 5  ;;  %v2614_v36 = vrot.slane %v2612_v16, 5  ;;  %v2673_v26 = vsel %vm5414_vm11, %v2668_v47, %v2672_v48  ;;  %v2618_v59 = vrot.slane %v2616_v56, 4 }
 0x196   : > { %v2168_v14 = vpop.permute.xlu1 %2167  ;;  %v2654_v53 = vshll.u32 %v2329_v0, 16  ;;  %v2337_v49 = vld [vmem:[#allocation2 + $0xc8] sm:$0x1]  ;;  %v2857_v56 = vld [vmem:[#allocation2 + $0x24] sm:$0xe] }
 0x197   : > { %2261 = vst.msk [vmem:[#allocation3 + $0xc] sm:$0xf] %vm2257_vm1, %v2168_v14  ;;  %2744 = vrot.lane.b32.xlu2 %v2481_v28, %s5251_s16  ;;  %v2642_v14 = vrot.slane %v2640_v50, 4  ;;  %v2585_v28 = vor.u32 %v2584_v11, %v2581_v40  ;;  %v2553_v32 = vsel %vm5414_vm11, %v2548_v12, %v2552_v41  ;;  %v2615_v15 = vsel %vm5414_vm11, %v2610_v39, %v2614_v36 }
 0x198   : > { %v2681_v50 = vor.u32 %v2680_v51, %v2677_v60  ;;  %v2624_v40 = vrot.slane %v2622_v57, 5  ;;  %v2653_v11 = vrot.slane %v2651_v34, 4  ;;  %v2656_v39 = vrot.slane %v2654_v53, 5  ;;  %v2854_v60 = vld [vmem:[#allocation2 + $0x18] sm:$0xe] }
 0x199   : > { %v2182_v21 = vpop.permute.xlu2 %2181  ;;  %v2643_v13 = vor.u32 %v2642_v14, %v6304_v27  ;;  %v2586_v9 = vrot.slane %v2585_v28, 4  ;;  %v2951_v41 = vrot.slane %v2949_v35, 4  ;;  %v2855_v51 = vld [vmem:[#allocation2 + $0x1c] sm:$0xf]  ;;  %v4939_v53 = vrot.slane %v2854_v60, 9 }
 0x19a   : > { %2764 = vrot.lane.b32.xlu0 %v2601_v17, %s5251_s16  ;;  %2268 = vst.msk [vmem:[#allocation3 + $0x28] sm:$0xf] %vm2257_vm1, %v2182_v21  ;;  %v2682_v48 = vrot.slane %v2681_v50, 4  ;;  %v2657_v28 = vor.u32 %v2656_v39, %v2653_v11  ;;  %v2851_v50 = vld [vmem:[#allocation2 + $0xc] sm:$0xe] }
 0x19b   : > { %v2644_v27 = vrot.slane %v2643_v13, 4  ;;  %v4940_v13 = vrot.slane %v2857_v56, 9  ;;  %v2859_v11 = vld [vmem:[#allocation2 + $0x2c] sm:$0x1]  ;;  %v4938_v39 = vrot.slane %v2851_v50, 9 }
 0x19c   : > { %2754 = vrot.lane.b32.xlu1 %v2543_v58, %s5251_s16  ;;  %v2184_v44 = vpop.permute.xlu0 %2183  ;;  %v2705_v58 = vor.u32 %v2704_v24, %v2701_v63  ;;  %v2714_v24 = vrot.slane %v2712_v42, 4 }
 0x19d   : > { %2269 = vst.msk [vmem:[#allocation3 + $0x2c] sm:$0xf] %vm2257_vm1, %v2184_v44 }
 0x19e   : > { %v2174_v30 = vpop.permute.xlu1 %2173  ;;  %v2706_v25 = vrot.slane %v2705_v58, 4  ;;  %v2715_v55 = vor.u32 %v2714_v24, %v6344_v8  ;;  %v2658_v58 = vrot.slane %v2657_v28, 4  ;;  %v2966_v24 = vrot.slane %v2859_v11, 5 }
 0x19f   : > { %2264 = vst.msk [vmem:[#allocation3 + $0x18] sm:$0xf] %vm2257_vm1, %v2174_v30  ;;  %2750 = vrot.lane.b32.xlu2 %v2519_v4, %s5251_s16  ;;  %v2591_v4 = vsel %vm5414_vm11, %v2586_v9, %v6262_v10  ;;  %v2333_v30 = vld [vmem:[#allocation2 + $0xb8] sm:$0xf]  ;;  %v2649_v10 = vsel %vm5414_vm11, %v2644_v27, %v2648_v54  ;;  %v2334_v9 = vld [vmem:[#allocation2 + $0xbc] sm:$0x1] }
 0x1a0   : > { %v2711_v52 = vsel %vm5414_vm11, %v2706_v25, %v6344_v8  ;;  %v2684_v16 = vshll.u32 %v2333_v30, 16  ;;  %v2663_v8 = vsel %vm5414_vm11, %v2658_v58, %v6309_v29  ;;  %v2694_v0 = vshll.u32 %v2334_v9, 16  ;;  %v2862_v54 = vld [vmem:[#allocation2 + $0x38] sm:$0x1] }
 0x1a1   : > { %v2188_v37 = vpop.permute.xlu2 %2187  ;;  %v2970_v27 = vrot.slane %v6384_v18, 5  ;;  %v2973_v57 = vrot.slane %v2862_v54, 5  ;;  %v2872_v18 = vld [vmem:[#allocation2 + $0x60] sm:$0xe] }
 0x1a2   : > { %2770 = vrot.lane.b32.xlu0 %v2639_v20, %s5251_s16  ;;  %2271 = vst.msk [vmem:[#allocation3 + $0x34] sm:$0xf] %vm2257_vm1, %v2188_v37  ;;  %v2619_v20 = vor.u32 %v2618_v59, %v2614_v36  ;;  %v2952_v37 = vrot.slane %v2853_v22, 5  ;;  %v2686_v63 = vrot.slane %v2684_v16, 5  ;;  %v2688_v36 = vshrl.u32 %v2333_v30, 16 }
 0x1a3   : > { %v2716_v59 = vrot.slane %v2715_v55, 4  ;;  %v2866_v16 = vld [vmem:[#allocation2 + $0x48] sm:$0xe]  ;;  %v4945_v11 = vrot.slane %v2872_v18, 9 }
 0x1a4   : > { %2760 = vrot.lane.b32.xlu1 %v2577_v43, %s5251_s16  ;;  %v2190_v46 = vpop.permute.xlu0 %2189  ;;  %v2620_v43 = vrot.slane %v2619_v20, 4  ;;  %v2687_v62 = vsel %vm5414_vm11, %v2682_v48, %v2686_v63  ;;  %v2690_v6 = vrot.slane %v2688_v36, 4  ;;  %v2972_v20 = vrot.slane %v2970_v27, 4  ;;  %v6414_v48 = vld [vmem:[#allocation2 + $0x58] sm:$0xf] }
 0x1a5   : > { %2272 = vst.msk [vmem:[#allocation3 + $0x38] sm:$0xf] %vm2257_vm1, %v2190_v46  ;;  %v2950_v36 = vsel %vm5872_vm14, %v4938_v39, %v2949_v35  ;;  %v2991_v28 = vrot.slane %v6414_v48, 5  ;;  %v2881_v48 = vld [vmem:[#allocation2 + $0x84] sm:$0xe] }
 0x1a6   : > { %v2180_v17 = vpop.permute.xlu1 %2179  ;;  %v2625_v14 = vsel %vm5414_vm11, %v2620_v43, %v2624_v40  ;;  %v2691_v23 = vor.u32 %v2690_v6, %v2686_v63  ;;  %v2974_v42 = vsel %vm5872_vm14, %v2972_v20, %v2973_v57  ;;  %v2867_v43 = vld [vmem:[#allocation2 + $0x4c] sm:$0xf] }
 0x1a7   : > { %2267 = vst.msk [vmem:[#allocation3 + $0x24] sm:$0xf] %vm2257_vm1, %v2180_v17  ;;  %2756 = vrot.lane.b32.xlu2 %v2553_v32, %s5251_s16  ;;  %v2953_v17 = vsel %vm5872_vm14, %v2951_v41, %v2952_v37  ;;  %v6374_v32 = vld [vmem:[#allocation2 + $0x28] sm:$0xf]  ;;  %v4943_v41 = vrot.slane %v2866_v16, 9  ;;  %v2984_v37 = vrot.slane %v2867_v43, 5 }
 0x1a8   : > { %v2963_v45 = vrot.slane %v6374_v32, 5  ;;  %v2692_v29 = vrot.slane %v2691_v23, 4  ;;  %v2864_v32 = vld [vmem:[#allocation2 + $0x40] sm:$0xf]  ;;  %v2868_v23 = vld [vmem:[#allocation2 + $0x50] sm:$0x1] }
 0x1a9   : > { %v2194_v21 = vpop.permute.xlu2 %2193 }
 0x1aa   : > { %2776 = vrot.lane.b32.xlu0 %v2673_v26, %s5251_s16  ;;  %2274 = vst.msk [vmem:[#allocation3 + $0x40] sm:$0xf] %vm2257_vm1, %v2194_v21  ;;  %v2718_v26 = vshll.u32 %v2337_v49, 16  ;;  %v2965_v63 = vrot.slane %v2963_v45, 4  ;;  %v2856_v49 = vld [vmem:[#allocation2 + $0x20] sm:$0x1] }
 0x1ac   : > { %2766 = vrot.lane.b32.xlu1 %v2615_v15, %s5251_s16  ;;  %v2196_v44 = vpop.permute.xlu0 %2195  ;;  %v2720_v21 = vrot.slane %v2718_v26, 5  ;;  %v2967_v56 = vsel %vm5872_vm14, %v2965_v63, %v2966_v24  ;;  %v2993_v26 = vrot.slane %v2991_v28, 4  ;;  %v2884_v63 = vld [vmem:[#allocation2 + $0x90] sm:$0xe]  ;;  %v6470_v24 = vld [vmem:[#allocation2 + $0x94] sm:$0xf] }
 0x1ad   : > { %2275 = vst.msk [vmem:[#allocation3 + $0x44] sm:$0xf] %vm2257_vm1, %v2196_v44  ;;  %v2964_v44 = vsel %vm5872_vm14, %v4940_v13, %v2963_v45  ;;  %v2977_v13 = vrot.slane %v2864_v32, 5  ;;  %v6479_v32 = vld [vmem:[#allocation2 + $0xa0] sm:$0xf] }
 0x1ae   : > { %v2186_v31 = vpop.permute.xlu1 %2185 }
 0x1af   : > { %2270 = vst.msk [vmem:[#allocation3 + $0x30] sm:$0xf] %vm2257_vm1, %v2186_v31  ;;  %2762 = vrot.lane.b32.xlu2 %v2591_v4, %s5251_s16  ;;  %v2721_v4 = vsel %vm5414_vm11, %v2716_v59, %v2720_v21  ;;  %v2696_v31 = vrot.slane %v2694_v0, 5  ;;  %v2860_v59 = vld [vmem:[#allocation2 + $0x30] sm:$0xe] }
 0x1b0   : > { %v2875_v21 = vld [vmem:[#allocation2 + $0x6c] sm:$0xe]  ;;  %v4941_v0 = vrot.slane %v2860_v59, 9 }
 0x1b1   : > { %v2200_v12 = vpop.permute.xlu2 %2199  ;;  %v4946_v54 = vrot.slane %v2875_v21, 9 }
 0x1b2   : > { %2782 = vrot.lane.b32.xlu0 %v2711_v52, %s5251_s16  ;;  %2277 = vst.msk [vmem:[#allocation3 + $0x4c] sm:$0xf] %vm2257_vm1, %v2200_v12  ;;  %v2956_v52 = vrot.slane %v2855_v51, 5  ;;  %v6445_v51 = vld [vmem:[#allocation2 + $0x7c] sm:$0xf]  ;;  %v2971_v20 = vsel %vm5872_vm14, %v4941_v0, %v2970_v27  ;;  %v4948_v0 = vrot.slane %v2881_v48, 9 }
 0x1b4   : > { %2772 = vrot.lane.b32.xlu1 %v2649_v10, %s5251_s16  ;;  %v2202_v47 = vpop.permute.xlu0 %2201  ;;  %v2697_v10 = vsel %vm5414_vm11, %v2692_v29, %v2696_v31  ;;  %v2957_v40 = vsel %vm5872_vm14, %v4939_v53, %v2956_v52  ;;  %v2958_v35 = vrot.slane %v2956_v52, 4  ;;  %v2986_v29 = vrot.slane %v2984_v37, 4  ;;  %v2880_v52 = vld [vmem:[#allocation2 + $0x80] sm:$0x1] }
 0x1b5   : > { %2278 = vst.msk [vmem:[#allocation3 + $0x50] sm:$0xf] %vm2257_vm1, %v2202_v47  ;;  %v2987_v31 = vrot.slane %v2868_v23, 5  ;;  %v3012_v53 = vrot.slane %v6445_v51, 5  ;;  %v3015_v43 = vrot.slane %v2880_v52, 5 }
 0x1b6   : > { %v2192_v46 = vpop.permute.xlu1 %2191  ;;  %v3382_v23 = vld [vmem:[#allocation2 + $0x18] sm:$0xf]  ;;  %v2890_v51 = vld [vmem:[#allocation2 + $0xa8] sm:$0xe] }
 0x1b7   : > { %2273 = vst.msk [vmem:[#allocation3 + $0x3c] sm:$0xf] %vm2257_vm1, %v2192_v46  ;;  %2768 = vrot.lane.b32.xlu2 %v2625_v14, %s5251_s16  ;;  %v2985_v14 = vsel %vm5872_vm14, %v4943_v41, %v2984_v37  ;;  %v3014_v16 = vrot.slane %v3012_v53, 4  ;;  %v2886_v52 = vld [vmem:[#allocation2 + $0x98] sm:$0x1] }
 0x1b9   : > { %v2206_v15 = vpop.permute.xlu2 %2205  ;;  %v3016_v37 = vsel %vm5872_vm14, %v3014_v16, %v3015_v43  ;;  %v3383_v43 = vld [vmem:[#allocation2 + $0x1c] sm:$0xf] }
 0x1ba   : > { %3061 = vrot.lane.b32.xlu0 %v2953_v17, %s5252_s17  ;;  %2280 = vst.msk [vmem:[#allocation3 + $0x58] sm:$0xf] %vm2257_vm1, %v2206_v15  ;;  %v2871_v17 = vld [vmem:[#allocation2 + $0x5c] sm:$0x1]  ;;  %v4942_v15 = vrot.slane %v2863_v61, 9 }
 0x1bb   : > { %v2994_v58 = vrot.slane %v2871_v17, 5  ;;  %v4949_v17 = vrot.slane %v2884_v63, 9  ;;  %v3440_v63 = vshll.u32 %v3383_v43, 16 }
 0x1bc   : > { %2778 = vrot.lane.b32.xlu1 %v2687_v62, %s5251_s16  ;;  %v2208_v1 = vpop.permute.xlu0 %2207  ;;  %v2959_v62 = vrot.slane %v2856_v49, 5 }
 0x1bd   : > { %2281 = vst.msk [vmem:[#allocation3 + $0x5c] sm:$0xf] %vm2257_vm1, %v2208_v1  ;;  %v2995_v1 = vsel %vm5872_vm14, %v2993_v26, %v2994_v58 }
 0x1be   : > { %v2198_v25 = vpop.permute.xlu1 %2197  ;;  %v2960_v9 = vsel %vm5872_vm14, %v2958_v35, %v2959_v62 }
 0x1bf   : > { %2276 = vst.msk [vmem:[#allocation3 + $0x48] sm:$0xf] %vm2257_vm1, %v2198_v25  ;;  %2774 = vrot.lane.b32.xlu2 %v2663_v8, %s5251_s16  ;;  %v2876_v25 = vld [vmem:[#allocation2 + $0x70] sm:$0xf]  ;;  %v2978_v8 = vsel %vm5872_vm14, %v4942_v15, %v2977_v13  ;;  %v3033_v15 = vrot.slane %v6479_v32, 5 }
 0x1c1   : > { %v2212_v30 = vpop.permute.xlu2 %2211  ;;  %v3035_v21 = vrot.slane %v3033_v15, 4 }
 0x1c2   : > { %3067 = vrot.lane.b32.xlu0 %v2964_v44, %s5252_s17  ;;  %2283 = vst.msk [vmem:[#allocation3 + $0x64] sm:$0xf] %vm2257_vm1, %v2212_v30 }
 0x1c4   : > { %2784 = vrot.lane.b32.xlu1 %v2721_v4, %s5251_s16  ;;  %v2214_v34 = vpop.permute.xlu0 %2213  ;;  %v3005_v4 = vrot.slane %v2876_v25, 5 }
 0x1c5   : > { %2284 = vst.msk [vmem:[#allocation3 + $0x68] sm:$0xf] %vm2257_vm1, %v2214_v34  ;;  %v2865_v34 = vld [vmem:[#allocation2 + $0x44] sm:$0x1] }
 0x1c6   : > { %v2204_v22 = vpop.permute.xlu1 %2203  ;;  %v3006_v57 = vsel %vm5872_vm14, %v4946_v54, %v3005_v4  ;;  %v2980_v27 = vrot.slane %v2865_v34, 5  ;;  %v3007_v35 = vrot.slane %v3005_v4, 4 }
 0x1c7   : > { %2279 = vst.msk [vmem:[#allocation3 + $0x54] sm:$0xf] %vm2257_vm1, %v2204_v22  ;;  %2780 = vrot.lane.b32.xlu2 %v2697_v10, %s5251_s16  ;;  %v2988_v22 = vsel %vm5872_vm14, %v2986_v29, %v2987_v31  ;;  %v2873_v10 = vld [vmem:[#allocation2 + $0x64] sm:$0xf]  ;;  %v2878_v29 = vld [vmem:[#allocation2 + $0x78] sm:$0xe] }
 0x1c8   : > { %v2998_v39 = vrot.slane %v2873_v10, 5  ;;  %v3431_v31 = vshrl.u32 %v3382_v23, 16 }
 0x1c9   : > { %v2218_v12 = vpop.permute.xlu2 %2217 }
 0x1ca   : > { %3073 = vrot.lane.b32.xlu0 %v2974_v42, %s5252_s17  ;;  %2286 = vst.msk [vmem:[#allocation3 + $0x70] sm:$0xf] %vm2257_vm1, %v2218_v12  ;;  %v2979_v42 = vrot.slane %v2977_v13, 4  ;;  %v2889_v13 = vld [vmem:[#allocation2 + $0xa4] sm:$0x1] }
 0x1cb   : > { %v3036_v25 = vrot.slane %v2889_v13, 5 }
 0x1cc   : > { %3063 = vrot.lane.b32.xlu1 %v2957_v40, %s5252_s17  ;;  %v2220_v47 = vpop.permute.xlu0 %2219  ;;  %v2981_v41 = vsel %vm5872_vm14, %v2979_v42, %v2980_v27  ;;  %v3433_v27 = vrot.slane %v3431_v31, 4 }
 0x1cd   : > { %2287 = vst.msk [vmem:[#allocation3 + $0x74] sm:$0xf] %vm2257_vm1, %v2220_v47  ;;  %v2869_v47 = vld [vmem:[#allocation2 + $0x54] sm:$0xe] }
 0x1ce   : > { %v2210_v46 = vpop.permute.xlu1 %2209 }
 0x1cf   : > { %2282 = vst.msk [vmem:[#allocation3 + $0x60] sm:$0xf] %vm2257_vm1, %v2210_v46  ;;  %3059 = vrot.lane.b32.xlu2 %v2950_v36, %s5252_s17  ;;  %v2999_v46 = vsel %vm5872_vm14, %v4945_v11, %v2998_v39  ;;  %v2877_v36 = vld [vmem:[#allocation2 + $0x74] sm:$0x1]  ;;  %v3029_v11 = vrot.slane %v2886_v52, 5 }
 0x1d0   : > { %v3008_v62 = vrot.slane %v2877_v36, 5 }
 0x1d1   : > { %v2224_v55 = vpop.permute.xlu2 %2223 }
 0x1d2   : > { %3079 = vrot.lane.b32.xlu0 %v2985_v14, %s5252_s17  ;;  %2289 = vst.msk [vmem:[#allocation3 + $0x7c] sm:$0xf] %vm2257_vm1, %v2224_v55  ;;  %v4944_v14 = vrot.slane %v2869_v47, 9 }
 0x1d4   : > { %3069 = vrot.lane.b32.xlu1 %v2967_v56, %s5252_s17  ;;  %v2723_v6 = vpop.permute.xlu0 %2722  ;;  %v3026_v56 = vrot.slane %v6470_v24, 5  ;;  %v2992_v26 = vsel %vm5872_vm14, %v4944_v14, %v2991_v28 }
 0x1d5   : > { %2819 = vst.msk [vmem:[#allocation3] sm:$0xf] %vm2818_vm3, %v2723_v6  ;;  %v2874_v6 = vld [vmem:[#allocation2 + $0x68] sm:$0x1] }
 0x1d6   : > { %v2216_v45 = vpop.permute.xlu1 %2215  ;;  %v3027_v58 = vsel %vm5872_vm14, %v4949_v17, %v3026_v56  ;;  %v3001_v28 = vrot.slane %v2874_v6, 5  ;;  %v3442_v17 = vrot.slane %v3440_v63, 5  ;;  %v2887_v6 = vld [vmem:[#allocation2 + $0x9c] sm:$0xe] }
 0x1d7   : > { %2285 = vst.msk [vmem:[#allocation3 + $0x6c] sm:$0xf] %vm2257_vm1, %v2216_v45  ;;  %3065 = vrot.lane.b32.xlu2 %v2960_v9, %s5252_s17  ;;  %v3009_v45 = vsel %vm5872_vm14, %v3007_v35, %v3008_v62  ;;  %v2882_v9 = vld [vmem:[#allocation2 + $0x88] sm:$0xf]  ;;  %v4951_v35 = vrot.slane %v2890_v51, 9 }
 0x1d9   : > { %v2727_v44 = vpop.permute.xlu2 %2726 }
 0x1da   : > { %3085 = vrot.lane.b32.xlu0 %v2995_v1, %s5252_s17  ;;  %2821 = vst.msk [vmem:[#allocation3 + $0x8] sm:$0xf] %vm2818_vm3, %v2727_v44  ;;  %v3000_v1 = vrot.slane %v2998_v39, 4  ;;  %v3019_v44 = vrot.slane %v2882_v9, 5  ;;  %v3444_v9 = vshrl.u32 %v3383_v43, 16 }
 0x1dc   : > { %3075 = vrot.lane.b32.xlu1 %v2978_v8, %s5252_s17  ;;  %v2729_v60 = vpop.permute.xlu0 %2728  ;;  %v3002_v4 = vsel %vm5872_vm14, %v3000_v1, %v3001_v28  ;;  %v3020_v34 = vsel %vm5872_vm14, %v4948_v0, %v3019_v44  ;;  %v4950_v1 = vrot.slane %v2887_v6, 9 }
 0x1dd   : > { %2822 = vst.msk [vmem:[#allocation3 + $0xc] sm:$0xf] %vm2818_vm3, %v2729_v60  ;;  %v3037_v60 = vsel %vm5872_vm14, %v3035_v21, %v3036_v25 }
 0x1de   : > { %v2222_v30 = vpop.permute.xlu1 %2221 }
 0x1df   : > { %2288 = vst.msk [vmem:[#allocation3 + $0x78] sm:$0xf] %vm2257_vm1, %v2222_v30  ;;  %3071 = vrot.lane.b32.xlu2 %v2971_v20, %s5252_s17  ;;  %v3434_v30 = vshll.u32 %v3382_v23, 16  ;;  %v2893_v20 = vld [vmem:[#allocation2 + $0xb4] sm:$0xe]  ;;  %v3446_v23 = vrot.slane %v3444_v9, 4 }
 0x1e0   : > { %v4952_v10 = vrot.slane %v2893_v20, 9  ;;  %v6582_v9 = vld [vmem:[#allocation2 + $0x4c] sm:$0xf] }
 0x1e1   : > { %v2733_v50 = vpop.permute.xlu2 %2732  ;;  %v3447_v20 = vor.u32 %v3446_v23, %v3442_v17 }
 0x1e2   : > { %3091 = vrot.lane.b32.xlu0 %v3006_v57, %s5252_s17  ;;  %2824 = vst.msk [vmem:[#allocation3 + $0x14] sm:$0xf] %vm2818_vm3, %v2733_v50  ;;  %v6504_v57 = vld [vmem:[#allocation2 + $0xb8] sm:$0xf]  ;;  %v3436_v50 = vrot.slane %v3434_v30, 5 }
 0x1e3   : > { %v3047_v42 = vrot.slane %v6504_v57, 5  ;;  %v3189_v30 = vld [vmem:[#allocation2 + $0x18] sm:$0xf] }
 0x1e4   : > { %3081 = vrot.lane.b32.xlu1 %v2988_v22, %s5252_s17  ;;  %v2735_v40 = vpop.permute.xlu0 %2734  ;;  %v4947_v22 = vrot.slane %v2878_v29, 9  ;;  %v3437_v47 = vor.u32 %v3436_v50, %v3433_v27  ;;  %v3387_v27 = vld [vmem:[#allocation2 + $0x2c] sm:$0x1]  ;;  %v3448_v50 = vrot.slane %v3447_v20, 4 }
 0x1e5   : > { %2825 = vst.msk [vmem:[#allocation3 + $0x18] sm:$0xf] %vm2818_vm3, %v2735_v40  ;;  %v3028_v40 = vrot.slane %v3026_v56, 4 }
 0x1e6   : > { %v2725_v12 = vpop.permute.xlu1 %2724 }
 0x1e7   : > { %2820 = vst.msk [vmem:[#allocation3 + $0x4] sm:$0xf] %vm2818_vm3, %v2725_v12  ;;  %3077 = vrot.lane.b32.xlu2 %v2981_v41, %s5252_s17  ;;  %v3013_v12 = vsel %vm5872_vm14, %v4947_v22, %v3012_v53  ;;  %v3048_v41 = vsel %vm5872_vm14, %v4952_v10, %v3047_v42  ;;  %v3030_v24 = vsel %vm5872_vm14, %v3028_v40, %v3029_v11  ;;  %v3021_v53 = vrot.slane %v3019_v44, 4  ;;  %v3197_v11 = vld [vmem:[#allocation2 + $0x48] sm:$0xf] }
 0x1e8   : > { %v3034_v44 = vsel %vm5872_vm14, %v4950_v1, %v3033_v15  ;;  %v3406_v1 = vld [vmem:[#allocation2 + $0x78] sm:$0xf] }
 0x1e9   : > { %v2739_v49 = vpop.permute.xlu2 %2738 }
 0x1ea   : > { %3097 = vrot.lane.b32.xlu0 %v3016_v37, %s5252_s17  ;;  %2827 = vst.msk [vmem:[#allocation3 + $0x20] sm:$0xf] %vm2818_vm3, %v2739_v49  ;;  %v2883_v37 = vld [vmem:[#allocation2 + $0x8c] sm:$0x1]  ;;  %v3438_v49 = vrot.slane %v3437_v47, 4 }
 0x1eb   : > { %v3022_v36 = vrot.slane %v2883_v37, 5 }
 0x1ec   : > { %3087 = vrot.lane.b32.xlu1 %v2999_v46, %s5252_s17  ;;  %v2741_v61 = vpop.permute.xlu0 %2740  ;;  %v2891_v46 = vld [vmem:[#allocation2 + $0xac] sm:$0xf] }
 0x1ed   : > { %2828 = vst.msk [vmem:[#allocation3 + $0x24] sm:$0xf] %vm2818_vm3, %v2741_v61  ;;  %v6529_v61 = vld [vmem:[#allocation2 + $0x1c] sm:$0xf]  ;;  %v3040_v62 = vrot.slane %v2891_v46, 5 }
 0x1ee   : > { %v2731_v55 = vpop.permute.xlu1 %2730  ;;  %v4041_v13 = vrot.slane %v6529_v61, 5  ;;  %v3190_v46 = vld [vmem:[#allocation2 + $0x1c] sm:$0xf] }
 0x1ef   : > { %2823 = vst.msk [vmem:[#allocation3 + $0x10] sm:$0xf] %vm2818_vm3, %v2731_v55  ;;  %3083 = vrot.lane.b32.xlu2 %v2992_v26, %s5252_s17  ;;  %v3023_v26 = vsel %vm5872_vm14, %v3021_v53, %v3022_v36  ;;  %v3041_v48 = vsel %vm5872_vm14, %v4951_v35, %v3040_v62  ;;  %v3042_v32 = vrot.slane %v3040_v62, 4  ;;  %v3394_v53 = vld [vmem:[#allocation2 + $0x48] sm:$0xf] }
 0x1f0   : > { %v3527_v35 = vshrl.u32 %v3394_v53, 16  ;;  %v3530_v62 = vshll.u32 %v3394_v53, 16 }
 0x1f1   : > { %v2745_v59 = vpop.permute.xlu2 %2744 }
 0x1f2   : > { %3103 = vrot.lane.b32.xlu0 %v3027_v58, %s5252_s17  ;;  %2830 = vst.msk [vmem:[#allocation3 + $0x2c] sm:$0xf] %vm2818_vm3, %v2745_v59  ;;  %v3443_v58 = vsel %vm5414_vm11, %v3438_v49, %v3442_v17  ;;  %v4043_v59 = vrot.slane %v4041_v13, 4  ;;  %v3946_v49 = vld [vmem:[#allocation2 + $0x24] sm:$0xe] }
 0x1f3   : > { %v6575_v17 = vld [vmem:[#allocation2 + $0x28] sm:$0xf] }
 0x1f4   : > { %3093 = vrot.lane.b32.xlu1 %v3009_v45, %s5252_s17  ;;  %v2747_v8 = vpop.permute.xlu0 %2746  ;;  %v3945_v45 = vld [vmem:[#allocation2 + $0x20] sm:$0x1]  ;;  %v4048_v6 = vrot.slane %v6575_v17, 5 }
 0x1f5   : > { %2831 = vst.msk [vmem:[#allocation3 + $0x30] sm:$0xf] %vm2818_vm3, %v2747_v8  ;;  %v4044_v21 = vrot.slane %v3945_v45, 5  ;;  %v3386_v8 = vld [vmem:[#allocation2 + $0x28] sm:$0xf] }
 0x1f6   : > { %v2737_v54 = vpop.permute.xlu1 %2736  ;;  %v3464_v29 = vshll.u32 %v3386_v8, 16  ;;  %v3468_v31 = vshrl.u32 %v3386_v8, 16  ;;  %v3385_v45 = vld [vmem:[#allocation2 + $0x24] sm:$0xf]  ;;  %v3395_v8 = vld [vmem:[#allocation2 + $0x4c] sm:$0xf] }
 0x1f7   : > { %2826 = vst.msk [vmem:[#allocation3 + $0x1c] sm:$0xf] %vm2818_vm3, %v2737_v54  ;;  %3089 = vrot.lane.b32.xlu2 %v3002_v4, %s5252_s17  ;;  %v3384_v54 = vld [vmem:[#allocation2 + $0x20] sm:$0x1]  ;;  %v4045_v4 = vsel %vm5872_vm14, %v4043_v59, %v4044_v21  ;;  %v3532_v59 = vrot.slane %v3530_v62, 5  ;;  %v3455_v23 = vshrl.u32 %v3385_v45, 16 }
 0x1f8   : > { %v6556_v22 = vrot.slane %v3464_v29, 5  ;;  %v3957_v29 = vld [vmem:[#allocation2 + $0x50] sm:$0x1] }
 0x1f9   : > { %v2751_v18 = vpop.permute.xlu2 %2750 }
 0x1fa   : > { %3109 = vrot.lane.b32.xlu0 %v3037_v60, %s5252_s17  ;;  %2833 = vst.msk [vmem:[#allocation3 + $0x38] sm:$0xf] %vm2818_vm3, %v2751_v18  ;;  %v2892_v60 = vld [vmem:[#allocation2 + $0xb0] sm:$0x1]  ;;  %v3470_v18 = vrot.slane %v3468_v31, 4 }
 0x1fb   : > { %v3043_v52 = vrot.slane %v2892_v60, 5  ;;  %v3626_v60 = vshll.u32 %v3406_v1, 16  ;;  %v3198_v31 = vld [vmem:[#allocation2 + $0x4c] sm:$0xf] }
 0x1fc   : > { %3099 = vrot.lane.b32.xlu1 %v3020_v34, %s5252_s17  ;;  %v2753_v16 = vpop.permute.xlu0 %2752  ;;  %v3450_v34 = vshll.u32 %v3384_v54, 16  ;;  %v4069_v54 = vrot.slane %v6582_v9, 5 }
 0x1fd   : > { %2834 = vst.msk [vmem:[#allocation3 + $0x3c] sm:$0xf] %vm2818_vm3, %v2753_v16  ;;  %v3044_v40 = vsel %vm5872_vm14, %v3042_v32, %v3043_v52  ;;  %v4072_v52 = vrot.slane %v3957_v29, 5  ;;  %v3408_v29 = vld [vmem:[#allocation2 + $0x80] sm:$0x1] }
 0x1fe   : > { %v2743_v39 = vpop.permute.xlu1 %2742  ;;  %v3452_v16 = vrot.slane %v3450_v34, 5  ;;  %v4071_v32 = vrot.slane %v4069_v54, 4 }
 0x1ff   : > { %2829 = vst.msk [vmem:[#allocation3 + $0x28] sm:$0xf] %vm2818_vm3, %v2743_v39  ;;  %3095 = vrot.lane.b32.xlu2 %v3013_v12, %s5252_s17  ;;  %v3471_v39 = vor.u32 %v3470_v18, %v6556_v22  ;;  %v3474_v12 = vshll.u32 %v3387_v27, 16  ;;  %v3628_v18 = vrot.slane %v3626_v60, 5  ;;  %v3407_v27 = vld [vmem:[#allocation2 + $0x7c] sm:$0xf] }
 0x201   : > { %v2757_v14 = vpop.permute.xlu2 %2756  ;;  %v3472_v47 = vrot.slane %v3471_v39, 4  ;;  %v3476_v63 = vrot.slane %v3474_v12, 5  ;;  %v4073_v12 = vsel %vm5872_vm14, %v4071_v32, %v4072_v52  ;;  %v3642_v32 = vshll.u32 %v3408_v29, 16  ;;  %v3200_v29 = vld [vmem:[#allocation2 + $0x58] sm:$0xf] }
 0x202   : > { %3115 = vrot.lane.b32.xlu0 %v3048_v41, %s5252_s17  ;;  %2836 = vst.msk [vmem:[#allocation3 + $0x44] sm:$0xf] %vm2818_vm3, %v2757_v14  ;;  %v3453_v41 = vsel %vm5414_vm11, %v3448_v50, %v3452_v16  ;;  %v3943_v14 = vld [vmem:[#allocation2 + $0x18] sm:$0xe] }
 0x203   : > { %v3477_v36 = vsel %vm5414_vm11, %v3472_v47, %v3476_v63  ;;  %v3948_v63 = vld [vmem:[#allocation2 + $0x2c] sm:$0x1] }
 0x204   : > { %3105 = vrot.lane.b32.xlu1 %v3030_v24, %s5252_s17  ;;  %v2759_v56 = vpop.permute.xlu0 %2758  ;;  %v4051_v62 = vrot.slane %v3948_v63, 5 }
 0x205   : > { %2837 = vst.msk [vmem:[#allocation3 + $0x48] sm:$0xf] %vm2818_vm3, %v2759_v56  ;;  %v3191_v56 = vld [vmem:[#allocation2 + $0x24] sm:$0xf] }
 0x206   : > { %v2749_v55 = vpop.permute.xlu1 %2748 }
 0x207   : > { %2832 = vst.msk [vmem:[#allocation3 + $0x34] sm:$0xf] %vm2818_vm3, %v2749_v55  ;;  %3101 = vrot.lane.b32.xlu2 %v3023_v26, %s5252_s17  ;;  %v4954_v55 = vrot.slane %v3943_v14, 9  ;;  %v3396_v14 = vld [vmem:[#allocation2 + $0x50] sm:$0x1] }
 0x209   : > { %v2763_v28 = vpop.permute.xlu2 %2762 }
 0x20a   : > { %3814 = vrot.lane.b32.xlu0 %v3443_v58, %s5253_s22  ;;  %2839 = vst.msk [vmem:[#allocation3 + $0x50] sm:$0xf] %vm2818_vm3, %v2763_v28  ;;  %v4955_v58 = vrot.slane %v3946_v49, 9  ;;  %v3529_v28 = vrot.slane %v3527_v35, 4  ;;  %v4050_v35 = vrot.slane %v4048_v6, 4 }
 0x20c   : > { %3111 = vrot.lane.b32.xlu1 %v3041_v48, %s5252_s17  ;;  %v2765_v25 = vpop.permute.xlu0 %2764  ;;  %v3533_v61 = vor.u32 %v3532_v59, %v3529_v28  ;;  %v3969_v28 = vld [vmem:[#allocation2 + $0x80] sm:$0x1]  ;;  %v4052_v17 = vsel %vm5872_vm14, %v4050_v35, %v4051_v62  ;;  %v3193_v35 = vld [vmem:[#allocation2 + $0x30] sm:$0xf] }
 0x20d   : > { %2840 = vst.msk [vmem:[#allocation3 + $0x54] sm:$0xf] %vm2818_vm3, %v2765_v25  ;;  %v4042_v25 = vsel %vm5872_vm14, %v4954_v55, %v4041_v13  ;;  %v3536_v13 = vshll.u32 %v3395_v8, 16 }
 0x20e   : > { %v2755_v0 = vpop.permute.xlu1 %2754  ;;  %v3534_v50 = vrot.slane %v3533_v61, 4  ;;  %v3955_v61 = vld [vmem:[#allocation2 + $0x48] sm:$0xe] }
 0x20f   : > { %2835 = vst.msk [vmem:[#allocation3 + $0x40] sm:$0xf] %vm2818_vm3, %v2755_v0  ;;  %3107 = vrot.lane.b32.xlu2 %v3034_v44, %s5252_s17  ;;  %v3458_v0 = vshll.u32 %v3385_v45, 16  ;;  %v4049_v44 = vsel %vm5872_vm14, %v4955_v58, %v4048_v6  ;;  %v3538_v16 = vrot.slane %v3536_v13, 5  ;;  %v3546_v45 = vshll.u32 %v3396_v14, 16 }
 0x210   : > { %v3636_v6 = vshrl.u32 %v3407_v27, 16  ;;  %v4958_v52 = vrot.slane %v3955_v61, 9  ;;  %v3949_v14 = vld [vmem:[#allocation2 + $0x30] sm:$0xe] }
 0x211   : > { %v2769_v15 = vpop.permute.xlu2 %2768  ;;  %v3460_v20 = vrot.slane %v3458_v0, 5  ;;  %v3539_v47 = vsel %vm5414_vm11, %v3534_v50, %v3538_v16  ;;  %v3389_v0 = vld [vmem:[#allocation2 + $0x34] sm:$0xf]  ;;  %v3390_v50 = vld [vmem:[#allocation2 + $0x38] sm:$0x1] }
 0x212   : > { %4153 = vrot.lane.b32.xlu0 %v4045_v4, %s5254_s23  ;;  %2842 = vst.msk [vmem:[#allocation3 + $0x5c] sm:$0xf] %vm2818_vm3, %v2769_v15  ;;  %v3623_v4 = vshrl.u32 %v3406_v1, 16  ;;  %v3488_v13 = vshll.u32 %v3389_v0, 16 }
 0x214   : > { %3253 = vrot.lane.b32.xlu1 %v3189_v30, %s5255_s24  ;;  %v2771_v10 = vpop.permute.xlu0 %2770  ;;  %v3457_v30 = vrot.slane %v3455_v23, 4  ;;  %v3625_v15 = vrot.slane %v3623_v4, 4 }
 0x215   : > { %2843 = vst.msk [vmem:[#allocation3 + $0x60] sm:$0xf] %vm2818_vm3, %v2771_v10 }
 0x216   : > { %v2761_v43 = vpop.permute.xlu1 %2760  ;;  %v3461_v39 = vor.u32 %v3460_v20, %v3457_v30  ;;  %v3492_v30 = vshrl.u32 %v3389_v0, 16  ;;  %v3205_v20 = vld [vmem:[#allocation2 + $0x78] sm:$0xf] }
 0x217   : > { %2838 = vst.msk [vmem:[#allocation3 + $0x4c] sm:$0xf] %vm2818_vm3, %v2761_v43  ;;  %3113 = vrot.lane.b32.xlu2 %v3044_v40, %s5252_s17  ;;  %v3540_v40 = vshrl.u32 %v3395_v8, 16  ;;  %v4100_v8 = vrot.slane %v3969_v28, 5  ;;  %v3388_v28 = vld [vmem:[#allocation2 + $0x30] sm:$0xf] }
 0x218   : > { %v3482_v0 = vshll.u32 %v3388_v28, 16 }
 0x219   : > { %v2775_v37 = vpop.permute.xlu2 %2774 }
 0x21a   : > { %3269 = vrot.lane.b32.xlu0 %v3197_v11, %s5255_s24  ;;  %2845 = vst.msk [vmem:[#allocation3 + $0x68] sm:$0xf] %vm2818_vm3, %v2775_v37  ;;  %v3192_v11 = vld [vmem:[#allocation2 + $0x28] sm:$0xf]  ;;  %v3632_v37 = vshll.u32 %v3407_v27, 16 }
 0x21c   : > { %3816 = vrot.lane.b32.xlu1 %v3453_v41, %s5253_s22  ;;  %v2777_v24 = vpop.permute.xlu0 %2776  ;;  %v3629_v41 = vor.u32 %v3628_v18, %v3625_v15  ;;  %v6639_v18 = vrot.slane %v3488_v13, 5 }
 0x21d   : > { %2846 = vst.msk [vmem:[#allocation3 + $0x6c] sm:$0xf] %vm2818_vm3, %v2777_v24  ;;  %v3462_v24 = vrot.slane %v3461_v39, 4  ;;  %v3199_v39 = vld [vmem:[#allocation2 + $0x54] sm:$0xf] }
 0x21e   : > { %v2767_v51 = vpop.permute.xlu1 %2766  ;;  %v3630_v53 = vrot.slane %v3629_v41, 4  ;;  %v3498_v41 = vshll.u32 %v3390_v50, 16  ;;  %v3194_v50 = vld [vmem:[#allocation2 + $0x34] sm:$0xf] }
 0x21f   : > { %2841 = vst.msk [vmem:[#allocation3 + $0x58] sm:$0xf] %vm2818_vm3, %v2767_v51  ;;  %3255 = vrot.lane.b32.xlu2 %v3190_v46, %s5255_s24  ;;  %v3542_v51 = vrot.slane %v3540_v40, 4 }
 0x221   : > { %v2781_v26 = vpop.permute.xlu2 %2780  ;;  %v3543_v58 = vor.u32 %v3542_v51, %v3538_v16  ;;  %v3206_v51 = vld [vmem:[#allocation2 + $0x7c] sm:$0xf] }
 0x222   : > { %3820 = vrot.lane.b32.xlu0 %v3477_v36, %s5253_s22  ;;  %2848 = vst.msk [vmem:[#allocation3 + $0x74] sm:$0xf] %vm2818_vm3, %v2781_v26  ;;  %v3634_v36 = vrot.slane %v3632_v37, 5  ;;  %v3467_v26 = vsel %vm5414_vm11, %v3462_v24, %v6556_v22  ;;  %v3548_v22 = vrot.slane %v3546_v45, 5  ;;  %v3500_v24 = vrot.slane %v3498_v41, 5 }
 0x223   : > { %v3544_v59 = vrot.slane %v3543_v58, 4  ;;  %v4956_v45 = vrot.slane %v3949_v14, 9 }
 0x224   : > { %3257 = vrot.lane.b32.xlu1 %v3191_v56, %s5255_s24  ;;  %v2783_v48 = vpop.permute.xlu0 %2782  ;;  %v6611_v56 = vld [vmem:[#allocation2 + $0x7c] sm:$0xf] }
 0x225   : > { %2849 = vst.msk [vmem:[#allocation3 + $0x78] sm:$0xf] %vm2818_vm3, %v2783_v48  ;;  %v3635_v48 = vsel %vm5414_vm11, %v3630_v53, %v3634_v36  ;;  %v4097_v1 = vrot.slane %v6611_v56, 5  ;;  %v3549_v60 = vsel %vm5414_vm11, %v3544_v59, %v3548_v22 }
 0x226   : > { %v2773_v21 = vpop.permute.xlu1 %2772 }
 0x227   : > { %2844 = vst.msk [vmem:[#allocation3 + $0x64] sm:$0xf] %vm2818_vm3, %v2773_v21  ;;  %4151 = vrot.lane.b32.xlu2 %v4042_v25, %s5254_s23  ;;  %v4099_v25 = vrot.slane %v4097_v1, 4 }
 0x229   : > { %v3060_v34 = vpop.permute.xlu2 %3059 }
 0x22a   : > { %4155 = vrot.lane.b32.xlu0 %v4049_v44, %s5254_s23  ;;  %3156 = vst.msk [vmem:[#allocation3] sm:$0xf] %vm3155_vm4, %v3060_v34  ;;  %v3638_v44 = vrot.slane %v3636_v6, 4  ;;  %v6667_v6 = vld [vmem:[#allocation2 + $0x58] sm:$0xf] }
 0x22c   : > { %3271 = vrot.lane.b32.xlu1 %v3198_v31, %s5255_s24  ;;  %v3062_v10 = vpop.permute.xlu0 %3061  ;;  %v4101_v31 = vsel %vm5872_vm14, %v4099_v25, %v4100_v8  ;;  %v3639_v34 = vor.u32 %v3638_v44, %v3634_v36  ;;  %v3967_v36 = vld [vmem:[#allocation2 + $0x78] sm:$0xe] }
 0x22d   : > { %3157 = vst.msk [vmem:[#allocation3 + $0x4] sm:$0xf] %vm3155_vm4, %v3062_v10  ;;  %v3494_v10 = vrot.slane %v3492_v30, 4  ;;  %v3398_v8 = vld [vmem:[#allocation2 + $0x58] sm:$0xf] }
 0x22e   : > { %v2779_v43 = vpop.permute.xlu1 %2778  ;;  %v3640_v16 = vrot.slane %v3639_v34, 4  ;;  %v3560_v61 = vshll.u32 %v3398_v8, 16 }
 0x22f   : > { %2847 = vst.msk [vmem:[#allocation3 + $0x70] sm:$0xf] %vm2818_vm3, %v2779_v43  ;;  %3259 = vrot.lane.b32.xlu2 %v3192_v11, %s5255_s24  ;;  %v3644_v43 = vrot.slane %v3642_v32, 5  ;;  %v4070_v11 = vsel %vm5872_vm14, %v4958_v52, %v4069_v54  ;;  %v3410_v32 = vld [vmem:[#allocation2 + $0x88] sm:$0xf] }
 0x231   : > { %v3066_v46 = vpop.permute.xlu2 %3065  ;;  %v3645_v37 = vsel %vm5414_vm11, %v3640_v16, %v3644_v43 }
 0x232   : > { %4169 = vrot.lane.b32.xlu0 %v4073_v12, %s5254_s23  ;;  %3159 = vst.msk [vmem:[#allocation3 + $0xc] sm:$0xf] %vm3155_vm4, %v3066_v46  ;;  %v3495_v12 = vor.u32 %v3494_v10, %v6639_v18  ;;  %v3397_v46 = vld [vmem:[#allocation2 + $0x54] sm:$0xf] }
 0x233   : > { %v3551_v62 = vshrl.u32 %v3397_v46, 16 }
 0x234   : > { %3830 = vrot.lane.b32.xlu1 %v3539_v47, %s5253_s22  ;;  %v3068_v49 = vpop.permute.xlu0 %3067  ;;  %v3496_v63 = vrot.slane %v3495_v12, 4 }
 0x235   : > { %3160 = vst.msk [vmem:[#allocation3 + $0x10] sm:$0xf] %vm3155_vm4, %v3068_v49  ;;  %v6660_v49 = vld [vmem:[#allocation2 + $0x34] sm:$0xf]  ;;  %v3553_v59 = vrot.slane %v3551_v62, 4 }
 0x236   : > { %v2785_v55 = vpop.permute.xlu1 %2784  ;;  %v3501_v53 = vsel %vm5414_vm11, %v3496_v63, %v3500_v24 }
 0x237   : > { %2850 = vst.msk [vmem:[#allocation3 + $0x7c] sm:$0xf] %vm2818_vm3, %v2785_v55  ;;  %3818 = vrot.lane.b32.xlu2 %v3467_v26, %s5253_s22  ;;  %v3554_v55 = vshll.u32 %v3397_v46, 16  ;;  %v4962_v26 = vrot.slane %v3967_v36, 9  ;;  %v3411_v36 = vld [vmem:[#allocation2 + $0x8c] sm:$0x1] }
 0x239   : > { %v3072_v21 = vpop.permute.xlu2 %3071  ;;  %v3556_v22 = vrot.slane %v3554_v55, 5  ;;  %v4098_v25 = vsel %vm5872_vm14, %v4962_v26, %v4097_v1  ;;  %v3484_v1 = vrot.slane %v3482_v0, 5  ;;  %v5088_v0 = vld [vmem:[%s7315_s3 + $0x10] sm:$0xff] }
 0x23a   : > { %3846 = vrot.lane.b32.xlu0 %v3635_v48, %s5253_s22  ;;  %3162 = vst.msk [vmem:[#allocation3 + $0x18] sm:$0xf] %vm3155_vm4, %v3072_v21  ;;  %v4055_v48 = vrot.slane %v6660_v49, 5 }
 0x23c   : > { %4157 = vrot.lane.b32.xlu1 %v4052_v17, %s5254_s23  ;;  %v3074_v23 = vpop.permute.xlu0 %3073  ;;  %v4056_v44 = vsel %vm5872_vm14, %v4956_v45, %v4055_v48  ;;  %v4057_v14 = vrot.slane %v4055_v48, 4  ;;  %v3213_v45 = vld [vmem:[#allocation2 + $0xa8] sm:$0xf]  ;;  %v5089_v48 = vld [vmem:[%s7315_s3 + $0x18] sm:$0xff] }
 0x23d   : > { %3163 = vst.msk [vmem:[#allocation3 + $0x1c] sm:$0xf] %vm3155_vm4, %v3074_v23  ;;  %v3479_v23 = vshrl.u32 %v3388_v28, 16 }
 0x23e   : > { %v3064_v4 = vpop.permute.xlu1 %3063 }
 0x23f   : > { %3158 = vst.msk [vmem:[#allocation3 + $0x8] sm:$0xf] %vm3155_vm4, %v3064_v4  ;;  %3832 = vrot.lane.b32.xlu2 %v3549_v60, %s5253_s22  ;;  %v4076_v4 = vrot.slane %v6667_v6, 5  ;;  %v3960_v60 = vld [vmem:[#allocation2 + $0x5c] sm:$0x1]  ;;  %v3481_v56 = vrot.slane %v3479_v23, 4 }
 0x240   : > { %v3214_v6 = vld [vmem:[#allocation2 + $0xac] sm:$0xf] }
 0x241   : > { %v3078_v15 = vpop.permute.xlu2 %3077  ;;  %v4078_v30 = vrot.slane %v4076_v4, 4  ;;  %v3485_v16 = vor.u32 %v3484_v1, %v3481_v56  ;;  %v3970_v56 = vld [vmem:[#allocation2 + $0x84] sm:$0xe]  ;;  %v6723_v1 = vld [vmem:[#allocation2 + $0x88] sm:$0xf] }
 0x242   : > { %4185 = vrot.lane.b32.xlu0 %v4101_v31, %s5254_s23  ;;  %3165 = vst.msk [vmem:[#allocation3 + $0x24] sm:$0xf] %vm3155_vm4, %v3078_v15  ;;  %v3557_v31 = vor.u32 %v3556_v22, %v3553_v59  ;;  %v3562_v15 = vrot.slane %v3560_v61, 5  ;;  %v3958_v61 = vld [vmem:[#allocation2 + $0x54] sm:$0xe] }
 0x244   : > { %3285 = vrot.lane.b32.xlu1 %v3205_v20, %s5255_s24  ;;  %v3080_v27 = vpop.permute.xlu0 %3079  ;;  %v4079_v20 = vrot.slane %v3960_v60, 5  ;;  %v3558_v52 = vrot.slane %v3557_v31, 4 }
 0x245   : > { %3166 = vst.msk [vmem:[#allocation3 + $0x28] sm:$0xf] %vm3155_vm4, %v3080_v27  ;;  %v3564_v27 = vshrl.u32 %v3398_v8, 16 }
 0x246   : > { %v3070_v40 = vpop.permute.xlu1 %3069  ;;  %v4080_v43 = vsel %vm5872_vm14, %v4078_v30, %v4079_v20  ;;  %v3563_v12 = vsel %vm5414_vm11, %v3558_v52, %v3562_v15  ;;  %v3207_v30 = vld [vmem:[#allocation2 + $0x84] sm:$0xf] }
 0x247   : > { %3161 = vst.msk [vmem:[#allocation3 + $0x14] sm:$0xf] %vm3155_vm4, %v3070_v40  ;;  %4167 = vrot.lane.b32.xlu2 %v4070_v11, %s5254_s23  ;;  %v3656_v40 = vshll.u32 %v3410_v32, 16  ;;  %v3660_v11 = vshrl.u32 %v3410_v32, 16  ;;  %v3566_v63 = vrot.slane %v3564_v27, 4  ;;  %v4959_v32 = vrot.slane %v3958_v61, 9 }
 0x248   : > { %v3409_v27 = vld [vmem:[#allocation2 + $0x84] sm:$0xf] }
 0x249   : > { %v3084_v47 = vpop.permute.xlu2 %3083  ;;  %v3567_v26 = vor.u32 %v3566_v63, %v3562_v15  ;;  %v4963_v15 = vrot.slane %v3970_v56, 9 }
 0x24a   : > { %3273 = vrot.lane.b32.xlu0 %v3199_v39, %s5255_s24  ;;  %3168 = vst.msk [vmem:[#allocation3 + $0x30] sm:$0xf] %vm3155_vm4, %v3084_v47  ;;  %v4320_v39 = vld [vmem:[%s7315_s3 + $0x20] sm:$0xf]  ;;  %v3486_v47 = vrot.slane %v3485_v16, 4 }
 0x24b   : > { %v4418_v41 = vunpack.c.l.b16 %v4320_v39  ;;  %v6733_v16 = vld [vmem:[#allocation2 + $0xac] sm:$0xf] }
 0x24c   : > { %3848 = vrot.lane.b32.xlu1 %v3645_v37, %s5253_s22  ;;  %v3086_v9 = vpop.permute.xlu0 %3085  ;;  %v3951_v37 = vld [vmem:[#allocation2 + $0x38] sm:$0x1]  ;;  %v3491_v55 = vsel %vm5414_vm11, %v3486_v47, %v6639_v18  ;;  %v3568_v18 = vrot.slane %v3567_v26, 4  ;;  %v3650_v47 = vshll.u32 %v3409_v27, 16 }
 0x24d   : > { %3169 = vst.msk [vmem:[#allocation3 + $0x34] sm:$0xf] %vm3155_vm4, %v3086_v9  ;;  %v3399_v9 = vld [vmem:[#allocation2 + $0x5c] sm:$0x1]  ;;  %v4423_v46 = vpack.c.b16 %v4418_v41, %v4418_v41  ;;  %v4058_v49 = vrot.slane %v3951_v37, 5  ;;  %v3647_v37 = vshrl.u32 %v3409_v27, 16 }
 0x24e   : > { %v3076_v54 = vpop.permute.xlu1 %3075  ;;  %v3419_v41 = vld [vmem:[#allocation2 + $0xac] sm:$0xf] }
 0x24f   : > { %3164 = vst.msk [vmem:[#allocation3 + $0x20] sm:$0xf] %vm3155_vm4, %v3076_v54  ;;  %3287 = vrot.lane.b32.xlu2 %v3206_v51, %s5255_s24  ;;  %v6695_v54 = vrot.slane %v3656_v40, 5  ;;  %v3662_v51 = vrot.slane %v3660_v11, 4  ;;  %v4059_v59 = vsel %vm5872_vm14, %v4057_v14, %v4058_v49 }
 0x251   : > { %v3090_v58 = vpop.permute.xlu2 %3089  ;;  %v3663_v28 = vor.u32 %v3662_v51, %v6695_v54  ;;  %v3728_v51 = vshll.u32 %v3419_v41, 16 }
 0x252   : > { %3824 = vrot.lane.b32.xlu0 %v3501_v53, %s5253_s22  ;;  %3171 = vst.msk [vmem:[#allocation3 + $0x3c] sm:$0xf] %vm3155_vm4, %v3090_v58  ;;  %v3570_v58 = vshll.u32 %v3399_v9, 16  ;;  %v3981_v9 = vld [vmem:[#allocation2 + $0xb0] sm:$0x1] }
 0x253   : > { %v4128_v49 = vrot.slane %v3981_v9, 5  ;;  %v3730_v26 = vrot.slane %v3728_v51, 5  ;;  %v3195_v9 = vld [vmem:[#allocation2 + $0x3c] sm:$0xf] }
 0x254   : > { %3261 = vrot.lane.b32.xlu1 %v3193_v35, %s5255_s24  ;;  %v3092_v17 = vpop.permute.xlu0 %3091  ;;  %v4479_v35 = vsel %vm4477_vm5, %v4423_v46, 0  ;;  %v3572_v22 = vrot.slane %v3570_v58, 5  ;;  %v3649_v46 = vrot.slane %v3647_v37, 4  ;;  %v3979_v37 = vld [vmem:[#allocation2 + $0xa8] sm:$0xe] }
 0x255   : > { %3172 = vst.msk [vmem:[#allocation3 + $0x40] sm:$0xf] %vm3155_vm4, %v3092_v17  ;;  %4484 = vmatpush.bf16.msra.mxu0 %v4479_v35  ;;  %5169 = vmatpush.bf16.msra.mxu1 %v4479_v35  ;;  %v3666_v17 = vshll.u32 %v3411_v36, 16  ;;  %v4966_v51 = vrot.slane %v3979_v37, 9 }
 0x256   : > { %v3082_v21 = vpop.permute.xlu1 %3081  ;;  %5170 = vmatpush.bf16.msra.mxu2 %v4479_v35  ;;  %5171 = vmatpush.bf16.msra.mxu3 %v4479_v35  ;;  %v3573_v60 = vsel %vm5414_vm11, %v3568_v18, %v3572_v22 }
 0x257   : > { %3167 = vst.msk [vmem:[#allocation3 + $0x2c] sm:$0xf] %vm3155_vm4, %v3082_v21  ;;  %4183 = vrot.lane.b32.xlu2 %v4098_v25, %s5254_s23  ;;  %v3664_v25 = vrot.slane %v3663_v28, 4  ;;  %v3668_v8 = vrot.slane %v3666_v17, 5  ;;  %v3208_v28 = vld [vmem:[#allocation2 + $0x88] sm:$0xf] }
 0x259   : > { %v3096_v13 = vpop.permute.xlu2 %3095  ;;  %4485 = vmatpush.bf16.msra.mxu0 %v5089_v48  ;;  %5172 = vmatpush.bf16.msra.mxu1 %v5089_v48  ;;  %v3669_v31 = vsel %vm5414_vm11, %v3664_v25, %v3668_v8 }
 0x25a   : > { %4159 = vrot.lane.b32.xlu0 %v4056_v44, %s5254_s23  ;;  %3174 = vst.msk [vmem:[#allocation3 + $0x48] sm:$0xf] %vm3155_vm4, %v3096_v13  ;;  %5173 = vmatpush.bf16.msra.mxu2 %v5089_v48  ;;  %v5087_v13 = vld [vmem:[%s7315_s3 + $0x8] sm:$0xff] }
 0x25b   : > { %5174 = vmatpush.bf16.msra.mxu3 %v5089_v48 }
 0x25c   : > { %3275 = vrot.lane.b32.xlu1 %v3200_v29, %s5255_s24  ;;  %v3098_v34 = vpop.permute.xlu0 %3097  ;;  %v3418_v29 = vld [vmem:[#allocation2 + $0xa8] sm:$0xf] }
 0x25d   : > { %3175 = vst.msk [vmem:[#allocation3 + $0x4c] sm:$0xf] %vm3155_vm4, %v3098_v34  ;;  %4486 = vmatpush.bf16.msra.mxu0 %v5088_v0  ;;  %5175 = vmatpush.bf16.msra.mxu1 %v5088_v0  ;;  %v3719_v20 = vshrl.u32 %v3418_v29, 16  ;;  %v3722_v34 = vshll.u32 %v3418_v29, 16 }
 0x25e   : > { %v3088_v10 = vpop.permute.xlu1 %3087  ;;  %5176 = vmatpush.bf16.msra.mxu2 %v5088_v0 }
 0x25f   : > { %3170 = vst.msk [vmem:[#allocation3 + $0x38] sm:$0xf] %vm3155_vm4, %v3088_v10  ;;  %3263 = vrot.lane.b32.xlu2 %v3194_v50, %s5255_s24  ;;  %5177 = vmatpush.bf16.msra.mxu3 %v5088_v0  ;;  %v4104_v10 = vrot.slane %v6723_v1, 5  ;;  %v3721_v40 = vrot.slane %v3719_v20, 4  ;;  %v3724_v11 = vrot.slane %v3722_v34, 5 }
 0x260   : > { %v3420_v0 = vld [vmem:[#allocation2 + $0xb0] sm:$0x1] }
 0x261   : > { %v3102_v24 = vpop.permute.xlu2 %3101  ;;  %4487 = vmatpush.bf16.msra.mxu0 %v5087_v13  ;;  %5178 = vmatpush.bf16.msra.mxu1 %v5087_v13  ;;  %v4105_v63 = vsel %vm5872_vm14, %v4963_v15, %v4104_v10  ;;  %v4106_v61 = vrot.slane %v4104_v10, 4  ;;  %v3738_v34 = vshll.u32 %v3420_v0, 16 }
 0x262   : > { %4173 = vrot.lane.b32.xlu0 %v4080_v43, %s5254_s23  ;;  %3177 = vst.msk [vmem:[#allocation3 + $0x54] sm:$0xf] %vm3155_vm4, %v3102_v24  ;;  %5179 = vmatpush.bf16.msra.mxu2 %v5087_v13  ;;  %v5086_v43 = vld [vmem:[%s7315_s3] sm:$0xff]  ;;  %v4125_v24 = vrot.slane %v6733_v16, 5 }
 0x263   : > { %5180 = vmatpush.bf16.msra.mxu3 %v5087_v13  ;;  %v3740_v10 = vrot.slane %v3738_v34, 5  ;;  %v3202_v16 = vld [vmem:[#allocation2 + $0x64] sm:$0xf] }
 0x264   : > { %3834 = vrot.lane.b32.xlu1 %v3563_v12, %s5253_s22  ;;  %v3104_v53 = vpop.permute.xlu0 %3103  ;;  %v4077_v12 = vsel %vm5872_vm14, %v4959_v32, %v4076_v4  ;;  %v3725_v4 = vor.u32 %v3724_v11, %v3721_v40  ;;  %v4127_v14 = vrot.slane %v4125_v24, 4  ;;  %v3201_v32 = vld [vmem:[#allocation2 + $0x60] sm:$0xf] }
 0x265   : > { %3178 = vst.msk [vmem:[#allocation3 + $0x58] sm:$0xf] %vm3155_vm4, %v3104_v53  ;;  %4488 = vmatpush.bf16.msra.mxu0 %v5086_v43  ;;  %5181 = vmatpush.bf16.msra.mxu1 %v5086_v43  ;;  %v3652_v53 = vrot.slane %v3650_v47, 5  ;;  %v3952_v47 = vld [vmem:[#allocation2 + $0x3c] sm:$0xe] }
 0x266   : > { %v3094_v62 = vpop.permute.xlu1 %3093  ;;  %5182 = vmatpush.bf16.msra.mxu2 %v5086_v43  ;;  %v4129_v48 = vsel %vm5872_vm14, %v4127_v14, %v4128_v49  ;;  %v3391_v14 = vld [vmem:[#allocation2 + $0x3c] sm:$0xf] }
 0x267   : > { %3173 = vst.msk [vmem:[#allocation3 + $0x44] sm:$0xf] %vm3155_vm4, %v3094_v62  ;;  %3822 = vrot.lane.b32.xlu2 %v3491_v55, %s5253_s22  ;;  %5183 = vmatpush.bf16.msra.mxu3 %v5086_v43  ;;  %v3392_v62 = vld [vmem:[#allocation2 + $0x40] sm:$0xf]  ;;  %v3726_v55 = vrot.slane %v3725_v4, 4  ;;  %v3653_v17 = vor.u32 %v3652_v53, %v3649_v46  ;;  %v4957_v53 = vrot.slane %v3952_v47, 9 }
 0x268   : > { %v3516_v18 = vshrl.u32 %v3392_v62, 16 }
 0x269   : > { %v3108_v21 = vpop.permute.xlu2 %3107  ;;  %v3731_v22 = vsel %vm5414_vm11, %v3726_v55, %v3730_v26  ;;  %v3654_v25 = vrot.slane %v3653_v17, 4  ;;  %v3506_v17 = vshll.u32 %v3391_v14, 16 }
 0x26a   : > { %3301 = vrot.lane.b32.xlu0 %v3213_v45, %s5255_s24  ;;  %3180 = vst.msk [vmem:[#allocation3 + $0x60] sm:$0xf] %vm3155_vm4, %v3108_v21  ;;  %v3732_v45 = vshrl.u32 %v3419_v41, 16  ;;  %v3972_v21 = vld [vmem:[#allocation2 + $0x8c] sm:$0x1] }
 0x26b   : > { %v4107_v56 = vrot.slane %v3972_v21, 5 }
 0x26c   : > { %4161 = vrot.lane.b32.xlu1 %v4059_v59, %s5254_s23  ;;  %v3110_v23 = vpop.permute.xlu0 %3109  ;;  %v3512_v59 = vshll.u32 %v3392_v62, 16  ;;  %v3734_v8 = vrot.slane %v3732_v45, 4  ;;  %v3401_v45 = vld [vmem:[#allocation2 + $0x64] sm:$0xf] }
 0x26d   : > { %3181 = vst.msk [vmem:[#allocation3 + $0x64] sm:$0xf] %vm3155_vm4, %v3110_v23  ;;  %v4108_v1 = vsel %vm5872_vm14, %v4106_v61, %v4107_v56  ;;  %v3584_v21 = vshll.u32 %v3401_v45, 16 }
 0x26e   : > { %v3100_v44 = vpop.permute.xlu1 %3099  ;;  %v3735_v20 = vor.u32 %v3734_v8, %v3730_v26  ;;  %v3508_v8 = vrot.slane %v3506_v17, 5 }
 0x26f   : > { %3176 = vst.msk [vmem:[#allocation3 + $0x50] sm:$0xf] %vm3155_vm4, %v3100_v44  ;;  %3836 = vrot.lane.b32.xlu2 %v3573_v60, %s5253_s22  ;;  %v6762_v44 = vrot.slane %v3512_v59, 5  ;;  %v3518_v60 = vrot.slane %v3516_v18, 4  ;;  %v3586_v56 = vrot.slane %v3584_v21, 5 }
 0x271   : > { %v3114_v52 = vpop.permute.xlu2 %3113 }
 0x272   : > { %3852 = vrot.lane.b32.xlu0 %v3669_v31, %s5253_s22  ;;  %3183 = vst.msk [vmem:[#allocation3 + $0x6c] sm:$0xf] %vm3155_vm4, %v3114_v52  ;;  %v3393_v31 = vld [vmem:[#allocation2 + $0x44] sm:$0x1]  ;;  %v3519_v52 = vor.u32 %v3518_v60, %v6762_v44 }
 0x273   : > { %v3522_v15 = vshll.u32 %v3393_v31, 16  ;;  %v3413_v31 = vld [vmem:[#allocation2 + $0x94] sm:$0xf] }
 0x274   : > { %3289 = vrot.lane.b32.xlu1 %v3207_v30, %s5255_s24  ;;  %v3116_v50 = vpop.permute.xlu0 %3115  ;;  %v3659_v30 = vsel %vm5414_vm11, %v3654_v25, %v6695_v54  ;;  %v3736_v54 = vrot.slane %v3735_v20, 4  ;;  %v3196_v20 = vld [vmem:[#allocation2 + $0x40] sm:$0xf] }
 0x275   : > { %3184 = vst.msk [vmem:[#allocation3 + $0x70] sm:$0xf] %vm3155_vm4, %v3116_v50  ;;  %v3520_v50 = vrot.slane %v3519_v52, 4  ;;  %v3524_v43 = vrot.slane %v3522_v15, 5  ;;  %v3680_v52 = vshll.u32 %v3413_v31, 16  ;;  %v3684_v15 = vshrl.u32 %v3413_v31, 16 }
 0x276   : > { %v3106_v39 = vpop.permute.xlu1 %3105  ;;  %v6848_v31 = vld [vmem:[#allocation2 + $0xb8] sm:$0xf] }
 0x277   : > { %3179 = vst.msk [vmem:[#allocation3 + $0x5c] sm:$0xf] %vm3155_vm4, %v3106_v39  ;;  %4171 = vrot.lane.b32.xlu2 %v4077_v12, %s5254_s23  ;;  %v3741_v39 = vsel %vm5414_vm11, %v3736_v54, %v3740_v10  ;;  %v3400_v12 = vld [vmem:[#allocation2 + $0x60] sm:$0xf]  ;;  %v3525_v41 = vsel %vm5414_vm11, %v3520_v50, %v3524_v43  ;;  %v3954_v54 = vld [vmem:[#allocation2 + $0x44] sm:$0x1] }
 0x278   : > { %v3578_v4 = vshll.u32 %v3400_v12, 16  ;;  %v3402_v43 = vld [vmem:[#allocation2 + $0x68] sm:$0x1]  ;;  %v4065_v37 = vrot.slane %v3954_v54, 5  ;;  %v4132_v54 = vrot.slane %v6848_v31, 5 }
 0x279   : > { %v3256_v36 = vpop.permute.xlu2 %3255 }
 0x27a   : > { %4187 = vrot.lane.b32.xlu0 %v4105_v63, %s5254_s23  ;;  %3351 = vst.msk [vmem:[#allocation3 + $0x4] sm:$0xf] %vm3349_vm9, %v3256_v36  ;;  %v6787_v63 = vld [vmem:[#allocation2 + $0x40] sm:$0xf]  ;;  %v3580_v55 = vrot.slane %v3578_v4, 5 }
 0x27b   : > { %v4062_v36 = vrot.slane %v6787_v63, 5  ;;  %v3215_v4 = vld [vmem:[#allocation2 + $0xb4] sm:$0xf] }
 0x27c   : > { %3303 = vrot.lane.b32.xlu1 %v3214_v6, %s5255_s24  ;;  %v3815_v35 = vpop.permute.xlu0 %3814  ;;  %v3575_v6 = vshrl.u32 %v3400_v12, 16  ;;  %v3414_v12 = vld [vmem:[#allocation2 + $0x98] sm:$0x1] }
 0x27d   : > { %v4063_v59 = vsel %vm5872_vm14, %v4957_v53, %v4062_v36 }
 0x27e   : > { %v3112_v58 = vpop.permute.xlu1 %3111  ;;  %v3577_v62 = vrot.slane %v3575_v6, 4  ;;  %v3594_v6 = vshll.u32 %v3402_v43, 16 }
 0x27f   : > { %3182 = vst.msk [vmem:[#allocation3 + $0x68] sm:$0xf] %vm3155_vm4, %v3112_v58  ;;  %3291 = vrot.lane.b32.xlu2 %v3208_v28, %s5255_s24  ;;  %v4126_v58 = vsel %vm5872_vm14, %v4966_v51, %v4125_v24  ;;  %v3503_v28 = vshrl.u32 %v3391_v14, 16 }
 0x280   : > { %v3581_v24 = vor.u32 %v3580_v55, %v3577_v62  ;;  %v3596_v14 = vrot.slane %v3594_v6, 5  ;;  %v3404_v6 = vld [vmem:[#allocation2 + $0x70] sm:$0xf] }
 0x281   : > { %v4152_v23 = vpop.permute.xlu2 %4151  ;;  %v3505_v25 = vrot.slane %v3503_v28, 4 }
 0x282   : > { %4201 = vrot.lane.b32.xlu0 %v4129_v48, %s5254_s23  ;;  %v3582_v61 = vrot.slane %v3581_v24, 4 }
 0x283   : > { %v3509_v34 = vor.u32 %v3508_v8, %v3505_v25 }
 0x284   : > { %3862 = vrot.lane.b32.xlu1 %v3731_v22, %s5253_s22  ;;  %v4154_v29 = vpop.permute.xlu0 %4153  ;;  %v3963_v22 = vld [vmem:[#allocation2 + $0x68] sm:$0x1] }
 0x285   : > { %v4086_v60 = vrot.slane %v3963_v22, 5  ;;  %v3510_v10 = vrot.slane %v3509_v34, 4  ;;  %v6841_v22 = vld [vmem:[#allocation2 + $0x94] sm:$0xf] }
 0x286   : > { %v3254_v13 = vpop.permute.xlu1 %3253 }
 0x287   : > { %3350 = vst.msk [vmem:[#allocation3] sm:$0xf] %vm3349_vm9, %v3254_v13  ;;  %3850 = vrot.lane.b32.xlu2 %v3659_v30, %s5253_s22  ;;  %v3588_v30 = vshrl.u32 %v3401_v45, 16  ;;  %v3515_v63 = vsel %vm5414_vm11, %v3510_v10, %v6762_v44  ;;  %v3421_v45 = vld [vmem:[#allocation2 + $0xb4] sm:$0xf] }
 0x288   : > { %3911 = vst.msk [vmem:[#allocation3] sm:$0xf] %vm3910_vm10, %v3815_v35  ;;  %v6793_v35 = vld [vmem:[#allocation2 + $0x64] sm:$0xf]  ;;  %v3743_v24 = vshrl.u32 %v3421_v45, 16  ;;  %v3746_v21 = vshll.u32 %v3421_v45, 16 }
 0x289   : > { %4248 = vst.msk [vmem:[#allocation3] sm:$0xf] %vm4247_vm12, %v4152_v23  ;;  %v3260_v27 = vpop.permute.xlu2 %3259  ;;  %v4083_v18 = vrot.slane %v6793_v35, 5  ;;  %v3984_v35 = vld [vmem:[#allocation2 + $0xbc] sm:$0x1] }
 0x28a   : > { %3277 = vrot.lane.b32.xlu0 %v3201_v32, %s5255_s24  ;;  %3353 = vst.msk [vmem:[#allocation3 + $0xc] sm:$0xf] %vm3349_vm9, %v3260_v27  ;;  %v3590_v27 = vrot.slane %v3588_v30, 4 }
 0x28b   : > { %v4085_v0 = vrot.slane %v4083_v18, 4 }
 0x28c   : > { %4189 = vrot.lane.b32.xlu1 %v4108_v1, %s5254_s23  ;;  %v3270_v40 = vpop.permute.xlu0 %3269  ;;  %v3587_v1 = vsel %vm5414_vm11, %v3582_v61, %v3586_v56  ;;  %v3403_v61 = vld [vmem:[#allocation2 + $0x6c] sm:$0xf] }
 0x28d   : > { %3358 = vst.msk [vmem:[#allocation3 + $0x20] sm:$0xf] %vm3349_vm9, %v3270_v40  ;;  %v4087_v32 = vsel %vm5872_vm14, %v4085_v0, %v4086_v60  ;;  %v6820_v40 = vrot.slane %v3680_v52, 5  ;;  %v4111_v0 = vrot.slane %v6841_v22, 5  ;;  %v3412_v60 = vld [vmem:[#allocation2 + $0x90] sm:$0xf] }
 0x28e   : > { %v3817_v11 = vpop.permute.xlu1 %3816  ;;  %v3671_v52 = vshrl.u32 %v3412_v60, 16  ;;  %v3599_v10 = vshrl.u32 %v3403_v61, 16  ;;  %v3966_v22 = vld [vmem:[#allocation2 + $0x74] sm:$0x1] }
 0x28f   : > { %3912 = vst.msk [vmem:[#allocation3 + $0x4] sm:$0xf] %vm3910_vm10, %v3817_v11  ;;  %3864 = vrot.lane.b32.xlu2 %v3741_v39, %s5253_s22  ;;  %v3686_v11 = vrot.slane %v3684_v15, 4  ;;  %v3674_v15 = vshll.u32 %v3412_v60, 16 }
 0x290   : > { %4249 = vst.msk [vmem:[#allocation3 + $0x4] sm:$0xf] %vm4247_vm12, %v4154_v29 }
 0x291   : > { %v3819_v46 = vpop.permute.xlu2 %3818  ;;  %v3687_v51 = vor.u32 %v3686_v11, %v6820_v40  ;;  %v3673_v11 = vrot.slane %v3671_v52, 4  ;;  %v4093_v52 = vrot.slane %v3966_v22, 5  ;;  %v3204_v22 = vld [vmem:[#allocation2 + $0x70] sm:$0xf] }
 0x292   : > { %3828 = vrot.lane.b32.xlu0 %v3525_v41, %s5253_s22  ;;  %v4064_v41 = vrot.slane %v4062_v36, 4 }
 0x294   : > { %3265 = vrot.lane.b32.xlu1 %v3195_v9, %s5255_s24  ;;  %v3821_v49 = vpop.permute.xlu0 %3820  ;;  %v3591_v9 = vor.u32 %v3590_v27, %v3586_v56  ;;  %v4066_v53 = vsel %vm5872_vm14, %v4064_v41, %v4065_v37  ;;  %v3745_v56 = vrot.slane %v3743_v24, 4  ;;  %v3602_v27 = vshll.u32 %v3403_v61, 16  ;;  %v6879_v24 = vld [vmem:[#allocation2 + $0x70] sm:$0xf] }
 0x295   : > { %3914 = vst.msk [vmem:[#allocation3 + $0xc] sm:$0xf] %vm3910_vm10, %v3821_v49  ;;  %v3688_v49 = vrot.slane %v3687_v51, 4  ;;  %v4134_v41 = vrot.slane %v4132_v54, 4  ;;  %v4135_v37 = vrot.slane %v3984_v35, 5 }
 0x296   : > { %v3258_v26 = vpop.permute.xlu1 %3257  ;;  %v3592_v36 = vrot.slane %v3591_v9, 4 }
 0x297   : > { %3352 = vst.msk [vmem:[#allocation3 + $0x8] sm:$0xf] %vm3349_vm9, %v3258_v26  ;;  %v5070_v48 = vld [vmem:[#allocation3] sm:$0xff]  ;;  %4199 = vrot.lane.b32.xlu2 %v4126_v58, %s5254_s23 }
 0x298   : > { %3913 = vst.msk [vmem:[#allocation3 + $0x8] sm:$0xf] %vm3910_vm10, %v3819_v46  ;;  %5050 = vmatmul.msk.bf16.vlgmr.msra.gmra.mxu0 %vm4428_vm13, %v5070_v48  ;;  %v3690_v46 = vshll.u32 %v3414_v12, 16  ;;  %v3597_v58 = vsel %vm5414_vm11, %v3592_v36, %v3596_v14  ;;  %v3961_v48 = vld [vmem:[#allocation2 + $0x60] sm:$0xe] }
 0x299   : > { %v3833_v23 = vpop.permute.xlu2 %3832  ;;  %v4960_v25 = vrot.slane %v3961_v48, 9  ;;  %v3210_v36 = vld [vmem:[#allocation2 + $0x94] sm:$0xf] }
 0x29a   : > { %4163 = vrot.lane.b32.xlu0 %v4063_v59, %s5254_s23  ;;  %v3692_v62 = vrot.slane %v3690_v46, 5  ;;  %v3973_v59 = vld [vmem:[#allocation2 + $0x90] sm:$0xe] }
 0x29b   : > { %v4084_v34 = vsel %vm5872_vm14, %v4960_v25, %v4083_v18  ;;  %v3216_v18 = vld [vmem:[#allocation2 + $0xb8] sm:$0xf] }
 0x29c   : > { %3279 = vrot.lane.b32.xlu1 %v3202_v16, %s5255_s24  ;;  %v4156_v29 = vpop.permute.xlu0 %4155  ;;  %v3693_v17 = vsel %vm5414_vm11, %v3688_v49, %v3692_v62  ;;  %v3209_v16 = vld [vmem:[#allocation2 + $0x90] sm:$0xf]  ;;  %v3608_v62 = vshll.u32 %v3404_v6, 16 }
 0x29d   : > { %4250 = vst.msk [vmem:[#allocation3 + $0x8] sm:$0xf] %vm4247_vm12, %v4156_v29 }
 0x29e   : > { %v3272_v13 = vpop.permute.xlu1 %3271 }
 0x29f   : > { %3359 = vst.msk [vmem:[#allocation3 + $0x24] sm:$0xf] %vm3349_vm9, %v3272_v13  ;;  %3267 = vrot.lane.b32.xlu2 %v3196_v20, %s5255_s24  ;;  %v3748_v13 = vrot.slane %v3746_v21, 5  ;;  %v4113_v21 = vrot.slane %v4111_v0, 4 }
 0x2a0   : > { %3920 = vst.msk [vmem:[#allocation3 + $0x24] sm:$0xf] %vm3910_vm10, %v3833_v23  ;;  %v4964_v23 = vrot.slane %v3973_v59, 9  ;;  %v3610_v59 = vrot.slane %v3608_v62, 5 }
 0x2a1   : > { %v4168_v50 = vpop.permute.xlu2 %4167 }
 0x2a2   : > { %4177 = vrot.lane.b32.xlu0 %v4087_v32, %s5254_s23  ;;  %v3422_v32 = vld [vmem:[#allocation2 + $0xb8] sm:$0xf] }
 0x2a3   : > { %v3752_v43 = vshll.u32 %v3422_v32, 16 }
 0x2a4   : > { %3838 = vrot.lane.b32.xlu1 %v3587_v1, %s5253_s22  ;;  %v4170_v39 = vpop.permute.xlu0 %4169  ;;  %v4112_v1 = vsel %vm5872_vm14, %v4964_v23, %v4111_v0 }
 0x2a5   : > { %4257 = vst.msk [vmem:[#allocation3 + $0x24] sm:$0xf] %vm4247_vm12, %v4170_v39  ;;  %v3676_v39 = vrot.slane %v3674_v15, 5  ;;  %v3754_v51 = vrot.slane %v3752_v43, 5  ;;  %v3415_v15 = vld [vmem:[#allocation2 + $0x9c] sm:$0xf] }
 0x2a6   : > { %v3831_v47 = vpop.permute.xlu1 %3830  ;;  %v3698_v43 = vshll.u32 %v3415_v15, 16 }
 0x2a7   : > { %3919 = vst.msk [vmem:[#allocation3 + $0x20] sm:$0xf] %vm3910_vm10, %v3831_v47  ;;  %3826 = vrot.lane.b32.xlu2 %v3515_v63, %s5253_s22  ;;  %v3601_v47 = vrot.slane %v3599_v10, 4  ;;  %v3604_v63 = vrot.slane %v3602_v27, 5  ;;  %v3677_v14 = vor.u32 %v3676_v39, %v3673_v11  ;;  %v3982_v11 = vld [vmem:[#allocation2 + $0xb4] sm:$0xe] }
 0x2a8   : > { %4256 = vst.msk [vmem:[#allocation3 + $0x20] sm:$0xf] %vm4247_vm12, %v4168_v50  ;;  %v3749_v50 = vor.u32 %v3748_v13, %v3745_v56  ;;  %v4090_v13 = vrot.slane %v6879_v24, 5 }
 0x2a9   : > { %v3288_v44 = vpop.permute.xlu2 %3287  ;;  %v3605_v49 = vor.u32 %v3604_v63, %v3601_v47  ;;  %v1013_v47 = vld [vmem:[#allocation2 + $0xcc] sm:$0xf]  ;;  %v4967_v63 = vrot.slane %v3982_v11, 9  ;;  %v3985_v11 = vld [vmem:[#allocation2 + $0xc0] sm:$0xe] }
 0x2aa   : > { %3305 = vrot.lane.b32.xlu0 %v3215_v4, %s5255_s24  ;;  %3367 = vst.msk [vmem:[#allocation3 + $0x44] sm:$0xf] %vm3349_vm9, %v3288_v44  ;;  %v3750_v4 = vrot.slane %v3749_v50, 4  ;;  %v4136_v44 = vsel %vm5872_vm14, %v4134_v41, %v4135_v37  ;;  %v3695_v50 = vshrl.u32 %v3415_v15, 16 }
 0x2ab   : > { %v3606_v48 = vrot.slane %v3605_v49, 4  ;;  %v4133_v62 = vsel %vm5872_vm14, %v4967_v63, %v4132_v54 }
 0x2ac   : > { %4165 = vrot.lane.b32.xlu1 %v4066_v53, %s5254_s23  ;;  %v3847_v55 = vpop.permute.xlu0 %3846  ;;  %v3756_v53 = vshrl.u32 %v3422_v32, 16  ;;  %v4092_v32 = vrot.slane %v4090_v13, 4 }
 0x2ad   : > { %v3611_v56 = vsel %vm5414_vm11, %v3606_v48, %v3610_v59 }
 0x2ae   : > { %v4158_v26 = vpop.permute.xlu1 %4157  ;;  %v3758_v45 = vrot.slane %v3756_v53, 4  ;;  %v4094_v39 = vsel %vm5872_vm14, %v4092_v32, %v4093_v52  ;;  %v3416_v53 = vld [vmem:[#allocation2 + $0xa0] sm:$0xf] }
 0x2af   : > { %4251 = vst.msk [vmem:[#allocation3 + $0xc] sm:$0xf] %vm4247_vm12, %v4158_v26  ;;  %v5074_v28 = vld [vmem:[#allocation3 + $0x20] sm:$0xff]  ;;  %3840 = vrot.lane.b32.xlu2 %v3597_v58, %s5253_s22  ;;  %v3678_v58 = vrot.slane %v3677_v14, 4 }
 0x2b0   : > { %5054 = vmatmul.msk.bf16.vlgmr.msra.gmra.mxu1 %vm4428_vm13, %v5074_v28  ;;  %v3975_v26 = vld [vmem:[#allocation2 + $0x98] sm:$0x1]  ;;  %v3759_v60 = vor.u32 %v3758_v45, %v3754_v51 }
 0x2b1   : > { %v4184_v8 = vpop.permute.xlu2 %4183  ;;  %v4114_v25 = vrot.slane %v3975_v26, 5  ;;  %v3683_v23 = vsel %vm5414_vm11, %v3678_v58, %v6820_v40  ;;  %v3612_v40 = vshrl.u32 %v3404_v6, 16  ;;  %v3700_v6 = vrot.slane %v3698_v43, 5 }
 0x2b2   : > { %3856 = vrot.lane.b32.xlu0 %v3693_v17, %s5253_s22  ;;  %v3423_v17 = vld [vmem:[#allocation2 + $0xbc] sm:$0x1] }
 0x2b3   : > { %v4115_v0 = vsel %vm5872_vm14, %v4113_v21, %v4114_v25  ;;  %v3614_v10 = vrot.slane %v3612_v40, 4 }
 0x2b4   : > { %3293 = vrot.lane.b32.xlu1 %v3209_v16, %s5255_s24  ;;  %v4186_v29 = vpop.permute.xlu0 %4185 }
 0x2b5   : > { %v3615_v41 = vor.u32 %v3614_v10, %v3610_v59 }
 0x2b6   : > { %v3286_v30 = vpop.permute.xlu1 %3285  ;;  %v5071_v20 = vld [vmem:[#allocation3 + $0x8] sm:$0xff] }
 0x2b7   : > { %3366 = vst.msk [vmem:[#allocation3 + $0x40] sm:$0xf] %vm3349_vm9, %v3286_v30  ;;  %5051 = vmatmul.msk.bf16.gmra.mxu0 %vm4428_vm13, %v5071_v20  ;;  %4175 = vrot.lane.b32.xlu2 %v4084_v34, %s5254_s23  ;;  %v3760_v30 = vrot.slane %v3759_v60, 4  ;;  %v3616_v14 = vrot.slane %v3615_v41, 4  ;;  %v3049_v60 = vrot.slane %v3047_v42, 4 }
 0x2b8   : > { %3927 = vst.msk [vmem:[#allocation3 + $0x40] sm:$0xf] %vm3910_vm10, %v3847_v55  ;;  %v3755_v55 = vsel %vm5414_vm11, %v3750_v4, %v3754_v51  ;;  %v1014_v4 = vsel %vm5322_vm7, %v5308_v2, %v1013_v47  ;;  %v3704_v2 = vshll.u32 %v3416_v53, 16  ;;  %v4968_v47 = vrot.slane %v3985_v11, 9 }
 0x2b9   : > { %4264 = vst.msk [vmem:[#allocation3 + $0x40] sm:$0xf] %vm4247_vm12, %v4184_v8  ;;  %v3264_v12 = vpop.permute.xlu2 %3263 }
 0x2ba   : > { %4191 = vrot.lane.b32.xlu0 %v4112_v1, %s5254_s23  ;;  %3355 = vst.msk [vmem:[#allocation3 + $0x14] sm:$0xf] %vm3349_vm9, %v3264_v12  ;;  %v3203_v12 = vld [vmem:[#allocation2 + $0x6c] sm:$0xf]  ;;  %v6924_v48 = vrot.slane %v3704_v2, 5 }
 0x2bb   : > { %1015 = vst [vmem:[#allocation2 + $0xcc] sm:$0xf] %v1014_v4  ;;  %v6968_v4 = vld [vmem:[#allocation2 + $0xc4] sm:$0xf]  ;;  %v2898_v2 = vld [vmem:[#allocation2 + $0xc8] sm:$0x1] }
 0x2bc   : > { %3307 = vrot.lane.b32.xlu1 %v3216_v18, %s5255_s24  ;;  %v3274_v9 = vpop.permute.xlu0 %3273  ;;  %v3405_v18 = vld [vmem:[#allocation2 + $0x74] sm:$0x1] }
 0x2bd   : > { %3360 = vst.msk [vmem:[#allocation3 + $0x28] sm:$0xf] %vm3349_vm9, %v3274_v9  ;;  %v3618_v37 = vshll.u32 %v3405_v18, 16  ;;  %v3697_v9 = vrot.slane %v3695_v50, 4  ;;  %v3417_v18 = vld [vmem:[#allocation2 + $0xa4] sm:$0x1] }
 0x2be   : > { %v3849_v46 = vpop.permute.xlu1 %3848 }
 0x2bf   : > { %3928 = vst.msk [vmem:[#allocation3 + $0x44] sm:$0xf] %vm3910_vm10, %v3849_v46  ;;  %3295 = vrot.lane.b32.xlu2 %v3210_v36, %s5255_s24  ;;  %v3425_v36 = vld [vmem:[#allocation2 + $0xc4] sm:$0xf]  ;;  %v3701_v7 = vor.u32 %v3700_v6, %v3697_v9  ;;  %v3424_v9 = vld [vmem:[#allocation2 + $0xc0] sm:$0xf] }
 0x2c0   : > { %4265 = vst.msk [vmem:[#allocation3 + $0x44] sm:$0xf] %vm4247_vm12, %v4186_v29  ;;  %v3762_v29 = vshll.u32 %v3423_v17, 16  ;;  %v3776_v26 = vshll.u32 %v3425_v36, 16  ;;  %v3780_v58 = vshrl.u32 %v3425_v36, 16 }
 0x2c1   : > { %v3823_v28 = vpop.permute.xlu2 %3822  ;;  %v3702_v31 = vrot.slane %v3701_v7, 4  ;;  %v3211_v36 = vld [vmem:[#allocation2 + $0x9c] sm:$0xf] }
 0x2c2   : > { %4205 = vrot.lane.b32.xlu0 %v4136_v44, %s5254_s23  ;;  %v3764_v20 = vrot.slane %v3762_v29, 5  ;;  %v3620_v44 = vrot.slane %v3618_v37, 5  ;;  %v1071_v17 = vld [vmem:[#allocation2 + $0xcc] sm:$0x1]  ;;  %v6926_v59 = vrot.slane %v3776_v26, 5 }
 0x2c3   : > { %v1072_v21 = vsel %vm5311_vm6, 0, %v1071_v17  ;;  %v3707_v40 = vsel %vm5414_vm11, %v3702_v31, %v6924_v48 }
 0x2c4   : > { %3866 = vrot.lane.b32.xlu1 %v3755_v55, %s5253_s22  ;;  %v3825_v16 = vpop.permute.xlu0 %3824  ;;  %v3765_v35 = vsel %vm5414_vm11, %v3760_v30, %v3764_v20  ;;  %v3212_v55 = vld [vmem:[#allocation2 + $0xa0] sm:$0xf]  ;;  %v3621_v45 = vsel %vm5414_vm11, %v3616_v14, %v3620_v44  ;;  %1073 = vst [vmem:[#allocation2 + $0xcc] sm:$0x1] %v1072_v21  ;;  %v3964_v30 = vld [vmem:[#allocation2 + $0x6c] sm:$0xe] }
 0x2c5   : > { %3916 = vst.msk [vmem:[#allocation3 + $0x14] sm:$0xf] %vm3910_vm10, %v3825_v16  ;;  %v3782_v16 = vrot.slane %v3780_v58, 4  ;;  %v4961_v42 = vrot.slane %v3964_v30, 9  ;;  %v3767_v14 = vshrl.u32 %v3424_v9, 16  ;;  %v3770_v44 = vshll.u32 %v3424_v9, 16 }
 0x2c6   : > { %v3262_v8 = vpop.permute.xlu1 %3261  ;;  %v3976_v58 = vld [vmem:[#allocation2 + $0x9c] sm:$0xe] }
 0x2c7   : > { %3354 = vst.msk [vmem:[#allocation3 + $0x10] sm:$0xf] %vm3349_vm9, %v3262_v8  ;;  %v5078_v61 = vld [vmem:[#allocation3 + $0x40] sm:$0xff]  ;;  %3854 = vrot.lane.b32.xlu2 %v3683_v23, %s5253_s22  ;;  %v3426_v8 = vld [vmem:[#allocation2 + $0xc8] sm:$0x1]  ;;  %v3783_v20 = vor.u32 %v3782_v16, %v6926_v59  ;;  %v3772_v31 = vrot.slane %v3770_v44, 5 }
 0x2c8   : > { %3915 = vst.msk [vmem:[#allocation3 + $0x10] sm:$0xf] %vm3910_vm10, %v3823_v28  ;;  %5058 = vmatmul.msk.bf16.vlgmr.msra.gmra.mxu2 %vm4428_vm13, %v5078_v61  ;;  %v2895_v28 = vld [vmem:[#allocation2 + $0xbc] sm:$0x1]  ;;  %v1017_v23 = vld [vmem:[#allocation2 + $0xd4] sm:$0x1] }
 0x2c9   : > { %v3837_v34 = vpop.permute.xlu2 %3836  ;;  %v3050_v29 = vrot.slane %v2895_v28, 5  ;;  %v1018_v61 = vsel %vm5311_vm6, %v5316_v5, %v1017_v23  ;;  %v3786_v57 = vshll.u32 %v3426_v8, 16  ;;  %v3708_v5 = vshrl.u32 %v3416_v53, 16  ;;  %v3428_v8 = vld [vmem:[#allocation2 + $0xd0] sm:$0xf] }
 0x2ca   : > { %3842 = vrot.lane.b32.xlu0 %v3611_v56, %s5253_s22  ;;  %1019 = vst [vmem:[#allocation2 + $0xd4] sm:$0x1] %v1018_v61  ;;  %v3784_v32 = vrot.slane %v3783_v20, 4  ;;  %v3769_v28 = vrot.slane %v3767_v14, 4  ;;  %v4965_v23 = vrot.slane %v3976_v58, 9  ;;  %vm4570_vm6 = vcmask 64512  }
 0x2cb   : > { %v3051_v3 = vsel %vm5872_vm14, %v3049_v60, %v3050_v29  ;;  %v3788_v52 = vrot.slane %v3786_v57, 5  ;;  %v3218_v61 = vld [vmem:[#allocation2 + $0xc4] sm:$0xf]  ;;  %v3987_v20 = vld [vmem:[#allocation2 + $0xc8] sm:$0x1] }
 0x2cc   : > { %4193 = vrot.lane.b32.xlu1 %v4115_v0, %s5254_s23  ;;  %v4160_v1 = vpop.permute.xlu0 %4159 }
 0x2cd   : > { %4252 = vst.msk [vmem:[#allocation3 + $0x10] sm:$0xf] %vm4247_vm12, %v4160_v1  ;;  %v3710_v1 = vrot.slane %v3708_v5, 4  ;;  %v3789_v50 = vsel %vm5414_vm11, %v3784_v32, %v3788_v52  ;;  %v6994_v32 = vld [vmem:[#allocation2 + $0xd0] sm:$0xf] }
 0x2ce   : > { %v3276_v27 = vpop.permute.xlu1 %3275 }
 0x2cf   : > { %3361 = vst.msk [vmem:[#allocation3 + $0x2c] sm:$0xf] %vm3349_vm9, %v3276_v27  ;;  %3868 = vrot.lane.b32.xlu2 %v3765_v35, %s5253_s22  ;;  %v4091_v35 = vsel %vm5872_vm14, %v4961_v42, %v4090_v13  ;;  %v3711_v24 = vor.u32 %v3710_v1, %v6924_v48  ;;  %v3714_v13 = vshll.u32 %v3417_v18, 16  ;;  %v3057_v48 = vrot.slane %v2898_v2, 5  ;;  %v3978_v18 = vld [vmem:[#allocation2 + $0xa4] sm:$0x1] }
 0x2d0   : > { %3922 = vst.msk [vmem:[#allocation3 + $0x2c] sm:$0xf] %vm3910_vm10, %v3837_v34 }
 0x2d1   : > { %v4172_v51 = vpop.permute.xlu2 %4171  ;;  %v1126_v43 = vld [vmem:[#allocation2 + $0xd4] sm:$0x1]  ;;  %v3716_v53 = vrot.slane %v3714_v13, 5 }
 0x2d2   : > { %4181 = vrot.lane.b32.xlu0 %v4094_v39, %s5254_s23  ;;  %v6959_v39 = vld [vmem:[#allocation2 + $0xc4] sm:$0xf]  ;;  %v1127_v41 = vsel %vm5368_vm8, 0, %v1126_v43 }
 0x2d3   : > { %1128 = vst [vmem:[#allocation2 + $0xd4] sm:$0x1] %v1127_v41  ;;  %v4139_v63 = vrot.slane %v6959_v39, 5  ;;  %v3804_v39 = vshrl.u32 %v3428_v8, 16 }
 0x2d4   : > { %3281 = vrot.lane.b32.xlu1 %v3203_v12, %s5255_s24  ;;  %v4174_v46 = vpop.permute.xlu0 %4173  ;;  %v3217_v12 = vld [vmem:[#allocation2 + $0xc0] sm:$0xf] }
 0x2d5   : > { %4259 = vst.msk [vmem:[#allocation3 + $0x2c] sm:$0xf] %vm4247_vm12, %v4174_v46  ;;  %v3712_v46 = vrot.slane %v3711_v24, 4  ;;  %v4141_v52 = vrot.slane %v4139_v63, 4 }
 0x2d6   : > { %v3835_v49 = vpop.permute.xlu1 %3834 }
 0x2d7   : > { %3921 = vst.msk [vmem:[#allocation3 + $0x28] sm:$0xf] %vm3910_vm10, %v3835_v49  ;;  %4203 = vrot.lane.b32.xlu2 %v4133_v62, %s5254_s23  ;;  %v4140_v49 = vsel %vm5872_vm14, %v4968_v47, %v4139_v63  ;;  %v3054_v62 = vrot.slane %v6968_v4, 5  ;;  %v3717_v26 = vsel %vm5414_vm11, %v3712_v46, %v3716_v53  ;;  %v3806_v47 = vrot.slane %v3804_v39, 4  ;;  %v2896_v53 = vld [vmem:[#allocation2 + $0xc0] sm:$0xe] }
 0x2d8   : > { %4258 = vst.msk [vmem:[#allocation3 + $0x28] sm:$0xf] %vm4247_vm12, %v4172_v51  ;;  %v3427_v51 = vld [vmem:[#allocation2 + $0xcc] sm:$0xf]  ;;  %v4953_v44 = vrot.slane %v2896_v53, 9 }
 0x2d9   : > { %v3292_v54 = vpop.permute.xlu2 %3291  ;;  %v3794_v7 = vshll.u32 %v3427_v51, 16 }
 0x2da   : > { %3299 = vrot.lane.b32.xlu0 %v3212_v55, %s5255_s24  ;;  %3369 = vst.msk [vmem:[#allocation3 + $0x4c] sm:$0xf] %vm3349_vm9, %v3292_v54  ;;  %v3791_v55 = vshrl.u32 %v3427_v51, 16  ;;  %v3056_v54 = vrot.slane %v3054_v62, 4  ;;  %v3990_v43 = vld [vmem:[#allocation2 + $0xd4] sm:$0x1]  ;;  %v3055_v58 = vsel %vm5872_vm14, %v4953_v44, %v3054_v62 }
 0x2db   : > { %v3796_v21 = vrot.slane %v3794_v7, 5  ;;  %v4149_v41 = vrot.slane %v3990_v43, 5  ;;  %v3429_v51 = vld [vmem:[#allocation2 + $0xd4] sm:$0x1] }
 0x2dc   : > { %3844 = vrot.lane.b32.xlu1 %v3621_v45, %s5253_s22  ;;  %v3302_v25 = vpop.permute.xlu0 %3301  ;;  %v3977_v45 = vld [vmem:[#allocation2 + $0xa0] sm:$0xf]  ;;  %v3793_v16 = vrot.slane %v3791_v55, 4  ;;  %v3810_v14 = vshll.u32 %v3429_v51, 16 }
 0x2dd   : > { %3374 = vst.msk [vmem:[#allocation3 + $0x60] sm:$0xf] %vm3349_vm9, %v3302_v25  ;;  %v4118_v60 = vrot.slane %v3977_v45, 5 }
 0x2de   : > { %v4162_v56 = vpop.permute.xlu1 %4161  ;;  %v3812_v2 = vrot.slane %v3810_v14, 5 }
 0x2df   : > { %4253 = vst.msk [vmem:[#allocation3 + $0x14] sm:$0xf] %vm4247_vm12, %v4162_v56  ;;  %v5075_v0 = vld [vmem:[#allocation3 + $0x28] sm:$0xff]  ;;  %3283 = vrot.lane.b32.xlu2 %v3204_v22, %s5255_s24  ;;  %v3773_v56 = vor.u32 %v3772_v31, %v3769_v28  ;;  %v3058_v22 = vsel %vm5872_vm14, %v3056_v54, %v3057_v48  ;;  %v4119_v30 = vsel %vm5872_vm14, %v4965_v23, %v4118_v60 }
 0x2e0   : > { %5055 = vmatmul.msk.bf16.gmra.mxu1 %vm4428_vm13, %v5075_v0  ;;  %v3797_v0 = vor.u32 %v3796_v21, %v3793_v16 }
 0x2e1   : > { %v3851_v34 = vpop.permute.xlu2 %3850  ;;  %v3774_v57 = vrot.slane %v3773_v56, 4 }
 0x2e2   : > { %3858 = vrot.lane.b32.xlu0 %v3707_v40, %s5253_s22  ;;  %v3800_v40 = vshll.u32 %v3428_v8, 16  ;;  %v3798_v5 = vrot.slane %v3797_v0, 4 }
 0x2e4   : > { %3117 = vrot.lane.b32.xlu1 %v3051_v3, %s5252_s17  ;;  %v3853_v15 = vpop.permute.xlu0 %3852  ;;  %v3802_v42 = vrot.slane %v3800_v40, 5 }
 0x2e5   : > { %3930 = vst.msk [vmem:[#allocation3 + $0x4c] sm:$0xf] %vm3910_vm10, %v3853_v15  ;;  %v4142_v15 = vrot.slane %v3987_v20, 5 }
 0x2e6   : > { %v3290_v10 = vpop.permute.xlu1 %3289  ;;  %v5072_v27 = vld [vmem:[#allocation3 + $0x10] sm:$0xff] }
 0x2e7   : > { %3368 = vst.msk [vmem:[#allocation3 + $0x48] sm:$0xf] %vm3349_vm9, %v3290_v10  ;;  %5052 = vmatmul.msk.bf16.gmra.mxu0 %vm4428_vm13, %v5072_v27  ;;  %4179 = vrot.lane.b32.xlu2 %v4091_v35, %s5254_s23  ;;  %v3779_v10 = vsel %vm5414_vm11, %v3774_v57, %v6926_v59  ;;  %v3803_v35 = vsel %vm5414_vm11, %v3798_v5, %v3802_v42  ;;  %v4120_v59 = vrot.slane %v4118_v60, 4 }
 0x2e8   : > { %3929 = vst.msk [vmem:[#allocation3 + $0x48] sm:$0xf] %vm3910_vm10, %v3851_v34  ;;  %v4143_v11 = vsel %vm5872_vm14, %v4141_v52, %v4142_v15 }
 0x2e9   : > { %v3865_v37 = vpop.permute.xlu2 %3864 }
 0x2ea   : > { %3872 = vrot.lane.b32.xlu0 %v3789_v50, %s5253_s22  ;;  %v4146_v50 = vrot.slane %v6994_v32, 5 }
 0x2ec   : > { %3309 = vrot.lane.b32.xlu1 %v3217_v12, %s5255_s24  ;;  %v4188_v6 = vpop.permute.xlu0 %4187  ;;  %v4121_v12 = vrot.slane %v3978_v18, 5  ;;  %v4148_v13 = vrot.slane %v4146_v50, 4 }
 0x2ed   : > { %4266 = vst.msk [vmem:[#allocation3 + $0x48] sm:$0xf] %vm4247_vm12, %v4188_v6 }
 0x2ee   : > { %v3304_v33 = vpop.permute.xlu1 %3303  ;;  %v4122_v6 = vsel %vm5872_vm14, %v4120_v59, %v4121_v12  ;;  %v4150_v46 = vsel %vm5872_vm14, %v4148_v13, %v4149_v41 }
 0x2ef   : > { %3375 = vst.msk [vmem:[#allocation3 + $0x64] sm:$0xf] %vm3349_vm9, %v3304_v33  ;;  %3297 = vrot.lane.b32.xlu2 %v3211_v36, %s5255_s24  ;;  %v3219_v33 = vld [vmem:[#allocation2 + $0xcc] sm:$0xf]  ;;  %v3807_v36 = vor.u32 %v3806_v47, %v3802_v42 }
 0x2f0   : > { %3936 = vst.msk [vmem:[#allocation3 + $0x64] sm:$0xf] %vm3910_vm10, %v3865_v37 }
 0x2f1   : > { %v4200_v17 = vpop.permute.xlu2 %4199  ;;  %v3808_v7 = vrot.slane %v3807_v36, 4 }
 0x2f2   : > { %4207 = vrot.lane.b32.xlu0 %v4140_v49, %s5254_s23 }
 0x2f3   : > { %v3813_v45 = vsel %vm5414_vm11, %v3808_v7, %v3812_v2 }
 0x2f4   : > { %3860 = vrot.lane.b32.xlu1 %v3717_v26, %s5253_s22  ;;  %v4202_v25 = vpop.permute.xlu0 %4201 }
 0x2f5   : > { %4273 = vst.msk [vmem:[#allocation3 + $0x64] sm:$0xf] %vm4247_vm12, %v4202_v25 }
 0x2f6   : > { %v3863_v29 = vpop.permute.xlu1 %3862 }
 0x2f7   : > { %3935 = vst.msk [vmem:[#allocation3 + $0x60] sm:$0xf] %vm3910_vm10, %v3863_v29  ;;  %3311 = vrot.lane.b32.xlu2 %v3218_v61, %s5255_s24 }
 0x2f8   : > { %4272 = vst.msk [vmem:[#allocation3 + $0x60] sm:$0xf] %vm4247_vm12, %v4200_v17  ;;  %v3988_v17 = vld [vmem:[#allocation2 + $0xcc] sm:$0xe] }
 0x2f9   : > { %v3268_v3 = vpop.permute.xlu2 %3267  ;;  %v4969_v54 = vrot.slane %v3988_v17, 9 }
 0x2fa   : > { %3121 = vrot.lane.b32.xlu0 %v3058_v22, %s5252_s17  ;;  %3357 = vst.msk [vmem:[#allocation3 + $0x1c] sm:$0xf] %vm3349_vm9, %v3268_v3 }
 0x2fb   : > { %v4147_v23 = vsel %vm5872_vm14, %v4969_v54, %v4146_v50 }
 0x2fc   : > { %4195 = vrot.lane.b32.xlu1 %v4119_v30, %s5254_s23  ;;  %v3278_v34 = vpop.permute.xlu0 %3277 }
 0x2fd   : > { %3362 = vst.msk [vmem:[#allocation3 + $0x30] sm:$0xf] %vm3349_vm9, %v3278_v34 }
 0x2fe   : > { %v4190_v1 = vpop.permute.xlu1 %4189 }
 0x2ff   : > { %4267 = vst.msk [vmem:[#allocation3 + $0x4c] sm:$0xf] %vm4247_vm12, %v4190_v1  ;;  %v5082_v27 = vld [vmem:[#allocation3 + $0x60] sm:$0xff]  ;;  %3870 = vrot.lane.b32.xlu2 %v3779_v10, %s5253_s22 }
 0x300   : > { %5062 = vmatmul.msk.bf16.vlgmr.msra.gmra.mxu3 %vm4428_vm13, %v5082_v27 }
 0x301   : > { %v3827_v24 = vpop.permute.xlu2 %3826 }
 0x302   : > { %3874 = vrot.lane.b32.xlu0 %v3803_v35, %s5253_s22 }
 0x304   : > { %4209 = vrot.lane.b32.xlu1 %v4143_v11, %s5254_s23  ;;  %v3829_v37 = vpop.permute.xlu0 %3828 }
 0x305   : > { %3918 = vst.msk [vmem:[#allocation3 + $0x1c] sm:$0xf] %vm3910_vm10, %v3829_v37 }
 0x306   : > { %v3266_v63 = vpop.permute.xlu1 %3265  ;;  %v5079_v9 = vld [vmem:[#allocation3 + $0x48] sm:$0xff] }
 0x307   : > { %3356 = vst.msk [vmem:[#allocation3 + $0x18] sm:$0xf] %vm3349_vm9, %v3266_v63  ;;  %5059 = vmatmul.msk.bf16.gmra.mxu2 %vm4428_vm13, %v5079_v9  ;;  %4197 = vrot.lane.b32.xlu2 %v4122_v6, %s5254_s23 }
 0x308   : > { %3917 = vst.msk [vmem:[#allocation3 + $0x18] sm:$0xf] %vm3910_vm10, %v3827_v24 }
 0x309   : > { %v3841_v49 = vpop.permute.xlu2 %3840 }
 0x30a   : > { %4213 = vrot.lane.b32.xlu0 %v4150_v46, %s5254_s23 }
 0x30c   : > { %3313 = vrot.lane.b32.xlu1 %v3219_v33, %s5255_s24  ;;  %v4164_v55 = vpop.permute.xlu0 %4163 }
 0x30d   : > { %4254 = vst.msk [vmem:[#allocation3 + $0x18] sm:$0xf] %vm4247_vm12, %v4164_v55 }
 0x30e   : > { %v3280_v26 = vpop.permute.xlu1 %3279 }
 0x30f   : > { %3363 = vst.msk [vmem:[#allocation3 + $0x34] sm:$0xf] %vm3349_vm9, %v3280_v26  ;;  %3119 = vrot.lane.b32.xlu2 %v3055_v58, %s5252_s17  ;;  %s268_s17 = scalar_lea.vmem %s7317_s5, %s4919_s14 }
 0x310   : > { %3924 = vst.msk [vmem:[#allocation3 + $0x34] sm:$0xf] %vm3910_vm10, %v3841_v49 }
 0x311   : > { %v4176_v28 = vpop.permute.xlu2 %4175 }
 0x314   : > { %3876 = vrot.lane.b32.xlu1 %v3813_v45, %s5253_s22  ;;  %v4178_v31 = vpop.permute.xlu0 %4177 }
 0x315   : > { %4261 = vst.msk [vmem:[#allocation3 + $0x34] sm:$0xf] %vm4247_vm12, %v4178_v31  ;;  %v4490_v62 = vpop.f32.mrf.mxu0 }
 0x316   : > { %v3839_v4 = vpop.permute.xlu1 %3838  ;;  %4571 = vst.msk [vmem:[%s7039_s13] sm:$0xff] %vm4570_vm6, %v4490_v62  ;;  %v4674_v21 = vmul.f32 %v4490_v62, %v4490_v62  ;;  %v4603_v60 = vsel %vm4570_vm6, %v4490_v62, 0.0 }
 0x317   : > { %3923 = vst.msk [vmem:[#allocation3 + $0x30] sm:$0xf] %vm3910_vm10, %v3839_v4  ;;  %3315 = vrot.lane.b32.xlu2 %v3220_v38, %s5255_s24 }
 0x318   : > { %4260 = vst.msk [vmem:[#allocation3 + $0x30] sm:$0xf] %vm4247_vm12, %v4176_v28  ;;  %v4706_v0 = vsel %vm4570_vm6, %v4674_v21, 0.0 }
 0x319   : > { %v3296_v48 = vpop.permute.xlu2 %3295 }
 0x31a   : > { %3371 = vst.msk [vmem:[#allocation3 + $0x54] sm:$0xf] %vm3349_vm9, %v3296_v48 }
 0x31c   : > { %v3306_v16 = vpop.permute.xlu0 %3305 }
 0x31d   : > { %3376 = vst.msk [vmem:[#allocation3 + $0x68] sm:$0xf] %vm3349_vm9, %v3306_v16  ;;  %v4492_v8 = vpop.f32.mrf.mxu0 }
 0x31e   : > { %v4166_v25 = vpop.permute.xlu1 %4165  ;;  %v4604_v29 = vsel %vm4570_vm6, %v4492_v8, 0.0  ;;  %v4675_v61 = vmul.f32 %v4492_v8, %v4492_v8  ;;  %4572 = vst.msk [vmem:[%s7039_s13 + $0x8] sm:$0xff] %vm4570_vm6, %v4492_v8 }
 0x31f   : > { %4255 = vst.msk [vmem:[#allocation3 + $0x1c] sm:$0xf] %vm4247_vm12, %v4166_v25  ;;  %v5076_v56 = vld [vmem:[#allocation3 + $0x30] sm:$0xff]  ;;  %v4605_v22 = vadd.f32 %v4604_v29, %v4603_v60  ;;  %4211 = vrot.lane.b32.xlu2 %v4147_v23, %s5254_s23 }
 0x320   : > { %v4707_v40 = vsel %vm4570_vm6, %v4675_v61, 0.0  ;;  %5056 = vmatmul.msk.bf16.gmra.mxu1 %vm4428_vm13, %v5076_v56 }
 0x321   : > { %v4708_v19 = vadd.f32 %v4707_v40, %v4706_v0  ;;  %v3855_v30 = vpop.permute.xlu2 %3854 }
 0x324   : > { %v3857_v20 = vpop.permute.xlu0 %3856 }
 0x325   : > { %3932 = vst.msk [vmem:[#allocation3 + $0x54] sm:$0xf] %vm3910_vm10, %v3857_v20 }
 0x326   : > { %v3294_v57 = vpop.permute.xlu1 %3293  ;;  %v5073_v3 = vld [vmem:[#allocation3 + $0x18] sm:$0xff] }
 0x327   : > { %3370 = vst.msk [vmem:[#allocation3 + $0x50] sm:$0xf] %vm3349_vm9, %v3294_v57  ;;  %5053 = vmatmul.msk.bf16.gmra.mxu0 %vm4428_vm13, %v5073_v3 }
 0x328   : > { %3931 = vst.msk [vmem:[#allocation3 + $0x50] sm:$0xf] %vm3910_vm10, %v3855_v30 }
 0x329   : > { %v3869_v5 = vpop.permute.xlu2 %3868 }
 0x32c   : > { %v4192_v42 = vpop.permute.xlu0 %4191 }
 0x32d   : > { %4268 = vst.msk [vmem:[#allocation3 + $0x50] sm:$0xf] %vm4247_vm12, %v4192_v42  ;;  %v7066_v32 = vpop.f32.mrf.mxu1 }
 0x32e   : > { %v3308_v34 = vpop.permute.xlu1 %3307  ;;  %4579 = vst.msk [vmem:[%s7039_s13 + $0x40] sm:$0xff] %vm4570_vm6, %v7066_v32 }
 0x32f   : > { %3377 = vst.msk [vmem:[#allocation3 + $0x6c] sm:$0xf] %vm3349_vm9, %v3308_v34 }
 0x330   : > { %3938 = vst.msk [vmem:[#allocation3 + $0x6c] sm:$0xf] %vm3910_vm10, %v3869_v5 }
 0x331   : > { %v4204_v52 = vpop.permute.xlu2 %4203 }
 0x334   : > { %v4206_v15 = vpop.permute.xlu0 %4205  ;;  %v4495_v1 = vpop.f32.mrf.mxu0 }
 0x335   : > { %4275 = vst.msk [vmem:[#allocation3 + $0x6c] sm:$0xf] %vm4247_vm12, %v4206_v15  ;;  %v4606_v27 = vsel %vm4570_vm6, %v4495_v1, 0.0  ;;  %v4676_v35 = vmul.f32 %v4495_v1, %v4495_v1  ;;  %v7077_v18 = vpop.f32.mrf.mxu1 }
 0x336   : > { %v3867_v10 = vpop.permute.xlu1 %3866  ;;  %4573 = vst.msk [vmem:[%s7039_s13 + $0x10] sm:$0xff] %vm4570_vm6, %v4495_v1  ;;  %v4607_v50 = vadd.f32 %v4606_v27, %v4605_v22 }
 0x337   : > { %3937 = vst.msk [vmem:[#allocation3 + $0x68] sm:$0xf] %vm3910_vm10, %v3867_v10  ;;  %v4709_v43 = vsel %vm4570_vm6, %v4676_v35, 0.0 }
 0x338   : > { %4274 = vst.msk [vmem:[#allocation3 + $0x68] sm:$0xf] %vm4247_vm12, %v4204_v52  ;;  %v4710_v11 = vadd.f32 %v4709_v43, %v4708_v19 }
 0x339   : > { %4580 = vst.msk [vmem:[%s7039_s13 + $0x48] sm:$0xff] %vm4570_vm6, %v7077_v18  ;;  %v3284_v39 = vpop.permute.xlu2 %3283 }
 0x33a   : > { %3365 = vst.msk [vmem:[#allocation3 + $0x3c] sm:$0xf] %vm3349_vm9, %v3284_v39 }
 0x33c   : > { %v3843_v59 = vpop.permute.xlu0 %3842  ;;  %v4497_v12 = vpop.f32.mrf.mxu0 }
 0x33d   : > { %4574 = vst.msk [vmem:[%s7039_s13 + $0x18] sm:$0xff] %vm4570_vm6, %v4497_v12  ;;  %v4608_v13 = vsel %vm4570_vm6, %v4497_v12, 0.0  ;;  %v4677_v41 = vmul.f32 %v4497_v12, %v4497_v12 }
 0x33e   : > { %v4194_v24 = vpop.permute.xlu1 %4193  ;;  %v4609_v37 = vadd.f32 %v4608_v13, %v4607_v50 }
 0x33f   : > { %4269 = vst.msk [vmem:[#allocation3 + $0x54] sm:$0xf] %vm4247_vm12, %v4194_v24  ;;  %v5083_v47 = vld [vmem:[#allocation3 + $0x68] sm:$0xff]  ;;  %v4711_v63 = vsel %vm4570_vm6, %v4677_v41, 0.0 }
 0x340   : > { %v4712_v9 = vadd.f32 %v4711_v63, %v4710_v11  ;;  %5063 = vmatmul.msk.bf16.gmra.mxu3 %vm4428_vm13, %v5083_v47  ;;  %v4682_v47 = vmul.f32 %v7066_v32, %v7066_v32 }
 0x341   : > { %v4180_v6 = vpop.permute.xlu2 %4179 }
 0x344   : > { %v4182_v51 = vpop.permute.xlu0 %4181 }
 0x346   : > { %v3282_v46 = vpop.permute.xlu1 %3281  ;;  %v5080_v53 = vld [vmem:[#allocation3 + $0x50] sm:$0xff] }
 0x347   : > { %3364 = vst.msk [vmem:[#allocation3 + $0x38] sm:$0xf] %vm3349_vm9, %v3282_v46  ;;  %5060 = vmatmul.msk.bf16.gmra.mxu2 %vm4428_vm13, %v5080_v53  ;;  %v4683_v46 = vmul.f32 %v7077_v18, %v7077_v18 }
 0x348   : > { %3925 = vst.msk [vmem:[#allocation3 + $0x38] sm:$0xf] %vm3910_vm10, %v3843_v59 }
 0x349   : > { %4262 = vst.msk [vmem:[#allocation3 + $0x38] sm:$0xf] %vm4247_vm12, %v4180_v6  ;;  %v3298_v33 = vpop.permute.xlu2 %3297 }
 0x34a   : > { %3372 = vst.msk [vmem:[#allocation3 + $0x58] sm:$0xf] %vm3349_vm9, %v3298_v33 }
 0x34b   : > { %v7096_v36 = vpop.f32.mrf.mxu2 }
 0x34c   : > { %v3300_v14 = vpop.permute.xlu0 %3299  ;;  %4587 = vst.msk [vmem:[%s7039_s13 + $0x80] sm:$0xff] %vm4570_vm6, %v7096_v36 }
 0x34d   : > { %3373 = vst.msk [vmem:[#allocation3 + $0x5c] sm:$0xf] %vm3349_vm9, %v3300_v14 }
 0x34e   : > { %v3845_v44 = vpop.permute.xlu1 %3844 }
 0x34f   : > { %3926 = vst.msk [vmem:[#allocation3 + $0x3c] sm:$0xf] %vm3910_vm10, %v3845_v44  ;;  %v4721_v44 = vsel %vm4570_vm6, %v4682_v47, 0.0 }
 0x350   : > { %4263 = vst.msk [vmem:[#allocation3 + $0x3c] sm:$0xf] %vm4247_vm12, %v4182_v51  ;;  %v4618_v51 = vsel %vm4570_vm6, %v7066_v32, 0.0 }
 0x351   : > { %v3312_v49 = vpop.permute.xlu2 %3311 }
 0x353   : > { %v7105_v55 = vpop.f32.mrf.mxu2 }
 0x354   : > { %v3859_v7 = vpop.permute.xlu0 %3858  ;;  %4588 = vst.msk [vmem:[%s7039_s13 + $0x88] sm:$0xff] %vm4570_vm6, %v7105_v55 }
 0x355   : > { %3933 = vst.msk [vmem:[#allocation3 + $0x58] sm:$0xf] %vm3910_vm10, %v3859_v7 }
 0x356   : > { %v3118_v2 = vpop.permute.xlu1 %3117 }
 0x357   : > { %3185 = vst.msk [vmem:[#allocation3 + $0x74] sm:$0xf] %vm3155_vm4, %v3118_v2  ;;  %v5077_v26 = vld [vmem:[#allocation3 + $0x38] sm:$0xff] }
 0x358   : > { %3379 = vst.msk [vmem:[#allocation3 + $0x74] sm:$0xf] %vm3349_vm9, %v3312_v49  ;;  %5057 = vmatmul.msk.bf16.gmra.mxu1 %vm4428_vm13, %v5077_v26  ;;  %v4620_v49 = vsel %vm4570_vm6, %v7077_v18, 0.0 }
 0x359   : > { %v3871_v58 = vpop.permute.xlu2 %3870 }
 0x35c   : > { %v3873_v45 = vpop.permute.xlu0 %3872 }
 0x35d   : > { %3940 = vst.msk [vmem:[#allocation3 + $0x74] sm:$0xf] %vm3910_vm10, %v3873_v45  ;;  %v7115_v31 = vpop.f32.mrf.mxu1 }
 0x35e   : > { %v3310_v28 = vpop.permute.xlu1 %3309  ;;  %4581 = vst.msk [vmem:[%s7039_s13 + $0x50] sm:$0xff] %vm4570_vm6, %v7115_v31  ;;  %v4684_v7 = vmul.f32 %v7115_v31, %v7115_v31  ;;  %v4622_v32 = vsel %vm4570_vm6, %v7115_v31, 0.0 }
 0x35f   : > { %3378 = vst.msk [vmem:[#allocation3 + $0x70] sm:$0xf] %vm3349_vm9, %v3310_v28 }
 0x360   : > { %3939 = vst.msk [vmem:[#allocation3 + $0x70] sm:$0xf] %vm3910_vm10, %v3871_v58  ;;  %v4723_v58 = vsel %vm4570_vm6, %v4683_v46, 0.0 }
 0x361   : > { %v4198_v4 = vpop.permute.xlu2 %4197 }
 0x364   : > { %v4208_v62 = vpop.permute.xlu0 %4207  ;;  %v4500_v38 = vpop.f32.mrf.mxu0 }
 0x365   : > { %4276 = vst.msk [vmem:[#allocation3 + $0x70] sm:$0xf] %vm4247_vm12, %v4208_v62  ;;  %v4610_v54 = vsel %vm4570_vm6, %v4500_v38, 0.0  ;;  %v4678_v48 = vmul.f32 %v4500_v38, %v4500_v38  ;;  %v7126_v16 = vpop.f32.mrf.mxu1  ;;  %v4725_v62 = vsel %vm4570_vm6, %v4684_v7, 0.0 }
 0x366   : > { %v3861_v17 = vpop.permute.xlu1 %3860  ;;  %4575 = vst.msk [vmem:[%s7039_s13 + $0x20] sm:$0xff] %vm4570_vm6, %v4500_v38  ;;  %v4611_v21 = vadd.f32 %v4610_v54, %v4609_v37  ;;  %v4685_v45 = vmul.f32 %v7126_v16, %v7126_v16  ;;  %v4624_v18 = vsel %vm4570_vm6, %v7126_v16, 0.0 }
 0x367   : > { %3934 = vst.msk [vmem:[#allocation3 + $0x5c] sm:$0xf] %vm3910_vm10, %v3861_v17  ;;  %v4713_v25 = vsel %vm4570_vm6, %v4678_v48, 0.0 }
 0x368   : > { %4582 = vst.msk [vmem:[%s7039_s13 + $0x58] sm:$0xff] %vm4570_vm6, %v7126_v16  ;;  %v4714_v8 = vadd.f32 %v4713_v25, %v4712_v9  ;;  %v4727_v48 = vsel %vm4570_vm6, %v4685_v45, 0.0 }
 0x369   : > { %4271 = vst.msk [vmem:[#allocation3 + $0x5c] sm:$0xf] %vm4247_vm12, %v4198_v4  ;;  %v3120_v23 = vpop.permute.xlu2 %3119 }
 0x36a   : > { %3186 = vst.msk [vmem:[#allocation3 + $0x78] sm:$0xf] %vm3155_vm4, %v3120_v23 }
 0x36c   : > { %v3122_v60 = vpop.permute.xlu0 %3121  ;;  %v4502_v29 = vpop.f32.mrf.mxu0 }
 0x36d   : > { %3187 = vst.msk [vmem:[#allocation3 + $0x7c] sm:$0xf] %vm3155_vm4, %v3122_v60  ;;  %v4612_v56 = vsel %vm4570_vm6, %v4502_v29, 0.0  ;;  %v4679_v22 = vmul.f32 %v4502_v29, %v4502_v29 }
 0x36e   : > { %v4196_v61 = vpop.permute.xlu1 %4195  ;;  %4576 = vst.msk [vmem:[%s7039_s13 + $0x28] sm:$0xff] %vm4570_vm6, %v4502_v29  ;;  %v4613_v0 = vadd.f32 %v4612_v56, %v4611_v21 }
 0x36f   : > { %4270 = vst.msk [vmem:[#allocation3 + $0x58] sm:$0xf] %vm4247_vm12, %v4196_v61  ;;  %v4715_v40 = vsel %vm4570_vm6, %v4679_v22, 0.0 }
 0x370   : > { %v4716_v19 = vadd.f32 %v4715_v40, %v4714_v8 }
 0x371   : > { %v3316_v30 = vpop.permute.xlu2 %3315 }
 0x372   : > { %3381 = vst.msk [vmem:[#allocation3 + $0x7c] sm:$0xf] %vm3349_vm9, %v3316_v30 }
 0x374   : > { %v3875_v3 = vpop.permute.xlu0 %3874 }
 0x376   : > { %v4210_v20 = vpop.permute.xlu1 %4209  ;;  %v5081_v57 = vld [vmem:[#allocation3 + $0x58] sm:$0xff] }
 0x377   : > { %4277 = vst.msk [vmem:[#allocation3 + $0x74] sm:$0xf] %vm4247_vm12, %v4210_v20  ;;  %5061 = vmatmul.msk.bf16.gmra.mxu2 %vm4428_vm13, %v5081_v57 }
 0x379   : > { %v4212_v34 = vpop.permute.xlu2 %4211 }
 0x37c   : > { %v4214_v15 = vpop.permute.xlu0 %4213 }
 0x37e   : > { %v3314_v5 = vpop.permute.xlu1 %3313  ;;  %v5084_v42 = vld [vmem:[#allocation3 + $0x70] sm:$0xff] }
 0x37f   : > { %3380 = vst.msk [vmem:[#allocation3 + $0x78] sm:$0xf] %vm3349_vm9, %v3314_v5  ;;  %5064 = vmatmul.msk.bf16.gmra.mxu3 %vm4428_vm13, %v5084_v42 }
 0x380   : > { %3941 = vst.msk [vmem:[#allocation3 + $0x78] sm:$0xf] %vm3910_vm10, %v3875_v3 }
 0x381   : > { %4278 = vst.msk [vmem:[#allocation3 + $0x78] sm:$0xf] %vm4247_vm12, %v4212_v34  ;;  %v4690_v34 = vmul.f32 %v7096_v36, %v7096_v36 }
 0x383   : > { %v7148_v52 = vpop.f32.mrf.mxu3 }
 0x384   : > { %4595 = vst.msk [vmem:[%s7039_s13 + $0xc0] sm:$0xff] %vm4570_vm6, %v7148_v52 }
 0x386   : > { %v3877_v1 = vpop.permute.xlu1 %3876 }
 0x387   : > { %3942 = vst.msk [vmem:[#allocation3 + $0x7c] sm:$0xf] %vm3910_vm10, %v3877_v1 }
 0x388   : > { %4279 = vst.msk [vmem:[#allocation3 + $0x7c] sm:$0xf] %vm4247_vm12, %v4214_v15 }
 0x38a   : > { %v7155_v10 = vpop.f32.mrf.mxu2 }
 0x38b   : > { %4589 = vst.msk [vmem:[%s7039_s13 + $0x90] sm:$0xff] %vm4570_vm6, %v7155_v10  ;;  %v7160_v27 = vpop.f32.mrf.mxu3 }
 0x38c   : > { %4596 = vst.msk [vmem:[%s7039_s13 + $0xc8] sm:$0xff] %vm4570_vm6, %v7160_v27 }
 0x38f   : > { %v5085_v35 = vld [vmem:[#allocation3 + $0x78] sm:$0xff] }
 0x390   : > { %5065 = vmatmul.msk.bf16.gmra.mxu3 %vm4428_vm13, %v5085_v35 }
 0x392   : > { %v7166_v50 = vpop.f32.mrf.mxu2 }
 0x393   : > { %4590 = vst.msk [vmem:[%s7039_s13 + $0x98] sm:$0xff] %vm4570_vm6, %v7166_v50 }
 0x39d   : > { %v4520_v43 = vpop.f32.mrf.mxu1 }
 0x39e   : > { %4583 = vst.msk [vmem:[%s7039_s13 + $0x60] sm:$0xff] %vm4570_vm6, %v4520_v43  ;;  %v4686_v38 = vmul.f32 %v4520_v43, %v4520_v43  ;;  %v4626_v31 = vsel %vm4570_vm6, %v4520_v43, 0.0 }
 0x3a0   : > { %v4729_v23 = vsel %vm4570_vm6, %v4686_v38, 0.0 }
 0x3a4   : > { %v4505_v11 = vpop.f32.mrf.mxu0 }
 0x3a5   : > { %4577 = vst.msk [vmem:[%s7039_s13 + $0x30] sm:$0xff] %vm4570_vm6, %v4505_v11  ;;  %v4614_v39 = vsel %vm4570_vm6, %v4505_v11, 0.0  ;;  %v4680_v59 = vmul.f32 %v4505_v11, %v4505_v11  ;;  %v4522_v12 = vpop.f32.mrf.mxu1  ;;  %v4634_v11 = vsel %vm4570_vm6, %v7096_v36, 0.0 }
 0x3a6   : > { %v4615_v24 = vadd.f32 %v4614_v39, %v4613_v0  ;;  %4584 = vst.msk [vmem:[%s7039_s13 + $0x68] sm:$0xff] %vm4570_vm6, %v4522_v12  ;;  %v4687_v21 = vmul.f32 %v4522_v12, %v4522_v12  ;;  %v4628_v60 = vsel %vm4570_vm6, %v4522_v12, 0.0  ;;  %v4691_v39 = vmul.f32 %v7105_v55, %v7105_v55 }
 0x3a7   : > { %v4717_v13 = vsel %vm4570_vm6, %v4680_v59, 0.0 }
 0x3a8   : > { %v4718_v41 = vadd.f32 %v4717_v13, %v4716_v19  ;;  %v4731_v61 = vsel %vm4570_vm6, %v4687_v21, 0.0  ;;  %v4737_v13 = vsel %vm4570_vm6, %v4690_v34, 0.0  ;;  %v4739_v36 = vsel %vm4570_vm6, %v4691_v39, 0.0 }
 0x3a9   : > { %v4698_v21 = vmul.f32 %v7148_v52, %v7148_v52 }
 0x3ac   : > { %v4507_v37 = vpop.f32.mrf.mxu0 }
 0x3ad   : > { %4578 = vst.msk [vmem:[%s7039_s13 + $0x38] sm:$0xff] %vm4570_vm6, %v4507_v37  ;;  %v4616_v63 = vsel %vm4570_vm6, %v4507_v37, 0.0  ;;  %v4681_v9 = vmul.f32 %v4507_v37, %v4507_v37  ;;  %v4692_v37 = vmul.f32 %v7155_v10, %v7155_v10 }
 0x3ae   : > { %v4617_v6 = vadd.f32 %v4616_v63, %v4615_v24 }
 0x3af   : > { %v4719_v53 = vsel %vm4570_vm6, %v4681_v9, 0.0  ;;  %v4638_v9 = vsel %vm4570_vm6, %v7155_v10, 0.0 }
 0x3b0   : > { %v4619_v33 = vadd.f32 %v4618_v51, %v4617_v6  ;;  %v4720_v14 = vadd.f32 %v4719_v53, %v4718_v41  ;;  %v4636_v41 = vsel %vm4570_vm6, %v7105_v55, 0.0  ;;  %v4693_v6 = vmul.f32 %v7166_v50, %v7166_v50 }
 0x3b1   : > { %v4741_v53 = vsel %vm4570_vm6, %v4692_v37, 0.0  ;;  %v4640_v55 = vsel %vm4570_vm6, %v7166_v50, 0.0 }
 0x3b2   : > { %v4621_v2 = vadd.f32 %v4620_v49, %v4619_v33  ;;  %v4722_v26 = vadd.f32 %v4721_v44, %v4720_v14  ;;  %v4743_v44 = vsel %vm4570_vm6, %v4693_v6, 0.0 }
 0x3b4   : > { %v4623_v28 = vadd.f32 %v4622_v32, %v4621_v2  ;;  %v4724_v4 = vadd.f32 %v4723_v58, %v4722_v26 }
 0x3b6   : > { %v4726_v17 = vadd.f32 %v4725_v62, %v4724_v4  ;;  %v4625_v54 = vadd.f32 %v4624_v18, %v4623_v28 }
 0x3b8   : > { %v4627_v25 = vadd.f32 %v4626_v31, %v4625_v54  ;;  %v4728_v8 = vadd.f32 %v4727_v48, %v4726_v17 }
 0x3ba   : > { %v4629_v16 = vadd.f32 %v4628_v60, %v4627_v25  ;;  %v4730_v29 = vadd.f32 %v4729_v23, %v4728_v8 }
 0x3bc   : > { %v4732_v56 = vadd.f32 %v4731_v61, %v4730_v29  ;;  %v4699_v29 = vmul.f32 %v7160_v27, %v7160_v27 }
 0x3c3   : > { %v7207_v22 = vpop.f32.mrf.mxu3 }
 0x3c4   : > { %4597 = vst.msk [vmem:[%s7039_s13 + $0xd0] sm:$0xff] %vm4570_vm6, %v7207_v22 }
 0x3ca   : > { %v4540_v0 = vpop.f32.mrf.mxu2 }
 0x3cb   : > { %4591 = vst.msk [vmem:[%s7039_s13 + $0xa0] sm:$0xff] %vm4570_vm6, %v4540_v0  ;;  %v7214_v40 = vpop.f32.mrf.mxu3  ;;  %v4694_v7 = vmul.f32 %v4540_v0, %v4540_v0  ;;  %v4642_v26 = vsel %vm4570_vm6, %v4540_v0, 0.0 }
 0x3cc   : > { %4598 = vst.msk [vmem:[%s7039_s13 + $0xd8] sm:$0xff] %vm4570_vm6, %v7214_v40 }
 0x3cd   : > { %v4745_v58 = vsel %vm4570_vm6, %v4694_v7, 0.0 }
 0x3d2   : > { %v4542_v19 = vpop.f32.mrf.mxu2 }
 0x3d3   : > { %4592 = vst.msk [vmem:[%s7039_s13 + $0xa8] sm:$0xff] %vm4570_vm6, %v4542_v19  ;;  %v4695_v32 = vmul.f32 %v4542_v19, %v4542_v19  ;;  %v4644_v50 = vsel %vm4570_vm6, %v4542_v19, 0.0  ;;  %v4753_v19 = vsel %vm4570_vm6, %v4698_v21, 0.0 }
 0x3d5   : > { %v4525_v30 = vpop.f32.mrf.mxu1  ;;  %v4747_v18 = vsel %vm4570_vm6, %v4695_v32, 0.0 }
 0x3d6   : > { %4585 = vst.msk [vmem:[%s7039_s13 + $0x70] sm:$0xff] %vm4570_vm6, %v4525_v30  ;;  %v4688_v20 = vmul.f32 %v4525_v30, %v4525_v30  ;;  %v4630_v57 = vsel %vm4570_vm6, %v4525_v30, 0.0  ;;  %v4652_v30 = vsel %vm4570_vm6, %v7160_v27, 0.0  ;;  %v4656_v27 = vsel %vm4570_vm6, %v7214_v40, 0.0 }
 0x3d7   : > { %v4631_v5 = vadd.f32 %v4630_v57, %v4629_v16  ;;  %v4650_v16 = vsel %vm4570_vm6, %v7148_v52, 0.0  ;;  %v4755_v52 = vsel %vm4570_vm6, %v4699_v29, 0.0 }
 0x3d8   : > { %v4733_v3 = vsel %vm4570_vm6, %v4688_v20, 0.0  ;;  %v4700_v20 = vmul.f32 %v7207_v22, %v7207_v22 }
 0x3d9   : > { %v4734_v35 = vadd.f32 %v4733_v3, %v4732_v56 }
 0x3dd   : > { %v4527_v42 = vpop.f32.mrf.mxu1 }
 0x3de   : > { %4586 = vst.msk [vmem:[%s7039_s13 + $0x78] sm:$0xff] %vm4570_vm6, %v4527_v42  ;;  %v4632_v15 = vsel %vm4570_vm6, %v4527_v42, 0.0  ;;  %v4689_v1 = vmul.f32 %v4527_v42, %v4527_v42  ;;  %v4701_v42 = vmul.f32 %v7214_v40, %v7214_v40 }
 0x3df   : > { %v4633_v43 = vadd.f32 %v4632_v15, %v4631_v5  ;;  %v4654_v5 = vsel %vm4570_vm6, %v7207_v22, 0.0 }
 0x3e0   : > { %v4735_v59 = vsel %vm4570_vm6, %v4689_v1, 0.0  ;;  %v4759_v39 = vsel %vm4570_vm6, %v4701_v42, 0.0 }
 0x3e1   : > { %v4635_v12 = vadd.f32 %v4634_v11, %v4633_v43  ;;  %v4736_v24 = vadd.f32 %v4735_v59, %v4734_v35  ;;  %v4757_v35 = vsel %vm4570_vm6, %v4700_v20, 0.0 }
 0x3e3   : > { %v4637_v47 = vadd.f32 %v4636_v41, %v4635_v12  ;;  %v4738_v63 = vadd.f32 %v4737_v13, %v4736_v24 }
 0x3e5   : > { %v4639_v51 = vadd.f32 %v4638_v9, %v4637_v47  ;;  %v4740_v46 = vadd.f32 %v4739_v36, %v4738_v63 }
 0x3e7   : > { %v4742_v33 = vadd.f32 %v4741_v53, %v4740_v46  ;;  %v4641_v14 = vadd.f32 %v4640_v55, %v4639_v51 }
 0x3e9   : > { %v4744_v49 = vadd.f32 %v4743_v44, %v4742_v33  ;;  %v4643_v10 = vadd.f32 %v4642_v26, %v4641_v14 }
 0x3eb   : > { %v4746_v28 = vadd.f32 %v4745_v58, %v4744_v49  ;;  %v4645_v62 = vadd.f32 %v4644_v50, %v4643_v10 }
 0x3ed   : > { %v4748_v54 = vadd.f32 %v4747_v18, %v4746_v28 }
 0x3fa   : > { %v4545_v2 = vpop.f32.mrf.mxu2 }
 0x3fb   : > { %4593 = vst.msk [vmem:[%s7039_s13 + $0xb0] sm:$0xff] %vm4570_vm6, %v4545_v2  ;;  %v4696_v45 = vmul.f32 %v4545_v2, %v4545_v2  ;;  %v4646_v4 = vsel %vm4570_vm6, %v4545_v2, 0.0 }
 0x3fc   : > { %v4647_v17 = vadd.f32 %v4646_v4, %v4645_v62 }
 0x3fd   : > { %v4749_v38 = vsel %vm4570_vm6, %v4696_v45, 0.0 }
 0x3fe   : > { %v4750_v23 = vadd.f32 %v4749_v38, %v4748_v54 }
 0x402   : > { %v4547_v48 = vpop.f32.mrf.mxu2  ;;  %v4560_v31 = vpop.f32.mrf.mxu3 }
 0x403   : > { %4594 = vst.msk [vmem:[%s7039_s13 + $0xb8] sm:$0xff] %vm4570_vm6, %v4547_v48  ;;  %v4648_v25 = vsel %vm4570_vm6, %v4547_v48, 0.0  ;;  %v4697_v8 = vmul.f32 %v4547_v48, %v4547_v48  ;;  %v4702_v12 = vmul.f32 %v4560_v31, %v4560_v31  ;;  %v4658_v24 = vsel %vm4570_vm6, %v4560_v31, 0.0 }
 0x404   : > { %v4649_v60 = vadd.f32 %v4648_v25, %v4647_v17  ;;  %4599 = vst.msk [vmem:[%s7039_s13 + $0xe0] sm:$0xff] %vm4570_vm6, %v4560_v31 }
 0x405   : > { %v4751_v61 = vsel %vm4570_vm6, %v4697_v8, 0.0  ;;  %v4761_v41 = vsel %vm4570_vm6, %v4702_v12, 0.0 }
 0x406   : > { %v4651_v56 = vadd.f32 %v4650_v16, %v4649_v60  ;;  %v4752_v0 = vadd.f32 %v4751_v61, %v4750_v23 }
 0x408   : > { %v4653_v57 = vadd.f32 %v4652_v30, %v4651_v56  ;;  %v4754_v3 = vadd.f32 %v4753_v19, %v4752_v0 }
 0x40a   : > { %v4756_v34 = vadd.f32 %v4755_v52, %v4754_v3  ;;  %v4655_v15 = vadd.f32 %v4654_v5, %v4653_v57  ;;  %v4562_v1 = vpop.f32.mrf.mxu3 }
 0x40b   : > { %4600 = vst.msk [vmem:[%s7039_s13 + $0xe8] sm:$0xff] %vm4570_vm6, %v4562_v1  ;;  %v4703_v37 = vmul.f32 %v4562_v1, %v4562_v1  ;;  %v4660_v63 = vsel %vm4570_vm6, %v4562_v1, 0.0 }
 0x40c   : > { %v4657_v43 = vadd.f32 %v4656_v27, %v4655_v15  ;;  %v4758_v11 = vadd.f32 %v4757_v35, %v4756_v34 }
 0x40d   : > { %v4763_v6 = vsel %vm4570_vm6, %v4703_v37, 0.0 }
 0x40e   : > { %v4760_v59 = vadd.f32 %v4759_v39, %v4758_v11  ;;  %v4659_v13 = vadd.f32 %v4658_v24, %v4657_v43 }
 0x410   : > { %v4762_v40 = vadd.f32 %v4761_v41, %v4760_v59  ;;  %v4661_v9 = vadd.f32 %v4660_v63, %v4659_v13 }
 0x412   : > { %v4764_v46 = vadd.f32 %v4763_v6, %v4762_v40 }
 0x413   : > { %v4565_v22 = vpop.f32.mrf.mxu3 }
 0x414   : > { %4601 = vst.msk [vmem:[%s7039_s13 + $0xf0] sm:$0xff] %vm4570_vm6, %v4565_v22  ;;  %v4704_v47 = vmul.f32 %v4565_v22, %v4565_v22  ;;  %v4662_v36 = vsel %vm4570_vm6, %v4565_v22, 0.0 }
 0x415   : > { %v4663_v53 = vadd.f32 %v4662_v36, %v4661_v9 }
 0x416   : > { %v4765_v51 = vsel %vm4570_vm6, %v4704_v47, 0.0 }
 0x417   : > { %v4766_v44 = vadd.f32 %v4765_v51, %v4764_v46 }
 0x41b   : > { %v4567_v55 = vpop.f32.mrf.mxu3 }
 0x41c   : > { %4602 = vst.msk [vmem:[%s7039_s13 + $0xf8] sm:$0xff] %vm4570_vm6, %v4567_v55  ;;  %v4664_v33 = vsel %vm4570_vm6, %v4567_v55, 0.0  ;;  %v4705_v14 = vmul.f32 %v4567_v55, %v4567_v55 }
 0x41d   : > { %v4665_v49 = vadd.f32 %v4664_v33, %v4663_v53 }
 0x41e   : > { %v4767_v7 = vsel %vm4570_vm6, %v4705_v14, 0.0 }
 0x41f   : > { %v4666_v2 = vrot.slane %v4665_v49, 4  ;;  %v4768_v26 = vadd.f32 %v4767_v7, %v4766_v44 }
 0x421   : > { %v4667_v10 = vadd.f32 %v4666_v2, %v4665_v49  ;;  %v4769_v58 = vrot.slane %v4768_v26, 4 }
 0x423   : > { %v4668_v32 = vrot.slane %v4667_v10, 2  ;;  %v4770_v45 = vadd.f32 %v4769_v58, %v4768_v26 }
 0x425   : > { %v4669_v28 = vadd.f32 %v4668_v32, %v4667_v10  ;;  %v4771_v50 = vrot.slane %v4770_v45, 2 }
 0x427   : > { %v4670_v4 = vrot.slane %v4669_v28, 1  ;;  %v4772_v62 = vadd.f32 %v4771_v50, %v4770_v45 }
 0x429   : > { %v4671_v18 = vadd.f32 %v4670_v4, %v4669_v28  ;;  %v4773_v38 = vrot.slane %v4772_v62, 1 }
 0x42b   : > { %4673 = vst.msk [vmem:[%s268_s17] sm:$0x1] %vm806_vm2, %v4671_v18  ;;  %v4774_v17 = vadd.f32 %v4773_v38, %v4772_v62 }
 0x42d   : > { %4775 = vst.msk [vmem:[%s268_s17 + $0x1] sm:$0x1] %vm806_vm2, %v4774_v17 }
 0x42e PF: > { %s16_s20 = sadd.s32 1, %s5245_s20   ;;  %s7330_s18 = smov %s5241_s19 }
 0x42f   : > { %p13_p5 = scmp.ge.s32.totalorder %s16_s20, 4   ;;  %s7331_s19 = smov %s7333_s21 }
 0x431   :  { %15 = sbr.rel (!%p13_p5) target bundleno = 2 (0x2), region = 84 }

</bundles_post_ra>
